<compile_context>
chip_gen: v7x
topology: tpu7x:2x2x1
jax: 0.10.0
libtpu: 0.0.40
codegen_flags: <defaults>
</compile_context>

<pallas_src>
import functools

import jax
import jax.numpy as jnp
from jax.experimental import pallas as pl
from jax.experimental.pallas import tpu as pltpu


def _zero_halo(ref):
    """Zero only the 1-pixel spatial halo of a (N, Hp, Wp, C) padded buffer."""
    Nn, Hp, Wp, C = ref.shape
    z_row = jnp.zeros((Nn, 1, Wp, C), ref.dtype)
    z_col = jnp.zeros((Nn, Hp, 1, C), ref.dtype)
    ref[:, 0:1, :, :] = z_row
    ref[:, Hp - 1:Hp, :, :] = z_row
    ref[:, :, 0:1, :] = z_col
    ref[:, :, Wp - 1:Wp, :] = z_col


# -----------------------------------------------------------------------------
# Fused decoder kernel
# -----------------------------------------------------------------------------
def _decoder_kernel(x1_ref, x2_ref, wph_ref, wc_ref, bup4_ref, bc_ref, g_ref, b_ref,
                    o_ref, x1p_ref, up_pad_ref, x2p_ref, p3_ref, p9_ref,
                    *, norm, eps):
    """grid=(1,):
       x1_ref : (N, H, W, Cin)   f32   input of the transposed conv
       x2_ref : (N, 2H, 2W, Cs)  f32   skip connection
       wph_ref: (9*Cin, 4*Cout)  bf16  phase-split ConvTranspose weights
       wc_ref : (9*Ccat, Cout)   bf16  3x3 conv weights, tap-major, [up|skip] rows
       bup4   : (1, 4*Cout) f32  ConvT bias tiled over the 4 phases
       bc/g/b : (1, Cout)   f32  conv bias / BN gamma,beta
       o_ref  : (N, Cout, 2H*2W) f32   NCHW-flat, lane-dense output
       scratch: padded x1 / padded up / padded skip (f32), im2col mats (bf16).
    """
    N, H, W, Cin = x1_ref.shape
    _, Ho, Wo, Cskip = x2_ref.shape
    Cout = bc_ref.shape[1]
    Ccat = Cout + Cskip
    PIXC = N * H * W          # coarse pixels
    PIXF = N * Ho * Wo        # fine pixels
    f32 = jnp.float32
    bf16 = jnp.bfloat16

    # ---- zero-pad x1 (halo only; interior overwritten) ----------------------
    _zero_halo(x1p_ref)
    x1p_ref[:, 1:1 + H, 1:1 + W, :] = x1_ref[...]

    # ---- coarse 3x3 im2col, staged in bf16 ----------------------------------
    for u in range(3):
        for v in range(3):
            t = u * 3 + v
            p3_ref[:, t * Cin:(t + 1) * Cin] = (
                x1p_ref[:, u:u + H, v:v + W, :].reshape(PIXC, Cin).astype(bf16))

    # ---- ConvTranspose2d (K=4, s=2, p=1): ONE single-pass bf16 matmul -------
    up = jnp.dot(p3_ref[...], wph_ref[...],
                 preferred_element_type=f32) + bup4_ref[...]      # (PIXC, 4*Cout)

    # ---- phase interleave via strided stores (no selection matmuls) --------
    _zero_halo(up_pad_ref)
    for r in range(2):
        for c in range(2):
            k = 2 * r + c
            ph = up[:, k * Cout:(k + 1) * Cout].reshape(N, H, W, Cout)
            up_pad_ref[:, pl.ds(1 + r, H, stride=2),
                       pl.ds(1 + c, W, stride=2), :] = ph

    # ---- padded skip buffer (concat is never materialized) -----------------
    _zero_halo(x2p_ref)
    x2p_ref[:, 1:1 + Ho, 1:1 + Wo, :] = x2_ref[...]

    # ---- fine 3x3 im2col, [up | skip] channel order per tap, bf16 ----------
    for kh in range(3):
        for kw in range(3):
            t = kh * 3 + kw
            p9_ref[:, t * Ccat:t * Ccat + Cout] = (
                up_pad_ref[:, kh:kh + Ho, kw:kw + Wo, :]
                .reshape(PIXF, Cout).astype(bf16))
            p9_ref[:, t * Ccat + Cout:(t + 1) * Ccat] = (
                x2p_ref[:, kh:kh + Ho, kw:kw + Wo, :]
                .reshape(PIXF, Cskip).astype(bf16))

    # ---- 3x3 conv: ONE single-pass bf16 matmul (K = 9*Ccat) -----------------
    y = jnp.dot(p9_ref[...], wc_ref[...],
                preferred_element_type=f32) + bc_ref[...]         # (PIXF, Cout) f32

    # ---- BatchNorm2d (training-mode batch stats) + ReLU, all in f32 --------
    if norm:
        mean = jnp.mean(y, axis=0, keepdims=True)
        var = jnp.mean(jnp.square(y - mean), axis=0, keepdims=True)
        y = (y - mean) * jax.lax.rsqrt(var + eps) * g_ref[...] + b_ref[...]
    y = jnp.maximum(y, 0.0)

    # ---- lane-dense, NCHW-flat store: (N, Cout, Ho*Wo) ----------------------
    yT = y.T                                                      # (Cout, PIXF)
    for n in range(N):
        o_ref[n] = yT[:, n * Ho * Wo:(n + 1) * Ho * Wo]


# -----------------------------------------------------------------------------
# One-time weight packing (hoisted out of the per-call path)
# -----------------------------------------------------------------------------
def pack_decoder_params(params):
    up_w = jnp.asarray(params["up_w"], jnp.float32)       # (Cin, Cout, 4, 4)
    conv_w = jnp.asarray(params["conv_w"], jnp.float32)   # (Cout, Ccat, 3, 3)
    Cin, Cout, K, _ = up_w.shape
    assert K == 4, "phase-split specialized for kernel=4, stride=2, padding=1"
    Ccat = conv_w.shape[1]

    # Phase-split ConvTranspose weights -> (9*Cin, 4*Cout); each phase's 2x2
    # footprint placed inside the shared coarse 3x3 window, zeros elsewhere.
    wph = jnp.zeros((9 * Cin, 4 * Cout), jnp.float32)
    for r in range(2):
        for c in range(2):
            for a in range(2):
                for b in range(2):
                    u, v = r + a, c + b
                    blk = up_w[:, :, 3 - r - 2 * a, 3 - c - 2 * b]   # (Cin, Cout)
                    wph = wph.at[(u * 3 + v) * Cin:(u * 3 + v + 1) * Cin,
                                 (2 * r + c) * Cout:(2 * r + c + 1) * Cout].set(blk)

    # 3x3 conv weights -> (9*Ccat, Cout); rows (tap, channel), channel order
    # [up | skip] matching torch.cat((x1, x2), dim=1).
    wc = jnp.concatenate([conv_w[:, :, kh, kw].T
                          for kh in range(3) for kw in range(3)], axis=0)

    return {
        "wph": wph.astype(jnp.bfloat16),
        "wc": wc.astype(jnp.bfloat16),
        "bup4": jnp.tile(jnp.asarray(params["up_b"], jnp.float32).reshape(1, Cout),
                         (1, 4)),
        "bc": jnp.asarray(params["conv_b"], jnp.float32).reshape(1, Cout),
        "gamma": jnp.asarray(params["gamma"], jnp.float32).reshape(1, Cout),
        "beta": jnp.asarray(params["beta"], jnp.float32).reshape(1, Cout),
        "dims": (int(Cin), int(Cout), int(Ccat)),
    }


# -----------------------------------------------------------------------------
# Wrapper (NCHW in / NCHW out, matching the PyTorch module)
# -----------------------------------------------------------------------------
def decoder_forward(packed, x1_nchw, x2_nchw, *, norm=True, eps=1e-5):
    Cin, Cout, Ccat = packed["dims"]
    Cskip = Ccat - Cout
    N, _, H, W = x1_nchw.shape
    Ho, Wo = 2 * H, 2 * W
    PIXC, PIXF = N * H * W, N * Ho * Wo

    # Tiny boundary layout ops only (inputs are KB-scale); kernel emits NCHW-flat.
    x1 = jnp.transpose(x1_nchw, (0, 2, 3, 1)).astype(jnp.float32)
    x2 = jnp.transpose(x2_nchw, (0, 2, 3, 1)).astype(jnp.float32)

    kern = functools.partial(_decoder_kernel, norm=norm, eps=eps)
    out = pl.pallas_call(
        kern,
        out_shape=jax.ShapeDtypeStruct((N, Cout, Ho * Wo), jnp.float32),
        grid_spec=pltpu.PrefetchScalarGridSpec(
            num_scalar_prefetch=0,
            grid=(1,),
            in_specs=[
                pl.BlockSpec((N, H, W, Cin), lambda i: (0, 0, 0, 0)),
                pl.BlockSpec((N, Ho, Wo, Cskip), lambda i: (0, 0, 0, 0)),
                pl.BlockSpec((9 * Cin, 4 * Cout), lambda i: (0, 0)),
                pl.BlockSpec((9 * Ccat, Cout), lambda i: (0, 0)),
                pl.BlockSpec((1, 4 * Cout), lambda i: (0, 0)),
                pl.BlockSpec((1, Cout), lambda i: (0, 0)),
                pl.BlockSpec((1, Cout), lambda i: (0, 0)),
                pl.BlockSpec((1, Cout), lambda i: (0, 0)),
            ],
            out_specs=pl.BlockSpec((N, Cout, Ho * Wo), lambda i: (0, 0, 0)),
            scratch_shapes=[
                pltpu.VMEM((N, H + 2, W + 2, Cin), jnp.float32),      # padded x1
                pltpu.VMEM((N, Ho + 2, Wo + 2, Cout), jnp.float32),   # padded up
                pltpu.VMEM((N, Ho + 2, Wo + 2, Cskip), jnp.float32),  # padded skip
                pltpu.VMEM((PIXC, 9 * Cin), jnp.bfloat16),            # coarse im2col
                pltpu.VMEM((PIXF, 9 * Ccat), jnp.bfloat16),           # fine im2col
            ],
        ),
        compiler_params=pltpu.CompilerParams(
            dimension_semantics=("arbitrary",),
            vmem_limit_bytes=32 * 1024 * 1024,
        ),
    )(x1, x2, packed["wph"], packed["wc"], packed["bup4"], packed["bc"],
      packed["gamma"], packed["beta"])
    return out.reshape(N, Cout, Ho, Wo)                   # free metadata reshape


# -----------------------------------------------------------------------------
# Pure-JAX reference for validation (f32, HIGHEST precision)
# -----------------------------------------------------------------------------
def decoder_reference(params, x1_nchw, x2_nchw, *, stride, padding,
                      norm=True, eps=1e-5):
    x1 = jnp.transpose(x1_nchw, (0, 2, 3, 1)).astype(jnp.float32)
    x2 = jnp.transpose(x2_nchw, (0, 2, 3, 1)).astype(jnp.float32)
    wt = params["up_w"]
    K = wt.shape[-1]
    w_up = jnp.transpose(wt[:, :, ::-1, ::-1], (2, 3, 0, 1))        # HWIO
    p = K - 1 - padding
    up = jax.lax.conv_general_dilated(
        x1, w_up, window_strides=(1, 1), padding=[(p, p), (p, p)],
        lhs_dilation=(stride, stride),
        dimension_numbers=("NHWC", "HWIO", "NHWC"),
        precision=jax.lax.Precision.HIGHEST) + params["up_b"]
    cat = jnp.concatenate([up, x2], axis=-1)
    w_c = jnp.transpose(params["conv_w"], (2, 3, 1, 0))             # HWIO
    y = jax.lax.conv_general_dilated(
        cat, w_c, window_strides=(1, 1), padding=[(1, 1), (1, 1)],
        dimension_numbers=("NHWC", "HWIO", "NHWC"),
        precision=jax.lax.Precision.HIGHEST) + params["conv_b"]
    if norm:
        mean = y.mean(axis=(0, 1, 2), keepdims=True)
        var = ((y - mean) ** 2).mean(axis=(0, 1, 2), keepdims=True)
        y = (y - mean) * jax.lax.rsqrt(var + eps) * params["gamma"] + params["beta"]
    y = jnp.maximum(y, 0.0)
    return jnp.transpose(y, (0, 3, 1, 2))


# -----------------------------------------------------------------------------
# Main
# -----------------------------------------------------------------------------
if __name__ == "__main__":
    # Generator.decode_layer4: Decoder(in=128, cat=64+64, out=64, kernel=4, stride=2, padding=1)
    Cin, Cout, Cskip = 128, 64, 64
    Ccat = Cout + Cskip
    K, stride, padding = 4, 2, 1
    N, H, W = 2, 8, 8                    # x1: 8x8 -> upsampled 16x16 (matches x2)

    key = jax.random.PRNGKey(0)
    ks = jax.random.split(key, 8)
    params = {
        "up_w": 0.05 * jax.random.normal(ks[0], (Cin, Cout, K, K), jnp.float32),
        "up_b": 0.05 * jax.random.normal(ks[1], (Cout,), jnp.float32),
        "conv_w": 0.05 * jax.random.normal(ks[2], (Cout, Ccat, 3, 3), jnp.float32),
        "conv_b": 0.05 * jax.random.normal(ks[3], (Cout,), jnp.float32),
        "gamma": 1.0 + 0.05 * jax.random.normal(ks[4], (Cout,), jnp.float32),
        "beta": 0.05 * jax.random.normal(ks[5], (Cout,), jnp.float32),
    }

    x1 = jax.random.normal(ks[6], (N, Cin, H, W), jnp.float32)            # NCHW
    x2 = jax.random.normal(ks[7], (N, Cskip, 2 * H, 2 * W), jnp.float32)  # NCHW skip

    packed = pack_decoder_params(params)          # one-time weight packing
    out = decoder_forward(packed, x1, x2, norm=True)
    out = jax.block_until_ready(out)

    ref = decoder_reference(params, x1, x2, stride=stride, padding=padding, norm=True)
    ref = jax.block_until_ready(ref)

    assert out.shape == (N, Cout, 2 * H, 2 * W), out.shape
    max_err = float(jnp.max(jnp.abs(out - ref)))
    # Kernel matmuls run single-pass bf16 on the MXU (per perf review); the
    # reference is HIGHEST-precision f32, so the tolerance reflects bf16 compute.
    assert jnp.allclose(out, ref, atol=5e-2, rtol=5e-2), max_err

    print("KERNEL_OK")
</pallas_src>

<mosaic_0001>
module attributes {stable_mosaic.version = 11 : i64} {
  func.func @_decoder_kernel(%arg0: i32, %arg1: memref<2x8x8x128xf32, #tpu.memory_space<vmem>>, %arg2: memref<2x16x16x64xf32, #tpu.memory_space<vmem>>, %arg3: memref<1152x256xbf16, #tpu.memory_space<vmem>>, %arg4: memref<1152x64xbf16, #tpu.memory_space<vmem>>, %arg5: memref<1x256xf32, #tpu.memory_space<vmem>>, %arg6: memref<1x64xf32, #tpu.memory_space<vmem>>, %arg7: memref<1x64xf32, #tpu.memory_space<vmem>>, %arg8: memref<1x64xf32, #tpu.memory_space<vmem>>, %arg9: memref<2x64x256xf32, #tpu.memory_space<vmem>>, %arg10: memref<2x10x10x128xf32, #tpu.memory_space<vmem>>, %arg11: memref<2x18x18x64xf32, #tpu.memory_space<vmem>>, %arg12: memref<2x18x18x64xf32, #tpu.memory_space<vmem>>, %arg13: memref<128x1152xbf16, #tpu.memory_space<vmem>>, %arg14: memref<512x1152xbf16, #tpu.memory_space<vmem>>) attributes {dimension_semantics = [#tpu.dimension_semantics<arbitrary>], iteration_bounds = array<i64: 1>, scalar_prefetch = 0 : i64, scratch_operands = 5 : i64, tpu.core_type = #tpu.core_type<tc>, window_params = [{pipeline_mode = #tpu.pipeline_mode<synchronous>, transform_indices = @transform_0, window_bounds = array<i64: 2, 8, 8, 128>}, {pipeline_mode = #tpu.pipeline_mode<synchronous>, transform_indices = @transform_1, window_bounds = array<i64: 2, 16, 16, 64>}, {pipeline_mode = #tpu.pipeline_mode<synchronous>, transform_indices = @transform_2, window_bounds = array<i64: 1152, 256>}, {pipeline_mode = #tpu.pipeline_mode<synchronous>, transform_indices = @transform_3, window_bounds = array<i64: 1152, 64>}, {pipeline_mode = #tpu.pipeline_mode<synchronous>, transform_indices = @transform_4, window_bounds = array<i64: 1, 256>}, {pipeline_mode = #tpu.pipeline_mode<synchronous>, transform_indices = @transform_5, window_bounds = array<i64: 1, 64>}, {pipeline_mode = #tpu.pipeline_mode<synchronous>, transform_indices = @transform_6, window_bounds = array<i64: 1, 64>}, {pipeline_mode = #tpu.pipeline_mode<synchronous>, transform_indices = @transform_7, window_bounds = array<i64: 1, 64>}, {pipeline_mode = #tpu.pipeline_mode<synchronous>, transform_indices = @transform_8, window_bounds = array<i64: 2, 64, 256>}]} {
    %cst = arith.constant 0.000000e+00 : f32
    %0 = vector.broadcast %cst : f32 to vector<2x1x10x128xf32>
    %cst_0 = arith.constant 0.000000e+00 : f32
    %1 = vector.broadcast %cst_0 : f32 to vector<2x10x1x128xf32>
    %c0 = arith.constant 0 : index
    %c0_1 = arith.constant 0 : index
    %c0_2 = arith.constant 0 : index
    %c0_3 = arith.constant 0 : index
    %2 = vector.load %arg10[%c0, %c0_1, %c0_2, %c0_3] : memref<2x10x10x128xf32, #tpu.memory_space<vmem>>, vector<2x1x10x128xf32>
    tpu.vector_store %arg10[%c0, %c0_1, %c0_2, %c0_3], %0 {strides = array<i32>} : memref<2x10x10x128xf32, #tpu.memory_space<vmem>>, vector<2x1x10x128xf32>,
    %c0_4 = arith.constant 0 : index
    %c9 = arith.constant 9 : index
    %c0_5 = arith.constant 0 : index
    %c0_6 = arith.constant 0 : index
    %3 = vector.load %arg10[%c0_4, %c9, %c0_5, %c0_6] : memref<2x10x10x128xf32, #tpu.memory_space<vmem>>, vector<2x1x10x128xf32>
    tpu.vector_store %arg10[%c0_4, %c9, %c0_5, %c0_6], %0 {strides = array<i32>} : memref<2x10x10x128xf32, #tpu.memory_space<vmem>>, vector<2x1x10x128xf32>,
    %c0_7 = arith.constant 0 : index
    %c0_8 = arith.constant 0 : index
    %c0_9 = arith.constant 0 : index
    %c0_10 = arith.constant 0 : index
    %4 = vector.load %arg10[%c0_7, %c0_8, %c0_9, %c0_10] : memref<2x10x10x128xf32, #tpu.memory_space<vmem>>, vector<2x10x1x128xf32>
    tpu.vector_store %arg10[%c0_7, %c0_8, %c0_9, %c0_10], %1 {strides = array<i32>} : memref<2x10x10x128xf32, #tpu.memory_space<vmem>>, vector<2x10x1x128xf32>,
    %c0_11 = arith.constant 0 : index
    %c0_12 = arith.constant 0 : index
    %c9_13 = arith.constant 9 : index
    %c0_14 = arith.constant 0 : index
    %5 = vector.load %arg10[%c0_11, %c0_12, %c9_13, %c0_14] : memref<2x10x10x128xf32, #tpu.memory_space<vmem>>, vector<2x10x1x128xf32>
    tpu.vector_store %arg10[%c0_11, %c0_12, %c9_13, %c0_14], %1 {strides = array<i32>} : memref<2x10x10x128xf32, #tpu.memory_space<vmem>>, vector<2x10x1x128xf32>,
    %c0_15 = arith.constant 0 : index
    %c0_16 = arith.constant 0 : index
    %c0_17 = arith.constant 0 : index
    %c0_18 = arith.constant 0 : index
    %6 = vector.load %arg1[%c0_15, %c0_16, %c0_17, %c0_18] : memref<2x8x8x128xf32, #tpu.memory_space<vmem>>, vector<2x8x8x128xf32>
    %c0_19 = arith.constant 0 : index
    %c1 = arith.constant 1 : index
    %c1_20 = arith.constant 1 : index
    %c0_21 = arith.constant 0 : index
    %7 = vector.load %arg10[%c0_19, %c1, %c1_20, %c0_21] : memref<2x10x10x128xf32, #tpu.memory_space<vmem>>, vector<2x8x8x128xf32>
    tpu.vector_store %arg10[%c0_19, %c1, %c1_20, %c0_21], %6 {strides = array<i32>} : memref<2x10x10x128xf32, #tpu.memory_space<vmem>>, vector<2x8x8x128xf32>,
    %c0_22 = arith.constant 0 : index
    %c0_23 = arith.constant 0 : index
    %c0_24 = arith.constant 0 : index
    %c0_25 = arith.constant 0 : index
    %8 = vector.load %arg10[%c0_22, %c0_23, %c0_24, %c0_25] : memref<2x10x10x128xf32, #tpu.memory_space<vmem>>, vector<2x8x8x128xf32>
    %9 = vector.shape_cast %8 : vector<2x8x8x128xf32> to vector<128x128xf32>
    %10 = arith.truncf %9 : vector<128x128xf32> to vector<128x128xbf16>
    %c0_26 = arith.constant 0 : index
    %c0_27 = arith.constant 0 : index
    %11 = vector.load %arg13[%c0_26, %c0_27] : memref<128x1152xbf16, #tpu.memory_space<vmem>>, vector<128x128xbf16>
    tpu.vector_store %arg13[%c0_26, %c0_27], %10 {strides = array<i32>} : memref<128x1152xbf16, #tpu.memory_space<vmem>>, vector<128x128xbf16>,
    %c0_28 = arith.constant 0 : index
    %c0_29 = arith.constant 0 : index
    %c1_30 = arith.constant 1 : index
    %c0_31 = arith.constant 0 : index
    %12 = vector.load %arg10[%c0_28, %c0_29, %c1_30, %c0_31] : memref<2x10x10x128xf32, #tpu.memory_space<vmem>>, vector<2x8x8x128xf32>
    %13 = vector.shape_cast %12 : vector<2x8x8x128xf32> to vector<128x128xf32>
    %14 = arith.truncf %13 : vector<128x128xf32> to vector<128x128xbf16>
    %c0_32 = arith.constant 0 : index
    %c128 = arith.constant 128 : index
    %15 = vector.load %arg13[%c0_32, %c128] : memref<128x1152xbf16, #tpu.memory_space<vmem>>, vector<128x128xbf16>
    tpu.vector_store %arg13[%c0_32, %c128], %14 {strides = array<i32>} : memref<128x1152xbf16, #tpu.memory_space<vmem>>, vector<128x128xbf16>,
    %c0_33 = arith.constant 0 : index
    %c0_34 = arith.constant 0 : index
    %c2 = arith.constant 2 : index
    %c0_35 = arith.constant 0 : index
    %16 = vector.load %arg10[%c0_33, %c0_34, %c2, %c0_35] : memref<2x10x10x128xf32, #tpu.memory_space<vmem>>, vector<2x8x8x128xf32>
    %17 = vector.shape_cast %16 : vector<2x8x8x128xf32> to vector<128x128xf32>
    %18 = arith.truncf %17 : vector<128x128xf32> to vector<128x128xbf16>
    %c0_36 = arith.constant 0 : index
    %c256 = arith.constant 256 : index
    %19 = vector.load %arg13[%c0_36, %c256] : memref<128x1152xbf16, #tpu.memory_space<vmem>>, vector<128x128xbf16>
    tpu.vector_store %arg13[%c0_36, %c256], %18 {strides = array<i32>} : memref<128x1152xbf16, #tpu.memory_space<vmem>>, vector<128x128xbf16>,
    %c0_37 = arith.constant 0 : index
    %c1_38 = arith.constant 1 : index
    %c0_39 = arith.constant 0 : index
    %c0_40 = arith.constant 0 : index
    %20 = vector.load %arg10[%c0_37, %c1_38, %c0_39, %c0_40] : memref<2x10x10x128xf32, #tpu.memory_space<vmem>>, vector<2x8x8x128xf32>
    %21 = vector.shape_cast %20 : vector<2x8x8x128xf32> to vector<128x128xf32>
    %22 = arith.truncf %21 : vector<128x128xf32> to vector<128x128xbf16>
    %c0_41 = arith.constant 0 : index
    %c384 = arith.constant 384 : index
    %23 = vector.load %arg13[%c0_41, %c384] : memref<128x1152xbf16, #tpu.memory_space<vmem>>, vector<128x128xbf16>
    tpu.vector_store %arg13[%c0_41, %c384], %22 {strides = array<i32>} : memref<128x1152xbf16, #tpu.memory_space<vmem>>, vector<128x128xbf16>,
    %c0_42 = arith.constant 0 : index
    %c1_43 = arith.constant 1 : index
    %c1_44 = arith.constant 1 : index
    %c0_45 = arith.constant 0 : index
    %24 = vector.load %arg10[%c0_42, %c1_43, %c1_44, %c0_45] : memref<2x10x10x128xf32, #tpu.memory_space<vmem>>, vector<2x8x8x128xf32>
    %25 = vector.shape_cast %24 : vector<2x8x8x128xf32> to vector<128x128xf32>
    %26 = arith.truncf %25 : vector<128x128xf32> to vector<128x128xbf16>
    %c0_46 = arith.constant 0 : index
    %c512 = arith.constant 512 : index
    %27 = vector.load %arg13[%c0_46, %c512] : memref<128x1152xbf16, #tpu.memory_space<vmem>>, vector<128x128xbf16>
    tpu.vector_store %arg13[%c0_46, %c512], %26 {strides = array<i32>} : memref<128x1152xbf16, #tpu.memory_space<vmem>>, vector<128x128xbf16>,
    %c0_47 = arith.constant 0 : index
    %c1_48 = arith.constant 1 : index
    %c2_49 = arith.constant 2 : index
    %c0_50 = arith.constant 0 : index
    %28 = vector.load %arg10[%c0_47, %c1_48, %c2_49, %c0_50] : memref<2x10x10x128xf32, #tpu.memory_space<vmem>>, vector<2x8x8x128xf32>
    %29 = vector.shape_cast %28 : vector<2x8x8x128xf32> to vector<128x128xf32>
    %30 = arith.truncf %29 : vector<128x128xf32> to vector<128x128xbf16>
    %c0_51 = arith.constant 0 : index
    %c640 = arith.constant 640 : index
    %31 = vector.load %arg13[%c0_51, %c640] : memref<128x1152xbf16, #tpu.memory_space<vmem>>, vector<128x128xbf16>
    tpu.vector_store %arg13[%c0_51, %c640], %30 {strides = array<i32>} : memref<128x1152xbf16, #tpu.memory_space<vmem>>, vector<128x128xbf16>,
    %c0_52 = arith.constant 0 : index
    %c2_53 = arith.constant 2 : index
    %c0_54 = arith.constant 0 : index
    %c0_55 = arith.constant 0 : index
    %32 = vector.load %arg10[%c0_52, %c2_53, %c0_54, %c0_55] : memref<2x10x10x128xf32, #tpu.memory_space<vmem>>, vector<2x8x8x128xf32>
    %33 = vector.shape_cast %32 : vector<2x8x8x128xf32> to vector<128x128xf32>
    %34 = arith.truncf %33 : vector<128x128xf32> to vector<128x128xbf16>
    %c0_56 = arith.constant 0 : index
    %c768 = arith.constant 768 : index
    %35 = vector.load %arg13[%c0_56, %c768] : memref<128x1152xbf16, #tpu.memory_space<vmem>>, vector<128x128xbf16>
    tpu.vector_store %arg13[%c0_56, %c768], %34 {strides = array<i32>} : memref<128x1152xbf16, #tpu.memory_space<vmem>>, vector<128x128xbf16>,
    %c0_57 = arith.constant 0 : index
    %c2_58 = arith.constant 2 : index
    %c1_59 = arith.constant 1 : index
    %c0_60 = arith.constant 0 : index
    %36 = vector.load %arg10[%c0_57, %c2_58, %c1_59, %c0_60] : memref<2x10x10x128xf32, #tpu.memory_space<vmem>>, vector<2x8x8x128xf32>
    %37 = vector.shape_cast %36 : vector<2x8x8x128xf32> to vector<128x128xf32>
    %38 = arith.truncf %37 : vector<128x128xf32> to vector<128x128xbf16>
    %c0_61 = arith.constant 0 : index
    %c896 = arith.constant 896 : index
    %39 = vector.load %arg13[%c0_61, %c896] : memref<128x1152xbf16, #tpu.memory_space<vmem>>, vector<128x128xbf16>
    tpu.vector_store %arg13[%c0_61, %c896], %38 {strides = array<i32>} : memref<128x1152xbf16, #tpu.memory_space<vmem>>, vector<128x128xbf16>,
    %c0_62 = arith.constant 0 : index
    %c2_63 = arith.constant 2 : index
    %c2_64 = arith.constant 2 : index
    %c0_65 = arith.constant 0 : index
    %40 = vector.load %arg10[%c0_62, %c2_63, %c2_64, %c0_65] : memref<2x10x10x128xf32, #tpu.memory_space<vmem>>, vector<2x8x8x128xf32>
    %41 = vector.shape_cast %40 : vector<2x8x8x128xf32> to vector<128x128xf32>
    %42 = arith.truncf %41 : vector<128x128xf32> to vector<128x128xbf16>
    %c0_66 = arith.constant 0 : index
    %c1024 = arith.constant 1024 : index
    %43 = vector.load %arg13[%c0_66, %c1024] : memref<128x1152xbf16, #tpu.memory_space<vmem>>, vector<128x128xbf16>
    tpu.vector_store %arg13[%c0_66, %c1024], %42 {strides = array<i32>} : memref<128x1152xbf16, #tpu.memory_space<vmem>>, vector<128x128xbf16>,
    %c0_67 = arith.constant 0 : index
    %c0_68 = arith.constant 0 : index
    %44 = vector.load %arg13[%c0_67, %c0_68] : memref<128x1152xbf16, #tpu.memory_space<vmem>>, vector<128x1152xbf16>
    %c0_69 = arith.constant 0 : index
    %c0_70 = arith.constant 0 : index
    %45 = vector.load %arg3[%c0_69, %c0_70] : memref<1152x256xbf16, #tpu.memory_space<vmem>>, vector<1152x256xbf16>
    %cst_71 = arith.constant dense<0.000000e+00> : vector<128x256xf32>
    %46 = tpu.matmul %44, %45, %cst_71 {dimension_numbers = #tpu.dot_dimension_numbers<[1], [0], [0], [1], [0, 0, 1, 1], [], []>} : vector<128x1152xbf16>, vector<1152x256xbf16>, vector<128x256xf32> -> vector<128x256xf32>
    %c0_72 = arith.constant 0 : index
    %c0_73 = arith.constant 0 : index
    %47 = vector.load %arg5[%c0_72, %c0_73] : memref<1x256xf32, #tpu.memory_space<vmem>>, vector<1x256xf32>
    %48 = vector.broadcast %47 : vector<1x256xf32> to vector<128x256xf32>
    %49 = arith.addf %46, %48 : vector<128x256xf32>
    %cst_74 = arith.constant 0.000000e+00 : f32
    %50 = vector.broadcast %cst_74 : f32 to vector<2x1x18x64xf32>
    %cst_75 = arith.constant 0.000000e+00 : f32
    %51 = vector.broadcast %cst_75 : f32 to vector<2x18x1x64xf32>
    %c0_76 = arith.constant 0 : index
    %c0_77 = arith.constant 0 : index
    %c0_78 = arith.constant 0 : index
    %c0_79 = arith.constant 0 : index
    %52 = vector.load %arg11[%c0_76, %c0_77, %c0_78, %c0_79] : memref<2x18x18x64xf32, #tpu.memory_space<vmem>>, vector<2x1x18x64xf32>
    tpu.vector_store %arg11[%c0_76, %c0_77, %c0_78, %c0_79], %50 {strides = array<i32>} : memref<2x18x18x64xf32, #tpu.memory_space<vmem>>, vector<2x1x18x64xf32>,
    %c0_80 = arith.constant 0 : index
    %c17 = arith.constant 17 : index
    %c0_81 = arith.constant 0 : index
    %c0_82 = arith.constant 0 : index
    %53 = vector.load %arg11[%c0_80, %c17, %c0_81, %c0_82] : memref<2x18x18x64xf32, #tpu.memory_space<vmem>>, vector<2x1x18x64xf32>
    tpu.vector_store %arg11[%c0_80, %c17, %c0_81, %c0_82], %50 {strides = array<i32>} : memref<2x18x18x64xf32, #tpu.memory_space<vmem>>, vector<2x1x18x64xf32>,
    %c0_83 = arith.constant 0 : index
    %c0_84 = arith.constant 0 : index
    %c0_85 = arith.constant 0 : index
    %c0_86 = arith.constant 0 : index
    %54 = vector.load %arg11[%c0_83, %c0_84, %c0_85, %c0_86] : memref<2x18x18x64xf32, #tpu.memory_space<vmem>>, vector<2x18x1x64xf32>
    tpu.vector_store %arg11[%c0_83, %c0_84, %c0_85, %c0_86], %51 {strides = array<i32>} : memref<2x18x18x64xf32, #tpu.memory_space<vmem>>, vector<2x18x1x64xf32>,
    %c0_87 = arith.constant 0 : index
    %c0_88 = arith.constant 0 : index
    %c17_89 = arith.constant 17 : index
    %c0_90 = arith.constant 0 : index
    %55 = vector.load %arg11[%c0_87, %c0_88, %c17_89, %c0_90] : memref<2x18x18x64xf32, #tpu.memory_space<vmem>>, vector<2x18x1x64xf32>
    tpu.vector_store %arg11[%c0_87, %c0_88, %c17_89, %c0_90], %51 {strides = array<i32>} : memref<2x18x18x64xf32, #tpu.memory_space<vmem>>, vector<2x18x1x64xf32>,
    %56 = vector.extract_strided_slice %49 {offsets = [0, 0], sizes = [128, 64], strides = [1, 1]} : vector<128x256xf32> to vector<128x64xf32>
    %57 = vector.shape_cast %56 : vector<128x64xf32> to vector<2x8x8x64xf32>
    %c0_91 = arith.constant 0 : index
    %c1_92 = arith.constant 1 : index
    %c1_93 = arith.constant 1 : index
    %c0_94 = arith.constant 0 : index
    %58 = tpu.strided_load %arg11[%c0_91, %c1_92, %c1_93, %c0_94] {strides = array<i32: 1, 2, 2, 1>} : memref<2x18x18x64xf32, #tpu.memory_space<vmem>>, vector<2x8x8x64xf32>
    tpu.strided_store %arg11[%c0_91, %c1_92, %c1_93, %c0_94], %57 {strides = array<i32: 1, 2, 2, 1>} : memref<2x18x18x64xf32, #tpu.memory_space<vmem>>, vector<2x8x8x64xf32>
    %59 = vector.extract_strided_slice %49 {offsets = [0, 64], sizes = [128, 64], strides = [1, 1]} : vector<128x256xf32> to vector<128x64xf32>
    %60 = vector.shape_cast %59 : vector<128x64xf32> to vector<2x8x8x64xf32>
    %c0_95 = arith.constant 0 : index
    %c1_96 = arith.constant 1 : index
    %c2_97 = arith.constant 2 : index
    %c0_98 = arith.constant 0 : index
    %61 = tpu.strided_load %arg11[%c0_95, %c1_96, %c2_97, %c0_98] {strides = array<i32: 1, 2, 2, 1>} : memref<2x18x18x64xf32, #tpu.memory_space<vmem>>, vector<2x8x8x64xf32>
    tpu.strided_store %arg11[%c0_95, %c1_96, %c2_97, %c0_98], %60 {strides = array<i32: 1, 2, 2, 1>} : memref<2x18x18x64xf32, #tpu.memory_space<vmem>>, vector<2x8x8x64xf32>
    %62 = vector.extract_strided_slice %49 {offsets = [0, 128], sizes = [128, 64], strides = [1, 1]} : vector<128x256xf32> to vector<128x64xf32>
    %63 = vector.shape_cast %62 : vector<128x64xf32> to vector<2x8x8x64xf32>
    %c0_99 = arith.constant 0 : index
    %c2_100 = arith.constant 2 : index
    %c1_101 = arith.constant 1 : index
    %c0_102 = arith.constant 0 : index
    %64 = tpu.strided_load %arg11[%c0_99, %c2_100, %c1_101, %c0_102] {strides = array<i32: 1, 2, 2, 1>} : memref<2x18x18x64xf32, #tpu.memory_space<vmem>>, vector<2x8x8x64xf32>
    tpu.strided_store %arg11[%c0_99, %c2_100, %c1_101, %c0_102], %63 {strides = array<i32: 1, 2, 2, 1>} : memref<2x18x18x64xf32, #tpu.memory_space<vmem>>, vector<2x8x8x64xf32>
    %65 = vector.extract_strided_slice %49 {offsets = [0, 192], sizes = [128, 64], strides = [1, 1]} : vector<128x256xf32> to vector<128x64xf32>
    %66 = vector.shape_cast %65 : vector<128x64xf32> to vector<2x8x8x64xf32>
    %c0_103 = arith.constant 0 : index
    %c2_104 = arith.constant 2 : index
    %c2_105 = arith.constant 2 : index
    %c0_106 = arith.constant 0 : index
    %67 = tpu.strided_load %arg11[%c0_103, %c2_104, %c2_105, %c0_106] {strides = array<i32: 1, 2, 2, 1>} : memref<2x18x18x64xf32, #tpu.memory_space<vmem>>, vector<2x8x8x64xf32>
    tpu.strided_store %arg11[%c0_103, %c2_104, %c2_105, %c0_106], %66 {strides = array<i32: 1, 2, 2, 1>} : memref<2x18x18x64xf32, #tpu.memory_space<vmem>>, vector<2x8x8x64xf32>
    %cst_107 = arith.constant 0.000000e+00 : f32
    %68 = vector.broadcast %cst_107 : f32 to vector<2x1x18x64xf32>
    %cst_108 = arith.constant 0.000000e+00 : f32
    %69 = vector.broadcast %cst_108 : f32 to vector<2x18x1x64xf32>
    %c0_109 = arith.constant 0 : index
    %c0_110 = arith.constant 0 : index
    %c0_111 = arith.constant 0 : index
    %c0_112 = arith.constant 0 : index
    %70 = vector.load %arg12[%c0_109, %c0_110, %c0_111, %c0_112] : memref<2x18x18x64xf32, #tpu.memory_space<vmem>>, vector<2x1x18x64xf32>
    tpu.vector_store %arg12[%c0_109, %c0_110, %c0_111, %c0_112], %68 {strides = array<i32>} : memref<2x18x18x64xf32, #tpu.memory_space<vmem>>, vector<2x1x18x64xf32>,
    %c0_113 = arith.constant 0 : index
    %c17_114 = arith.constant 17 : index
    %c0_115 = arith.constant 0 : index
    %c0_116 = arith.constant 0 : index
    %71 = vector.load %arg12[%c0_113, %c17_114, %c0_115, %c0_116] : memref<2x18x18x64xf32, #tpu.memory_space<vmem>>, vector<2x1x18x64xf32>
    tpu.vector_store %arg12[%c0_113, %c17_114, %c0_115, %c0_116], %68 {strides = array<i32>} : memref<2x18x18x64xf32, #tpu.memory_space<vmem>>, vector<2x1x18x64xf32>,
    %c0_117 = arith.constant 0 : index
    %c0_118 = arith.constant 0 : index
    %c0_119 = arith.constant 0 : index
    %c0_120 = arith.constant 0 : index
    %72 = vector.load %arg12[%c0_117, %c0_118, %c0_119, %c0_120] : memref<2x18x18x64xf32, #tpu.memory_space<vmem>>, vector<2x18x1x64xf32>
    tpu.vector_store %arg12[%c0_117, %c0_118, %c0_119, %c0_120], %69 {strides = array<i32>} : memref<2x18x18x64xf32, #tpu.memory_space<vmem>>, vector<2x18x1x64xf32>,
    %c0_121 = arith.constant 0 : index
    %c0_122 = arith.constant 0 : index
    %c17_123 = arith.constant 17 : index
    %c0_124 = arith.constant 0 : index
    %73 = vector.load %arg12[%c0_121, %c0_122, %c17_123, %c0_124] : memref<2x18x18x64xf32, #tpu.memory_space<vmem>>, vector<2x18x1x64xf32>
    tpu.vector_store %arg12[%c0_121, %c0_122, %c17_123, %c0_124], %69 {strides = array<i32>} : memref<2x18x18x64xf32, #tpu.memory_space<vmem>>, vector<2x18x1x64xf32>,
    %c0_125 = arith.constant 0 : index
    %c0_126 = arith.constant 0 : index
    %c0_127 = arith.constant 0 : index
    %c0_128 = arith.constant 0 : index
    %74 = vector.load %arg2[%c0_125, %c0_126, %c0_127, %c0_128] : memref<2x16x16x64xf32, #tpu.memory_space<vmem>>, vector<2x16x16x64xf32>
    %c0_129 = arith.constant 0 : index
    %c1_130 = arith.constant 1 : index
    %c1_131 = arith.constant 1 : index
    %c0_132 = arith.constant 0 : index
    %75 = vector.load %arg12[%c0_129, %c1_130, %c1_131, %c0_132] : memref<2x18x18x64xf32, #tpu.memory_space<vmem>>, vector<2x16x16x64xf32>
    tpu.vector_store %arg12[%c0_129, %c1_130, %c1_131, %c0_132], %74 {strides = array<i32>} : memref<2x18x18x64xf32, #tpu.memory_space<vmem>>, vector<2x16x16x64xf32>,
    %c0_133 = arith.constant 0 : index
    %c0_134 = arith.constant 0 : index
    %c0_135 = arith.constant 0 : index
    %c0_136 = arith.constant 0 : index
    %76 = vector.load %arg11[%c0_133, %c0_134, %c0_135, %c0_136] : memref<2x18x18x64xf32, #tpu.memory_space<vmem>>, vector<2x16x16x64xf32>
    %77 = vector.shape_cast %76 : vector<2x16x16x64xf32> to vector<512x64xf32>
    %78 = arith.truncf %77 : vector<512x64xf32> to vector<512x64xbf16>
    %c0_137 = arith.constant 0 : index
    %c0_138 = arith.constant 0 : index
    %79 = vector.load %arg14[%c0_137, %c0_138] : memref<512x1152xbf16, #tpu.memory_space<vmem>>, vector<512x64xbf16>
    tpu.vector_store %arg14[%c0_137, %c0_138], %78 {strides = array<i32>} : memref<512x1152xbf16, #tpu.memory_space<vmem>>, vector<512x64xbf16>,
    %c0_139 = arith.constant 0 : index
    %c0_140 = arith.constant 0 : index
    %c0_141 = arith.constant 0 : index
    %c0_142 = arith.constant 0 : index
    %80 = vector.load %arg12[%c0_139, %c0_140, %c0_141, %c0_142] : memref<2x18x18x64xf32, #tpu.memory_space<vmem>>, vector<2x16x16x64xf32>
    %81 = vector.shape_cast %80 : vector<2x16x16x64xf32> to vector<512x64xf32>
    %82 = arith.truncf %81 : vector<512x64xf32> to vector<512x64xbf16>
    %c0_143 = arith.constant 0 : index
    %c64 = arith.constant 64 : index
    %83 = vector.load %arg14[%c0_143, %c64] : memref<512x1152xbf16, #tpu.memory_space<vmem>>, vector<512x64xbf16>
    tpu.vector_store %arg14[%c0_143, %c64], %82 {strides = array<i32>} : memref<512x1152xbf16, #tpu.memory_space<vmem>>, vector<512x64xbf16>,
    %c0_144 = arith.constant 0 : index
    %c0_145 = arith.constant 0 : index
    %c1_146 = arith.constant 1 : index
    %c0_147 = arith.constant 0 : index
    %84 = vector.load %arg11[%c0_144, %c0_145, %c1_146, %c0_147] : memref<2x18x18x64xf32, #tpu.memory_space<vmem>>, vector<2x16x16x64xf32>
    %85 = vector.shape_cast %84 : vector<2x16x16x64xf32> to vector<512x64xf32>
    %86 = arith.truncf %85 : vector<512x64xf32> to vector<512x64xbf16>
    %c0_148 = arith.constant 0 : index
    %c128_149 = arith.constant 128 : index
    %87 = vector.load %arg14[%c0_148, %c128_149] : memref<512x1152xbf16, #tpu.memory_space<vmem>>, vector<512x64xbf16>
    tpu.vector_store %arg14[%c0_148, %c128_149], %86 {strides = array<i32>} : memref<512x1152xbf16, #tpu.memory_space<vmem>>, vector<512x64xbf16>,
    %c0_150 = arith.constant 0 : index
    %c0_151 = arith.constant 0 : index
    %c1_152 = arith.constant 1 : index
    %c0_153 = arith.constant 0 : index
    %88 = vector.load %arg12[%c0_150, %c0_151, %c1_152, %c0_153] : memref<2x18x18x64xf32, #tpu.memory_space<vmem>>, vector<2x16x16x64xf32>
    %89 = vector.shape_cast %88 : vector<2x16x16x64xf32> to vector<512x64xf32>
    %90 = arith.truncf %89 : vector<512x64xf32> to vector<512x64xbf16>
    %c0_154 = arith.constant 0 : index
    %c192 = arith.constant 192 : index
    %91 = vector.load %arg14[%c0_154, %c192] : memref<512x1152xbf16, #tpu.memory_space<vmem>>, vector<512x64xbf16>
    tpu.vector_store %arg14[%c0_154, %c192], %90 {strides = array<i32>} : memref<512x1152xbf16, #tpu.memory_space<vmem>>, vector<512x64xbf16>,
    %c0_155 = arith.constant 0 : index
    %c0_156 = arith.constant 0 : index
    %c2_157 = arith.constant 2 : index
    %c0_158 = arith.constant 0 : index
    %92 = vector.load %arg11[%c0_155, %c0_156, %c2_157, %c0_158] : memref<2x18x18x64xf32, #tpu.memory_space<vmem>>, vector<2x16x16x64xf32>
    %93 = vector.shape_cast %92 : vector<2x16x16x64xf32> to vector<512x64xf32>
    %94 = arith.truncf %93 : vector<512x64xf32> to vector<512x64xbf16>
    %c0_159 = arith.constant 0 : index
    %c256_160 = arith.constant 256 : index
    %95 = vector.load %arg14[%c0_159, %c256_160] : memref<512x1152xbf16, #tpu.memory_space<vmem>>, vector<512x64xbf16>
    tpu.vector_store %arg14[%c0_159, %c256_160], %94 {strides = array<i32>} : memref<512x1152xbf16, #tpu.memory_space<vmem>>, vector<512x64xbf16>,
    %c0_161 = arith.constant 0 : index
    %c0_162 = arith.constant 0 : index
    %c2_163 = arith.constant 2 : index
    %c0_164 = arith.constant 0 : index
    %96 = vector.load %arg12[%c0_161, %c0_162, %c2_163, %c0_164] : memref<2x18x18x64xf32, #tpu.memory_space<vmem>>, vector<2x16x16x64xf32>
    %97 = vector.shape_cast %96 : vector<2x16x16x64xf32> to vector<512x64xf32>
    %98 = arith.truncf %97 : vector<512x64xf32> to vector<512x64xbf16>
    %c0_165 = arith.constant 0 : index
    %c320 = arith.constant 320 : index
    %99 = vector.load %arg14[%c0_165, %c320] : memref<512x1152xbf16, #tpu.memory_space<vmem>>, vector<512x64xbf16>
    tpu.vector_store %arg14[%c0_165, %c320], %98 {strides = array<i32>} : memref<512x1152xbf16, #tpu.memory_space<vmem>>, vector<512x64xbf16>,
    %c0_166 = arith.constant 0 : index
    %c1_167 = arith.constant 1 : index
    %c0_168 = arith.constant 0 : index
    %c0_169 = arith.constant 0 : index
    %100 = vector.load %arg11[%c0_166, %c1_167, %c0_168, %c0_169] : memref<2x18x18x64xf32, #tpu.memory_space<vmem>>, vector<2x16x16x64xf32>
    %101 = vector.shape_cast %100 : vector<2x16x16x64xf32> to vector<512x64xf32>
    %102 = arith.truncf %101 : vector<512x64xf32> to vector<512x64xbf16>
    %c0_170 = arith.constant 0 : index
    %c384_171 = arith.constant 384 : index
    %103 = vector.load %arg14[%c0_170, %c384_171] : memref<512x1152xbf16, #tpu.memory_space<vmem>>, vector<512x64xbf16>
    tpu.vector_store %arg14[%c0_170, %c384_171], %102 {strides = array<i32>} : memref<512x1152xbf16, #tpu.memory_space<vmem>>, vector<512x64xbf16>,
    %c0_172 = arith.constant 0 : index
    %c1_173 = arith.constant 1 : index
    %c0_174 = arith.constant 0 : index
    %c0_175 = arith.constant 0 : index
    %104 = vector.load %arg12[%c0_172, %c1_173, %c0_174, %c0_175] : memref<2x18x18x64xf32, #tpu.memory_space<vmem>>, vector<2x16x16x64xf32>
    %105 = vector.shape_cast %104 : vector<2x16x16x64xf32> to vector<512x64xf32>
    %106 = arith.truncf %105 : vector<512x64xf32> to vector<512x64xbf16>
    %c0_176 = arith.constant 0 : index
    %c448 = arith.constant 448 : index
    %107 = vector.load %arg14[%c0_176, %c448] : memref<512x1152xbf16, #tpu.memory_space<vmem>>, vector<512x64xbf16>
    tpu.vector_store %arg14[%c0_176, %c448], %106 {strides = array<i32>} : memref<512x1152xbf16, #tpu.memory_space<vmem>>, vector<512x64xbf16>,
    %c0_177 = arith.constant 0 : index
    %c1_178 = arith.constant 1 : index
    %c1_179 = arith.constant 1 : index
    %c0_180 = arith.constant 0 : index
    %108 = vector.load %arg11[%c0_177, %c1_178, %c1_179, %c0_180] : memref<2x18x18x64xf32, #tpu.memory_space<vmem>>, vector<2x16x16x64xf32>
    %109 = vector.shape_cast %108 : vector<2x16x16x64xf32> to vector<512x64xf32>
    %110 = arith.truncf %109 : vector<512x64xf32> to vector<512x64xbf16>
    %c0_181 = arith.constant 0 : index
    %c512_182 = arith.constant 512 : index
    %111 = vector.load %arg14[%c0_181, %c512_182] : memref<512x1152xbf16, #tpu.memory_space<vmem>>, vector<512x64xbf16>
    tpu.vector_store %arg14[%c0_181, %c512_182], %110 {strides = array<i32>} : memref<512x1152xbf16, #tpu.memory_space<vmem>>, vector<512x64xbf16>,
    %c0_183 = arith.constant 0 : index
    %c1_184 = arith.constant 1 : index
    %c1_185 = arith.constant 1 : index
    %c0_186 = arith.constant 0 : index
    %112 = vector.load %arg12[%c0_183, %c1_184, %c1_185, %c0_186] : memref<2x18x18x64xf32, #tpu.memory_space<vmem>>, vector<2x16x16x64xf32>
    %113 = vector.shape_cast %112 : vector<2x16x16x64xf32> to vector<512x64xf32>
    %114 = arith.truncf %113 : vector<512x64xf32> to vector<512x64xbf16>
    %c0_187 = arith.constant 0 : index
    %c576 = arith.constant 576 : index
    %115 = vector.load %arg14[%c0_187, %c576] : memref<512x1152xbf16, #tpu.memory_space<vmem>>, vector<512x64xbf16>
    tpu.vector_store %arg14[%c0_187, %c576], %114 {strides = array<i32>} : memref<512x1152xbf16, #tpu.memory_space<vmem>>, vector<512x64xbf16>,
    %c0_188 = arith.constant 0 : index
    %c1_189 = arith.constant 1 : index
    %c2_190 = arith.constant 2 : index
    %c0_191 = arith.constant 0 : index
    %116 = vector.load %arg11[%c0_188, %c1_189, %c2_190, %c0_191] : memref<2x18x18x64xf32, #tpu.memory_space<vmem>>, vector<2x16x16x64xf32>
    %117 = vector.shape_cast %116 : vector<2x16x16x64xf32> to vector<512x64xf32>
    %118 = arith.truncf %117 : vector<512x64xf32> to vector<512x64xbf16>
    %c0_192 = arith.constant 0 : index
    %c640_193 = arith.constant 640 : index
    %119 = vector.load %arg14[%c0_192, %c640_193] : memref<512x1152xbf16, #tpu.memory_space<vmem>>, vector<512x64xbf16>
    tpu.vector_store %arg14[%c0_192, %c640_193], %118 {strides = array<i32>} : memref<512x1152xbf16, #tpu.memory_space<vmem>>, vector<512x64xbf16>,
    %c0_194 = arith.constant 0 : index
    %c1_195 = arith.constant 1 : index
    %c2_196 = arith.constant 2 : index
    %c0_197 = arith.constant 0 : index
    %120 = vector.load %arg12[%c0_194, %c1_195, %c2_196, %c0_197] : memref<2x18x18x64xf32, #tpu.memory_space<vmem>>, vector<2x16x16x64xf32>
    %121 = vector.shape_cast %120 : vector<2x16x16x64xf32> to vector<512x64xf32>
    %122 = arith.truncf %121 : vector<512x64xf32> to vector<512x64xbf16>
    %c0_198 = arith.constant 0 : index
    %c704 = arith.constant 704 : index
    %123 = vector.load %arg14[%c0_198, %c704] : memref<512x1152xbf16, #tpu.memory_space<vmem>>, vector<512x64xbf16>
    tpu.vector_store %arg14[%c0_198, %c704], %122 {strides = array<i32>} : memref<512x1152xbf16, #tpu.memory_space<vmem>>, vector<512x64xbf16>,
    %c0_199 = arith.constant 0 : index
    %c2_200 = arith.constant 2 : index
    %c0_201 = arith.constant 0 : index
    %c0_202 = arith.constant 0 : index
    %124 = vector.load %arg11[%c0_199, %c2_200, %c0_201, %c0_202] : memref<2x18x18x64xf32, #tpu.memory_space<vmem>>, vector<2x16x16x64xf32>
    %125 = vector.shape_cast %124 : vector<2x16x16x64xf32> to vector<512x64xf32>
    %126 = arith.truncf %125 : vector<512x64xf32> to vector<512x64xbf16>
    %c0_203 = arith.constant 0 : index
    %c768_204 = arith.constant 768 : index
    %127 = vector.load %arg14[%c0_203, %c768_204] : memref<512x1152xbf16, #tpu.memory_space<vmem>>, vector<512x64xbf16>
    tpu.vector_store %arg14[%c0_203, %c768_204], %126 {strides = array<i32>} : memref<512x1152xbf16, #tpu.memory_space<vmem>>, vector<512x64xbf16>,
    %c0_205 = arith.constant 0 : index
    %c2_206 = arith.constant 2 : index
    %c0_207 = arith.constant 0 : index
    %c0_208 = arith.constant 0 : index
    %128 = vector.load %arg12[%c0_205, %c2_206, %c0_207, %c0_208] : memref<2x18x18x64xf32, #tpu.memory_space<vmem>>, vector<2x16x16x64xf32>
    %129 = vector.shape_cast %128 : vector<2x16x16x64xf32> to vector<512x64xf32>
    %130 = arith.truncf %129 : vector<512x64xf32> to vector<512x64xbf16>
    %c0_209 = arith.constant 0 : index
    %c832 = arith.constant 832 : index
    %131 = vector.load %arg14[%c0_209, %c832] : memref<512x1152xbf16, #tpu.memory_space<vmem>>, vector<512x64xbf16>
    tpu.vector_store %arg14[%c0_209, %c832], %130 {strides = array<i32>} : memref<512x1152xbf16, #tpu.memory_space<vmem>>, vector<512x64xbf16>,
    %c0_210 = arith.constant 0 : index
    %c2_211 = arith.constant 2 : index
    %c1_212 = arith.constant 1 : index
    %c0_213 = arith.constant 0 : index
    %132 = vector.load %arg11[%c0_210, %c2_211, %c1_212, %c0_213] : memref<2x18x18x64xf32, #tpu.memory_space<vmem>>, vector<2x16x16x64xf32>
    %133 = vector.shape_cast %132 : vector<2x16x16x64xf32> to vector<512x64xf32>
    %134 = arith.truncf %133 : vector<512x64xf32> to vector<512x64xbf16>
    %c0_214 = arith.constant 0 : index
    %c896_215 = arith.constant 896 : index
    %135 = vector.load %arg14[%c0_214, %c896_215] : memref<512x1152xbf16, #tpu.memory_space<vmem>>, vector<512x64xbf16>
    tpu.vector_store %arg14[%c0_214, %c896_215], %134 {strides = array<i32>} : memref<512x1152xbf16, #tpu.memory_space<vmem>>, vector<512x64xbf16>,
    %c0_216 = arith.constant 0 : index
    %c2_217 = arith.constant 2 : index
    %c1_218 = arith.constant 1 : index
    %c0_219 = arith.constant 0 : index
    %136 = vector.load %arg12[%c0_216, %c2_217, %c1_218, %c0_219] : memref<2x18x18x64xf32, #tpu.memory_space<vmem>>, vector<2x16x16x64xf32>
    %137 = vector.shape_cast %136 : vector<2x16x16x64xf32> to vector<512x64xf32>
    %138 = arith.truncf %137 : vector<512x64xf32> to vector<512x64xbf16>
    %c0_220 = arith.constant 0 : index
    %c960 = arith.constant 960 : index
    %139 = vector.load %arg14[%c0_220, %c960] : memref<512x1152xbf16, #tpu.memory_space<vmem>>, vector<512x64xbf16>
    tpu.vector_store %arg14[%c0_220, %c960], %138 {strides = array<i32>} : memref<512x1152xbf16, #tpu.memory_space<vmem>>, vector<512x64xbf16>,
    %c0_221 = arith.constant 0 : index
    %c2_222 = arith.constant 2 : index
    %c2_223 = arith.constant 2 : index
    %c0_224 = arith.constant 0 : index
    %140 = vector.load %arg11[%c0_221, %c2_222, %c2_223, %c0_224] : memref<2x18x18x64xf32, #tpu.memory_space<vmem>>, vector<2x16x16x64xf32>
    %141 = vector.shape_cast %140 : vector<2x16x16x64xf32> to vector<512x64xf32>
    %142 = arith.truncf %141 : vector<512x64xf32> to vector<512x64xbf16>
    %c0_225 = arith.constant 0 : index
    %c1024_226 = arith.constant 1024 : index
    %143 = vector.load %arg14[%c0_225, %c1024_226] : memref<512x1152xbf16, #tpu.memory_space<vmem>>, vector<512x64xbf16>
    tpu.vector_store %arg14[%c0_225, %c1024_226], %142 {strides = array<i32>} : memref<512x1152xbf16, #tpu.memory_space<vmem>>, vector<512x64xbf16>,
    %c0_227 = arith.constant 0 : index
    %c2_228 = arith.constant 2 : index
    %c2_229 = arith.constant 2 : index
    %c0_230 = arith.constant 0 : index
    %144 = vector.load %arg12[%c0_227, %c2_228, %c2_229, %c0_230] : memref<2x18x18x64xf32, #tpu.memory_space<vmem>>, vector<2x16x16x64xf32>
    %145 = vector.shape_cast %144 : vector<2x16x16x64xf32> to vector<512x64xf32>
    %146 = arith.truncf %145 : vector<512x64xf32> to vector<512x64xbf16>
    %c0_231 = arith.constant 0 : index
    %c1088 = arith.constant 1088 : index
    %147 = vector.load %arg14[%c0_231, %c1088] : memref<512x1152xbf16, #tpu.memory_space<vmem>>, vector<512x64xbf16>
    tpu.vector_store %arg14[%c0_231, %c1088], %146 {strides = array<i32>} : memref<512x1152xbf16, #tpu.memory_space<vmem>>, vector<512x64xbf16>,
    %c0_232 = arith.constant 0 : index
    %c0_233 = arith.constant 0 : index
    %148 = vector.load %arg14[%c0_232, %c0_233] : memref<512x1152xbf16, #tpu.memory_space<vmem>>, vector<512x1152xbf16>
    %c0_234 = arith.constant 0 : index
    %c0_235 = arith.constant 0 : index
    %149 = vector.load %arg4[%c0_234, %c0_235] : memref<1152x64xbf16, #tpu.memory_space<vmem>>, vector<1152x64xbf16>
    %cst_236 = arith.constant dense<0.000000e+00> : vector<512x64xf32>
    %150 = tpu.matmul %148, %149, %cst_236 {dimension_numbers = #tpu.dot_dimension_numbers<[1], [0], [0], [1], [0, 0, 1, 1], [], []>} : vector<512x1152xbf16>, vector<1152x64xbf16>, vector<512x64xf32> -> vector<512x64xf32>
    %c0_237 = arith.constant 0 : index
    %c0_238 = arith.constant 0 : index
    %151 = vector.load %arg6[%c0_237, %c0_238] : memref<1x64xf32, #tpu.memory_space<vmem>>, vector<1x64xf32>
    %152 = vector.broadcast %151 : vector<1x64xf32> to vector<512x64xf32>
    %153 = arith.addf %150, %152 : vector<512x64xf32>
    %cst_239 = arith.constant dense<0.000000e+00> : vector<64xf32>
    %154 = vector.multi_reduction <add>, %153, %cst_239 [0] : vector<512x64xf32> to vector<64xf32>
    %155 = vector.shape_cast %154 : vector<64xf32> to vector<1x64xf32>
    %cst_240 = arith.constant 5.120000e+02 : f32
    %156 = vector.broadcast %cst_240 : f32 to vector<1x64xf32>
    %157 = arith.divf %155, %156 : vector<1x64xf32>
    %158 = vector.broadcast %157 : vector<1x64xf32> to vector<512x64xf32>
    %159 = arith.subf %153, %158 : vector<512x64xf32>
    %160 = arith.mulf %159, %159 : vector<512x64xf32>
    %cst_241 = arith.constant dense<0.000000e+00> : vector<64xf32>
    %161 = vector.multi_reduction <add>, %160, %cst_241 [0] : vector<512x64xf32> to vector<64xf32>
    %162 = vector.shape_cast %161 : vector<64xf32> to vector<1x64xf32>
    %cst_242 = arith.constant 5.120000e+02 : f32
    %163 = vector.broadcast %cst_242 : f32 to vector<1x64xf32>
    %164 = arith.divf %162, %163 : vector<1x64xf32>
    %165 = vector.broadcast %157 : vector<1x64xf32> to vector<512x64xf32>
    %166 = arith.subf %153, %165 : vector<512x64xf32>
    %cst_243 = arith.constant 9.99999974E-6 : f32
    %167 = vector.broadcast %cst_243 : f32 to vector<1x64xf32>
    %168 = arith.addf %164, %167 : vector<1x64xf32>
    %169 = math.rsqrt %168 : vector<1x64xf32>
    %170 = vector.broadcast %169 : vector<1x64xf32> to vector<512x64xf32>
    %171 = arith.mulf %166, %170 : vector<512x64xf32>
    %c0_244 = arith.constant 0 : index
    %c0_245 = arith.constant 0 : index
    %172 = vector.load %arg7[%c0_244, %c0_245] : memref<1x64xf32, #tpu.memory_space<vmem>>, vector<1x64xf32>
    %173 = vector.broadcast %172 : vector<1x64xf32> to vector<512x64xf32>
    %174 = arith.mulf %171, %173 : vector<512x64xf32>
    %c0_246 = arith.constant 0 : index
    %c0_247 = arith.constant 0 : index
    %175 = vector.load %arg8[%c0_246, %c0_247] : memref<1x64xf32, #tpu.memory_space<vmem>>, vector<1x64xf32>
    %176 = vector.broadcast %175 : vector<1x64xf32> to vector<512x64xf32>
    %177 = arith.addf %174, %176 : vector<512x64xf32>
    %cst_248 = arith.constant 0.000000e+00 : f32
    %178 = vector.broadcast %cst_248 : f32 to vector<512x64xf32>
    %179 = arith.maximumf %177, %178 : vector<512x64xf32>
    %180 = tpu.transpose %179, [1, 0] : vector<512x64xf32> -> vector<64x512xf32>
    %181 = vector.extract_strided_slice %180 {offsets = [0, 0], sizes = [64, 256], strides = [1, 1]} : vector<64x512xf32> to vector<64x256xf32>
    %c0_249 = arith.constant 0 : index
    %c0_250 = arith.constant 0 : index
    %c0_251 = arith.constant 0 : index
    %182 = vector.load %arg9[%c0_249, %c0_250, %c0_251] : memref<2x64x256xf32, #tpu.memory_space<vmem>>, vector<1x64x256xf32>
    %183 = vector.shape_cast %182 : vector<1x64x256xf32> to vector<64x256xf32>
    %184 = vector.shape_cast %181 : vector<64x256xf32> to vector<1x64x256xf32>
    tpu.vector_store %arg9[%c0_249, %c0_250, %c0_251], %184 {strides = array<i32>} : memref<2x64x256xf32, #tpu.memory_space<vmem>>, vector<1x64x256xf32>,
    %185 = vector.extract_strided_slice %180 {offsets = [0, 256], sizes = [64, 256], strides = [1, 1]} : vector<64x512xf32> to vector<64x256xf32>
    %c1_252 = arith.constant 1 : index
    %c0_253 = arith.constant 0 : index
    %c0_254 = arith.constant 0 : index
    %186 = vector.load %arg9[%c1_252, %c0_253, %c0_254] : memref<2x64x256xf32, #tpu.memory_space<vmem>>, vector<1x64x256xf32>
    %187 = vector.shape_cast %186 : vector<1x64x256xf32> to vector<64x256xf32>
    %188 = vector.shape_cast %185 : vector<64x256xf32> to vector<1x64x256xf32>
    tpu.vector_store %arg9[%c1_252, %c0_253, %c0_254], %188 {strides = array<i32>} : memref<2x64x256xf32, #tpu.memory_space<vmem>>, vector<1x64x256xf32>,
    return
  }
  func.func @transform_0(%arg0: i32) -> (i32, i32, i32, i32) {
    %c0_i32 = arith.constant 0 : i32
    %c0_i32_0 = arith.constant 0 : i32
    %c0_i32_1 = arith.constant 0 : i32
    %c0_i32_2 = arith.constant 0 : i32
    %c0_i32_3 = arith.constant 0 : i32
    return %c0_i32, %c0_i32_0, %c0_i32_1, %c0_i32_2 : i32, i32, i32, i32
  }
  func.func @transform_1(%arg0: i32) -> (i32, i32, i32, i32) {
    %c0_i32 = arith.constant 0 : i32
    %c0_i32_0 = arith.constant 0 : i32
    %c0_i32_1 = arith.constant 0 : i32
    %c0_i32_2 = arith.constant 0 : i32
    %c0_i32_3 = arith.constant 0 : i32
    return %c0_i32, %c0_i32_0, %c0_i32_1, %c0_i32_2 : i32, i32, i32, i32
  }
  func.func @transform_2(%arg0: i32) -> (i32, i32) {
    %c0_i32 = arith.constant 0 : i32
    %c0_i32_0 = arith.constant 0 : i32
    %c0_i32_1 = arith.constant 0 : i32
    return %c0_i32, %c0_i32_0 : i32, i32
  }
  func.func @transform_3(%arg0: i32) -> (i32, i32) {
    %c0_i32 = arith.constant 0 : i32
    %c0_i32_0 = arith.constant 0 : i32
    %c0_i32_1 = arith.constant 0 : i32
    return %c0_i32, %c0_i32_0 : i32, i32
  }
  func.func @transform_4(%arg0: i32) -> (i32, i32) {
    %c0_i32 = arith.constant 0 : i32
    %c0_i32_0 = arith.constant 0 : i32
    %c0_i32_1 = arith.constant 0 : i32
    return %c0_i32, %c0_i32_0 : i32, i32
  }
  func.func @transform_5(%arg0: i32) -> (i32, i32) {
    %c0_i32 = arith.constant 0 : i32
    %c0_i32_0 = arith.constant 0 : i32
    %c0_i32_1 = arith.constant 0 : i32
    return %c0_i32, %c0_i32_0 : i32, i32
  }
  func.func @transform_6(%arg0: i32) -> (i32, i32) {
    %c0_i32 = arith.constant 0 : i32
    %c0_i32_0 = arith.constant 0 : i32
    %c0_i32_1 = arith.constant 0 : i32
    return %c0_i32, %c0_i32_0 : i32, i32
  }
  func.func @transform_7(%arg0: i32) -> (i32, i32) {
    %c0_i32 = arith.constant 0 : i32
    %c0_i32_0 = arith.constant 0 : i32
    %c0_i32_1 = arith.constant 0 : i32
    return %c0_i32, %c0_i32_0 : i32, i32
  }
  func.func @transform_8(%arg0: i32) -> (i32, i32, i32) {
    %c0_i32 = arith.constant 0 : i32
    %c0_i32_0 = arith.constant 0 : i32
    %c0_i32_1 = arith.constant 0 : i32
    %c0_i32_2 = arith.constant 0 : i32
    return %c0_i32, %c0_i32_0, %c0_i32_1 : i32, i32, i32
  }
}

</mosaic_0001>

<bundles_post_ra>
// kernel: tpu_custom_call.1
= control target key start
LH: loop header
LB: loop body
LE: loop exit
PB: predicated region body
PF: predicated region fallthrough
CT: control target
= control target key end

     0   :  { %13 = vsyncpa [#allocation8], 0  ;;  %s14751_s0 = inlined_call_operand.vmem [shape: f32[2,8,8,128], index: 0, kind: input, shape index: {}]   ;;  %s14752_s1 = inlined_call_operand.vmem [shape: f32[2,16,16,64], index: 1, kind: input, shape index: {}]   ;;  %s14753_s2 = inlined_call_operand.hbm [shape: bf16[1152,256], index: 2, kind: input, shape index: {}]   ;;  %s14754_s3 = inlined_call_operand.vmem [shape: bf16[1152,64], index: 3, kind: input, shape index: {}]   ;;  %s14755_s4 = inlined_call_operand.vmem [shape: f32[1,256], index: 4, kind: input, shape index: {}]   ;;  %s14756_s5 = inlined_call_operand.vmem [shape: f32[1,64], index: 5, kind: input, shape index: {}]   ;;  %s14757_s6 = inlined_call_operand.vmem [shape: f32[1,64], index: 6, kind: input, shape index: {}]   ;;  %s14758_s7 = inlined_call_operand.vmem [shape: f32[1,64], index: 7, kind: input, shape index: {}]   ;;  %s14759_s8 = inlined_call_operand.hbm [shape: f32[2,64,256], index: 8, kind: output, shape index: {}]  }
   0x1   :  { %14 = vsyncpa [#allocation9], 0  ;;  %s10460_s27 = smov [#allocation7]   ;;  %s10412_s9 = scalar_lea.hbm %s14753_s2, 18432 }
   0x2   :  { %s24_s28 = sshll.u32 %s10460_s27, 4  ;;  %p10413_p0 = scmp.ne.s32.totalorder %s14753_s2, %s10412_s9  ;;  %s25_s28 = int_to_ptr.vmem [resolvable:$true] %s24_s28 }
   0x3   :  { %p10416_p1 = scmp.lt.u32.totalorder %s10412_s9, %s14753_s2 }
   0x5   :  { %p10418_p2 = pnand %p10416_p1, %p10413_p0 }
   0x7   :  { %10421 = shalt.err (!%p10418_p2)
}
   0x8   :  { %s10422_s14 = scalar_lea.vmem %s25_s28, 18432  ;;  %p10427_p4 = scmp.lt.s32.totalorder %s25_s28, %s25_s28 }
   0x9   :  { %p10423_p3 = scmp.ne.s32.totalorder %s25_s28, %s10422_s14  ;;  %p10428_p5 = scmp.lt.s32.totalorder %s10422_s14, %s10422_s14 }
   0xb   :  { %p10429_p6 = por %p10428_p5, %p10427_p4 }
   0xd   :  { %p10430_p7 = pnand %p10429_p6, %p10423_p3 }
   0xf   :  { %10433 = shalt.err (!%p10430_p7)
}
  0x10   :  { %s10461_s15 = smov 128   ;;  %s10462_s16 = smov 8  }
  0x11   :  { %30 = dma.hbm_to_vmem [thread:$0]  %s14753_s2, 18432, %s25_s28, [#allocation8], %s10461_s15, %s10461_s15, %s10462_s16  }
  0x12   :  { %10456 = dma.done.wait [#allocation8], 18432  }
  0x13   :  { %10457 = vsyncadd [#allocation8], 4294948864  ;;  %v10463_v0 = vmov 0.0   ;;  %v10098_v1 = vld [vmem:[#allocation7 + $0x4] ss:$8 sps:$4 sm:$0xff]   ;;  %v10589_v20 = vld [vmem:[%s14751_s0 + $0x10] sm:$0xff] }
  0x14   :  { %45 = vst [vmem:[#allocation2] sm:$0xff] %v10463_v0  ;;  %46 = vst [vmem:[#allocation2 + $0x8] sm:$0x3] %v10463_v0  ;;  %v10100_v2 = vld [vmem:[#allocation7] ss:$8 sps:$4 sm:$0xff]   ;;  %1364 = vmatprep.subr.bf16.mxu0 %v10098_v1  ;;  %v10596_v23 = vld [vmem:[%s14751_s0 + $0x18] sm:$0xff] }
  0x15   :  { %47 = vst [vmem:[#allocation2 + $0xa0] sm:$0xff] %v10463_v0  ;;  %48 = vst [vmem:[#allocation2 + $0xa8] sm:$0x3] %v10463_v0  ;;  %v10101_v3 = vld [vmem:[#allocation7 + $0x14] ss:$8 sps:$4 sm:$0xff]   ;;  %1365 = vmatpush1.bf16.msra.mxu0 %v10100_v2  ;;  %v10577_v14 = vld [vmem:[%s14751_s0] sm:$0xff]  ;;  %v272_v2 = vpack.c.bf16 %v10596_v23, %v10589_v20 }
  0x16   :  { %50 = vst [vmem:[#allocation2 + $0x90] sm:$0xff] %v10463_v0  ;;  %51 = vst [vmem:[#allocation2 + $0x98] sm:$0x3] %v10463_v0  ;;  %v10103_v4 = vld [vmem:[#allocation7 + $0x10] ss:$8 sps:$4 sm:$0xff]   ;;  %1366 = vmatprep.subr.bf16.mxu0 %v10101_v3  ;;  %v10584_v19 = vld [vmem:[%s14751_s0 + $0x8] sm:$0xff] }
  0x17   :  { %52 = vst [vmem:[#allocation2 + $0x130] sm:$0xff] %v10463_v0  ;;  %53 = vst [vmem:[#allocation2 + $0x138] sm:$0x3] %v10463_v0  ;;  %v10104_v5 = vld [vmem:[#allocation7 + $0x24] ss:$8 sps:$4 sm:$0xff]   ;;  %v10613_v28 = vld [vmem:[%s14751_s0 + $0x30] sm:$0xff]  ;;  %v10664_v54 = vpack.c.bf16 %v10589_v20, %v10584_v19  ;;  %v271_v56 = vpack.c.bf16 %v10584_v19, %v10577_v14 }
  0x18   :  { %55 = vst [vmem:[#allocation2 + $0x10] sm:$0x1] %v10463_v0  ;;  %56 = vst [vmem:[#allocation2 + $0x20] sm:$0x1] %v10463_v0  ;;  %v10106_v6 = vld [vmem:[#allocation7 + $0x20] ss:$8 sps:$4 sm:$0xff]  }
  0x19   :  { %57 = vst [vmem:[#allocation2 + $0x30] sm:$0x1] %v10463_v0  ;;  %58 = vst [vmem:[#allocation2 + $0x40] sm:$0x1] %v10463_v0  ;;  %1367 = vmatpush1.bf16.msra.mxu0 %v10103_v4  ;;  %v10107_v7 = vld [vmem:[#allocation7 + $0x34] ss:$8 sps:$4 sm:$0xff]  }
  0x1a   :  { %59 = vst [vmem:[#allocation2 + $0x50] sm:$0x1] %v10463_v0  ;;  %60 = vst [vmem:[#allocation2 + $0x60] sm:$0x1] %v10463_v0  ;;  %1368 = vmatprep.subr.bf16.mxu0 %v10104_v5  ;;  %v10109_v8 = vld [vmem:[#allocation7 + $0x30] ss:$8 sps:$4 sm:$0xff]  }
  0x1b   :  { %61 = vst [vmem:[#allocation2 + $0x70] sm:$0x1] %v10463_v0  ;;  %62 = vst [vmem:[#allocation2 + $0x80] sm:$0x1] %v10463_v0  ;;  %v10110_v9 = vld [vmem:[#allocation7 + $0x44] ss:$8 sps:$4 sm:$0xff]  }
  0x1c   :  { %65 = vst [vmem:[#allocation2 + $0xb0] sm:$0x1] %v10463_v0  ;;  %66 = vst [vmem:[#allocation2 + $0xc0] sm:$0x1] %v10463_v0  ;;  %v10112_v10 = vld [vmem:[#allocation7 + $0x40] ss:$8 sps:$4 sm:$0xff]  }
  0x1d   :  { %67 = vst [vmem:[#allocation2 + $0xd0] sm:$0x1] %v10463_v0  ;;  %68 = vst [vmem:[#allocation2 + $0xe0] sm:$0x1] %v10463_v0  ;;  %1369 = vmatpush1.bf16.msra.mxu0 %v10106_v6  ;;  %v10113_v11 = vld [vmem:[#allocation7 + $0x54] ss:$8 sps:$4 sm:$0xff]  }
  0x1e   :  { %69 = vst [vmem:[#allocation2 + $0xf0] sm:$0x1] %v10463_v0  ;;  %70 = vst [vmem:[#allocation2 + $0x100] sm:$0x1] %v10463_v0  ;;  %1370 = vmatprep.subr.bf16.mxu0 %v10107_v7  ;;  %v10115_v12 = vld [vmem:[#allocation7 + $0x50] ss:$8 sps:$4 sm:$0xff]  }
  0x1f   :  { %71 = vst [vmem:[#allocation2 + $0x110] sm:$0x1] %v10463_v0  ;;  %72 = vst [vmem:[#allocation2 + $0x120] sm:$0x1] %v10463_v0  ;;  %v10116_v13 = vld [vmem:[#allocation7 + $0x64] ss:$8 sps:$4 sm:$0xff]  }
  0x20   :  { %75 = vst [vmem:[#allocation2 + $0x19] sm:$0x1] %v10463_v0  ;;  %76 = vst [vmem:[#allocation2 + $0x29] sm:$0x1] %v10463_v0  ;;  %v159_v15 = vld [vmem:[#allocation2 + $0x1] sm:$0xff]  ;;  %v10631_v35 = vld [vmem:[%s14751_s0 + $0x50] sm:$0xff] }
  0x21   :  { %77 = vst [vmem:[#allocation2 + $0x39] sm:$0x1] %v10463_v0  ;;  %78 = vst [vmem:[#allocation2 + $0x49] sm:$0x1] %v10463_v0  ;;  %1371 = vmatpush1.bf16.msra.mxu0 %v10109_v8  ;;  %v175_v16 = vpack.c.bf16 %v10577_v14, %v159_v15  ;;  %v10118_v17 = vld [vmem:[#allocation7 + $0x60] ss:$8 sps:$4 sm:$0xff]  }
  0x22   :  { %79 = vst [vmem:[#allocation2 + $0x59] sm:$0x1] %v10463_v0  ;;  %80 = vst [vmem:[#allocation2 + $0x69] sm:$0x1] %v10463_v0  ;;  %1372 = vmatprep.subr.bf16.mxu0 %v10110_v9  ;;  %v10119_v18 = vld [vmem:[#allocation7 + $0x74] ss:$8 sps:$4 sm:$0xff]  }
  0x23   :  { %81 = vst [vmem:[#allocation2 + $0x79] sm:$0x1] %v10463_v0  ;;  %82 = vst [vmem:[#allocation2 + $0x89] sm:$0x1] %v10463_v0  ;;  %1396 = vmatprep.mubr.bf16.mxu0 %v175_v16  ;;  %v10121_v21 = vld [vmem:[#allocation7 + $0x70] ss:$8 sps:$4 sm:$0xff]  }
  0x24   :  { %85 = vst [vmem:[#allocation2 + $0xb9] sm:$0x1] %v10463_v0  ;;  %86 = vst [vmem:[#allocation2 + $0xc9] sm:$0x1] %v10463_v0  ;;  %v10122_v22 = vld [vmem:[#allocation7 + $0x84] ss:$8 sps:$4 sm:$0xff]  }
  0x25   :  { %87 = vst [vmem:[#allocation2 + $0xd9] sm:$0x1] %v10463_v0  ;;  %88 = vst [vmem:[#allocation2 + $0xe9] sm:$0x1] %v10463_v0  ;;  %1373 = vmatpush1.bf16.msra.mxu0 %v10112_v10  ;;  %v10601_v24 = vld [vmem:[%s14751_s0 + $0x20] sm:$0xff]  ;;  %v10608_v27 = vld [vmem:[%s14751_s0 + $0x28] sm:$0xff] }
  0x26   :  { %89 = vst [vmem:[#allocation2 + $0xf9] sm:$0x1] %v10463_v0  ;;  %90 = vst [vmem:[#allocation2 + $0x109] sm:$0x1] %v10463_v0  ;;  %1374 = vmatprep.subr.bf16.mxu0 %v10113_v11  ;;  %v10124_v25 = vld [vmem:[#allocation7 + $0x80] ss:$8 sps:$4 sm:$0xff]   ;;  %v10685_v1 = vpack.c.bf16 %v10601_v24, %v10596_v23  ;;  %v10707_v11 = vpack.c.bf16 %v10613_v28, %v10608_v27 }
  0x27   :  { %91 = vst [vmem:[#allocation2 + $0x119] sm:$0x1] %v10463_v0  ;;  %92 = vst [vmem:[#allocation2 + $0x129] sm:$0x1] %v10463_v0  ;;  %v10125_v26 = vld [vmem:[#allocation7 + $0x94] ss:$8 sps:$4 sm:$0xff]  }
  0x28   :  { %74 = vst [vmem:[#allocation2 + $0x9] sm:$0x1] %v10463_v0  ;;  %54 = vst [vmem:[#allocation2] sm:$0x1] %v10463_v0  ;;  %v10127_v29 = vld [vmem:[#allocation7 + $0x90] ss:$8 sps:$4 sm:$0xff]  }
  0x29   :  { %63 = vst [vmem:[#allocation2 + $0x90] sm:$0x1] %v10463_v0  ;;  %64 = vst [vmem:[#allocation2 + $0xa0] sm:$0x1] %v10463_v0  ;;  %1375 = vmatpush1.bf16.msra.mxu0 %v10115_v12  ;;  %v10128_v30 = vld [vmem:[#allocation7 + $0xa4] ss:$8 sps:$4 sm:$0xff]   ;;  %v273_v12 = vpack.c.bf16 %v10608_v27, %v10601_v24 }
  0x2a   :  { %73 = vst [vmem:[#allocation2 + $0x130] sm:$0x1] %v10463_v0  ;;  %83 = vst [vmem:[#allocation2 + $0x99] sm:$0x1] %v10463_v0  ;;  %1376 = vmatprep.subr.bf16.mxu0 %v10116_v13  ;;  %v10620_v31 = vld [vmem:[%s14751_s0 + $0x40] sm:$0xff]  ;;  %v10626_v34 = vld [vmem:[%s14751_s0 + $0x48] sm:$0xff] }
  0x2b   :  { %84 = vst [vmem:[#allocation2 + $0xa9] sm:$0x1] %v10463_v0  ;;  %93 = vst [vmem:[#allocation2 + $0x139] sm:$0x1] %v10463_v0  ;;  %v10130_v32 = vld [vmem:[#allocation7 + $0xa0] ss:$8 sps:$4 sm:$0xff]  }
  0x2c   :  { %111 = vst [vmem:[#allocation2 + $0x11] sm:$0xff] %v10577_v14  ;;  %112 = vst [vmem:[#allocation2 + $0x21] sm:$0xff] %v10584_v19  ;;  %v10131_v33 = vld [vmem:[#allocation7 + $0xb4] ss:$8 sps:$4 sm:$0xff]   ;;  %v10133_v36 = vld [vmem:[#allocation7 + $0xb0] ss:$8 sps:$4 sm:$0xff]  }
  0x2d   :  { %113 = vst [vmem:[#allocation2 + $0x31] sm:$0xff] %v10589_v20  ;;  %1377 = vmatpush1.bf16.msra.mxu0 %v10118_v17  ;;  %114 = vst [vmem:[#allocation2 + $0x41] sm:$0xff] %v10596_v23  ;;  %v10134_v37 = vld [vmem:[#allocation7 + $0xc4] ss:$8 sps:$4 sm:$0xff]   ;;  %v10638_v38 = vld [vmem:[%s14751_s0 + $0x58] sm:$0xff]  ;;  %vm1929_vm0 = vcmask 523264  }
  0x2e   :  { %1378 = vmatprep.subr.bf16.mxu0 %v10119_v18  ;;  %115 = vst [vmem:[#allocation2 + $0x51] sm:$0xff] %v10601_v24  ;;  %116 = vst [vmem:[#allocation2 + $0x61] sm:$0xff] %v10608_v27  ;;  %v10643_v39 = vld [vmem:[%s14751_s0 + $0x60] sm:$0xff]  ;;  %v10137_v41 = vld [vmem:[#allocation7 + $0xd4] ss:$8 sps:$4 sm:$0xff]   ;;  %vm1944_vm1 = vcmask 516096  }
  0x2f   :  { %117 = vst [vmem:[#allocation2 + $0x71] sm:$0xff] %v10613_v28  ;;  %119 = vst [vmem:[#allocation2 + $0xb1] sm:$0xff] %v10620_v31  ;;  %v10136_v40 = vld [vmem:[#allocation7 + $0xc0] ss:$8 sps:$4 sm:$0xff]   ;;  %v10655_v43 = vld [vmem:[%s14751_s0 + $0x70] sm:$0xff]  ;;  %vm1932_vm2 = vcmask 517120  }
  0x30   :  { %120 = vst [vmem:[#allocation2 + $0xc1] sm:$0xff] %v10626_v34  ;;  %121 = vst [vmem:[#allocation2 + $0xd1] sm:$0xff] %v10631_v35  ;;  %v10650_v42 = vld [vmem:[%s14751_s0 + $0x68] sm:$0xff]  ;;  %v10139_v44 = vld [vmem:[#allocation7 + $0xd0] ss:$8 sps:$4 sm:$0xff]   ;;  %s10465_s9 = smov 64  }
  0x31   :  { %1379 = vmatpush1.bf16.msra.mxu0 %v10121_v21  ;;  %122 = vst [vmem:[#allocation2 + $0xe1] sm:$0xff] %v10638_v38  ;;  %123 = vst [vmem:[#allocation2 + $0xf1] sm:$0xff] %v10643_v39  ;;  %v10140_v45 = vld [vmem:[#allocation7 + $0xe4] ss:$8 sps:$4 sm:$0xff]   ;;  %v10142_v46 = vld [vmem:[#allocation7 + $0xe0] ss:$8 sps:$4 sm:$0xff]  }
  0x32   :  { %1380 = vmatprep.subr.bf16.mxu0 %v10122_v22  ;;  %124 = vst [vmem:[#allocation2 + $0x101] sm:$0xff] %v10650_v42  ;;  %125 = vst [vmem:[#allocation2 + $0x111] sm:$0xff] %v10655_v43  ;;  %v10143_v47 = vld [vmem:[#allocation7 + $0xf4] ss:$8 sps:$4 sm:$0xff]   ;;  %v10145_v48 = vld [vmem:[#allocation7 + $0xf0] ss:$8 sps:$4 sm:$0xff]  }
  0x33   :  { %v127_v49 = vld [vmem:[#allocation2] sm:$0xff]  ;;  %v10659_v50 = vld [vmem:[#allocation2 + $0x10] sm:$0xff]  ;;  %v10669_v55 = vld [vmem:[%s14751_s0 + $0x38] sm:$0xff]  ;;  %2293 = vst.msk [vmem:[#allocation4 + $0x78] sm:$0x1] %vm1944_vm1, %v10463_v0  ;;  %vm2841_vm3 = vcmask 1048064  }
  0x34   :  { %v10148_v51 = vld [vmem:[#allocation7 + $0x104] ss:$8 sps:$4 sm:$0xff]   ;;  %v143_v52 = vpack.c.bf16 %v10659_v50, %v127_v49  ;;  %v10146_v53 = vld [vmem:[#allocation7 + $0x100] ss:$8 sps:$4 sm:$0xff]   ;;  %v10151_v57 = vld [vmem:[#allocation7 + $0x114] ss:$8 sps:$4 sm:$0xff]  }
  0x35   :  { %1381 = vmatpush1.bf16.msra.mxu0 %v10124_v25  ;;  %118 = vst [vmem:[#allocation2 + $0x81] sm:$0xff] %v10669_v55  ;;  %v10149_v58 = vld [vmem:[#allocation7 + $0x110] ss:$8 sps:$4 sm:$0xff]   ;;  %v10675_v59 = vld [vmem:[#allocation2 + $0x20] sm:$0xff]  ;;  %v10157_v3 = vld [vmem:[#allocation7 + $0x134] ss:$8 sps:$4 sm:$0xff]  }
  0x36   :  { %1382 = vmatprep.subr.bf16.mxu0 %v10125_v26  ;;  %v10677_v60 = vld [vmem:[#allocation2 + $0x30] sm:$0xff]  ;;  %v10154_v61 = vld [vmem:[#allocation7 + $0x124] ss:$8 sps:$4 sm:$0xff]   ;;  %v10152_v63 = vld [vmem:[#allocation7 + $0x120] ss:$8 sps:$4 sm:$0xff]   ;;  %1930 = vst.msk [vmem:[#allocation3] sm:$0xff] %vm1929_vm0, %v10463_v0 }
  0x37   :  { %v10681_v62 = vpack.c.bf16 %v10677_v60, %v10675_v59  ;;  %v10155_v4 = vld [vmem:[#allocation7 + $0x130] ss:$8 sps:$4 sm:$0xff]   ;;  %v10691_v5 = vld [vmem:[#allocation2 + $0x40] sm:$0xff]  ;;  %v10163_v13 = vld [vmem:[#allocation7 + $0x154] ss:$8 sps:$4 sm:$0xff]   ;;  %1931 = vst.msk [vmem:[#allocation3 + $0x8] sm:$0xff] %vm1929_vm0, %v10463_v0 }
  0x38   :  { %v10693_v6 = vld [vmem:[#allocation2 + $0x50] sm:$0xff]  ;;  %v10160_v7 = vld [vmem:[#allocation7 + $0x144] ss:$8 sps:$4 sm:$0xff]   ;;  %v10698_v8 = vld [vmem:[%s14751_s0 + $0x78] sm:$0xff]  ;;  %1934 = vst.msk [vmem:[#allocation3 + $0x1b0] sm:$0xff] %vm1929_vm0, %v10463_v0 }
  0x39   :  { %1383 = vmatpush1.bf16.msra.mxu0 %v10127_v29  ;;  %v10702_v9 = vpack.c.bf16 %v10693_v6, %v10691_v5  ;;  %126 = vst [vmem:[#allocation2 + $0x121] sm:$0xff] %v10698_v8  ;;  %v10158_v10 = vld [vmem:[#allocation7 + $0x140] ss:$8 sps:$4 sm:$0xff]   ;;  %v10161_v15 = vld [vmem:[#allocation7 + $0x150] ss:$8 sps:$4 sm:$0xff]   ;;  %1935 = vst.msk [vmem:[#allocation3 + $0x1b8] sm:$0xff] %vm1929_vm0, %v10463_v0 }
  0x3a   :  { %1384 = vmatprep.subr.bf16.mxu0 %v10128_v30  ;;  %v10713_v16 = vld [vmem:[#allocation2 + $0x60] sm:$0xff]  ;;  %v10715_v17 = vld [vmem:[#allocation2 + $0x70] sm:$0xff]  ;;  %1938 = vst.msk [vmem:[#allocation3 + $0x198] sm:$0xff] %vm1929_vm0, %v10463_v0  ;;  %1939 = vst.msk [vmem:[#allocation3 + $0x1a0] sm:$0xff] %vm1929_vm0, %v10463_v0 }
  0x3b   :  { %v10166_v18 = vld [vmem:[#allocation7 + $0x164] ss:$8 sps:$4 sm:$0xff]   ;;  %v10719_v22 = vpack.c.bf16 %v10715_v17, %v10713_v16  ;;  %v10164_v25 = vld [vmem:[#allocation7 + $0x160] ss:$8 sps:$4 sm:$0xff]   ;;  %v10169_v28 = vld [vmem:[#allocation7 + $0x174] ss:$8 sps:$4 sm:$0xff]  }
  0x3c   :  { %v167_v21 = vld [vmem:[#allocation2 + $0xa1] sm:$0xff]  ;;  %v10167_v29 = vld [vmem:[#allocation7 + $0x170] ss:$8 sps:$4 sm:$0xff]   ;;  %1941 = vst.msk [vmem:[#allocation3 + $0x348] sm:$0xff] %vm1929_vm0, %v10463_v0  ;;  %1942 = vst.msk [vmem:[#allocation3 + $0x350] sm:$0xff] %vm1929_vm0, %v10463_v0 }
  0x3d   :  { %1385 = vmatpush1.bf16.msra.mxu0 %v10130_v32  ;;  %v179_v26 = vpack.c.bf16 %v10620_v31, %v167_v21  ;;  %v135_v30 = vld [vmem:[#allocation2 + $0xa0] sm:$0xff]  ;;  %v10723_v32 = vld [vmem:[#allocation2 + $0xb0] sm:$0xff]  ;;  %1946 = vst.msk [vmem:[#allocation3 + $0x18] sm:$0x1] %vm1944_vm1, %v10463_v0  ;;  %1947 = vst.msk [vmem:[#allocation3 + $0x30] sm:$0x1] %vm1944_vm1, %v10463_v0 }
  0x3e   :  { %1386 = vmatprep.subr.bf16.mxu0 %v10131_v33  ;;  %v10172_v33 = vld [vmem:[#allocation7 + $0x184] ss:$8 sps:$4 sm:$0xff]   ;;  %v10176_v49 = vld [vmem:[#allocation7 + $0x1a0] ss:$8 sps:$4 sm:$0xff]   ;;  %v10765_v21 = vld [vmem:[#allocation2 + $0x110] sm:$0xff]  ;;  %2275 = vst.msk [vmem:[#allocation4] sm:$0xff] %vm1929_vm0, %v10463_v0 }
  0x3f   :  { %v10256_v14 = vld [vmem:[#allocation7 + $0x344] ss:$8 sps:$4 sm:$0xff]   ;;  %v10257_v20 = vld [vmem:[#allocation7 + $0x350] ss:$8 sps:$4 sm:$0xff]   ;;  %v10266_v27 = vld [vmem:[#allocation7 + $0x380] ss:$8 sps:$4 sm:$0xff]  }
  0x40   :  { %v10865_v19 = vld [vmem:[#allocation2 + $0x82] sm:$0xff]  ;;  %1948 = vst.msk [vmem:[#allocation3 + $0x48] sm:$0x1] %vm1944_vm1, %v10463_v0  ;;  %1949 = vst.msk [vmem:[#allocation3 + $0x60] sm:$0x1] %vm1944_vm1, %v10463_v0 }
  0x41   :  { %1387 = vmatpush1.bf16.msra.mxu0 %v10133_v36  ;;  %v10170_v36 = vld [vmem:[#allocation7 + $0x180] ss:$8 sps:$4 sm:$0xff]   ;;  %v10262_v23 = vld [vmem:[#allocation7 + $0x364] ss:$8 sps:$4 sm:$0xff]   ;;  %1950 = vst.msk [vmem:[#allocation3 + $0x78] sm:$0x1] %vm1944_vm1, %v10463_v0 }
  0x42   :  { %1388 = vmatprep.subr.bf16.mxu0 %v10134_v37  ;;  %v147_v37 = vpack.c.bf16 %v10723_v32, %v135_v30  ;;  %v10774_v30 = vld [vmem:[#allocation2 + $0x12] sm:$0xff]  ;;  %v10268_v24 = vld [vmem:[#allocation7 + $0x384] ss:$8 sps:$4 sm:$0xff]   ;;  %1951 = vst.msk [vmem:[#allocation3 + $0x90] sm:$0x1] %vm1944_vm1, %v10463_v0 }
  0x43   :  { %1952 = vst.msk [vmem:[#allocation3 + $0xa8] sm:$0x1] %vm1944_vm1, %v10463_v0  ;;  %1953 = vst.msk [vmem:[#allocation3 + $0xc0] sm:$0x1] %vm1944_vm1, %v10463_v0 }
  0x44   :  { %1954 = vst.msk [vmem:[#allocation3 + $0xd8] sm:$0x1] %vm1944_vm1, %v10463_v0  ;;  %1955 = vst.msk [vmem:[#allocation3 + $0xf0] sm:$0x1] %vm1944_vm1, %v10463_v0 }
  0x45   :  { %1389 = vmatpush1.bf16.msra.mxu0 %v10136_v40  ;;  %v10728_v40 = vpack.c.bf16 %v10631_v35, %v10626_v34  ;;  %1956 = vst.msk [vmem:[#allocation3 + $0x108] sm:$0x1] %vm1944_vm1, %v10463_v0  ;;  %1957 = vst.msk [vmem:[#allocation3 + $0x120] sm:$0x1] %vm1944_vm1, %v10463_v0 }
  0x46   :  { %1390 = vmatprep.subr.bf16.mxu0 %v10137_v41  ;;  %v275_v41 = vpack.c.bf16 %v10626_v34, %v10620_v31  ;;  %v10280_v31 = vld [vmem:[#allocation7 + $0x3c4] ss:$8 sps:$4 sm:$0xff]   ;;  %1958 = vst.msk [vmem:[#allocation3 + $0x138] sm:$0x1] %vm1944_vm1, %v10463_v0  ;;  %1959 = vst.msk [vmem:[#allocation3 + $0x150] sm:$0x1] %vm1944_vm1, %v10463_v0 }
  0x47   :  { %v10885_v34 = vld [vmem:[#allocation2 + $0x122] sm:$0xff]  ;;  %1960 = vst.msk [vmem:[#allocation3 + $0x168] sm:$0x1] %vm1944_vm1, %v10463_v0  ;;  %1961 = vst.msk [vmem:[#allocation3 + $0x180] sm:$0x1] %vm1944_vm1, %v10463_v0 }
  0x48   :  { %1964 = vst.msk [vmem:[#allocation3 + $0x1c8] sm:$0x1] %vm1944_vm1, %v10463_v0  ;;  %1965 = vst.msk [vmem:[#allocation3 + $0x1e0] sm:$0x1] %vm1944_vm1, %v10463_v0 }
  0x49   :  { %1391 = vmatpush1.bf16.msra.mxu0 %v10139_v44  ;;  %v10175_v44 = vld [vmem:[#allocation7 + $0x194] ss:$8 sps:$4 sm:$0xff]   ;;  %1966 = vst.msk [vmem:[#allocation3 + $0x1f8] sm:$0x1] %vm1944_vm1, %v10463_v0  ;;  %1967 = vst.msk [vmem:[#allocation3 + $0x210] sm:$0x1] %vm1944_vm1, %v10463_v0 }
  0x4a   :  { %1392 = vmatprep.subr.bf16.mxu0 %v10140_v45  ;;  %v10173_v45 = vld [vmem:[#allocation7 + $0x190] ss:$8 sps:$4 sm:$0xff]   ;;  %1968 = vst.msk [vmem:[#allocation3 + $0x228] sm:$0x1] %vm1944_vm1, %v10463_v0  ;;  %1969 = vst.msk [vmem:[#allocation3 + $0x240] sm:$0x1] %vm1944_vm1, %v10463_v0 }
  0x4b   :  { %1970 = vst.msk [vmem:[#allocation3 + $0x258] sm:$0x1] %vm1944_vm1, %v10463_v0  ;;  %1971 = vst.msk [vmem:[#allocation3 + $0x270] sm:$0x1] %vm1944_vm1, %v10463_v0 }
  0x4c   :  { %1972 = vst.msk [vmem:[#allocation3 + $0x288] sm:$0x1] %vm1944_vm1, %v10463_v0  ;;  %1973 = vst.msk [vmem:[#allocation3 + $0x2a0] sm:$0x1] %vm1944_vm1, %v10463_v0 }
  0x4d   :  { %1393 = vmatpush1.bf16.msra.mxu0 %v10142_v46  ;;  %v10178_v46 = vld [vmem:[#allocation7 + $0x1a4] ss:$8 sps:$4 sm:$0xff]   ;;  %1974 = vst.msk [vmem:[#allocation3 + $0x2b8] sm:$0x1] %vm1944_vm1, %v10463_v0  ;;  %1975 = vst.msk [vmem:[#allocation3 + $0x2d0] sm:$0x1] %vm1944_vm1, %v10463_v0 }
  0x4e   :  { %1394 = vmatprep.subr.bf16.mxu0 %v10143_v47  ;;  %v10733_v47 = vld [vmem:[#allocation2 + $0xc0] sm:$0xff]  ;;  %1976 = vst.msk [vmem:[#allocation3 + $0x2e8] sm:$0x1] %vm1944_vm1, %v10463_v0  ;;  %1977 = vst.msk [vmem:[#allocation3 + $0x300] sm:$0x1] %vm1944_vm1, %v10463_v0 }
  0x4f   :  { %1978 = vst.msk [vmem:[#allocation3 + $0x318] sm:$0x1] %vm1944_vm1, %v10463_v0  ;;  %1979 = vst.msk [vmem:[#allocation3 + $0x330] sm:$0x1] %vm1944_vm1, %v10463_v0 }
  0x50   :  { %1982 = vst.msk [vmem:[#allocation3 + $0x29] sm:$0x1] %vm1944_vm1, %v10463_v0  ;;  %1983 = vst.msk [vmem:[#allocation3 + $0x41] sm:$0x1] %vm1944_vm1, %v10463_v0 }
  0x51   :  { %1395 = vmatpush1.bf16.msra.mxu0 %v10145_v48  ;;  %v10735_v48 = vld [vmem:[#allocation2 + $0xd0] sm:$0xff]  ;;  %1984 = vst.msk [vmem:[#allocation3 + $0x59] sm:$0x1] %vm1944_vm1, %v10463_v0  ;;  %1985 = vst.msk [vmem:[#allocation3 + $0x71] sm:$0x1] %vm1944_vm1, %v10463_v0 }
  0x52   :  { %1477 = vmatprep.subr.bf16.mxu0 %v10148_v51  ;;  %v10739_v51 = vpack.c.bf16 %v10735_v48, %v10733_v47  ;;  %1986 = vst.msk [vmem:[#allocation3 + $0x89] sm:$0x1] %vm1944_vm1, %v10463_v0  ;;  %1987 = vst.msk [vmem:[#allocation3 + $0xa1] sm:$0x1] %vm1944_vm1, %v10463_v0 }
  0x53   :  { %1988 = vst.msk [vmem:[#allocation3 + $0xb9] sm:$0x1] %vm1944_vm1, %v10463_v0  ;;  %1989 = vst.msk [vmem:[#allocation3 + $0xd1] sm:$0x1] %vm1944_vm1, %v10463_v0 }
  0x54   :  { %1397 = vmatmul.mubr.bf16.vlgmr.msra.gmra.mrb[0].mxu0 %v143_v52  ;;  %v10743_v52 = vpack.c.bf16 %v10643_v39, %v10638_v38  ;;  %1990 = vst.msk [vmem:[#allocation3 + $0xe9] sm:$0x1] %vm1944_vm1, %v10463_v0  ;;  %1991 = vst.msk [vmem:[#allocation3 + $0x101] sm:$0x1] %vm1944_vm1, %v10463_v0 }
  0x55   :  { %1478 = vmatpush1.bf16.msra.mxu0 %v10146_v53  ;;  %1406 = vmatprep.mubr.bf16.mxu0 %v10664_v54  ;;  %v276_v53 = vpack.c.bf16 %v10638_v38, %v10631_v35  ;;  %v10281_v35 = vld [vmem:[#allocation7 + $0x3d0] ss:$8 sps:$4 sm:$0xff]   ;;  %v10286_v38 = vld [vmem:[#allocation7 + $0x3e4] ss:$8 sps:$4 sm:$0xff]   ;;  %1992 = vst.msk [vmem:[#allocation3 + $0x119] sm:$0x1] %vm1944_vm1, %v10463_v0 }
  0x56   :  { %1479 = vmatprep.subr.bf16.mxu0 %v10151_v57  ;;  %v10181_v57 = vld [vmem:[#allocation7 + $0x1b4] ss:$8 sps:$4 sm:$0xff]   ;;  %1993 = vst.msk [vmem:[#allocation3 + $0x131] sm:$0x1] %vm1944_vm1, %v10463_v0  ;;  %1994 = vst.msk [vmem:[#allocation3 + $0x149] sm:$0x1] %vm1944_vm1, %v10463_v0 }
  0x57   :  { %1995 = vst.msk [vmem:[#allocation3 + $0x161] sm:$0x1] %vm1944_vm1, %v10463_v0  ;;  %1996 = vst.msk [vmem:[#allocation3 + $0x179] sm:$0x1] %vm1944_vm1, %v10463_v0 }
  0x58   :  { %1997 = vst.msk [vmem:[#allocation3 + $0x191] sm:$0x1] %vm1944_vm1, %v10463_v0  ;;  %2000 = vst.msk [vmem:[#allocation3 + $0x1d9] sm:$0x1] %vm1944_vm1, %v10463_v0 }
  0x59   :  { %1480 = vmatpush1.bf16.msra.mxu0 %v10149_v58  ;;  %v10179_v58 = vld [vmem:[#allocation7 + $0x1b0] ss:$8 sps:$4 sm:$0xff]   ;;  %2001 = vst.msk [vmem:[#allocation3 + $0x1f1] sm:$0x1] %vm1944_vm1, %v10463_v0  ;;  %2002 = vst.msk [vmem:[#allocation3 + $0x209] sm:$0x1] %vm1944_vm1, %v10463_v0 }
  0x5a   :  { %1481 = vmatprep.subr.bf16.mxu0 %v10154_v61  ;;  %v10184_v61 = vld [vmem:[#allocation7 + $0x1c4] ss:$8 sps:$4 sm:$0xff]   ;;  %2003 = vst.msk [vmem:[#allocation3 + $0x221] sm:$0x1] %vm1944_vm1, %v10463_v0  ;;  %2004 = vst.msk [vmem:[#allocation3 + $0x239] sm:$0x1] %vm1944_vm1, %v10463_v0 }
  0x5b   :  { %2005 = vst.msk [vmem:[#allocation3 + $0x251] sm:$0x1] %vm1944_vm1, %v10463_v0  ;;  %2006 = vst.msk [vmem:[#allocation3 + $0x269] sm:$0x1] %vm1944_vm1, %v10463_v0 }
  0x5c   :  { %1407 = vmatmul.mubr.bf16.gmra.mrb[4].mxu0 %v10681_v62  ;;  %2007 = vst.msk [vmem:[#allocation3 + $0x281] sm:$0x1] %vm1944_vm1, %v10463_v0  ;;  %2008 = vst.msk [vmem:[#allocation3 + $0x299] sm:$0x1] %vm1944_vm1, %v10463_v0 }
  0x5d   :  { %1482 = vmatpush1.bf16.msra.mxu0 %v10152_v63  ;;  %1416 = vmatprep.mubr.bf16.mxu0 %v10685_v1  ;;  %v10749_v63 = vld [vmem:[#allocation2 + $0xe0] sm:$0xff]  ;;  %2009 = vst.msk [vmem:[#allocation3 + $0x2b1] sm:$0x1] %vm1944_vm1, %v10463_v0  ;;  %2010 = vst.msk [vmem:[#allocation3 + $0x2c9] sm:$0x1] %vm1944_vm1, %v10463_v0 }
  0x5e   :  { %1483 = vmatprep.subr.bf16.mxu0 %v10157_v3  ;;  %v10751_v3 = vld [vmem:[#allocation2 + $0xf0] sm:$0xff]  ;;  %2011 = vst.msk [vmem:[#allocation3 + $0x2e1] sm:$0x1] %vm1944_vm1, %v10463_v0  ;;  %2012 = vst.msk [vmem:[#allocation3 + $0x2f9] sm:$0x1] %vm1944_vm1, %v10463_v0 }
  0x5f   :  { %v10755_v39 = vpack.c.bf16 %v10751_v3, %v10749_v63  ;;  %2013 = vst.msk [vmem:[#allocation3 + $0x311] sm:$0x1] %vm1944_vm1, %v10463_v0  ;;  %2014 = vst.msk [vmem:[#allocation3 + $0x329] sm:$0x1] %vm1944_vm1, %v10463_v0 }
  0x60   :  { %2015 = vst.msk [vmem:[#allocation3 + $0x341] sm:$0x1] %vm1944_vm1, %v10463_v0  ;;  %2289 = vst.msk [vmem:[#allocation4 + $0x18] sm:$0x1] %vm1944_vm1, %v10463_v0 }
  0x61   :  { %1484 = vmatpush1.bf16.msra.mxu0 %v10155_v4  ;;  %v10182_v4 = vld [vmem:[#allocation7 + $0x1c0] ss:$8 sps:$4 sm:$0xff]   ;;  %2276 = vst.msk [vmem:[#allocation4 + $0x8] sm:$0xff] %vm1929_vm0, %v10463_v0  ;;  %2278 = vst.msk [vmem:[#allocation4 + $0x1b0] sm:$0xff] %vm1929_vm0, %v10463_v0 }
  0x62   :  { %1485 = vmatprep.subr.bf16.mxu0 %v10160_v7  ;;  %v10759_v7 = vpack.c.bf16 %v10655_v43, %v10650_v42  ;;  %v10188_v42 = vld [vmem:[#allocation7 + $0x1e0] ss:$8 sps:$4 sm:$0xff]   ;;  %v239_v43 = vpack.c.bf16 %v10675_v59, %v10659_v50  ;;  %v240_v50 = vpack.c.bf16 %v10691_v5, %v10677_v60  ;;  %v10197_v59 = vld [vmem:[#allocation7 + $0x210] ss:$8 sps:$4 sm:$0xff]   ;;  %v241_v60 = vpack.c.bf16 %v10713_v16, %v10693_v6  ;;  %v10211_v6 = vld [vmem:[#allocation7 + $0x254] ss:$8 sps:$4 sm:$0xff]  }
  0x63   :  { %v10203_v5 = vld [vmem:[#allocation7 + $0x230] ss:$8 sps:$4 sm:$0xff]   ;;  %2279 = vst.msk [vmem:[#allocation4 + $0x1b8] sm:$0xff] %vm1929_vm0, %v10463_v0  ;;  %2282 = vst.msk [vmem:[#allocation4 + $0x198] sm:$0xff] %vm1929_vm0, %v10463_v0 }
  0x64   :  { %1417 = vmatmul.mubr.bf16.gmra.mrb[8].mxu0 %v10702_v9  ;;  %2283 = vst.msk [vmem:[#allocation4 + $0x1a0] sm:$0xff] %vm1929_vm0, %v10463_v0  ;;  %2285 = vst.msk [vmem:[#allocation4 + $0x348] sm:$0xff] %vm1929_vm0, %v10463_v0 }
  0x65   :  { %1486 = vmatpush1.bf16.msra.mxu0 %v10158_v10  ;;  %1426 = vmatprep.mubr.bf16.mxu0 %v10707_v11  ;;  %v10187_v10 = vld [vmem:[#allocation7 + $0x1d4] ss:$8 sps:$4 sm:$0xff]   ;;  %2286 = vst.msk [vmem:[#allocation4 + $0x350] sm:$0xff] %vm1929_vm0, %v10463_v0 }
  0x66   :  { %1487 = vmatprep.subr.bf16.mxu0 %v10163_v13  ;;  %v10185_v13 = vld [vmem:[#allocation7 + $0x1d0] ss:$8 sps:$4 sm:$0xff]   ;;  %2290 = vst.msk [vmem:[#allocation4 + $0x30] sm:$0x1] %vm1944_vm1, %v10463_v0  ;;  %2291 = vst.msk [vmem:[#allocation4 + $0x48] sm:$0x1] %vm1944_vm1, %v10463_v0 }
  0x67   :  { %2292 = vst.msk [vmem:[#allocation4 + $0x60] sm:$0x1] %vm1944_vm1, %v10463_v0  ;;  %2294 = vst.msk [vmem:[#allocation4 + $0x90] sm:$0x1] %vm1944_vm1, %v10463_v0 }
  0x68   :  { %2295 = vst.msk [vmem:[#allocation4 + $0xa8] sm:$0x1] %vm1944_vm1, %v10463_v0  ;;  %2296 = vst.msk [vmem:[#allocation4 + $0xc0] sm:$0x1] %vm1944_vm1, %v10463_v0 }
  0x69   :  { %1488 = vmatpush1.bf16.msra.mxu0 %v10161_v15  ;;  %v10190_v15 = vld [vmem:[#allocation7 + $0x1e4] ss:$8 sps:$4 sm:$0xff]   ;;  %2297 = vst.msk [vmem:[#allocation4 + $0xd8] sm:$0x1] %vm1944_vm1, %v10463_v0  ;;  %2298 = vst.msk [vmem:[#allocation4 + $0xf0] sm:$0x1] %vm1944_vm1, %v10463_v0 }
  0x6a   :  { %1489 = vmatprep.subr.bf16.mxu0 %v10166_v18  ;;  %v10763_v18 = vld [vmem:[#allocation2 + $0x100] sm:$0xff]  ;;  %2299 = vst.msk [vmem:[#allocation4 + $0x108] sm:$0x1] %vm1944_vm1, %v10463_v0  ;;  %2300 = vst.msk [vmem:[#allocation4 + $0x120] sm:$0x1] %vm1944_vm1, %v10463_v0 }
  0x6b   :  { %2301 = vst.msk [vmem:[#allocation4 + $0x138] sm:$0x1] %vm1944_vm1, %v10463_v0  ;;  %2302 = vst.msk [vmem:[#allocation4 + $0x150] sm:$0x1] %vm1944_vm1, %v10463_v0 }
  0x6c   :  { %1427 = vmatmul.mubr.bf16.gmra.mrb[12].mxu0 %v10719_v22  ;;  %2303 = vst.msk [vmem:[#allocation4 + $0x168] sm:$0x1] %vm1944_vm1, %v10463_v0  ;;  %2304 = vst.msk [vmem:[#allocation4 + $0x180] sm:$0x1] %vm1944_vm1, %v10463_v0 }
  0x6d   :  { %1490 = vmatpush1.bf16.msra.mxu0 %v10164_v25  ;;  %1436 = vmatprep.mubr.bf16.mxu0 %v179_v26  ;;  %v10769_v25 = vpack.c.bf16 %v10765_v21, %v10763_v18  ;;  %v10193_v26 = vld [vmem:[#allocation7 + $0x1f4] ss:$8 sps:$4 sm:$0xff]   ;;  %2307 = vst.msk [vmem:[#allocation4 + $0x1c8] sm:$0x1] %vm1944_vm1, %v10463_v0  ;;  %2308 = vst.msk [vmem:[#allocation4 + $0x1e0] sm:$0x1] %vm1944_vm1, %v10463_v0 }
  0x6e   :  { %1491 = vmatprep.subr.bf16.mxu0 %v10169_v28  ;;  %v10191_v28 = vld [vmem:[#allocation7 + $0x1f0] ss:$8 sps:$4 sm:$0xff]   ;;  %2309 = vst.msk [vmem:[#allocation4 + $0x1f8] sm:$0x1] %vm1944_vm1, %v10463_v0  ;;  %2310 = vst.msk [vmem:[#allocation4 + $0x210] sm:$0x1] %vm1944_vm1, %v10463_v0 }
  0x6f   :  { %2311 = vst.msk [vmem:[#allocation4 + $0x228] sm:$0x1] %vm1944_vm1, %v10463_v0  ;;  %2312 = vst.msk [vmem:[#allocation4 + $0x240] sm:$0x1] %vm1944_vm1, %v10463_v0 }
  0x70   :  { %2313 = vst.msk [vmem:[#allocation4 + $0x258] sm:$0x1] %vm1944_vm1, %v10463_v0  ;;  %2314 = vst.msk [vmem:[#allocation4 + $0x270] sm:$0x1] %vm1944_vm1, %v10463_v0 }
  0x71   :  { %1492 = vmatpush1.bf16.msra.mxu0 %v10167_v29  ;;  %v191_v29 = vld [vmem:[#allocation2 + $0x2] sm:$0xff]  ;;  %2315 = vst.msk [vmem:[#allocation4 + $0x288] sm:$0x1] %vm1944_vm1, %v10463_v0  ;;  %2316 = vst.msk [vmem:[#allocation4 + $0x2a0] sm:$0x1] %vm1944_vm1, %v10463_v0 }
  0x72   :  { %1493 = vmatprep.subr.bf16.mxu0 %v10172_v33  ;;  %v10196_v33 = vld [vmem:[#allocation7 + $0x204] ss:$8 sps:$4 sm:$0xff]   ;;  %2317 = vst.msk [vmem:[#allocation4 + $0x2b8] sm:$0x1] %vm1944_vm1, %v10463_v0  ;;  %2318 = vst.msk [vmem:[#allocation4 + $0x2d0] sm:$0x1] %vm1944_vm1, %v10463_v0 }
  0x73   :  { %2319 = vst.msk [vmem:[#allocation4 + $0x2e8] sm:$0x1] %vm1944_vm1, %v10463_v0  ;;  %2320 = vst.msk [vmem:[#allocation4 + $0x300] sm:$0x1] %vm1944_vm1, %v10463_v0 }
  0x74   :  { %1437 = vmatmul.mubr.bf16.gmra.mrb[16].mxu0 %v147_v37  ;;  %v207_v37 = vpack.c.bf16 %v10774_v30, %v191_v29  ;;  %v10805_v29 = vld [vmem:[#allocation2 + $0x72] sm:$0xff]  ;;  %2321 = vst.msk [vmem:[#allocation4 + $0x318] sm:$0x1] %vm1944_vm1, %v10463_v0  ;;  %2322 = vst.msk [vmem:[#allocation4 + $0x330] sm:$0x1] %vm1944_vm1, %v10463_v0 }
  0x75   :  { %1494 = vmatpush1.bf16.msra.mxu0 %v10170_v36  ;;  %1446 = vmatprep.mubr.bf16.mxu0 %v10728_v40  ;;  %v10194_v36 = vld [vmem:[#allocation7 + $0x200] ss:$8 sps:$4 sm:$0xff]   ;;  %2325 = vst.msk [vmem:[#allocation4 + $0x29] sm:$0x1] %vm1944_vm1, %v10463_v0  ;;  %2326 = vst.msk [vmem:[#allocation4 + $0x41] sm:$0x1] %vm1944_vm1, %v10463_v0 }
  0x76   :  { %1495 = vmatprep.subr.bf16.mxu0 %v10175_v44  ;;  %v10199_v44 = vld [vmem:[#allocation7 + $0x214] ss:$8 sps:$4 sm:$0xff]   ;;  %2327 = vst.msk [vmem:[#allocation4 + $0x59] sm:$0x1] %vm1944_vm1, %v10463_v0  ;;  %2328 = vst.msk [vmem:[#allocation4 + $0x71] sm:$0x1] %vm1944_vm1, %v10463_v0 }
  0x77   :  { %2329 = vst.msk [vmem:[#allocation4 + $0x89] sm:$0x1] %vm1944_vm1, %v10463_v0  ;;  %2330 = vst.msk [vmem:[#allocation4 + $0xa1] sm:$0x1] %vm1944_vm1, %v10463_v0 }
  0x78   :  { %2331 = vst.msk [vmem:[#allocation4 + $0xb9] sm:$0x1] %vm1944_vm1, %v10463_v0  ;;  %2332 = vst.msk [vmem:[#allocation4 + $0xd1] sm:$0x1] %vm1944_vm1, %v10463_v0 }
  0x79   :  { %1496 = vmatpush1.bf16.msra.mxu0 %v10173_v45  ;;  %v10779_v45 = vld [vmem:[#allocation2 + $0x22] sm:$0xff]  ;;  %2333 = vst.msk [vmem:[#allocation4 + $0xe9] sm:$0x1] %vm1944_vm1, %v10463_v0  ;;  %2334 = vst.msk [vmem:[#allocation4 + $0x101] sm:$0x1] %vm1944_vm1, %v10463_v0 }
  0x7a   :  { %1497 = vmatprep.subr.bf16.mxu0 %v10178_v46  ;;  %v10781_v46 = vld [vmem:[#allocation2 + $0x32] sm:$0xff]  ;;  %2335 = vst.msk [vmem:[#allocation4 + $0x119] sm:$0x1] %vm1944_vm1, %v10463_v0  ;;  %2336 = vst.msk [vmem:[#allocation4 + $0x131] sm:$0x1] %vm1944_vm1, %v10463_v0 }
  0x7b   :  { %2337 = vst.msk [vmem:[#allocation4 + $0x149] sm:$0x1] %vm1944_vm1, %v10463_v0  ;;  %2338 = vst.msk [vmem:[#allocation4 + $0x161] sm:$0x1] %vm1944_vm1, %v10463_v0 }
  0x7c   :  { %1447 = vmatmul.mubr.bf16.gmra.mrb[20].mxu0 %v10739_v51  ;;  %2339 = vst.msk [vmem:[#allocation4 + $0x179] sm:$0x1] %vm1944_vm1, %v10463_v0  ;;  %2340 = vst.msk [vmem:[#allocation4 + $0x191] sm:$0x1] %vm1944_vm1, %v10463_v0 }
  0x7d   :  { %1498 = vmatpush1.bf16.msra.mxu0 %v10176_v49  ;;  %1456 = vmatprep.mubr.bf16.mxu0 %v10743_v52  ;;  %v10202_v49 = vld [vmem:[#allocation7 + $0x224] ss:$8 sps:$4 sm:$0xff]   ;;  %2343 = vst.msk [vmem:[#allocation4 + $0x1d9] sm:$0x1] %vm1944_vm1, %v10463_v0  ;;  %2344 = vst.msk [vmem:[#allocation4 + $0x1f1] sm:$0x1] %vm1944_vm1, %v10463_v0 }
  0x7e   :  { %1499 = vmatprep.subr.bf16.mxu0 %v10181_v57  ;;  %v10200_v57 = vld [vmem:[#allocation7 + $0x220] ss:$8 sps:$4 sm:$0xff]   ;;  %2345 = vst.msk [vmem:[#allocation4 + $0x209] sm:$0x1] %vm1944_vm1, %v10463_v0  ;;  %2346 = vst.msk [vmem:[#allocation4 + $0x221] sm:$0x1] %vm1944_vm1, %v10463_v0 }
  0x7f   :  { %2347 = vst.msk [vmem:[#allocation4 + $0x239] sm:$0x1] %vm1944_vm1, %v10463_v0  ;;  %2348 = vst.msk [vmem:[#allocation4 + $0x251] sm:$0x1] %vm1944_vm1, %v10463_v0 }
  0x80   :  { %2349 = vst.msk [vmem:[#allocation4 + $0x269] sm:$0x1] %vm1944_vm1, %v10463_v0  ;;  %2350 = vst.msk [vmem:[#allocation4 + $0x281] sm:$0x1] %vm1944_vm1, %v10463_v0 }
  0x81   :  { %1500 = vmatpush1.bf16.msra.mxu0 %v10179_v58  ;;  %v10785_v58 = vpack.c.bf16 %v10781_v46, %v10779_v45  ;;  %2351 = vst.msk [vmem:[#allocation4 + $0x299] sm:$0x1] %vm1944_vm1, %v10463_v0  ;;  %2352 = vst.msk [vmem:[#allocation4 + $0x2b1] sm:$0x1] %vm1944_vm1, %v10463_v0 }
  0x82   :  { %1501 = vmatprep.subr.bf16.mxu0 %v10184_v61  ;;  %v10205_v61 = vld [vmem:[#allocation7 + $0x234] ss:$8 sps:$4 sm:$0xff]   ;;  %2353 = vst.msk [vmem:[#allocation4 + $0x2c9] sm:$0x1] %vm1944_vm1, %v10463_v0  ;;  %2354 = vst.msk [vmem:[#allocation4 + $0x2e1] sm:$0x1] %vm1944_vm1, %v10463_v0 }
  0x83   :  { %2355 = vst.msk [vmem:[#allocation4 + $0x2f9] sm:$0x1] %vm1944_vm1, %v10463_v0  ;;  %2356 = vst.msk [vmem:[#allocation4 + $0x311] sm:$0x1] %vm1944_vm1, %v10463_v0 }
  0x84   :  { %1457 = vmatmul.mubr.bf16.gmra.mrb[24].mxu0 %v10755_v39  ;;  %2357 = vst.msk [vmem:[#allocation4 + $0x329] sm:$0x1] %vm1944_vm1, %v10463_v0  ;;  %2358 = vst.msk [vmem:[#allocation4 + $0x341] sm:$0x1] %vm1944_vm1, %v10463_v0 }
  0x85   :  { %1502 = vmatpush1.bf16.msra.mxu0 %v10182_v4  ;;  %1466 = vmatprep.mubr.bf16.mxu0 %v10759_v7  ;;  %v10789_v4 = vld [vmem:[#allocation2 + $0x42] sm:$0xff]  ;;  %1945 = vst.msk [vmem:[#allocation3] sm:$0x1] %vm1944_vm1, %v10463_v0  ;;  %1962 = vst.msk [vmem:[#allocation3 + $0x198] sm:$0x1] %vm1944_vm1, %v10463_v0 }
  0x86   :  { %1503 = vmatprep.subr.bf16.mxu0 %v10187_v10  ;;  %v10791_v10 = vld [vmem:[#allocation2 + $0x52] sm:$0xff]  ;;  %1963 = vst.msk [vmem:[#allocation3 + $0x1b0] sm:$0x1] %vm1944_vm1, %v10463_v0  ;;  %1980 = vst.msk [vmem:[#allocation3 + $0x348] sm:$0x1] %vm1944_vm1, %v10463_v0 }
  0x87   :  { %2288 = vst.msk [vmem:[#allocation4] sm:$0x1] %vm1944_vm1, %v10463_v0  ;;  %2305 = vst.msk [vmem:[#allocation4 + $0x198] sm:$0x1] %vm1944_vm1, %v10463_v0 }
  0x88   :  { %2306 = vst.msk [vmem:[#allocation4 + $0x1b0] sm:$0x1] %vm1944_vm1, %v10463_v0  ;;  %2323 = vst.msk [vmem:[#allocation4 + $0x348] sm:$0x1] %vm1944_vm1, %v10463_v0 }
  0x89   :  { %1504 = vmatpush1.bf16.msra.mxu0 %v10185_v13  ;;  %v10208_v13 = vld [vmem:[#allocation7 + $0x244] ss:$8 sps:$4 sm:$0xff]   ;;  %2280 = vst.msk [vmem:[#allocation4 + $0x1c0] sm:$0x3] %vm1932_vm2, %v10463_v0  ;;  %1933 = vst.msk [vmem:[#allocation3 + $0x10] sm:$0x3] %vm1932_vm2, %v10463_v0 }
  0x8a   :  { %1505 = vmatprep.subr.bf16.mxu0 %v10190_v15  ;;  %v10794_v15 = vld [vmem:[#allocation2 + $0x80] sm:$0xff]  ;;  %1936 = vst.msk [vmem:[#allocation3 + $0x1c0] sm:$0x3] %vm1932_vm2, %v10463_v0  ;;  %1940 = vst.msk [vmem:[#allocation3 + $0x1a8] sm:$0x3] %vm1932_vm2, %v10463_v0 }
  0x8b   :  { %v242_v16 = vpack.c.bf16 %v10794_v15, %v10715_v17  ;;  %v243_v17 = vpack.c.bf16 %v10733_v47, %v10723_v32  ;;  %v10223_v32 = vld [vmem:[#allocation7 + $0x294] ss:$8 sps:$4 sm:$0xff]   ;;  %v10221_v47 = vld [vmem:[#allocation7 + $0x290] ss:$8 sps:$4 sm:$0xff]   ;;  %1943 = vst.msk [vmem:[#allocation3 + $0x358] sm:$0x3] %vm1932_vm2, %v10463_v0 }
  0x8c   :  { %1467 = vmatmul.mubr.bf16.gmra.mrb[28].mxu0 %v10769_v25  ;;  %2277 = vst.msk [vmem:[#allocation4 + $0x10] sm:$0x3] %vm1932_vm2, %v10463_v0  ;;  %2284 = vst.msk [vmem:[#allocation4 + $0x1a8] sm:$0x3] %vm1932_vm2, %v10463_v0 }
  0x8d   :  { %1506 = vmatpush1.bf16.msra.mxu0 %v10188_v42  ;;  %1509 = vmatprep.mubr.bf16.mxu0 %v239_v43  ;;  %v10206_v42 = vld [vmem:[#allocation7 + $0x240] ss:$8 sps:$4 sm:$0xff]   ;;  %v10798_v43 = vpack.c.bf16 %v10791_v10, %v10789_v4  ;;  %2287 = vst.msk [vmem:[#allocation4 + $0x358] sm:$0x3] %vm1932_vm2, %v10463_v0 }
  0x8e   :  { %1507 = vmatprep.subr.bf16.mxu0 %v10193_v26  ;;  %v10209_v26 = vld [vmem:[#allocation7 + $0x250] ss:$8 sps:$4 sm:$0xff]   ;;  %2342 = vst.msk [vmem:[#allocation4 + $0x1c1] sm:$0x1] %vm1944_vm1, %v10463_v0  ;;  %1981 = vst.msk [vmem:[#allocation3 + $0x11] sm:$0x1] %vm1944_vm1, %v10463_v0 }
  0x8f   :  { %1998 = vst.msk [vmem:[#allocation3 + $0x1a9] sm:$0x1] %vm1944_vm1, %v10463_v0  ;;  %1999 = vst.msk [vmem:[#allocation3 + $0x1c1] sm:$0x1] %vm1944_vm1, %v10463_v0 }
  0x90   :  { %2016 = vst.msk [vmem:[#allocation3 + $0x359] sm:$0x1] %vm1944_vm1, %v10463_v0  ;;  %2324 = vst.msk [vmem:[#allocation4 + $0x11] sm:$0x1] %vm1944_vm1, %v10463_v0 }
  0x91   :  { %1508 = vmatpush1.bf16.msra.mxu0 %v10191_v28  ;;  %v10803_v28 = vld [vmem:[#allocation2 + $0x62] sm:$0xff]  ;;  %2341 = vst.msk [vmem:[#allocation4 + $0x1a9] sm:$0x1] %vm1944_vm1, %v10463_v0  ;;  %2359 = vst.msk [vmem:[#allocation4 + $0x359] sm:$0x1] %vm1944_vm1, %v10463_v0 }
  0x92   :  { %1590 = vmatprep.subr.bf16.mxu0 %v10196_v33  ;;  %v10214_v33 = vld [vmem:[#allocation7 + $0x264] ss:$8 sps:$4 sm:$0xff]  }
  0x93   :  { %v10315_v0 = vld [vmem:[%s14754_s3 + $0x88] sm:$0xff]  }
  0x94   :  { %1510 = vmatmul.mubr.bf16.vlgmr.msra.gmra.mrb[0].mxu0 %v207_v37  ;;  %v10809_v37 = vpack.c.bf16 %v10805_v29, %v10803_v28 }
  0x95   :  { %1591 = vmatpush1.bf16.msra.mxu0 %v10194_v36  ;;  %1519 = vmatprep.mubr.bf16.mxu0 %v240_v50  ;;  %v10212_v36 = vld [vmem:[#allocation7 + $0x260] ss:$8 sps:$4 sm:$0xff]   ;;  %v10215_v50 = vld [vmem:[#allocation7 + $0x270] ss:$8 sps:$4 sm:$0xff]  }
  0x96   :  { %1592 = vmatprep.subr.bf16.mxu0 %v10199_v44  ;;  %v10217_v44 = vld [vmem:[#allocation7 + $0x274] ss:$8 sps:$4 sm:$0xff]  }
  0x99   :  { %1593 = vmatpush1.bf16.msra.mxu0 %v10197_v59  ;;  %v199_v59 = vld [vmem:[#allocation2 + $0xa2] sm:$0xff] }
  0x9a   :  { %1594 = vmatprep.subr.bf16.mxu0 %v10202_v49  ;;  %v10814_v49 = vld [vmem:[#allocation2 + $0xb2] sm:$0xff] }
  0x9c   :  { %1520 = vmatmul.mubr.bf16.gmra.mrb[4].mxu0 %v10785_v58 }
  0x9d   :  { %1595 = vmatpush1.bf16.msra.mxu0 %v10200_v57  ;;  %1529 = vmatprep.mubr.bf16.mxu0 %v241_v60  ;;  %v10220_v57 = vld [vmem:[#allocation7 + $0x284] ss:$8 sps:$4 sm:$0xff]   ;;  %v211_v60 = vpack.c.bf16 %v10814_v49, %v199_v59 }
  0x9e   :  { %1596 = vmatprep.subr.bf16.mxu0 %v10205_v61  ;;  %v10218_v61 = vld [vmem:[#allocation7 + $0x280] ss:$8 sps:$4 sm:$0xff]  }
  0xa1   :  { %1597 = vmatpush1.bf16.msra.mxu0 %v10203_v5  ;;  %v244_v5 = vpack.c.bf16 %v10749_v63, %v10735_v48  ;;  %v245_v48 = vpack.c.bf16 %v10763_v18, %v10751_v3  ;;  %v10229_v63 = vld [vmem:[#allocation7 + $0x2b4] ss:$8 sps:$4 sm:$0xff]   ;;  %v10230_v3 = vld [vmem:[#allocation7 + $0x2c0] ss:$8 sps:$4 sm:$0xff]  }
  0xa2   :  { %1598 = vmatprep.subr.bf16.mxu0 %v10208_v13  ;;  %v10819_v13 = vld [vmem:[#allocation2 + $0xc2] sm:$0xff] }
  0xa4   :  { %1530 = vmatmul.mubr.bf16.gmra.mrb[8].mxu0 %v10798_v43 }
  0xa5   :  { %1599 = vmatpush1.bf16.msra.mxu0 %v10206_v42  ;;  %1539 = vmatprep.mubr.bf16.mxu0 %v242_v16  ;;  %v10821_v42 = vld [vmem:[#allocation2 + $0xd2] sm:$0xff] }
  0xa6   :  { %1600 = vmatprep.subr.bf16.mxu0 %v10211_v6  ;;  %v10226_v6 = vld [vmem:[#allocation7 + $0x2a4] ss:$8 sps:$4 sm:$0xff]   ;;  %v10825_v16 = vpack.c.bf16 %v10821_v42, %v10819_v13 }
  0xa9   :  { %1601 = vmatpush1.bf16.msra.mxu0 %v10209_v26  ;;  %v10224_v26 = vld [vmem:[#allocation7 + $0x2a0] ss:$8 sps:$4 sm:$0xff]  }
  0xaa   :  { %1602 = vmatprep.subr.bf16.mxu0 %v10214_v33  ;;  %v10227_v33 = vld [vmem:[#allocation7 + $0x2b0] ss:$8 sps:$4 sm:$0xff]  }
  0xac   :  { %1540 = vmatmul.mubr.bf16.gmra.mrb[12].mxu0 %v10809_v37 }
  0xad   :  { %1603 = vmatpush1.bf16.msra.mxu0 %v10212_v36  ;;  %1549 = vmatprep.mubr.bf16.mxu0 %v243_v17  ;;  %v10830_v36 = vld [vmem:[#allocation2 + $0xe2] sm:$0xff] }
  0xae   :  { %1604 = vmatprep.subr.bf16.mxu0 %v10217_v44  ;;  %v10832_v44 = vld [vmem:[#allocation2 + $0xf2] sm:$0xff]  ;;  %v10232_v17 = vld [vmem:[#allocation7 + $0x2c4] ss:$8 sps:$4 sm:$0xff]  }
  0xaf   :  { %v10838_v59 = vpack.c.bf16 %v10832_v44, %v10830_v36 }
  0xb1   :  { %1605 = vmatpush1.bf16.msra.mxu0 %v10215_v50  ;;  %v10834_v50 = vld [vmem:[#allocation2 + $0x120] sm:$0xff] }
  0xb2   :  { %1606 = vmatprep.subr.bf16.mxu0 %v10220_v57  ;;  %v246_v18 = vpack.c.bf16 %v10834_v50, %v10765_v21  ;;  %v10235_v57 = vld [vmem:[#allocation7 + $0x2d4] ss:$8 sps:$4 sm:$0xff]   ;;  %v303_v21 = vpack.c.bf16 %v10779_v45, %v10774_v30  ;;  %v10245_v30 = vld [vmem:[#allocation7 + $0x310] ss:$8 sps:$4 sm:$0xff]   ;;  %v10250_v45 = vld [vmem:[#allocation7 + $0x324] ss:$8 sps:$4 sm:$0xff]  }
  0xb4   :  { %1550 = vmatmul.mubr.bf16.gmra.mrb[16].mxu0 %v211_v60  ;;  %v10843_v60 = vld [vmem:[#allocation2 + $0x102] sm:$0xff] }
  0xb5   :  { %1607 = vmatpush1.bf16.msra.mxu0 %v10218_v61  ;;  %1559 = vmatprep.mubr.bf16.mxu0 %v244_v5  ;;  %v10233_v61 = vld [vmem:[#allocation7 + $0x2d0] ss:$8 sps:$4 sm:$0xff]  }
  0xb6   :  { %1608 = vmatprep.subr.bf16.mxu0 %v10223_v32  ;;  %v10845_v5 = vld [vmem:[#allocation2 + $0x112] sm:$0xff]  ;;  %v10238_v32 = vld [vmem:[#allocation7 + $0x2e4] ss:$8 sps:$4 sm:$0xff]  }
  0xb9   :  { %1609 = vmatpush1.bf16.msra.mxu0 %v10221_v47  ;;  %v10849_v47 = vpack.c.bf16 %v10845_v5, %v10843_v60 }
  0xba   :  { %1610 = vmatprep.subr.bf16.mxu0 %v10226_v6  ;;  %v10236_v6 = vld [vmem:[#allocation7 + $0x2e0] ss:$8 sps:$4 sm:$0xff]  }
  0xbc   :  { %1560 = vmatmul.mubr.bf16.gmra.mrb[20].mxu0 %v10825_v16 }
  0xbd   :  { %1611 = vmatpush1.bf16.msra.mxu0 %v10224_v26  ;;  %1569 = vmatprep.mubr.bf16.mxu0 %v245_v48  ;;  %v10241_v26 = vld [vmem:[#allocation7 + $0x2f4] ss:$8 sps:$4 sm:$0xff]   ;;  %v10239_v48 = vld [vmem:[#allocation7 + $0x2f0] ss:$8 sps:$4 sm:$0xff]  }
  0xbe   :  { %1612 = vmatprep.subr.bf16.mxu0 %v10229_v63  ;;  %v10244_v63 = vld [vmem:[#allocation7 + $0x304] ss:$8 sps:$4 sm:$0xff]  }
  0xc1   :  { %1613 = vmatpush1.bf16.msra.mxu0 %v10227_v33  ;;  %v10464_v33 = vmov 0  }
  0xc2   :  { %1614 = vmatprep.subr.bf16.mxu0 %v10232_v17  ;;  %9513 = vmatprep.subr.bf16.mxu1 %v10464_v33  ;;  %v10242_v17 = vld [vmem:[#allocation7 + $0x300] ss:$8 sps:$4 sm:$0xff]  }
  0xc4   :  { %1570 = vmatmul.mubr.bf16.gmra.mrb[24].mxu0 %v10838_v59 }
  0xc5   :  { %1615 = vmatpush1.bf16.msra.mxu0 %v10230_v3  ;;  %1579 = vmatprep.mubr.bf16.mxu0 %v246_v18  ;;  %v304_v3 = vpack.c.bf16 %v10789_v4, %v10781_v46  ;;  %v10247_v18 = vld [vmem:[#allocation7 + $0x314] ss:$8 sps:$4 sm:$0xff]   ;;  %v10251_v46 = vld [vmem:[#allocation7 + $0x330] ss:$8 sps:$4 sm:$0xff]   ;;  %v306_v4 = vpack.c.bf16 %v10865_v19, %v10805_v29 }
  0xc6   :  { %1616 = vmatprep.subr.bf16.mxu0 %v10235_v57  ;;  %v10248_v57 = vld [vmem:[#allocation7 + $0x320] ss:$8 sps:$4 sm:$0xff]   ;;  %v10265_v29 = vld [vmem:[#allocation7 + $0x374] ss:$8 sps:$4 sm:$0xff]  }
  0xc9   :  { %1617 = vmatpush1.bf16.msra.mxu0 %v10233_v61  ;;  %v305_v61 = vpack.c.bf16 %v10803_v28, %v10791_v10  ;;  %v10259_v10 = vld [vmem:[#allocation7 + $0x354] ss:$8 sps:$4 sm:$0xff]  }
  0xca   :  { %1618 = vmatprep.subr.bf16.mxu0 %v10238_v32  ;;  %v10253_v32 = vld [vmem:[#allocation7 + $0x334] ss:$8 sps:$4 sm:$0xff]  }
  0xcc   :  { %1580 = vmatmul.mubr.bf16.gmra.mrb[28].mxu0 %v10849_v47 }
  0xcd   :  { %1619 = vmatpush1.bf16.msra.mxu0 %v10236_v6  ;;  %1622 = vmatprep.mubr.bf16.mxu0 %v303_v21  ;;  %v10260_v6 = vld [vmem:[#allocation7 + $0x360] ss:$8 sps:$4 sm:$0xff]   ;;  %v307_v21 = vpack.c.bf16 %v10819_v13, %v10814_v49  ;;  %v10269_v49 = vld [vmem:[#allocation7 + $0x390] ss:$8 sps:$4 sm:$0xff]   ;;  %v10274_v13 = vld [vmem:[#allocation7 + $0x3a4] ss:$8 sps:$4 sm:$0xff]  }
  0xce   :  { %1620 = vmatprep.subr.bf16.mxu0 %v10241_v26  ;;  %v10263_v26 = vld [vmem:[#allocation7 + $0x370] ss:$8 sps:$4 sm:$0xff]  }
  0xd1   :  { %1621 = vmatpush1.bf16.msra.mxu0 %v10239_v48  ;;  %v10272_v48 = vld [vmem:[#allocation7 + $0x3a0] ss:$8 sps:$4 sm:$0xff]  }
  0xd2   :  { %1703 = vmatprep.subr.bf16.mxu0 %v10244_v63  ;;  %v309_v63 = vpack.c.bf16 %v10843_v60, %v10832_v44  ;;  %v310_v44 = vpack.c.bf16 %v10885_v34, %v10845_v5  ;;  %v10283_v60 = vld [vmem:[#allocation7 + $0x3d4] ss:$8 sps:$4 sm:$0xff]   ;;  %v10292_v5 = vld [vmem:[#allocation7 + $0x404] ss:$8 sps:$4 sm:$0xff]  }
  0xd4   :  { %1623 = vmatmul.mubr.bf16.vlgmr.msra.gmra.mrb[0].mxu0 %v271_v56  ;;  %v10254_v56 = vld [vmem:[#allocation7 + $0x340] ss:$8 sps:$4 sm:$0xff]  }
  0xd5   :  { %1704 = vmatpush1.bf16.msra.mxu0 %v10242_v17  ;;  %1632 = vmatprep.mubr.bf16.mxu0 %v304_v3  ;;  %v10277_v17 = vld [vmem:[#allocation7 + $0x3b4] ss:$8 sps:$4 sm:$0xff]  }
  0xd6   :  { %1705 = vmatprep.subr.bf16.mxu0 %v10247_v18  ;;  %v10278_v18 = vld [vmem:[#allocation7 + $0x3c0] ss:$8 sps:$4 sm:$0xff]  }
  0xd9   :  { %1706 = vmatpush1.bf16.msra.mxu0 %v10245_v30 }
  0xda   :  { %1707 = vmatprep.subr.bf16.mxu0 %v10250_v45  ;;  %v10284_v45 = vld [vmem:[#allocation7 + $0x3e0] ss:$8 sps:$4 sm:$0xff]  }
  0xdc   :  { %1633 = vmatmul.mubr.bf16.gmra.mrb[4].mxu0 %v272_v2  ;;  %v10388_v2 = vld [vmem:[#allocation2 + $0x71] sm:$0xff] }
  0xdd   :  { %1708 = vmatpush1.bf16.msra.mxu0 %v10248_v57  ;;  %1642 = vmatprep.mubr.bf16.mxu0 %v305_v61  ;;  %v274_v28 = vpack.c.bf16 %v10669_v55, %v10388_v2  ;;  %v10271_v55 = vld [vmem:[#allocation7 + $0x394] ss:$8 sps:$4 sm:$0xff]   ;;  %v10287_v61 = vld [vmem:[#allocation7 + $0x3f0] ss:$8 sps:$4 sm:$0xff]  }
  0xde   :  { %1709 = vmatprep.subr.bf16.mxu0 %v10253_v32  ;;  %v10289_v57 = vld [vmem:[#allocation7 + $0x3f4] ss:$8 sps:$4 sm:$0xff]   ;;  %v10290_v32 = vld [vmem:[#allocation7 + $0x400] ss:$8 sps:$4 sm:$0xff]  }
  0xdf   :  { %v10307_v2 = vld [vmem:[#allocation7 + $0x454] ss:$8 sps:$4 sm:$0xff]  }
  0xe1   :  { %1710 = vmatpush1.bf16.msra.mxu0 %v10251_v46  ;;  %v10295_v46 = vld [vmem:[#allocation7 + $0x414] ss:$8 sps:$4 sm:$0xff]  }
  0xe2   :  { %1711 = vmatprep.subr.bf16.mxu0 %v10256_v14  ;;  %v10298_v14 = vld [vmem:[#allocation7 + $0x424] ss:$8 sps:$4 sm:$0xff]  }
  0xe4   :  { %1643 = vmatmul.mubr.bf16.gmra.mrb[8].mxu0 %v273_v12  ;;  %v308_v12 = vpack.c.bf16 %v10830_v36, %v10821_v42  ;;  %v10275_v42 = vld [vmem:[#allocation7 + $0x3b0] ss:$8 sps:$4 sm:$0xff]   ;;  %v10390_v36 = vld [vmem:[#allocation2 + $0x101] sm:$0xff] }
  0xe5   :  { %1712 = vmatpush1.bf16.msra.mxu0 %v10254_v56  ;;  %1652 = vmatprep.mubr.bf16.mxu0 %v306_v4  ;;  %v10296_v56 = vld [vmem:[#allocation7 + $0x420] ss:$8 sps:$4 sm:$0xff]   ;;  %v10301_v4 = vld [vmem:[#allocation7 + $0x434] ss:$8 sps:$4 sm:$0xff]  }
  0xe6   :  { %1713 = vmatprep.subr.bf16.mxu0 %v10259_v10  ;;  %v359_v10 = vld [vmem:[#allocation2 + $0x91] sm:$0xff] }
  0xe9   :  { %1714 = vmatpush1.bf16.msra.mxu0 %v10257_v20  ;;  %v10304_v20 = vld [vmem:[#allocation7 + $0x444] ss:$8 sps:$4 sm:$0xff]  }
  0xea   :  { %1715 = vmatprep.subr.bf16.mxu0 %v10262_v23 }
  0xec   :  { %1653 = vmatmul.mubr.bf16.gmra.mrb[12].mxu0 %v274_v28  ;;  %v327_v28 = vld [vmem:[#allocation2 + $0x90] sm:$0xff] }
  0xed   :  { %1716 = vmatpush1.bf16.msra.mxu0 %v10260_v6  ;;  %1662 = vmatprep.mubr.bf16.mxu0 %v307_v21  ;;  %v10305_v6 = vld [vmem:[#allocation7 + $0x450] ss:$8 sps:$4 sm:$0xff]   ;;  %v10308_v21 = vld [vmem:[#allocation7 + $0x460] ss:$8 sps:$4 sm:$0xff]  }
  0xee   :  { %1717 = vmatprep.subr.bf16.mxu0 %v10265_v29  ;;  %v10313_v29 = vld [vmem:[#allocation7 + $0x474] ss:$8 sps:$4 sm:$0xff]  }
  0xf1   :  { %1718 = vmatpush1.bf16.msra.mxu0 %v10263_v26  ;;  %v10311_v26 = vld [vmem:[#allocation7 + $0x470] ss:$8 sps:$4 sm:$0xff]  }
  0xf2   :  { %1719 = vmatprep.subr.bf16.mxu0 %v10268_v24 }
  0xf4   :  { %1663 = vmatmul.mubr.bf16.gmra.mrb[16].mxu0 %v275_v41  ;;  %v10389_v41 = vld [vmem:[#allocation2 + $0xf1] sm:$0xff] }
  0xf5   :  { %1720 = vmatpush1.bf16.msra.mxu0 %v10266_v27  ;;  %1672 = vmatprep.mubr.bf16.mxu0 %v308_v12  ;;  %v277_v3 = vpack.c.bf16 %v10390_v36, %v10389_v41  ;;  %v2375_v12 = vld [vmem:[%s14752_s1 + $0x78] sm:$0xff]  ;;  %v2385_v41 = vld [vmem:[%s14752_s1 + $0xc8] sm:$0xff]  ;;  %v2386_v36 = vld [vmem:[%s14752_s1 + $0xd0] sm:$0xff] }
  0xf6   :  { %1721 = vmatprep.subr.bf16.mxu0 %v10271_v55  ;;  %2440 = vst.msk [vmem:[#allocation4 + $0xc9] sm:$0xff] %vm1929_vm0, %v2375_v12  ;;  %v2376_v55 = vld [vmem:[%s14752_s1 + $0x80] sm:$0xff]  ;;  %2450 = vst.msk [vmem:[#allocation4 + $0x141] sm:$0xff] %vm1929_vm0, %v2385_v41  ;;  %v2410_v12 = vld [vmem:[%s14752_s1 + $0x190] sm:$0xff] }
  0xf7   :  { %2441 = vst.msk [vmem:[#allocation4 + $0xd9] sm:$0xff] %vm1929_vm0, %v2376_v55  ;;  %2451 = vst.msk [vmem:[#allocation4 + $0x151] sm:$0xff] %vm1929_vm0, %v2386_v36  ;;  %v2411_v55 = vld [vmem:[%s14752_s1 + $0x198] sm:$0xff]  ;;  %v2412_v41 = vld [vmem:[%s14752_s1 + $0x1a0] sm:$0xff] }
  0xf8   :  { %2475 = vst.msk [vmem:[#allocation4 + $0x2a1] sm:$0xff] %vm1929_vm0, %v2410_v12  ;;  %2476 = vst.msk [vmem:[#allocation4 + $0x2a9] sm:$0xff] %vm1929_vm0, %v2411_v55  ;;  %v2413_v36 = vld [vmem:[%s14752_s1 + $0x1a8] sm:$0xff]  ;;  %v2419_v12 = vld [vmem:[%s14752_s1 + $0x1d8] sm:$0xff] }
  0xf9   :  { %1722 = vmatpush1.bf16.msra.mxu0 %v10269_v49  ;;  %v2377_v49 = vld [vmem:[%s14752_s1 + $0x88] sm:$0xff]  ;;  %2477 = vst.msk [vmem:[#allocation4 + $0x2b9] sm:$0xff] %vm1929_vm0, %v2412_v41  ;;  %2478 = vst.msk [vmem:[#allocation4 + $0x2c1] sm:$0xff] %vm1929_vm0, %v2413_v36  ;;  %v2420_v41 = vld [vmem:[%s14752_s1 + $0x1e0] sm:$0xff] }
  0xfa   :  { %1723 = vmatprep.subr.bf16.mxu0 %v10274_v13  ;;  %2442 = vst.msk [vmem:[#allocation4 + $0xe1] sm:$0xff] %vm1929_vm0, %v2377_v49  ;;  %v2378_v13 = vld [vmem:[%s14752_s1 + $0x90] sm:$0xff]  ;;  %2484 = vst.msk [vmem:[#allocation4 + $0x309] sm:$0xff] %vm1929_vm0, %v2419_v12  ;;  %v2421_v36 = vld [vmem:[%s14752_s1 + $0x1e8] sm:$0xff] }
  0xfb   :  { %2443 = vst.msk [vmem:[#allocation4 + $0xf1] sm:$0xff] %vm1929_vm0, %v2378_v13  ;;  %v10327_v13 = vld [vmem:[%s14754_s3 + $0xe8] sm:$0xff]   ;;  %2485 = vst.msk [vmem:[#allocation4 + $0x319] sm:$0xff] %vm1929_vm0, %v2420_v41 }
  0xfc   :  { %1673 = vmatmul.mubr.bf16.gmra.mrb[20].mxu0 %v276_v53  ;;  %v10391_v53 = vld [vmem:[#allocation2 + $0x111] sm:$0xff]  ;;  %2486 = vst.msk [vmem:[#allocation4 + $0x321] sm:$0xff] %vm1929_vm0, %v2421_v36 }
  0xfd   :  { %1724 = vmatpush1.bf16.msra.mxu0 %v10272_v48  ;;  %1682 = vmatprep.mubr.bf16.mxu0 %v309_v63  ;;  %v278_v30 = vpack.c.bf16 %v10698_v8, %v10391_v53  ;;  %v10293_v8 = vld [vmem:[#allocation7 + $0x410] ss:$8 sps:$4 sm:$0xff]   ;;  %v2380_v63 = vld [vmem:[%s14752_s1 + $0xa0] sm:$0xff]  ;;  %v2393_v53 = vld [vmem:[%s14752_s1 + $0x108] sm:$0xff] }
  0xfe   :  { %1725 = vmatprep.subr.bf16.mxu0 %v10277_v17  ;;  %v2379_v48 = vld [vmem:[%s14752_s1 + $0x98] sm:$0xff]  ;;  %v2381_v17 = vld [vmem:[%s14752_s1 + $0xa8] sm:$0xff]  ;;  %2445 = vst.msk [vmem:[#allocation4 + $0x109] sm:$0xff] %vm1929_vm0, %v2380_v63  ;;  %2458 = vst.msk [vmem:[#allocation4 + $0x1d1] sm:$0xff] %vm1929_vm0, %v2393_v53 }
  0xff   :  { %2444 = vst.msk [vmem:[#allocation4 + $0xf9] sm:$0xff] %vm1929_vm0, %v2379_v48  ;;  %2446 = vst.msk [vmem:[#allocation4 + $0x111] sm:$0xff] %vm1929_vm0, %v2381_v17  ;;  %v10328_v53 = vld [vmem:[%s14754_s3 + $0xf0] sm:$0xff]  }
 0x101   :  { %1726 = vmatpush1.bf16.msra.mxu0 %v10275_v42  ;;  %v2382_v42 = vld [vmem:[%s14752_s1 + $0xb0] sm:$0xff] }
 0x102   :  { %1727 = vmatprep.subr.bf16.mxu0 %v10280_v31  ;;  %v2383_v31 = vld [vmem:[%s14752_s1 + $0xb8] sm:$0xff]  ;;  %2447 = vst.msk [vmem:[#allocation4 + $0x121] sm:$0xff] %vm1929_vm0, %v2382_v42 }
 0x103   :  { %2448 = vst.msk [vmem:[#allocation4 + $0x129] sm:$0xff] %vm1929_vm0, %v2383_v31 }
 0x104   :  { %1683 = vmatmul.mubr.bf16.gmra.mrb[24].mxu0 %v277_v3  ;;  %v2387_v3 = vld [vmem:[%s14752_s1 + $0xd8] sm:$0xff] }
 0x105   :  { %1728 = vmatpush1.bf16.msra.mxu0 %v10278_v18  ;;  %1692 = vmatprep.mubr.bf16.mxu0 %v310_v44  ;;  %2452 = vst.msk [vmem:[#allocation4 + $0x159] sm:$0xff] %vm1929_vm0, %v2387_v3  ;;  %v2388_v18 = vld [vmem:[%s14752_s1 + $0xe0] sm:$0xff]  ;;  %v2389_v44 = vld [vmem:[%s14752_s1 + $0xe8] sm:$0xff] }
 0x106   :  { %1729 = vmatprep.subr.bf16.mxu0 %v10283_v60  ;;  %2453 = vst.msk [vmem:[#allocation4 + $0x169] sm:$0xff] %vm1929_vm0, %v2388_v18  ;;  %2454 = vst.msk [vmem:[#allocation4 + $0x171] sm:$0xff] %vm1929_vm0, %v2389_v44  ;;  %v2390_v60 = vld [vmem:[%s14752_s1 + $0xf0] sm:$0xff] }
 0x107   :  { %2455 = vst.msk [vmem:[#allocation4 + $0x181] sm:$0xff] %vm1929_vm0, %v2390_v60  ;;  %v3408_v12 = vld [vmem:[#allocation4 + $0x10a] sm:$0xff] }
 0x109   :  { %1730 = vmatpush1.bf16.msra.mxu0 %v10281_v35  ;;  %v2391_v35 = vld [vmem:[%s14752_s1 + $0xf8] sm:$0xff] }
 0x10a   :  { %1731 = vmatprep.subr.bf16.mxu0 %v10286_v38  ;;  %2456 = vst.msk [vmem:[#allocation4 + $0x189] sm:$0xff] %vm1929_vm0, %v2391_v35  ;;  %v2392_v38 = vld [vmem:[%s14752_s1 + $0x100] sm:$0xff] }
 0x10b   :  { %2457 = vst.msk [vmem:[#allocation4 + $0x1c9] sm:$0xff] %vm1929_vm0, %v2392_v38 }
 0x10c   :  { %1693 = vmatmul.mubr.bf16.gmra.mrb[28].mxu0 %v278_v30  ;;  %v10314_v30 = vld [vmem:[%s14754_s3 + $0x80] sm:$0xff]  }
 0x10d   :  { %1732 = vmatpush1.bf16.msra.mxu0 %v10284_v45  ;;  %1735 = vmatprep.mubr.bf16.mxu0 %v10664_v54  ;;  %v10299_v54 = vld [vmem:[#allocation7 + $0x430] ss:$8 sps:$4 sm:$0xff]  }
 0x10e   :  { %1733 = vmatprep.subr.bf16.mxu0 %v10289_v57  ;;  %v2394_v45 = vld [vmem:[%s14752_s1 + $0x110] sm:$0xff]  ;;  %v2395_v57 = vld [vmem:[%s14752_s1 + $0x118] sm:$0xff]  ;;  %9529 = vmatpush1.bf16.msra.mxu1 %v10314_v30 }
 0x10f   :  { %2459 = vst.msk [vmem:[#allocation4 + $0x1e1] sm:$0xff] %vm1929_vm0, %v2394_v45  ;;  %2460 = vst.msk [vmem:[#allocation4 + $0x1e9] sm:$0xff] %vm1929_vm0, %v2395_v57  ;;  %9514 = vmatprep.subr.bf16.mxu1 %v10464_v33 }
 0x111   :  { %1734 = vmatpush1.bf16.msra.mxu0 %v10287_v61  ;;  %v2396_v61 = vld [vmem:[%s14752_s1 + $0x120] sm:$0xff] }
 0x112   :  { %1816 = vmatprep.subr.bf16.mxu0 %v10292_v5  ;;  %v2397_v5 = vld [vmem:[%s14752_s1 + $0x128] sm:$0xff]  ;;  %9530 = vmatpush1.bf16.msra.mxu1 %v10315_v0  ;;  %2461 = vst.msk [vmem:[#allocation4 + $0x1f9] sm:$0xff] %vm1929_vm0, %v2396_v61 }
 0x113   :  { %2462 = vst.msk [vmem:[#allocation4 + $0x201] sm:$0xff] %vm1929_vm0, %v2397_v5  ;;  %9515 = vmatprep.subr.bf16.mxu1 %v10464_v33 }
 0x114   :  { %1736 = vmatmul.mubr.bf16.vlgmr.msra.gmra.mrb[0].mxu0 %v10681_v62  ;;  %v10392_v62 = vld [vmem:[#allocation2 + $0x81] sm:$0xff] }
 0x115   :  { %1817 = vmatpush1.bf16.msra.mxu0 %v10290_v32  ;;  %1745 = vmatprep.mubr.bf16.mxu0 %v10685_v1  ;;  %v371_v23 = vpack.c.bf16 %v359_v10, %v10392_v62  ;;  %v10302_v1 = vld [vmem:[#allocation7 + $0x440] ss:$8 sps:$4 sm:$0xff]   ;;  %v10316_v32 = vld [vmem:[%s14754_s3 + $0x90] sm:$0xff]  }
 0x116   :  { %1818 = vmatprep.subr.bf16.mxu0 %v10295_v46  ;;  %9531 = vmatpush1.bf16.msra.mxu1 %v10316_v32  ;;  %v10317_v46 = vld [vmem:[%s14754_s3 + $0x98] sm:$0xff]   ;;  %v10319_v10 = vld [vmem:[%s14754_s3 + $0xa8] sm:$0xff]   ;;  %v2402_v62 = vld [vmem:[%s14752_s1 + $0x150] sm:$0xff] }
 0x117   :  { %9516 = vmatprep.subr.bf16.mxu1 %v10464_v33  ;;  %2467 = vst.msk [vmem:[#allocation4 + $0x241] sm:$0xff] %vm1929_vm0, %v2402_v62 }
 0x119   :  { %1819 = vmatpush1.bf16.msra.mxu0 %v10293_v8  ;;  %v2398_v8 = vld [vmem:[%s14752_s1 + $0x130] sm:$0xff] }
 0x11a   :  { %1820 = vmatprep.subr.bf16.mxu0 %v10298_v14  ;;  %v2399_v14 = vld [vmem:[%s14752_s1 + $0x138] sm:$0xff]  ;;  %2463 = vst.msk [vmem:[#allocation4 + $0x211] sm:$0xff] %vm1929_vm0, %v2398_v8  ;;  %9532 = vmatpush1.bf16.msra.mxu1 %v10317_v46 }
 0x11b   :  { %2464 = vst.msk [vmem:[#allocation4 + $0x219] sm:$0xff] %vm1929_vm0, %v2399_v14  ;;  %9517 = vmatprep.subr.bf16.mxu1 %v10464_v33  ;;  %v10329_v8 = vld [vmem:[%s14754_s3 + $0xf8] sm:$0xff]   ;;  %v2414_v14 = vld [vmem:[%s14752_s1 + $0x1b0] sm:$0xff] }
 0x11c   :  { %1746 = vmatmul.mubr.bf16.gmra.mrb[4].mxu0 %v10702_v9  ;;  %v10310_v9 = vld [vmem:[#allocation7 + $0x464] ss:$8 sps:$4 sm:$0xff]   ;;  %2479 = vst.msk [vmem:[#allocation4 + $0x2d1] sm:$0xff] %vm1929_vm0, %v2414_v14 }
 0x11d   :  { %1755 = vmatprep.mubr.bf16.mxu0 %v10707_v11  ;;  %1821 = vmatpush1.bf16.msra.mxu0 %v10296_v56  ;;  %v339_v11 = vpack.c.bf16 %v327_v28, %v10794_v15  ;;  %v10393_v15 = vld [vmem:[#allocation2 + $0x121] sm:$0xff] }
 0x11e   :  { %1822 = vmatprep.subr.bf16.mxu0 %v10301_v4  ;;  %v10318_v56 = vld [vmem:[%s14754_s3 + $0xa0] sm:$0xff]  }
 0x11f   :  { %v2400_v4 = vld [vmem:[%s14752_s1 + $0x140] sm:$0xff]  ;;  %9533 = vmatpush1.bf16.msra.mxu1 %v10318_v56  ;;  %v2415_v56 = vld [vmem:[%s14752_s1 + $0x1b8] sm:$0xff] }
 0x120   :  { %2465 = vst.msk [vmem:[#allocation4 + $0x229] sm:$0xff] %vm1929_vm0, %v2400_v4  ;;  %9518 = vmatprep.subr.bf16.mxu1 %v10464_v33  ;;  %v2404_v28 = vld [vmem:[%s14752_s1 + $0x160] sm:$0xff]  ;;  %2480 = vst.msk [vmem:[#allocation4 + $0x2d9] sm:$0xff] %vm1929_vm0, %v2415_v56 }
 0x121   :  { %1823 = vmatpush1.bf16.msra.mxu0 %v10299_v54  ;;  %v2401_v54 = vld [vmem:[%s14752_s1 + $0x148] sm:$0xff]  ;;  %2469 = vst.msk [vmem:[#allocation4 + $0x259] sm:$0xff] %vm1929_vm0, %v2404_v28 }
 0x122   :  { %1824 = vmatprep.subr.bf16.mxu0 %v10304_v20  ;;  %2466 = vst.msk [vmem:[#allocation4 + $0x231] sm:$0xff] %vm1929_vm0, %v2401_v54  ;;  %v10320_v20 = vld [vmem:[%s14754_s3 + $0xb0] sm:$0xff]  }
 0x123   :  { %9534 = vmatpush1.bf16.msra.mxu1 %v10319_v10 }
 0x124   :  { %1756 = vmatmul.mubr.bf16.gmra.mrb[8].mxu0 %v10719_v22  ;;  %v367_v22 = vld [vmem:[#allocation2 + $0x131] sm:$0xff]  ;;  %9519 = vmatprep.subr.bf16.mxu1 %v10464_v33 }
 0x125   :  { %1765 = vmatprep.mubr.bf16.mxu0 %v371_v23  ;;  %1825 = vmatpush1.bf16.msra.mxu0 %v10302_v1  ;;  %v375_v24 = vpack.c.bf16 %v367_v22, %v10393_v15  ;;  %v2403_v23 = vld [vmem:[%s14752_s1 + $0x158] sm:$0xff]  ;;  %v632_v15 = vld [vmem:[%s14755_s4] sm:$0x3] }
 0x126   :  { %1826 = vmatprep.subr.bf16.mxu0 %v10307_v2  ;;  %2468 = vst.msk [vmem:[#allocation4 + $0x249] sm:$0xff] %vm1929_vm0, %v2403_v23  ;;  %v10321_v1 = vld [vmem:[%s14754_s3 + $0xb8] sm:$0xff]   ;;  %v634_v2 = vlaneseq }
 0x127   :  { %9535 = vmatpush1.bf16.msra.mxu1 %v10320_v20 }
 0x128   :  { %9520 = vmatprep.subr.bf16.mxu1 %v10464_v33 }
 0x129   :  { %1827 = vmatpush1.bf16.msra.mxu0 %v10305_v6  ;;  %v2405_v6 = vld [vmem:[%s14752_s1 + $0x168] sm:$0xff] }
 0x12a   :  { %1828 = vmatprep.subr.bf16.mxu0 %v10310_v9  ;;  %2470 = vst.msk [vmem:[#allocation4 + $0x261] sm:$0xff] %vm1929_vm0, %v2405_v6  ;;  %v10322_v9 = vld [vmem:[%s14754_s3 + $0xc0] sm:$0xff]  }
 0x12b   :  { %9536 = vmatpush1.bf16.msra.mxu1 %v10321_v1  ;;  %v2416_v6 = vld [vmem:[%s14752_s1 + $0x1c0] sm:$0xff] }
 0x12c   :  { %1766 = vmatmul.mubr.bf16.gmra.mrb[12].mxu0 %v339_v11  ;;  %9521 = vmatprep.subr.bf16.mxu1 %v10464_v33  ;;  %v635_v11 = vshrl.u32 %v634_v2, 7  ;;  %2481 = vst.msk [vmem:[#allocation4 + $0x2e9] sm:$0xff] %vm1929_vm0, %v2416_v6  ;;  %v2360_v6 = vld [vmem:[%s14752_s1] sm:$0xff] }
 0x12d   :  { %1775 = vmatprep.mubr.bf16.mxu0 %v10728_v40  ;;  %1829 = vmatpush1.bf16.msra.mxu0 %v10308_v21  ;;  %v335_v40 = vld [vmem:[#allocation2 + $0x130] sm:$0xff]  ;;  %v10323_v21 = vld [vmem:[%s14754_s3 + $0xc8] sm:$0xff]   ;;  %2425 = vst.msk [vmem:[#allocation4 + $0x19] sm:$0xff] %vm1929_vm0, %v2360_v6  ;;  %v3800_v6 = vld [vmem:[#allocation4 + $0x180] sm:$0xff] }
 0x12e   :  { %1830 = vmatprep.subr.bf16.mxu0 %v10313_v29  ;;  %v343_v27 = vpack.c.bf16 %v335_v40, %v10834_v50  ;;  %v2371_v50 = vld [vmem:[%s14752_s1 + $0x58] sm:$0xff]  ;;  %v2406_v29 = vld [vmem:[%s14752_s1 + $0x170] sm:$0xff]  ;;  %v636_v22 = vsub.s32 0, %v635_v11 }
 0x12f   :  { %2436 = vst.msk [vmem:[#allocation4 + $0x99] sm:$0xff] %vm1929_vm0, %v2371_v50  ;;  %9537 = vmatpush1.bf16.msra.mxu1 %v10322_v9  ;;  %2471 = vst.msk [vmem:[#allocation4 + $0x271] sm:$0xff] %vm1929_vm0, %v2406_v29  ;;  %v10324_v40 = vld [vmem:[%s14754_s3 + $0xd0] sm:$0xff]   ;;  %v2417_v9 = vld [vmem:[%s14752_s1 + $0x1c8] sm:$0xff] }
 0x130   :  { %9522 = vmatprep.subr.bf16.mxu1 %v10464_v33  ;;  %2482 = vst.msk [vmem:[#allocation4 + $0x2f1] sm:$0xff] %vm1929_vm0, %v2417_v9  ;;  %v2361_v9 = vld [vmem:[%s14752_s1 + $0x8] sm:$0xff] }
 0x131   :  { %1831 = vmatpush1.bf16.msra.mxu0 %v10311_v26  ;;  %v2407_v26 = vld [vmem:[%s14752_s1 + $0x178] sm:$0xff]  ;;  %2426 = vst.msk [vmem:[#allocation4 + $0x21] sm:$0xff] %vm1929_vm0, %v2361_v9  ;;  %v3801_v9 = vld [vmem:[#allocation4 + $0x188] sm:$0xff] }
 0x132   :  { %6818 = vmatprep.subr.bf16.mxu0 %v10464_v33  ;;  %2472 = vst.msk [vmem:[#allocation4 + $0x279] sm:$0xff] %vm1929_vm0, %v2407_v26 }
 0x133   :  { %9538 = vmatpush1.bf16.msra.mxu1 %v10323_v21 }
 0x134   :  { %1776 = vmatmul.mubr.bf16.gmra.mrb[16].mxu0 %v10739_v51  ;;  %v391_v51 = vld [vmem:[#allocation2 + $0x92] sm:$0xff]  ;;  %9523 = vmatprep.subr.bf16.mxu1 %v10464_v33 }
 0x135   :  { %1785 = vmatprep.mubr.bf16.mxu0 %v10743_v52  ;;  %v403_v52 = vpack.c.bf16 %v391_v51, %v10865_v19  ;;  %v2374_v19 = vld [vmem:[%s14752_s1 + $0x70] sm:$0xff]  ;;  %v2408_v51 = vld [vmem:[%s14752_s1 + $0x180] sm:$0xff] }
 0x136   :  { %2439 = vst.msk [vmem:[#allocation4 + $0xc1] sm:$0xff] %vm1929_vm0, %v2374_v19  ;;  %2473 = vst.msk [vmem:[#allocation4 + $0x289] sm:$0xff] %vm1929_vm0, %v2408_v51  ;;  %v10326_v19 = vld [vmem:[%s14754_s3 + $0xe0] sm:$0xff]  }
 0x137   :  { %9539 = vmatpush1.bf16.msra.mxu1 %v10324_v40  ;;  %v3399_v26 = vld [vmem:[#allocation4 + $0x9a] sm:$0xff] }
 0x138   :  { %9524 = vmatprep.subr.bf16.mxu1 %v10464_v33 }
 0x13c   :  { %1786 = vmatmul.mubr.bf16.gmra.mrb[20].mxu0 %v10755_v39  ;;  %v399_v39 = vld [vmem:[#allocation2 + $0x132] sm:$0xff] }
 0x13d   :  { %1795 = vmatprep.mubr.bf16.mxu0 %v10759_v7  ;;  %v407_v7 = vpack.c.bf16 %v399_v39, %v10885_v34  ;;  %v2384_v34 = vld [vmem:[%s14752_s1 + $0xc0] sm:$0xff] }
 0x13e   :  { %2449 = vst.msk [vmem:[#allocation4 + $0x139] sm:$0xff] %vm1929_vm0, %v2384_v34 }
 0x144   :  { %1796 = vmatmul.mubr.bf16.gmra.mrb[24].mxu0 %v10769_v25  ;;  %v2368_v25 = vld [vmem:[%s14752_s1 + $0x40] sm:$0xff] }
 0x145   :  { %1805 = vmatprep.mubr.bf16.mxu0 %v375_v24  ;;  %2433 = vst.msk [vmem:[#allocation4 + $0x79] sm:$0xff] %vm1929_vm0, %v2368_v25  ;;  %v640_v24 = vsub.s32 1, %v635_v11  ;;  %v10325_v25 = vld [vmem:[%s14754_s3 + $0xd8] sm:$0xff]   ;;  %v3795_v36 = vld [vmem:[#allocation4 + $0x140] sm:$0xff] }
 0x146   :  { %9540 = vmatpush1.bf16.msra.mxu1 %v10325_v25  ;;  %v3794_v41 = vld [vmem:[#allocation4 + $0x138] sm:$0xff] }
 0x147   :  { %v11471_v39 = vrot.slane %v632_v15, %v640_v24  ;;  %9525 = vmatprep.subr.bf16.mxu1 %v10464_v33 }
 0x14a   :  { %9541 = vmatpush1.bf16.msra.mxu1 %v10326_v19  ;;  %v2418_v19 = vld [vmem:[%s14752_s1 + $0x1d0] sm:$0xff] }
 0x14b   :  { %9526 = vmatprep.subr.bf16.mxu1 %v10464_v33  ;;  %2483 = vst.msk [vmem:[#allocation4 + $0x301] sm:$0xff] %vm1929_vm0, %v2418_v19  ;;  %v3793_v19 = vld [vmem:[#allocation4 + $0x128] sm:$0xff] }
 0x14c   :  { %1806 = vmatmul.mubr.bf16.gmra.mrb[28].mxu0 %v343_v27  ;;  %v11463_v27 = vrot.slane %v632_v15, %v636_v22  ;;  %v3778_v17 = vld [vmem:[#allocation4 + $0x78] sm:$0xff] }
 0x14d   :  { %1848 = vmatprep.mubr.bf16.mxu0 %v10464_v33 }
 0x14e   :  { %9542 = vmatpush1.bf16.msra.mxu1 %v10327_v13 }
 0x14f   :  { %9527 = vmatprep.subr.bf16.mxu1 %v10464_v33 }
 0x152   :  { %9543 = vmatpush1.bf16.msra.mxu1 %v10328_v53 }
 0x153   :  { %9528 = vmatprep.subr.bf16.mxu1 %v10464_v33 }
 0x154   :  { %1849 = vmatmul.mubr.bf16.vlgmr.msra.gmra.mrb[0].mxu0 %v10785_v58  ;;  %v2369_v58 = vld [vmem:[%s14752_s1 + $0x48] sm:$0xff] }
 0x155   :  { %1858 = vmatprep.mubr.bf16.mxu0 %v10464_v33  ;;  %2434 = vst.msk [vmem:[#allocation4 + $0x81] sm:$0xff] %vm1929_vm0, %v2369_v58 }
 0x156   :  { %9544 = vmatpush1.bf16.msra.mxu1 %v10329_v8  ;;  %v2423_v8 = vld [vmem:[%s14752_s1 + $0x1f8] sm:$0xff] }
 0x157   :  { %7396 = vmatprep.subr.bf16.mxu1 %v10464_v33  ;;  %2488 = vst.msk [vmem:[#allocation4 + $0x339] sm:$0xff] %vm1929_vm0, %v2423_v8 }
 0x15c   :  { %1859 = vmatmul.mubr.bf16.gmra.mrb[4].mxu0 %v10798_v43  ;;  %v2366_v43 = vld [vmem:[%s14752_s1 + $0x30] sm:$0xff]  ;;  %v3779_v42 = vld [vmem:[#allocation4 + $0x80] sm:$0xff] }
 0x15d   :  { %1868 = vmatprep.mubr.bf16.mxu0 %v10464_v33  ;;  %2431 = vst.msk [vmem:[#allocation4 + $0x61] sm:$0xff] %vm1929_vm0, %v2366_v43  ;;  %v3838_v60 = vpack.c.bf16 %v3779_v42, %v3778_v17  ;;  %v3396_v61 = vld [vmem:[#allocation4 + $0x7a] sm:$0xff]  ;;  %v3397_v5 = vld [vmem:[#allocation4 + $0x82] sm:$0xff] }
 0x15e   :  { %v3455_v1 = vpack.c.bf16 %v3397_v5, %v3396_v61  ;;  %v3786_v17 = vld [vmem:[#allocation4 + $0xd8] sm:$0xff]  ;;  %v3787_v42 = vld [vmem:[#allocation4 + $0xe0] sm:$0xff] }
 0x164   :  { %1869 = vmatmul.mubr.bf16.gmra.mrb[8].mxu0 %v10809_v37  ;;  %v2367_v37 = vld [vmem:[%s14752_s1 + $0x38] sm:$0xff] }
 0x165   :  { %1878 = vmatprep.mubr.bf16.mxu0 %v10464_v33  ;;  %2432 = vst.msk [vmem:[#allocation4 + $0x69] sm:$0xff] %vm1929_vm0, %v2367_v37 }
 0x16c   :  { %1879 = vmatmul.mubr.bf16.gmra.mrb[12].mxu0 %v403_v52  ;;  %v2409_v52 = vld [vmem:[%s14752_s1 + $0x188] sm:$0xff] }
 0x16d   :  { %1888 = vmatprep.mubr.bf16.mxu0 %v10464_v33  ;;  %2474 = vst.msk [vmem:[#allocation4 + $0x291] sm:$0xff] %vm1929_vm0, %v2409_v52  ;;  %v3394_v35 = vld [vmem:[#allocation4 + $0x62] sm:$0xff]  ;;  %v3395_v38 = vld [vmem:[#allocation4 + $0x6a] sm:$0xff] }
 0x16e   :  { %v3454_v30 = vpack.c.bf16 %v3395_v38, %v3394_v35  ;;  %v3402_v35 = vld [vmem:[#allocation4 + $0xc2] sm:$0xff]  ;;  %v3403_v38 = vld [vmem:[#allocation4 + $0xca] sm:$0xff] }
 0x16f   :  { %v3458_v53 = vpack.c.bf16 %v3403_v38, %v3402_v35  ;;  %v2365_v38 = vld [vmem:[%s14752_s1 + $0x28] sm:$0xff] }
 0x170   :  { %2430 = vst.msk [vmem:[#allocation4 + $0x51] sm:$0xff] %vm1929_vm0, %v2365_v38  ;;  %v3809_v38 = vld [vmem:[#allocation4 + $0x218] sm:$0xff] }
 0x174   :  { %1889 = vmatmul.mubr.bf16.gmra.mrb[16].mxu0 %v10825_v16  ;;  %v2370_v16 = vld [vmem:[%s14752_s1 + $0x50] sm:$0xff] }
 0x175   :  { %1898 = vmatprep.mubr.bf16.mxu0 %v10464_v33  ;;  %2435 = vst.msk [vmem:[#allocation4 + $0x91] sm:$0xff] %vm1929_vm0, %v2370_v16 }
 0x17c   :  { %1899 = vmatmul.mubr.bf16.gmra.mrb[20].mxu0 %v10838_v59  ;;  %v2372_v59 = vld [vmem:[%s14752_s1 + $0x60] sm:$0xff]  ;;  %v3780_v45 = vld [vmem:[#allocation4 + $0x90] sm:$0xff]  ;;  %v3781_v0 = vld [vmem:[#allocation4 + $0x98] sm:$0xff] }
 0x17d   :  { %1908 = vmatprep.mubr.bf16.mxu0 %v10464_v33  ;;  %2437 = vst.msk [vmem:[#allocation4 + $0xa9] sm:$0xff] %vm1929_vm0, %v2372_v59  ;;  %v3839_v62 = vpack.c.bf16 %v3781_v0, %v3780_v45  ;;  %v3398_v29 = vld [vmem:[#allocation4 + $0x92] sm:$0xff]  ;;  %v3404_v0 = vld [vmem:[#allocation4 + $0xda] sm:$0xff] }
 0x17e   :  { %v3788_v45 = vld [vmem:[#allocation4 + $0xf0] sm:$0xff] }
 0x184   :  { %1909 = vmatmul.mubr.bf16.gmra.mrb[24].mxu0 %v10849_v47  ;;  %v2373_v47 = vld [vmem:[%s14752_s1 + $0x68] sm:$0xff] }
 0x185   :  { %1918 = vmatprep.mubr.bf16.mxu0 %v10464_v33  ;;  %2438 = vst.msk [vmem:[#allocation4 + $0xb1] sm:$0xff] %vm1929_vm0, %v2373_v47  ;;  %v3782_v2 = vld [vmem:[#allocation4 + $0xa8] sm:$0xff] }
 0x18c   :  { %1919 = vmatmul.mubr.bf16.gmra.mrb[28].mxu0 %v407_v7  ;;  %v3783_v28 = vld [vmem:[#allocation4 + $0xb0] sm:$0xff] }
 0x18d   :  { %v3840_v21 = vpack.c.bf16 %v3783_v28, %v3782_v2  ;;  %v3790_v2 = vld [vmem:[#allocation4 + $0x108] sm:$0xff]  ;;  %v3791_v28 = vld [vmem:[#allocation4 + $0x110] sm:$0xff] }
 0x227   :  { %v1850_v7 = vpop.f32.mrb[0].mxu0 }
 0x228   :  { %v11480_v58 = vadd.f32 %v1850_v7, %v11463_v27  ;;  %v1852_v43 = vpop.f32.mrb[1].mxu0  ;;  %v3456_v7 = vpack.c.bf16 %v3399_v26, %v3398_v29  ;;  %v3407_v29 = vld [vmem:[#allocation4 + $0xfa] sm:$0xff] }
 0x229   :  { %v11483_v37 = vadd.f32 %v1852_v43, %v11471_v39  ;;  %v1854_v16 = vpop.f32.mrb[2].mxu0  ;;  %v3784_v43 = vld [vmem:[#allocation4 + $0xc0] sm:$0xff] }
 0x22a   :  { %2019 = vst [vmem:[#allocation3 + $0x19] ss:$2 sm:$0xff] %v11480_v58  ;;  %v11487_v50 = vadd.f32 %v1854_v16, %v11463_v27  ;;  %v1856_v59 = vpop.f32.mrb[3].mxu0  ;;  %v3785_v16 = vld [vmem:[#allocation4 + $0xc8] sm:$0xff] }
 0x22b   :  { %2148 = vst [vmem:[#allocation3 + $0x31] ss:$2 sm:$0xff] %v11483_v37  ;;  %v9548_v47 = vadd.f32 %v1856_v59, %v11471_v39  ;;  %v3400_v59 = vld [vmem:[#allocation4 + $0xaa] sm:$0xff]  ;;  %v3841_v55 = vpack.c.bf16 %v3785_v16, %v3784_v43 }
 0x22c   :  { %2021 = vst [vmem:[#allocation3 + $0x49] ss:$2 sm:$0xff] %v11487_v50 }
 0x22d   :  { %2150 = vst [vmem:[#allocation3 + $0x61] ss:$2 sm:$0xff] %v9548_v47 }
 0x22f   :  { %v1860_v49 = vpop.f32.mrb[4].mxu0 }
 0x230   :  { %v9549_v48 = vadd.f32 %v1860_v49, %v11463_v27  ;;  %v1862_v63 = vpop.f32.mrb[5].mxu0 }
 0x231   :  { %v9550_v31 = vadd.f32 %v1862_v63, %v11471_v39  ;;  %v1864_v34 = vpop.f32.mrb[6].mxu0 }
 0x232   :  { %2023 = vst [vmem:[#allocation3 + $0x79] ss:$2 sm:$0xff] %v9549_v48  ;;  %v9551_v3 = vadd.f32 %v1864_v34, %v11463_v27  ;;  %v1866_v18 = vpop.f32.mrb[7].mxu0  ;;  %2070 = vrot.lane.b32.xlu0 %v9549_v48, %s10465_s9 }
 0x233   :  { %2152 = vst [vmem:[#allocation3 + $0x91] ss:$2 sm:$0xff] %v9550_v31  ;;  %v9552_v44 = vadd.f32 %v1866_v18, %v11471_v39  ;;  %2199 = vrot.lane.b32.xlu1 %v9550_v31, %s10465_s9 }
 0x234   :  { %2025 = vst [vmem:[#allocation3 + $0xa9] ss:$2 sm:$0xff] %v9551_v3 }
 0x235   :  { %2154 = vst [vmem:[#allocation3 + $0xc1] ss:$2 sm:$0xff] %v9552_v44 }
 0x236   :  { %2197 = vrot.lane.b32.xlu0 %v9548_v47, %s10465_s9  ;;  %v3401_v47 = vld [vmem:[#allocation4 + $0xb2] sm:$0xff] }
 0x237   :  { %v1870_v57 = vpop.f32.mrb[8].mxu0  ;;  %3906 = vrot.lane.b32.xlu1 %v3838_v60, %s10465_s9  ;;  %v3457_v13 = vpack.c.bf16 %v3401_v47, %v3400_v59  ;;  %v3842_v60 = vpack.c.bf16 %v3787_v42, %v3786_v17  ;;  %v3792_v47 = vld [vmem:[#allocation4 + $0x120] sm:$0xff] }
 0x238   :  { %v9553_v32 = vadd.f32 %v1870_v57, %v11463_v27  ;;  %v1872_v46 = vpop.f32.mrb[9].mxu0  ;;  %v3789_v57 = vld [vmem:[#allocation4 + $0xf8] sm:$0xff] }
 0x239   :  { %v11540_v4 = vadd.f32 %v1872_v46, %v11471_v39  ;;  %v1874_v54 = vpop.f32.mrb[10].mxu0  ;;  %v2422_v46 = vld [vmem:[%s14752_s1 + $0x1f0] sm:$0xff] }
 0x23a   :  { %2027 = vst [vmem:[#allocation3 + $0xd9] ss:$2 sm:$0xff] %v9553_v32  ;;  %v11545_v10 = vadd.f32 %v1874_v54, %v11463_v27  ;;  %v1876_v20 = vpop.f32.mrb[11].mxu0  ;;  %3522 = vrot.lane.b32.xlu0 %v3454_v30, %s10465_s9  ;;  %2487 = vst.msk [vmem:[#allocation4 + $0x331] sm:$0xff] %vm1929_vm0, %v2422_v46  ;;  %v3412_v46 = vld [vmem:[#allocation4 + $0x13a] sm:$0xff] }
 0x23b   :  { %2156 = vst [vmem:[#allocation3 + $0xf1] ss:$2 sm:$0xff] %v11540_v4  ;;  %v11550_v23 = vadd.f32 %v1876_v20, %v11471_v39  ;;  %2072 = vrot.lane.b32.xlu1 %v9551_v3, %s10465_s9  ;;  %v3843_v20 = vpack.c.bf16 %v3789_v57, %v3788_v45  ;;  %v3846_v45 = vpack.c.bf16 %v3795_v36, %v3794_v41  ;;  %v3410_v57 = vld [vmem:[#allocation4 + $0x122] sm:$0xff]  ;;  %v3423_v36 = vld [vmem:[#allocation4 + $0x1ea] sm:$0xff] }
 0x23c   :  { %2029 = vst [vmem:[#allocation3 + $0x109] ss:$2 sm:$0xff] %v11545_v10  ;;  %v3422_v41 = vld [vmem:[#allocation4 + $0x1e2] sm:$0xff] }
 0x23d   :  { %2158 = vst [vmem:[#allocation3 + $0x121] ss:$2 sm:$0xff] %v11550_v23 }
 0x23e   :  { %3908 = vrot.lane.b32.xlu0 %v3839_v62, %s10465_s9 }
 0x23f   :  { %v1880_v11 = vpop.f32.mrb[12].mxu0  ;;  %3524 = vrot.lane.b32.xlu1 %v3455_v1, %s10465_s9 }
 0x240   :  { %v11567_v22 = vadd.f32 %v1880_v11, %v11463_v27  ;;  %v1882_v15 = vpop.f32.mrb[13].mxu0  ;;  %v3844_v11 = vpack.c.bf16 %v3791_v28, %v3790_v2  ;;  %v3415_v2 = vld [vmem:[#allocation4 + $0x15a] sm:$0xff] }
 0x241   :  { %v11570_v24 = vadd.f32 %v1882_v15, %v11471_v39  ;;  %v1884_v40 = vpop.f32.mrb[14].mxu0 }
 0x242   :  { %2031 = vst [vmem:[#allocation3 + $0x139] ss:$2 sm:$0xff] %v11567_v22  ;;  %v11574_v51 = vadd.f32 %v1884_v40, %v11463_v27  ;;  %v1886_v52 = vpop.f32.mrb[15].mxu0  ;;  %2201 = vrot.lane.b32.xlu0 %v9552_v44, %s10465_s9 }
 0x243   :  { %2160 = vst [vmem:[#allocation3 + $0x151] ss:$2 sm:$0xff] %v11570_v24  ;;  %v11579_v25 = vadd.f32 %v1886_v52, %v11471_v39  ;;  %3910 = vrot.lane.b32.xlu1 %v3840_v21, %s10465_s9  ;;  %v3406_v21 = vld [vmem:[#allocation4 + $0xf2] sm:$0xff] }
 0x244   :  { %2033 = vst [vmem:[#allocation3 + $0x169] ss:$2 sm:$0xff] %v11574_v51  ;;  %v3460_v16 = vpack.c.bf16 %v3407_v29, %v3406_v21  ;;  %v3291_v21 = vld [vmem:[#allocation3 + $0x1ba] sm:$0xff]  ;;  %v3849_v29 = vpack.c.bf16 %v3801_v9, %v3800_v6  ;;  %v3816_v9 = vld [vmem:[#allocation4 + $0x270] sm:$0xff] }
 0x245   :  { %2162 = vst [vmem:[#allocation3 + $0x181] ss:$2 sm:$0xff] %v11579_v25 }
 0x246   :  { %3526 = vrot.lane.b32.xlu0 %v3456_v7, %s10465_s9 }
 0x247   :  { %v1890_v49 = vpop.f32.mrb[16].mxu0  ;;  %2074 = vrot.lane.b32.xlu1 %v9553_v32, %s10465_s9  ;;  %v3405_v32 = vld [vmem:[#allocation4 + $0xe2] sm:$0xff] }
 0x248   :  { %v11595_v48 = vadd.f32 %v1890_v49, %v11463_v27  ;;  %v1892_v63 = vpop.f32.mrb[17].mxu0  ;;  %v3459_v1 = vpack.c.bf16 %v3405_v32, %v3404_v0  ;;  %v2362_v49 = vld [vmem:[%s14752_s1 + $0x10] sm:$0xff]  ;;  %v3797_v32 = vld [vmem:[#allocation4 + $0x158] sm:$0xff] }
 0x249   :  { %v11598_v31 = vadd.f32 %v1892_v63, %v11471_v39  ;;  %v1894_v34 = vpop.f32.mrb[18].mxu0  ;;  %2427 = vst.msk [vmem:[#allocation4 + $0x31] sm:$0xff] %vm1929_vm0, %v2362_v49  ;;  %v3411_v0 = vld [vmem:[#allocation4 + $0x12a] sm:$0xff] }
 0x24a   :  { %2035 = vst [vmem:[#allocation3 + $0x1c9] ss:$2 sm:$0xff] %v11595_v48  ;;  %v11608_v3 = vadd.f32 %v1894_v34, %v11463_v27  ;;  %v1896_v18 = vpop.f32.mrb[19].mxu0  ;;  %3912 = vrot.lane.b32.xlu0 %v3841_v55, %s10465_s9  ;;  %v3409_v55 = vld [vmem:[#allocation4 + $0x112] sm:$0xff]  ;;  %v3420_v49 = vld [vmem:[#allocation4 + $0x1ca] sm:$0xff] }
 0x24b   :  { %2164 = vst [vmem:[#allocation3 + $0x1e1] ss:$2 sm:$0xff] %v11598_v31  ;;  %v11615_v44 = vadd.f32 %v1896_v18, %v11471_v39  ;;  %3528 = vrot.lane.b32.xlu1 %v3457_v13, %s10465_s9  ;;  %v3845_v13 = vpack.c.bf16 %v3793_v19, %v3792_v47  ;;  %v3461_v17 = vpack.c.bf16 %v3409_v55, %v3408_v12  ;;  %v2364_v18 = vld [vmem:[%s14752_s1 + $0x20] sm:$0xff]  ;;  %v3418_v47 = vld [vmem:[#allocation4 + $0x1b2] sm:$0xff] }
 0x24c   :  { %2037 = vst [vmem:[#allocation3 + $0x1f9] ss:$2 sm:$0xff] %v11608_v3  ;;  %2429 = vst.msk [vmem:[#allocation4 + $0x49] sm:$0xff] %vm1929_vm0, %v2364_v18  ;;  %v3419_v19 = vld [vmem:[#allocation4 + $0x1ba] sm:$0xff]  ;;  %v3468_v18 = vpack.c.bf16 %v3423_v36, %v3422_v41 }
 0x24d   :  { %2166 = vst [vmem:[#allocation3 + $0x211] ss:$2 sm:$0xff] %v11615_v44  ;;  %v3466_v12 = vpack.c.bf16 %v3419_v19, %v3418_v47  ;;  %v3804_v55 = vld [vmem:[#allocation4 + $0x1e0] sm:$0xff]  ;;  %v3434_v47 = vld [vmem:[#allocation4 + $0x272] sm:$0xff] }
 0x24e   :  { %2203 = vrot.lane.b32.xlu0 %v11540_v4, %s10465_s9  ;;  %v3435_v19 = vld [vmem:[#allocation4 + $0x27a] sm:$0xff] }
 0x24f   :  { %v1900_v30 = vpop.f32.mrb[20].mxu0  ;;  %3914 = vrot.lane.b32.xlu1 %v3842_v60, %s10465_s9  ;;  %v3474_v41 = vpack.c.bf16 %v3435_v19, %v3434_v47  ;;  %v3820_v36 = vld [vmem:[#allocation4 + $0x2a0] sm:$0xff] }
 0x250   :  { %v11624_v61 = vadd.f32 %v1900_v30, %v11463_v27  ;;  %v1902_v5 = vpop.f32.mrb[21].mxu0 }
 0x251   :  { %v11633_v14 = vadd.f32 %v1902_v5, %v11471_v39  ;;  %v1904_v56 = vpop.f32.mrb[22].mxu0  ;;  %v3796_v5 = vld [vmem:[#allocation4 + $0x150] sm:$0xff] }
 0x252   :  { %2039 = vst [vmem:[#allocation3 + $0x229] ss:$2 sm:$0xff] %v11624_v61  ;;  %v11639_v4 = vadd.f32 %v1904_v56, %v11463_v27  ;;  %v1906_v54 = vpop.f32.mrb[23].mxu0  ;;  %3530 = vrot.lane.b32.xlu0 %v3458_v53, %s10465_s9  ;;  %v3847_v8 = vpack.c.bf16 %v3797_v32, %v3796_v5  ;;  %v3426_v5 = vld [vmem:[#allocation4 + $0x212] sm:$0xff]  ;;  %v3427_v32 = vld [vmem:[#allocation4 + $0x21a] sm:$0xff] }
 0x253   :  { %2168 = vst [vmem:[#allocation3 + $0x241] ss:$2 sm:$0xff] %v11633_v14  ;;  %v11644_v62 = vadd.f32 %v1906_v54, %v11471_v39  ;;  %2076 = vrot.lane.b32.xlu1 %v11545_v10, %s10465_s9  ;;  %v3798_v54 = vld [vmem:[#allocation4 + $0x168] sm:$0xff] }
 0x254   :  { %2041 = vst [vmem:[#allocation3 + $0x259] ss:$2 sm:$0xff] %v11639_v4 }
 0x255   :  { %2170 = vst [vmem:[#allocation3 + $0x271] ss:$2 sm:$0xff] %v11644_v62 }
 0x256   :  { %3916 = vrot.lane.b32.xlu0 %v3843_v20, %s10465_s9  ;;  %v3799_v20 = vld [vmem:[#allocation4 + $0x170] sm:$0xff] }
 0x257   :  { %v1910_v10 = vpop.f32.mrb[24].mxu0  ;;  %3532 = vrot.lane.b32.xlu1 %v3459_v1, %s10465_s9  ;;  %v3414_v1 = vld [vmem:[#allocation4 + $0x152] sm:$0xff] }
 0x258   :  { %v11661_v26 = vadd.f32 %v1910_v10, %v11463_v27  ;;  %v1912_v15 = vpop.f32.mrb[25].mxu0  ;;  %v3464_v28 = vpack.c.bf16 %v3415_v2, %v3414_v1  ;;  %v3416_v10 = vld [vmem:[#allocation4 + $0x16a] sm:$0xff]  ;;  %v3815_v1 = vld [vmem:[#allocation4 + $0x260] sm:$0xff] }
 0x259   :  { %v11664_v40 = vadd.f32 %v1912_v15, %v11471_v39  ;;  %v1914_v52 = vpop.f32.mrb[26].mxu0  ;;  %v3430_v2 = vld [vmem:[#allocation4 + $0x242] sm:$0xff] }
 0x25a   :  { %2043 = vst [vmem:[#allocation3 + $0x289] ss:$2 sm:$0xff] %v11661_v26  ;;  %v11668_v7 = vadd.f32 %v1914_v52, %v11463_v27  ;;  %v1916_v43 = vpop.f32.mrb[27].mxu0  ;;  %2205 = vrot.lane.b32.xlu0 %v11550_v23, %s10465_s9  ;;  %v2363_v23 = vld [vmem:[%s14752_s1 + $0x18] sm:$0xff] }
 0x25b   :  { %2172 = vst [vmem:[#allocation3 + $0x2a1] ss:$2 sm:$0xff] %v11664_v40  ;;  %v11674_v59 = vadd.f32 %v1916_v43, %v11471_v39  ;;  %3918 = vrot.lane.b32.xlu1 %v3844_v11, %s10465_s9  ;;  %2428 = vst.msk [vmem:[#allocation4 + $0x39] sm:$0xff] %vm1929_vm0, %v2363_v23  ;;  %v3290_v11 = vld [vmem:[#allocation3 + $0x1b2] sm:$0xff]  ;;  %v3802_v43 = vld [vmem:[#allocation4 + $0x1c8] sm:$0xff] }
 0x25c   :  { %2045 = vst [vmem:[#allocation3 + $0x2b9] ss:$2 sm:$0xff] %v11668_v7  ;;  %v3338_v15 = vpack.c.bf16 %v3291_v21, %v3290_v11  ;;  %v3421_v23 = vld [vmem:[#allocation4 + $0x1d2] sm:$0xff]  ;;  %v3433_v11 = vld [vmem:[#allocation4 + $0x262] sm:$0xff] }
 0x25d   :  { %2174 = vst [vmem:[#allocation3 + $0x2d1] ss:$2 sm:$0xff] %v11674_v59 }
 0x25e   :  { %3534 = vrot.lane.b32.xlu0 %v3460_v16, %s10465_s9  ;;  %v3803_v16 = vld [vmem:[#allocation4 + $0x1d0] sm:$0xff]  ;;  %3370 = vst.msk [vmem:[#allocation6 + $0x490] sm:$0xff] %vm1929_vm0, %v3338_v15 }
 0x25f   :  { %v1920_v63 = vpop.f32.mrb[28].mxu0  ;;  %2078 = vrot.lane.b32.xlu1 %v11567_v22, %s10465_s9 }
 0x260   :  { %v11691_v42 = vadd.f32 %v1920_v63, %v11463_v27  ;;  %v1922_v34 = vpop.f32.mrb[29].mxu0  ;;  %v3467_v63 = vpack.c.bf16 %v3421_v23, %v3420_v49 }
 0x261   :  { %v11697_v60 = vadd.f32 %v1922_v34, %v11471_v39  ;;  %v1924_v35 = vpop.f32.mrb[30].mxu0  ;;  %v3807_v34 = vld [vmem:[#allocation4 + $0x200] sm:$0xff] }
 0x262   :  { %2047 = vst [vmem:[#allocation3 + $0x2e9] ss:$2 sm:$0xff] %v11691_v42  ;;  %v11705_v22 = vadd.f32 %v1924_v35, %v11463_v27  ;;  %v1926_v53 = vpop.f32.mrb[31].mxu0  ;;  %3920 = vrot.lane.b32.xlu0 %v3845_v13, %s10465_s9  ;;  %v3462_v27 = vpack.c.bf16 %v3411_v0, %v3410_v57  ;;  %v3808_v35 = vld [vmem:[#allocation4 + $0x210] sm:$0xff]  ;;  %v3810_v0 = vld [vmem:[#allocation4 + $0x228] sm:$0xff] }
 0x263   :  { %2176 = vst [vmem:[#allocation3 + $0x301] ss:$2 sm:$0xff] %v11697_v60  ;;  %v11711_v30 = vadd.f32 %v1926_v53, %v11471_v39  ;;  %3536 = vrot.lane.b32.xlu1 %v3461_v17, %s10465_s9  ;;  %v3413_v39 = vld [vmem:[#allocation4 + $0x142] sm:$0xff]  ;;  %v3806_v17 = vld [vmem:[#allocation4 + $0x1f8] sm:$0xff] }
 0x264   :  { %2049 = vst [vmem:[#allocation3 + $0x319] ss:$2 sm:$0xff] %v11705_v22  ;;  %v3463_v56 = vpack.c.bf16 %v3413_v39, %v3412_v46  ;;  %v3424_v53 = vld [vmem:[#allocation4 + $0x1fa] sm:$0xff]  ;;  %v3470_v46 = vpack.c.bf16 %v3427_v32, %v3426_v5 }
 0x265   :  { %2178 = vst [vmem:[#allocation3 + $0x331] ss:$2 sm:$0xff] %v11711_v30  ;;  %v3812_v39 = vld [vmem:[#allocation4 + $0x240] sm:$0xff] }
 0x266   :  { %2207 = vrot.lane.b32.xlu0 %v11570_v24, %s10465_s9  ;;  %v3848_v24 = vpack.c.bf16 %v3799_v20, %v3798_v54 }
 0x267   :  { %3922 = vrot.lane.b32.xlu1 %v3846_v45, %s10465_s9  ;;  %v3853_v45 = vpack.c.bf16 %v3809_v38, %v3808_v35  ;;  %v3821_v38 = vld [vmem:[#allocation4 + $0x2a8] sm:$0xff] }
 0x268   :  { %v3859_v32 = vpack.c.bf16 %v3821_v38, %v3820_v36  ;;  %v3441_v38 = vld [vmem:[#allocation4 + $0x2c2] sm:$0xff] }
 0x26a   :  { %3538 = vrot.lane.b32.xlu0 %v3462_v27, %s10465_s9  ;;  %v3811_v27 = vld [vmem:[#allocation4 + $0x230] sm:$0xff] }
 0x26b   :  { %2080 = vrot.lane.b32.xlu1 %v11574_v51, %s10465_s9  ;;  %v3417_v51 = vld [vmem:[#allocation4 + $0x172] sm:$0xff] }
 0x26c   :  { %v3465_v52 = vpack.c.bf16 %v3417_v51, %v3416_v10  ;;  %v3817_v10 = vld [vmem:[#allocation4 + $0x278] sm:$0xff] }
 0x26e   :  { %3924 = vrot.lane.b32.xlu0 %v3847_v8, %s10465_s9  ;;  %v3813_v8 = vld [vmem:[#allocation4 + $0x248] sm:$0xff] }
 0x26f   :  { %3540 = vrot.lane.b32.xlu1 %v3463_v56, %s10465_s9  ;;  %v3428_v56 = vld [vmem:[#allocation4 + $0x22a] sm:$0xff]  ;;  %v3855_v54 = vpack.c.bf16 %v3813_v8, %v3812_v39 }
 0x272   :  { %2209 = vrot.lane.b32.xlu0 %v11579_v25, %s10465_s9  ;;  %v3850_v25 = vpack.c.bf16 %v3803_v16, %v3802_v43  ;;  %v3819_v43 = vld [vmem:[#allocation4 + $0x290] sm:$0xff] }
 0x273   :  { %3926 = vrot.lane.b32.xlu1 %v3848_v24, %s10465_s9  ;;  %v3814_v24 = vld [vmem:[#allocation4 + $0x258] sm:$0xff] }
 0x276   :  { %3542 = vrot.lane.b32.xlu0 %v3464_v28, %s10465_s9  ;;  %v3431_v28 = vld [vmem:[#allocation4 + $0x24a] sm:$0xff] }
 0x277   :  { %2082 = vrot.lane.b32.xlu1 %v11595_v48, %s10465_s9  ;;  %v3805_v48 = vld [vmem:[#allocation4 + $0x1e8] sm:$0xff]  ;;  %v3472_v6 = vpack.c.bf16 %v3431_v28, %v3430_v2  ;;  %v3822_v2 = vld [vmem:[#allocation4 + $0x2b8] sm:$0xff]  ;;  %v3823_v28 = vld [vmem:[#allocation4 + $0x2c0] sm:$0xff] }
 0x278   :  { %v3851_v13 = vpack.c.bf16 %v3805_v48, %v3804_v55 }
 0x27a   :  { %3928 = vrot.lane.b32.xlu0 %v3849_v29, %s10465_s9  ;;  %v3857_v29 = vpack.c.bf16 %v3817_v10, %v3816_v9 }
 0x27b   :  { %3544 = vrot.lane.b32.xlu1 %v3465_v52, %s10465_s9 }
 0x27e   :  { %2211 = vrot.lane.b32.xlu0 %v11598_v31, %s10465_s9  ;;  %v3852_v31 = vpack.c.bf16 %v3807_v34, %v3806_v17 }
 0x27f   :  { %3930 = vrot.lane.b32.xlu1 %v3850_v25, %s10465_s9 }
 0x282   :  { %3546 = vrot.lane.b32.xlu0 %v3466_v12, %s10465_s9 }
 0x283   :  { %2084 = vrot.lane.b32.xlu1 %v11608_v3, %s10465_s9  ;;  %v3425_v3 = vld [vmem:[#allocation4 + $0x202] sm:$0xff] }
 0x284   :  { %v3469_v57 = vpack.c.bf16 %v3425_v3, %v3424_v53  ;;  %v3436_v53 = vld [vmem:[#allocation4 + $0x28a] sm:$0xff]  ;;  %v3437_v3 = vld [vmem:[#allocation4 + $0x292] sm:$0xff] }
 0x286   :  { %3932 = vrot.lane.b32.xlu0 %v3851_v13, %s10465_s9 }
 0x287   :  { %3548 = vrot.lane.b32.xlu1 %v3467_v63, %s10465_s9 }
 0x28a   :  { %2213 = vrot.lane.b32.xlu0 %v11615_v44, %s10465_s9  ;;  %v3854_v44 = vpack.c.bf16 %v3811_v27, %v3810_v0 }
 0x28b   :  { %3934 = vrot.lane.b32.xlu1 %v3852_v31, %s10465_s9 }
 0x28e   :  { %3550 = vrot.lane.b32.xlu0 %v3468_v18, %s10465_s9 }
 0x28f   :  { %2086 = vrot.lane.b32.xlu1 %v11624_v61, %s10465_s9  ;;  %v3429_v61 = vld [vmem:[#allocation4 + $0x232] sm:$0xff] }
 0x290   :  { %v3471_v20 = vpack.c.bf16 %v3429_v61, %v3428_v56  ;;  %v3475_v56 = vpack.c.bf16 %v3437_v3, %v3436_v53 }
 0x292   :  { %3936 = vrot.lane.b32.xlu0 %v3853_v45, %s10465_s9 }
 0x293   :  { %3552 = vrot.lane.b32.xlu1 %v3469_v57, %s10465_s9 }
 0x296   :  { %2215 = vrot.lane.b32.xlu0 %v11633_v14, %s10465_s9  ;;  %v3856_v14 = vpack.c.bf16 %v3815_v1, %v3814_v24 }
 0x297   :  { %3938 = vrot.lane.b32.xlu1 %v3854_v44, %s10465_s9 }
 0x29a   :  { %3554 = vrot.lane.b32.xlu0 %v3470_v46, %s10465_s9 }
 0x29b   :  { %2088 = vrot.lane.b32.xlu1 %v11639_v4, %s10465_s9  ;;  %v3432_v4 = vld [vmem:[#allocation4 + $0x25a] sm:$0xff] }
 0x29c   :  { %v3473_v15 = vpack.c.bf16 %v3433_v11, %v3432_v4 }
 0x29e   :  { %3940 = vrot.lane.b32.xlu0 %v3855_v54, %s10465_s9 }
 0x29f   :  { %3556 = vrot.lane.b32.xlu1 %v3471_v20, %s10465_s9 }
 0x2a2   :  { %2217 = vrot.lane.b32.xlu0 %v11644_v62, %s10465_s9  ;;  %v3818_v62 = vld [vmem:[#allocation4 + $0x288] sm:$0xff] }
 0x2a3   :  { %3942 = vrot.lane.b32.xlu1 %v3856_v14, %s10465_s9  ;;  %v3858_v25 = vpack.c.bf16 %v3819_v43, %v3818_v62  ;;  %v3860_v62 = vpack.c.bf16 %v3823_v28, %v3822_v2  ;;  %v10332_v2 = vld [vmem:[%s14754_s3 + $0x110] sm:$0xff]  }
 0x2a4   :  { %v2071_v51 = vpop.permute.xlu0 %2070 }
 0x2a5   :  { %2119 = vst [vmem:[#allocation3 + $0x7a] ss:$2 sm:$0xff] %v2071_v51  ;;  %v2200_v21 = vpop.permute.xlu1 %2199 }
 0x2a6   :  { %2248 = vst [vmem:[#allocation3 + $0x92] ss:$2 sm:$0xff] %v2200_v21  ;;  %3558 = vrot.lane.b32.xlu0 %v3472_v6, %s10465_s9 }
 0x2a7   :  { %2090 = vrot.lane.b32.xlu1 %v11661_v26, %s10465_s9 }
 0x2a8   :  { %v2198_v52 = vpop.permute.xlu0 %2197 }
 0x2a9   :  { %2246 = vst [vmem:[#allocation3 + $0x62] ss:$2 sm:$0xff] %v2198_v52  ;;  %v3907_v16 = vpop.permute.xlu1 %3906  ;;  %v3439_v52 = vld [vmem:[#allocation4 + $0x2aa] sm:$0xff] }
 0x2aa   :  { %3944 = vrot.lane.b32.xlu0 %v3857_v29, %s10465_s9 }
 0x2ab   :  { %3560 = vrot.lane.b32.xlu1 %v3473_v15, %s10465_s9  ;;  %v3438_v15 = vld [vmem:[#allocation4 + $0x2a2] sm:$0xff] }
 0x2ac   :  { %v3650_v12 = vld [vmem:[#allocation3 + $0x78] sm:$0xff]  ;;  %v3651_v55 = vld [vmem:[#allocation3 + $0x80] sm:$0xff]  ;;  %v3523_v48 = vpop.permute.xlu0 %3522 }
 0x2ad   :  { %v3268_v49 = vld [vmem:[#allocation3 + $0x7a] sm:$0xff]  ;;  %v3710_v23 = vpack.c.bf16 %v3651_v55, %v3650_v12  ;;  %v2073_v26 = vpop.permute.xlu1 %2072  ;;  %v3652_v13 = vld [vmem:[#allocation3 + $0x90] sm:$0xff]  ;;  %v3269_v17 = vld [vmem:[#allocation3 + $0x82] sm:$0xff] }
 0x2ae   :  { %v3653_v63 = vld [vmem:[#allocation3 + $0x98] sm:$0xff]  ;;  %2121 = vst [vmem:[#allocation3 + $0xaa] ss:$2 sm:$0xff] %v2073_v26  ;;  %2219 = vrot.lane.b32.xlu0 %v11664_v40, %s10465_s9  ;;  %v3327_v31 = vpack.c.bf16 %v3269_v17, %v3268_v49  ;;  %v4419_v24 = vld [vmem:[#allocation3 + $0x82] sm:$0xff]  ;;  %v3824_v26 = vld [vmem:[#allocation4 + $0x2d0] sm:$0xff] }
 0x2af   :  { %v3711_v34 = vpack.c.bf16 %v3653_v63, %v3652_v13  ;;  %v3270_v18 = vld [vmem:[#allocation3 + $0x92] sm:$0xff]  ;;  %v3271_v35 = vld [vmem:[#allocation3 + $0x9a] sm:$0xff]  ;;  %3742 = vst.msk [vmem:[#allocation6 + $0x138] sm:$0xff] %vm1929_vm0, %v3710_v23  ;;  %3946 = vrot.lane.b32.xlu1 %v3858_v25, %s10465_s9 }
 0x2b0   :  { %v3328_v45 = vpack.c.bf16 %v3271_v35, %v3270_v18  ;;  %3998 = vst.msk [vmem:[#allocation6 + $0x138] sm:$0xff] %vm2841_vm3, %v3907_v16  ;;  %v3266_v57 = vld [vmem:[#allocation3 + $0x62] sm:$0xff]  ;;  %v3267_v0 = vld [vmem:[#allocation3 + $0x6a] sm:$0xff]  ;;  %v3909_v40 = vpop.permute.xlu0 %3908  ;;  %v4418_v20 = vld [vmem:[#allocation3 + $0x7a] sm:$0xff] }
 0x2b1   :  { %3743 = vst.msk [vmem:[#allocation6 + $0x180] sm:$0xff] %vm1929_vm0, %v3711_v34  ;;  %3359 = vst.msk [vmem:[#allocation6 + $0x178] sm:$0xff] %vm1929_vm0, %v3327_v31  ;;  %v4416_v27 = vld [vmem:[#allocation3 + $0x62] sm:$0xff]  ;;  %v3326_v44 = vpack.c.bf16 %v3267_v0, %v3266_v57  ;;  %v3525_v5 = vpop.permute.xlu1 %3524  ;;  %v4417_v46 = vld [vmem:[#allocation3 + $0x6a] sm:$0xff]  ;;  %v4478_v6 = vpack.c.bf16 %v4419_v24, %v4418_v20  ;;  %v3476_v34 = vpack.c.bf16 %v3439_v52, %v3438_v15 }
 0x2b2   :  { %3999 = vst.msk [vmem:[#allocation6 + $0x180] sm:$0xff] %vm2841_vm3, %v3909_v40  ;;  %3615 = vst.msk [vmem:[#allocation6 + $0x178] sm:$0xff] %vm2841_vm3, %v3525_v5  ;;  %3562 = vrot.lane.b32.xlu0 %v3474_v41, %s10465_s9  ;;  %v4032_v39 = vld [vmem:[#allocation3 + $0x61] sm:$0xff]  ;;  %v4033_v8 = vld [vmem:[#allocation3 + $0x69] sm:$0xff]  ;;  %v4477_v61 = vpack.c.bf16 %v4417_v46, %v4416_v27 }
 0x2b3   :  { %3360 = vst.msk [vmem:[#allocation6 + $0x1c0] sm:$0xff] %vm1929_vm0, %v3328_v45  ;;  %3358 = vst.msk [vmem:[#allocation6 + $0x130] sm:$0xff] %vm1929_vm0, %v3326_v44  ;;  %2092 = vrot.lane.b32.xlu1 %v11668_v7, %s10465_s9  ;;  %v4093_v54 = vpack.c.bf16 %v4033_v8, %v4032_v39  ;;  %v4034_v1 = vld [vmem:[#allocation3 + $0x79] sm:$0xff]  ;;  %v4035_v9 = vld [vmem:[#allocation3 + $0x81] sm:$0xff] }
 0x2b4   :  { %3614 = vst.msk [vmem:[#allocation6 + $0x130] sm:$0xff] %vm2841_vm3, %v3523_v48  ;;  %v2202_v14 = vpop.permute.xlu0 %2201  ;;  %v4094_v7 = vpack.c.bf16 %v4035_v9, %v4034_v1  ;;  %v4420_v25 = vld [vmem:[#allocation3 + $0x92] sm:$0xff]  ;;  %v4421_v47 = vld [vmem:[#allocation3 + $0x9a] sm:$0xff]  ;;  %v11807_v8 = vld [vmem:[#allocation4 + $0x2e8] sm:$0xff] }
 0x2b5   :  { %2250 = vst [vmem:[#allocation3 + $0xc2] ss:$2 sm:$0xff] %v2202_v14  ;;  %v3654_v10 = vld [vmem:[#allocation3 + $0xa8] sm:$0xff]  ;;  %v3655_v51 = vld [vmem:[#allocation3 + $0xb0] sm:$0xff]  ;;  %v3911_v4 = vpop.permute.xlu1 %3910  ;;  %4509 = vst.msk [vmem:[#allocation6 + $0x100] sm:$0xff] %vm1929_vm0, %v4477_v61  ;;  %v4479_v55 = vpack.c.bf16 %v4421_v47, %v4420_v25 }
 0x2b6   :  { %v3272_v11 = vld [vmem:[#allocation3 + $0xaa] sm:$0xff]  ;;  %4125 = vst.msk [vmem:[#allocation6 + $0xf8] sm:$0xff] %vm1929_vm0, %v4093_v54  ;;  %2974 = vst.msk [vmem:[#allocation6 + $0x128] sm:$0xff] %vm1929_vm0, %v4093_v54  ;;  %v3712_v21 = vpack.c.bf16 %v3655_v51, %v3654_v10  ;;  %3948 = vrot.lane.b32.xlu0 %v3859_v32, %s10465_s9  ;;  %v3273_v29 = vld [vmem:[#allocation3 + $0xb2] sm:$0xff] }
 0x2b7   :  { %4510 = vst.msk [vmem:[#allocation6 + $0x148] sm:$0xff] %vm1929_vm0, %v4478_v6  ;;  %3564 = vrot.lane.b32.xlu1 %v3475_v56, %s10465_s9  ;;  %v5986_v43 = vld [vmem:[#allocation6 + $0x138] sm:$0xff]  ;;  %v3329_v16 = vpack.c.bf16 %v3273_v29, %v3272_v11  ;;  %4126 = vst.msk [vmem:[#allocation6 + $0x140] sm:$0xff] %vm1929_vm0, %v4094_v7  ;;  %v10330_v12 = vld [vmem:[%s14754_s3 + $0x100] sm:$0xff]  }
 0x2b8   :  { %2975 = vst.msk [vmem:[#allocation6 + $0x170] sm:$0xff] %vm1929_vm0, %v4094_v7  ;;  %3744 = vst.msk [vmem:[#allocation6 + $0x1c8] sm:$0xff] %vm1929_vm0, %v3712_v21  ;;  %v3527_v19 = vpop.permute.xlu0 %3526  ;;  %7171 = vmatprep.mubr.bf16.mxu1 %v5986_v43  ;;  %v4036_v48 = vld [vmem:[#allocation3 + $0x91] sm:$0xff]  ;;  %v4037_v49 = vld [vmem:[#allocation3 + $0x99] sm:$0xff] }
 0x2b9   :  { %4000 = vst.msk [vmem:[#allocation6 + $0x1c8] sm:$0xff] %vm2841_vm3, %v3911_v4  ;;  %3616 = vst.msk [vmem:[#allocation6 + $0x1c0] sm:$0xff] %vm2841_vm3, %v3527_v19  ;;  %v2075_v23 = vpop.permute.xlu1 %2074  ;;  %v3825_v13 = vld [vmem:[#allocation4 + $0x2d8] sm:$0xff]  ;;  %v5995_v63 = vld [vmem:[#allocation6 + $0x180] sm:$0xff]  ;;  %v4095_v17 = vpack.c.bf16 %v4037_v49, %v4036_v48 }
 0x2ba   :  { %3361 = vst.msk [vmem:[#allocation6 + $0x208] sm:$0xff] %vm1929_vm0, %v3329_v16  ;;  %2123 = vst [vmem:[#allocation3 + $0xda] ss:$2 sm:$0xff] %v2075_v23  ;;  %2221 = vrot.lane.b32.xlu0 %v11674_v59, %s10465_s9  ;;  %v3440_v31 = vld [vmem:[#allocation4 + $0x2ba] sm:$0xff]  ;;  %v4422_v41 = vld [vmem:[#allocation3 + $0xaa] sm:$0xff]  ;;  %v3861_v46 = vpack.c.bf16 %v3825_v13, %v3824_v26 }
 0x2bb   :  { %4511 = vst.msk [vmem:[#allocation6 + $0x190] sm:$0xff] %vm1929_vm0, %v4479_v55  ;;  %v4423_v36 = vld [vmem:[#allocation3 + $0xb2] sm:$0xff]  ;;  %v4038_v18 = vld [vmem:[#allocation3 + $0xa9] sm:$0xff]  ;;  %3950 = vrot.lane.b32.xlu1 %v3860_v62, %s10465_s9  ;;  %4127 = vst.msk [vmem:[#allocation6 + $0x188] sm:$0xff] %vm1929_vm0, %v4095_v17  ;;  %v3477_v61 = vpack.c.bf16 %v3441_v38, %v3440_v31 }
 0x2bc   :  { %v5985_v35 = vld [vmem:[#allocation6 + $0x130] sm:$0xff]  ;;  %v4480_v53 = vpack.c.bf16 %v4423_v36, %v4422_v41  ;;  %2976 = vst.msk [vmem:[#allocation6 + $0x1b8] sm:$0xff] %vm1929_vm0, %v4095_v17  ;;  %v3656_v45 = vld [vmem:[#allocation3 + $0xc0] sm:$0xff]  ;;  %v3657_v57 = vld [vmem:[#allocation3 + $0xc8] sm:$0xff]  ;;  %v3913_v59 = vpop.permute.xlu0 %3912 }
 0x2bd   :  { %v4039_v3 = vld [vmem:[#allocation3 + $0xb1] sm:$0xff]  ;;  %7172 = vmatmul.mubr.bf16.vlgmr.msra.gmra.mrb[0].mxu1 %v5985_v35  ;;  %v3274_v0 = vld [vmem:[#allocation3 + $0xc2] sm:$0xff]  ;;  %v3713_v27 = vpack.c.bf16 %v3657_v57, %v3656_v45  ;;  %v3529_v44 = vpop.permute.xlu1 %3528  ;;  %v3443_v29 = vld [vmem:[#allocation4 + $0x2da] sm:$0xff] }
 0x2be   :  { %v4096_v40 = vpack.c.bf16 %v4039_v3, %v4038_v18  ;;  %7397 = vmatpush1.bf16.msra.mxu1 %v10330_v12  ;;  %7179 = vmatprep.mubr.bf16.mxu1 %v5995_v63  ;;  %v3275_v5 = vld [vmem:[#allocation3 + $0xca] sm:$0xff]  ;;  %4512 = vst.msk [vmem:[#allocation6 + $0x1d8] sm:$0xff] %vm1929_vm0, %v4480_v53  ;;  %v4424_v54 = vld [vmem:[#allocation3 + $0xc2] sm:$0xff]  ;;  %v5994_v14 = vld [vmem:[#allocation6 + $0x178] sm:$0xff] }
 0x2bf   :  { %v10331_v32 = vld [vmem:[%s14754_s3 + $0x108] sm:$0xff]   ;;  %3617 = vst.msk [vmem:[#allocation6 + $0x208] sm:$0xff] %vm2841_vm3, %v3529_v44  ;;  %3566 = vrot.lane.b32.xlu0 %v3476_v34, %s10465_s9  ;;  %v3330_v39 = vpack.c.bf16 %v3275_v5, %v3274_v0  ;;  %v11809_v56 = vld [vmem:[#allocation4 + $0x2f0] sm:$0xff]  ;;  %7398 = vmatprep.subr.bf16.mxu1 %v10464_v33  ;;  %v2497_v55 = vld [vmem:[#allocation3 + $0x60] sm:$0xff] }
 0x2c0   :  { %4128 = vst.msk [vmem:[#allocation6 + $0x1d0] sm:$0xff] %vm1929_vm0, %v4096_v40  ;;  %3745 = vst.msk [vmem:[#allocation6 + $0x210] sm:$0xff] %vm1929_vm0, %v3713_v27  ;;  %2094 = vrot.lane.b32.xlu1 %v11691_v42, %s10465_s9  ;;  %v4425_v20 = vld [vmem:[#allocation3 + $0xca] sm:$0xff]  ;;  %v4040_v24 = vld [vmem:[#allocation3 + $0xc1] sm:$0xff]  ;;  %v2204_v1 = vpop.permute.xlu0 %2203  ;;  %v3862_v52 = vpack.c.bf16 %v11809_v56, %v11807_v8 }
 0x2c1   :  { %4001 = vst.msk [vmem:[#allocation6 + $0x210] sm:$0xff] %vm2841_vm3, %v3913_v59  ;;  %v4481_v28 = vpack.c.bf16 %v4425_v20, %v4424_v54  ;;  %v4041_v6 = vld [vmem:[#allocation3 + $0xc9] sm:$0xff]  ;;  %2252 = vst [vmem:[#allocation3 + $0xf2] ss:$2 sm:$0xff] %v2204_v1  ;;  %v3658_v9 = vld [vmem:[#allocation3 + $0xd8] sm:$0xff]  ;;  %v3915_v42 = vpop.permute.xlu1 %3914 }
 0x2c2   :  { %3362 = vst.msk [vmem:[#allocation6 + $0x250] sm:$0xff] %vm1929_vm0, %v3330_v39  ;;  %v3659_v10 = vld [vmem:[#allocation3 + $0xe0] sm:$0xff]  ;;  %v11821_v4 = vld [vmem:[#allocation4 + $0x2d2] sm:$0xff]  ;;  %7399 = vmatpush1.bf16.msra.mxu1 %v10331_v32  ;;  %v4097_v11 = vpack.c.bf16 %v4041_v6, %v4040_v24  ;;  %v6004_v15 = vld [vmem:[#allocation6 + $0x1c8] sm:$0xff] }
 0x2c3   :  { %v3276_v51 = vld [vmem:[#allocation3 + $0xda] sm:$0xff]  ;;  %v3714_v7 = vpack.c.bf16 %v3659_v10, %v3658_v9  ;;  %3952 = vrot.lane.b32.xlu0 %v3861_v46, %s10465_s9  ;;  %v3277_v21 = vld [vmem:[#allocation3 + $0xe2] sm:$0xff]  ;;  %7400 = vmatprep.subr.bf16.mxu1 %v10464_v33  ;;  %4513 = vst.msk [vmem:[#allocation6 + $0x220] sm:$0xff] %vm1929_vm0, %v4481_v28  ;;  %v3478_v63 = vpack.c.bf16 %v3443_v29, %v11821_v4  ;;  %v11844_v17 = vld [vmem:[#allocation4 + $0x2ea] sm:$0xff] }
 0x2c4   :  { %3568 = vrot.lane.b32.xlu1 %v3477_v61, %s10465_s9  ;;  %v3331_v62 = vpack.c.bf16 %v3277_v21, %v3276_v51  ;;  %4129 = vst.msk [vmem:[#allocation6 + $0x218] sm:$0xff] %vm1929_vm0, %v4097_v11  ;;  %v4426_v43 = vld [vmem:[#allocation3 + $0xda] sm:$0xff]  ;;  %v4427_v16 = vld [vmem:[#allocation3 + $0xe2] sm:$0xff]  ;;  %v3531_v47 = vpop.permute.xlu0 %3530  ;;  %v3445_v36 = vld [vmem:[#allocation4 + $0x2f2] sm:$0xff] }
 0x2c5   :  { %v4042_v25 = vld [vmem:[#allocation3 + $0xd9] sm:$0xff]  ;;  %3746 = vst.msk [vmem:[#allocation6 + $0x258] sm:$0xff] %vm1929_vm0, %v3714_v7  ;;  %7180 = vmatmul.mubr.bf16.gmra.mrb[4].mxu1 %v5994_v14  ;;  %v4482_v19 = vpack.c.bf16 %v4427_v16, %v4426_v43  ;;  %v4043_v12 = vld [vmem:[#allocation3 + $0xe1] sm:$0xff]  ;;  %v2077_v48 = vpop.permute.xlu1 %2076  ;;  %v2501_v38 = vld [vmem:[#allocation3 + $0x90] sm:$0xff]  ;;  %v3479_v61 = vpack.c.bf16 %v3445_v36, %v11844_v17 }
 0x2c6   :  { %4002 = vst.msk [vmem:[#allocation6 + $0x258] sm:$0xff] %vm2841_vm3, %v3915_v42  ;;  %3618 = vst.msk [vmem:[#allocation6 + $0x250] sm:$0xff] %vm2841_vm3, %v3531_v47  ;;  %7187 = vmatprep.mubr.bf16.mxu1 %v6004_v15  ;;  %v11834_v49 = vld [vmem:[#allocation4 + $0x300] sm:$0xff]  ;;  %v11836_v23 = vld [vmem:[#allocation4 + $0x308] sm:$0xff]  ;;  %7401 = vmatpush1.bf16.msra.mxu1 %v10332_v2  ;;  %v4098_v13 = vpack.c.bf16 %v4043_v12, %v4042_v25 }
 0x2c7   :  { %3363 = vst.msk [vmem:[#allocation6 + $0x298] sm:$0xff] %vm1929_vm0, %v3331_v62  ;;  %v10333_v26 = vld [vmem:[%s14754_s3 + $0x118] sm:$0xff]   ;;  %2125 = vst [vmem:[#allocation3 + $0x10a] ss:$2 sm:$0xff] %v2077_v48  ;;  %2223 = vrot.lane.b32.xlu0 %v11697_v60, %s10465_s9  ;;  %7402 = vmatprep.subr.bf16.mxu1 %v10464_v33  ;;  %v2498_v34 = vld [vmem:[#allocation3 + $0x68] sm:$0xff]  ;;  %v3863_v32 = vpack.c.bf16 %v11836_v23, %v11834_v49 }
 0x2c8   :  { %4514 = vst.msk [vmem:[#allocation6 + $0x268] sm:$0xff] %vm1929_vm0, %v4482_v19  ;;  %v2499_v31 = vld [vmem:[#allocation3 + $0x78] sm:$0xff]  ;;  %v2500_v41 = vld [vmem:[#allocation3 + $0x80] sm:$0xff]  ;;  %3954 = vrot.lane.b32.xlu1 %v3862_v52, %s10465_s9  ;;  %4130 = vst.msk [vmem:[#allocation6 + $0x260] sm:$0xff] %vm1929_vm0, %v4098_v13  ;;  %v2557_v18 = vpack.c.bf16 %v2498_v34, %v2497_v55  ;;  %v3917_v45 = vpop.permute.xlu0 %3916 }
 0x2c9   :  { %v2558_v35 = vpack.c.bf16 %v2500_v41, %v2499_v31  ;;  %v2502_v60 = vld [vmem:[#allocation3 + $0x98] sm:$0xff]  ;;  %v3660_v53 = vld [vmem:[#allocation3 + $0xf0] sm:$0xff]  ;;  %v3533_v40 = vpop.permute.xlu1 %3532  ;;  %v6003_v27 = vld [vmem:[#allocation6 + $0x1c0] sm:$0xff] }
 0x2ca   :  { %v3661_v3 = vld [vmem:[#allocation3 + $0xf8] sm:$0xff]  ;;  %v2559_v59 = vpack.c.bf16 %v2502_v60, %v2501_v38  ;;  %7403 = vmatpush1.bf16.msra.mxu1 %v10333_v26  ;;  %v10334_v5 = vld [vmem:[%s14754_s3 + $0x120] sm:$0xff]   ;;  %2589 = vst.msk [vmem:[#allocation6 + $0x120] sm:$0xff] %vm1929_vm0, %v2557_v18  ;;  %v6013_v39 = vld [vmem:[#allocation6 + $0x210] sm:$0xff] }
 0x2cb   :  { %v3278_v57 = vld [vmem:[#allocation3 + $0xf2] sm:$0xff]  ;;  %v3715_v0 = vpack.c.bf16 %v3661_v3, %v3660_v53  ;;  %v3279_v44 = vld [vmem:[#allocation3 + $0xfa] sm:$0xff]  ;;  %2590 = vst.msk [vmem:[#allocation6 + $0x168] sm:$0xff] %vm1929_vm0, %v2558_v35  ;;  %3570 = vrot.lane.b32.xlu0 %v3478_v63, %s10465_s9  ;;  %7404 = vmatprep.subr.bf16.mxu1 %v10464_v33  ;;  %v10335_v28 = vld [vmem:[%s14754_s3 + $0x128] sm:$0xff]  }
 0x2cc   :  { %3619 = vst.msk [vmem:[#allocation6 + $0x298] sm:$0xff] %vm2841_vm3, %v3533_v40  ;;  %v3332_v46 = vpack.c.bf16 %v3279_v44, %v3278_v57  ;;  %v4428_v8 = vld [vmem:[#allocation3 + $0xf2] sm:$0xff]  ;;  %v4429_v56 = vld [vmem:[#allocation3 + $0xfa] sm:$0xff]  ;;  %2096 = vrot.lane.b32.xlu1 %v11705_v22, %s10465_s9  ;;  %v2206_v1 = vpop.permute.xlu0 %2205  ;;  %v3446_v11 = vld [vmem:[#allocation4 + $0x302] sm:$0xff] }
 0x2cd   :  { %2591 = vst.msk [vmem:[#allocation6 + $0x1b0] sm:$0xff] %vm1929_vm0, %v2559_v59  ;;  %3747 = vst.msk [vmem:[#allocation6 + $0x2a0] sm:$0xff] %vm1929_vm0, %v3715_v0  ;;  %v4483_v54 = vpack.c.bf16 %v4429_v56, %v4428_v8  ;;  %v4044_v20 = vld [vmem:[#allocation3 + $0xf1] sm:$0xff]  ;;  %v4045_v24 = vld [vmem:[#allocation3 + $0xf9] sm:$0xff]  ;;  %7188 = vmatmul.mubr.bf16.gmra.mrb[8].mxu1 %v6003_v27  ;;  %v3919_v10 = vpop.permute.xlu1 %3918 }
 0x2ce   :  { %4003 = vst.msk [vmem:[#allocation6 + $0x2a0] sm:$0xff] %vm2841_vm3, %v3917_v45  ;;  %v3830_v14 = vld [vmem:[#allocation4 + $0x318] sm:$0xff]  ;;  %v3831_v2 = vld [vmem:[#allocation4 + $0x320] sm:$0xff]  ;;  %v4099_v6 = vpack.c.bf16 %v4045_v24, %v4044_v20  ;;  %2254 = vst [vmem:[#allocation3 + $0x122] ss:$2 sm:$0xff] %v2206_v1  ;;  %7195 = vmatprep.mubr.bf16.mxu1 %v6013_v39  ;;  %7405 = vmatpush1.bf16.msra.mxu1 %v10334_v5 }
 0x2cf   :  { %3364 = vst.msk [vmem:[#allocation6 + $0x2e0] sm:$0xff] %vm1929_vm0, %v3332_v46  ;;  %v3662_v22 = vld [vmem:[#allocation3 + $0x108] sm:$0xff]  ;;  %v3663_v9 = vld [vmem:[#allocation3 + $0x110] sm:$0xff]  ;;  %4515 = vst.msk [vmem:[#allocation6 + $0x2b0] sm:$0xff] %vm1929_vm0, %v4483_v54  ;;  %3956 = vrot.lane.b32.xlu0 %v3863_v32, %s10465_s9  ;;  %7406 = vmatprep.subr.bf16.mxu1 %v10464_v33  ;;  %v3864_v21 = vpack.c.bf16 %v3831_v2, %v3830_v14 }
 0x2d0   :  { %v3280_v42 = vld [vmem:[#allocation3 + $0x10a] sm:$0xff]  ;;  %v3716_v51 = vpack.c.bf16 %v3663_v9, %v3662_v22  ;;  %v3281_v4 = vld [vmem:[#allocation3 + $0x112] sm:$0xff]  ;;  %v10341_v7 = vld [vmem:[%s14754_s3] sm:$0xff]   ;;  %4131 = vst.msk [vmem:[#allocation6 + $0x2a8] sm:$0xff] %vm1929_vm0, %v4099_v6  ;;  %3572 = vrot.lane.b32.xlu1 %v3479_v61, %s10465_s9  ;;  %v3535_v43 = vpop.permute.xlu0 %3534 }
 0x2d1   :  { %v3333_v29 = vpack.c.bf16 %v3281_v4, %v3280_v42  ;;  %v3447_v15 = vld [vmem:[#allocation4 + $0x30a] sm:$0xff]  ;;  %6819 = vmatpush1.bf16.msra.mxu0 %v10341_v7  ;;  %v4431_v16 = vld [vmem:[#allocation3 + $0x112] sm:$0xff]  ;;  %3620 = vst.msk [vmem:[#allocation6 + $0x2e0] sm:$0xff] %vm2841_vm3, %v3535_v43  ;;  %v2079_v19 = vpop.permute.xlu1 %2078  ;;  %v3448_v41 = vld [vmem:[#allocation4 + $0x31a] sm:$0xff] }
 0x2d2   :  { %v4430_v52 = vld [vmem:[#allocation3 + $0x10a] sm:$0xff]  ;;  %3748 = vst.msk [vmem:[#allocation6 + $0x2e8] sm:$0xff] %vm1929_vm0, %v3716_v51  ;;  %v11884_v48 = vld [vmem:[#allocation4 + $0x338] sm:$0xff]  ;;  %7407 = vmatpush1.bf16.msra.mxu1 %v10335_v28  ;;  %6820 = vmatprep.subr.bf16.mxu0 %v10464_v33  ;;  %2127 = vst [vmem:[#allocation3 + $0x13a] ss:$2 sm:$0xff] %v2079_v19  ;;  %v3480_v63 = vpack.c.bf16 %v3447_v15, %v3446_v11 }
 0x2d3   :  { %v2888_v62 = vld [vmem:[#allocation3 + $0xa9] sm:$0xff]  ;;  %v4047_v47 = vld [vmem:[#allocation3 + $0x111] sm:$0xff]  ;;  %4004 = vst.msk [vmem:[#allocation6 + $0x2e8] sm:$0xff] %vm2841_vm3, %v3919_v10  ;;  %v4484_v26 = vpack.c.bf16 %v4431_v16, %v4430_v52  ;;  %2225 = vrot.lane.b32.xlu0 %v11711_v30, %s10465_s9  ;;  %7408 = vmatprep.subr.bf16.mxu1 %v10464_v33  ;;  %v11907_v44 = vld [vmem:[#allocation4 + $0x1a] sm:$0xff] }
 0x2d4   :  { %v4046_v25 = vld [vmem:[#allocation3 + $0x109] sm:$0xff]  ;;  %3365 = vst.msk [vmem:[#allocation6 + $0x328] sm:$0xff] %vm1929_vm0, %v3333_v29  ;;  %v6022_v49 = vld [vmem:[#allocation6 + $0x258] sm:$0xff]  ;;  %3958 = vrot.lane.b32.xlu1 %v3864_v21, %s10465_s9  ;;  %v3921_v60 = vpop.permute.xlu0 %3920  ;;  %v10338_v54 = vld [vmem:[%s14754_s3 + $0x140] sm:$0xff]  }
 0x2d5   :  { %v6012_v12 = vld [vmem:[#allocation6 + $0x208] sm:$0xff]  ;;  %v11882_v55 = vld [vmem:[#allocation4 + $0x330] sm:$0xff]  ;;  %v4100_v13 = vpack.c.bf16 %v4047_v47, %v4046_v25  ;;  %4516 = vst.msk [vmem:[#allocation6 + $0x2f8] sm:$0xff] %vm1929_vm0, %v4484_v26  ;;  %v3664_v30 = vld [vmem:[#allocation3 + $0x120] sm:$0xff]  ;;  %v3537_v57 = vpop.permute.xlu1 %3536 }
 0x2d6   :  { %v10336_v23 = vld [vmem:[%s14754_s3 + $0x130] sm:$0xff]   ;;  %v10342_v17 = vld [vmem:[%s14754_s3 + $0x8] sm:$0xff]   ;;  %7196 = vmatmul.mubr.bf16.gmra.mrb[12].mxu1 %v6012_v12  ;;  %v10337_v0 = vld [vmem:[%s14754_s3 + $0x138] sm:$0xff]   ;;  %3621 = vst.msk [vmem:[#allocation6 + $0x328] sm:$0xff] %vm2841_vm3, %v3537_v57  ;;  %v3865_v40 = vpack.c.bf16 %v11884_v48, %v11882_v55 }
 0x2d7   :  { %v2889_v34 = vld [vmem:[#allocation3 + $0xb1] sm:$0xff]  ;;  %v2503_v31 = vld [vmem:[#allocation3 + $0xa8] sm:$0xff]  ;;  %4132 = vst.msk [vmem:[#allocation6 + $0x2f0] sm:$0xff] %vm1929_vm0, %v4100_v13  ;;  %6821 = vmatpush1.bf16.msra.mxu0 %v10342_v17  ;;  %7203 = vmatprep.mubr.bf16.mxu1 %v6022_v49  ;;  %v4154_v28 = vld [vmem:[#allocation4 + $0x19] sm:$0xff] }
 0x2d8   :  { %v3449_v36 = vld [vmem:[#allocation4 + $0x322] sm:$0xff]  ;;  %v2945_v18 = vpack.c.bf16 %v2889_v34, %v2888_v62  ;;  %v2504_v35 = vld [vmem:[#allocation3 + $0xb0] sm:$0xff]  ;;  %7409 = vmatpush1.bf16.msra.mxu1 %v10336_v23  ;;  %3574 = vrot.lane.b32.xlu0 %v3480_v63, %s10465_s9  ;;  %v2208_v56 = vpop.permute.xlu0 %2207  ;;  %v10345_v10 = vld [vmem:[%s14754_s3 + $0x18] sm:$0xff]  }
 0x2d9   :  { %v3665_v38 = vld [vmem:[#allocation3 + $0x128] sm:$0xff]  ;;  %v2560_v3 = vpack.c.bf16 %v2504_v35, %v2503_v31  ;;  %7410 = vmatprep.subr.bf16.mxu1 %v10464_v33  ;;  %v10343_v5 = vld [vmem:[%s14754_s3 + $0x10] sm:$0xff]   ;;  %2066 = vrot.lane.b32.xlu1 %v11480_v58, %s10465_s9  ;;  %v3481_v32 = vpack.c.bf16 %v3449_v36, %v3448_v41  ;;  %2256 = vst [vmem:[#allocation3 + $0x152] ss:$2 sm:$0xff] %v2208_v56  ;;  %v3666_v58 = vld [vmem:[#allocation3 + $0x138] sm:$0xff]  ;;  %v3923_v14 = vpop.permute.xlu1 %3922 }
 0x2da   :  { %v3282_v53 = vld [vmem:[#allocation3 + $0x122] sm:$0xff]  ;;  %v3717_v45 = vpack.c.bf16 %v3665_v38, %v3664_v30  ;;  %v3283_v59 = vld [vmem:[#allocation3 + $0x12a] sm:$0xff]  ;;  %2977 = vst.msk [vmem:[#allocation6 + $0x200] sm:$0xff] %vm1929_vm0, %v2945_v18  ;;  %6822 = vmatprep.subr.bf16.mxu0 %v10464_v33  ;;  %v3284_v2 = vld [vmem:[#allocation3 + $0x13a] sm:$0xff] }
 0x2db   :  { %v3334_v27 = vpack.c.bf16 %v3283_v59, %v3282_v53  ;;  %2592 = vst.msk [vmem:[#allocation6 + $0x1f8] sm:$0xff] %vm1929_vm0, %v2560_v3  ;;  %v4539_v46 = vld [vmem:[#allocation4 + $0x22] sm:$0xff]  ;;  %v4433_v8 = vld [vmem:[#allocation3 + $0x12a] sm:$0xff]  ;;  %6823 = vmatpush1.bf16.msra.mxu0 %v10343_v5  ;;  %v4434_v7 = vld [vmem:[#allocation3 + $0x13a] sm:$0xff] }
 0x2dc   :  { %3749 = vst.msk [vmem:[#allocation6 + $0x330] sm:$0xff] %vm1929_vm0, %v3717_v45  ;;  %v4432_v39 = vld [vmem:[#allocation3 + $0x122] sm:$0xff]  ;;  %v6021_v61 = vld [vmem:[#allocation6 + $0x250] sm:$0xff]  ;;  %7411 = vmatpush1.bf16.msra.mxu1 %v10337_v0  ;;  %6824 = vmatprep.subr.bf16.mxu0 %v10464_v33  ;;  %v4602_v42 = vpack.c.bf16 %v4539_v46, %v11907_v44  ;;  %v3539_v21 = vpop.permute.xlu0 %3538  ;;  %v11938_v43 = vld [vmem:[#allocation4 + $0x3a] sm:$0xff] }
 0x2dd   :  { %4005 = vst.msk [vmem:[#allocation6 + $0x330] sm:$0xff] %vm2841_vm3, %v3921_v60  ;;  %v4485_v20 = vpack.c.bf16 %v4433_v8, %v4432_v39  ;;  %v4048_v24 = vld [vmem:[#allocation3 + $0x121] sm:$0xff]  ;;  %3960 = vrot.lane.b32.xlu0 %v3865_v40, %s10465_s9  ;;  %7412 = vmatprep.subr.bf16.mxu1 %v10464_v33  ;;  %v4049_v11 = vld [vmem:[#allocation3 + $0x129] sm:$0xff]  ;;  %v2081_v52 = vpop.permute.xlu1 %2080  ;;  %v11936_v62 = vld [vmem:[#allocation4 + $0x32] sm:$0xff] }
 0x2de   :  { %3366 = vst.msk [vmem:[#allocation6 + $0x370] sm:$0xff] %vm1929_vm0, %v3334_v27  ;;  %v3667_v1 = vld [vmem:[#allocation3 + $0x140] sm:$0xff]  ;;  %3576 = vrot.lane.b32.xlu1 %v3481_v32, %s10465_s9  ;;  %7204 = vmatmul.mubr.bf16.gmra.mrb[16].mxu1 %v6021_v61  ;;  %v4101_v29 = vpack.c.bf16 %v4049_v11, %v4048_v24  ;;  %v10339_v16 = vld [vmem:[%s14754_s3 + $0x148] sm:$0xff]   ;;  %2129 = vst [vmem:[#allocation3 + $0x16a] ss:$2 sm:$0xff] %v2081_v52  ;;  %v4603_v45 = vpack.c.bf16 %v11938_v43, %v11936_v62 }
 0x2df   :  { %v3718_v6 = vpack.c.bf16 %v3667_v1, %v3666_v58  ;;  %v3285_v22 = vld [vmem:[#allocation3 + $0x142] sm:$0xff]  ;;  %4517 = vst.msk [vmem:[#allocation6 + $0x340] sm:$0xff] %vm1929_vm0, %v4485_v20  ;;  %6825 = vmatpush1.bf16.msra.mxu0 %v10345_v10  ;;  %v4156_v12 = vld [vmem:[#allocation4 + $0x31] sm:$0xff]  ;;  %v4157_v55 = vld [vmem:[#allocation4 + $0x39] sm:$0xff] }
 0x2e0   :  { %v6031_v9 = vld [vmem:[#allocation6 + $0x2a0] sm:$0xff]  ;;  %v3335_v51 = vpack.c.bf16 %v3285_v22, %v3284_v2  ;;  %3622 = vst.msk [vmem:[#allocation6 + $0x370] sm:$0xff] %vm2841_vm3, %v3539_v21  ;;  %7413 = vmatpush1.bf16.msra.mxu1 %v10338_v54  ;;  %v6030_v26 = vld [vmem:[#allocation6 + $0x298] sm:$0xff]  ;;  %6826 = vmatprep.subr.bf16.mxu0 %v10464_v33  ;;  %v2891_v63 = vld [vmem:[#allocation3 + $0xc9] sm:$0xff]  ;;  %v3925_v41 = vpop.permute.xlu0 %3924  ;;  %v11977_v44 = vpack.c.bf16 %v4157_v55, %v4156_v12 }
 0x2e1   :  { %v4155_v4 = vld [vmem:[#allocation4 + $0x21] sm:$0xff]  ;;  %3750 = vst.msk [vmem:[#allocation6 + $0x378] sm:$0xff] %vm1929_vm0, %v3718_v6  ;;  %7211 = vmatprep.mubr.bf16.mxu1 %v6031_v9  ;;  %2195 = vrot.lane.b32.xlu0 %v11483_v37, %s10465_s9  ;;  %4133 = vst.msk [vmem:[#allocation6 + $0x338] sm:$0xff] %vm1929_vm0, %v4101_v29  ;;  %v4050_v49 = vld [vmem:[#allocation3 + $0x139] sm:$0xff]  ;;  %v3541_v30 = vpop.permute.xlu1 %3540 }
 0x2e2   :  { %v4435_v15 = vld [vmem:[#allocation3 + $0x142] sm:$0xff]  ;;  %4006 = vst.msk [vmem:[#allocation6 + $0x378] sm:$0xff] %vm2841_vm3, %v3923_v14  ;;  %v11945_v19 = vpack.c.bf16 %v4155_v4, %v4154_v28  ;;  %7414 = vmatprep.subr.bf16.mxu1 %v10464_v33  ;;  %4666 = vrot.lane.b32.xlu1 %v4602_v42, %s10465_s9  ;;  %v10340_v37 = vld [vmem:[%s14754_s3 + $0x150] sm:$0xff]   ;;  %v3669_v31 = vld [vmem:[#allocation3 + $0x158] sm:$0xff] }
 0x2e3   :  { %3367 = vst.msk [vmem:[#allocation6 + $0x3b8] sm:$0xff] %vm1929_vm0, %v3335_v51  ;;  %v4486_v25 = vpack.c.bf16 %v4435_v15, %v4434_v7  ;;  %v2890_v47 = vld [vmem:[#allocation3 + $0xc1] sm:$0xff]  ;;  %v3668_v34 = vld [vmem:[#allocation3 + $0x150] sm:$0xff]  ;;  %v4053_v32 = vld [vmem:[#allocation3 + $0x159] sm:$0xff] }
 0x2e4   :  { %v10346_v48 = vld [vmem:[%s14754_s3 + $0x20] sm:$0xff]   ;;  %v3286_v36 = vld [vmem:[#allocation3 + $0x152] sm:$0xff]  ;;  %v2946_v18 = vpack.c.bf16 %v2891_v63, %v2890_v47  ;;  %v3719_v35 = vpack.c.bf16 %v3669_v31, %v3668_v34  ;;  %v11958_v60 = vld [vmem:[#allocation4 + $0x4a] sm:$0xff]  ;;  %7415 = vmatpush1.bf16.msra.mxu1 %v10339_v16  ;;  %3623 = vst.msk [vmem:[#allocation6 + $0x3b8] sm:$0xff] %vm2841_vm3, %v3541_v30  ;;  %v2210_v39 = vpop.permute.xlu0 %2209 }
 0x2e5   :  { %v4051_v23 = vld [vmem:[#allocation3 + $0x141] sm:$0xff]  ;;  %4518 = vst.msk [vmem:[#allocation6 + $0x388] sm:$0xff] %vm1929_vm0, %v4486_v25  ;;  %6827 = vmatpush1.bf16.msra.mxu0 %v10346_v48  ;;  %v4436_v53 = vld [vmem:[#allocation3 + $0x152] sm:$0xff]  ;;  %4282 = vrot.lane.b32.xlu0 %v11945_v19, %s10465_s9  ;;  %v4158_v8 = vld [vmem:[#allocation4 + $0x49] sm:$0xff]  ;;  %v3927_v58 = vpop.permute.xlu1 %3926 }
 0x2e6   :  { %v4102_v13 = vpack.c.bf16 %v4051_v23, %v4050_v49  ;;  %v2505_v17 = vld [vmem:[#allocation3 + $0xc0] sm:$0xff]  ;;  %6828 = vmatprep.subr.bf16.mxu0 %v10464_v33  ;;  %v11967_v59 = vld [vmem:[#allocation4 + $0x52] sm:$0xff]  ;;  %v6040_v0 = vld [vmem:[#allocation6 + $0x2e8] sm:$0xff]  ;;  %7416 = vmatprep.subr.bf16.mxu1 %v10464_v33  ;;  %2978 = vst.msk [vmem:[#allocation6 + $0x248] sm:$0xff] %vm1929_vm0, %v2946_v18 }
 0x2e7   :  { %v3287_v38 = vld [vmem:[#allocation3 + $0x15a] sm:$0xff]  ;;  %v10347_v40 = vld [vmem:[%s14754_s3 + $0x28] sm:$0xff]   ;;  %3751 = vst.msk [vmem:[#allocation6 + $0x3c0] sm:$0xff] %vm1929_vm0, %v3719_v35  ;;  %2068 = vrot.lane.b32.xlu1 %v11487_v50, %s10465_s9  ;;  %v4052_v5 = vld [vmem:[#allocation3 + $0x151] sm:$0xff]  ;;  %7212 = vmatmul.mubr.bf16.gmra.mrb[20].mxu1 %v6030_v26  ;;  %v4604_v2 = vpack.c.bf16 %v11967_v59, %v11958_v60 }
 0x2e8   :  { %4134 = vst.msk [vmem:[#allocation6 + $0x380] sm:$0xff] %vm1929_vm0, %v4102_v13  ;;  %v4437_v3 = vld [vmem:[#allocation3 + $0x15a] sm:$0xff]  ;;  %v3336_v57 = vpack.c.bf16 %v3287_v38, %v3286_v36  ;;  %v2506_v46 = vld [vmem:[#allocation3 + $0xc8] sm:$0xff]  ;;  %v4159_v56 = vld [vmem:[#allocation4 + $0x51] sm:$0xff]  ;;  %v4103_v50 = vpack.c.bf16 %v4053_v32, %v4052_v5  ;;  %7219 = vmatprep.mubr.bf16.mxu1 %v6040_v0  ;;  %7417 = vmatpush1.bf16.msra.mxu1 %v10340_v37  ;;  %v3543_v11 = vpop.permute.xlu0 %3542 }
 0x2e9   :  { %v4487_v27 = vpack.c.bf16 %v4437_v3, %v4436_v53  ;;  %4007 = vst.msk [vmem:[#allocation6 + $0x3c0] sm:$0xff] %vm2841_vm3, %v3925_v41  ;;  %v10344_v61 = vld [vmem:[%s14754_s3 + $0x158] sm:$0xff]   ;;  %6829 = vmatpush1.bf16.msra.mxu0 %v10347_v40  ;;  %v2561_v54 = vpack.c.bf16 %v2506_v46, %v2505_v17  ;;  %2258 = vst [vmem:[#allocation3 + $0x182] ss:$2 sm:$0xff] %v2210_v39  ;;  %v3670_v20 = vld [vmem:[#allocation3 + $0x168] sm:$0xff]  ;;  %4668 = vrot.lane.b32.xlu0 %v4603_v45, %s10465_s9  ;;  %v2083_v15 = vpop.permute.xlu1 %2082 }
 0x2ea   :  { %3368 = vst.msk [vmem:[#allocation6 + $0x400] sm:$0xff] %vm1929_vm0, %v3336_v57  ;;  %v3671_v24 = vld [vmem:[#allocation3 + $0x170] sm:$0xff]  ;;  %v4544_v6 = vld [vmem:[#allocation4 + $0x62] sm:$0xff]  ;;  %7418 = vmatprep.subr.bf16.mxu1 %v10464_v33  ;;  %4135 = vst.msk [vmem:[#allocation6 + $0x3c8] sm:$0xff] %vm1929_vm0, %v4103_v50  ;;  %v11993_v9 = vpack.c.bf16 %v4159_v56, %v4158_v8  ;;  %6830 = vmatprep.subr.bf16.mxu0 %v10464_v33 }
 0x2eb   :  { %4519 = vst.msk [vmem:[#allocation6 + $0x3d0] sm:$0xff] %vm1929_vm0, %v4487_v27  ;;  %v3288_v1 = vld [vmem:[#allocation3 + $0x16a] sm:$0xff]  ;;  %v3720_v14 = vpack.c.bf16 %v3671_v24, %v3670_v20  ;;  %v3289_v28 = vld [vmem:[#allocation3 + $0x172] sm:$0xff]  ;;  %2593 = vst.msk [vmem:[#allocation6 + $0x240] sm:$0xff] %vm1929_vm0, %v2561_v54  ;;  %4284 = vrot.lane.b32.xlu1 %v11977_v44, %s10465_s9 }
 0x2ec   :  { %v4545_v22 = vld [vmem:[#allocation4 + $0x6a] sm:$0xff]  ;;  %v3337_v10 = vpack.c.bf16 %v3289_v28, %v3288_v1  ;;  %v4160_v42 = vld [vmem:[#allocation4 + $0x61] sm:$0xff]  ;;  %v4439_v29 = vld [vmem:[#allocation3 + $0x172] sm:$0xff]  ;;  %3624 = vst.msk [vmem:[#allocation6 + $0x400] sm:$0xff] %vm2841_vm3, %v3543_v11  ;;  %7419 = vmatpush1.bf16.msra.mxu1 %v10344_v61  ;;  %v3929_v34 = vpop.permute.xlu0 %3928 }
 0x2ed   :  { %v4161_v51 = vld [vmem:[#allocation4 + $0x69] sm:$0xff]  ;;  %3752 = vst.msk [vmem:[#allocation6 + $0x408] sm:$0xff] %vm1929_vm0, %v3720_v14  ;;  %v6039_v7 = vld [vmem:[#allocation6 + $0x2e0] sm:$0xff]  ;;  %v4055_v25 = vld [vmem:[#allocation3 + $0x171] sm:$0xff]  ;;  %4670 = vrot.lane.b32.xlu0 %v4604_v2, %s10465_s9  ;;  %v4605_v47 = vpack.c.bf16 %v4545_v22, %v4544_v6  ;;  %7420 = vmatprep.subr.bf16.mxu1 %v10464_v33  ;;  %v3545_v36 = vpop.permute.xlu1 %3544 }
 0x2ee   :  { %v10349_v4 = vld [vmem:[%s14754_s3 + $0x30] sm:$0xff]   ;;  %4008 = vst.msk [vmem:[#allocation6 + $0x408] sm:$0xff] %vm2841_vm3, %v3927_v58  ;;  %v12003_v52 = vld [vmem:[#allocation4 + $0x7a] sm:$0xff]  ;;  %2131 = vst [vmem:[#allocation3 + $0x1ca] ss:$2 sm:$0xff] %v2083_v15  ;;  %v12015_v23 = vpack.c.bf16 %v4161_v51, %v4160_v42 }
 0x2ef   :  { %v4438_v21 = vld [vmem:[#allocation3 + $0x16a] sm:$0xff]  ;;  %3369 = vst.msk [vmem:[#allocation6 + $0x448] sm:$0xff] %vm1929_vm0, %v3337_v10  ;;  %v10348_v62 = vld [vmem:[%s14754_s3 + $0x160] sm:$0xff]   ;;  %6831 = vmatpush1.bf16.msra.mxu0 %v10349_v4  ;;  %v10350_v48 = vld [vmem:[%s14754_s3 + $0x38] sm:$0xff]   ;;  %4286 = vrot.lane.b32.xlu1 %v11993_v9, %s10465_s9 }
 0x2f0   :  { %v4488_v43 = vpack.c.bf16 %v4439_v29, %v4438_v21  ;;  %v4054_v16 = vld [vmem:[#allocation3 + $0x169] sm:$0xff]  ;;  %v4162_v26 = vld [vmem:[#allocation4 + $0x79] sm:$0xff]  ;;  %v4163_v37 = vld [vmem:[#allocation4 + $0x81] sm:$0xff]  ;;  %6832 = vmatprep.subr.bf16.mxu0 %v10464_v33  ;;  %7220 = vmatmul.mubr.bf16.gmra.mrb[24].mxu1 %v6039_v7  ;;  %3625 = vst.msk [vmem:[#allocation6 + $0x448] sm:$0xff] %vm2841_vm3, %v3545_v36  ;;  %v2212_v40 = vpop.permute.xlu0 %2211 }
 0x2f1   :  { %v4547_v12 = vld [vmem:[#allocation4 + $0x82] sm:$0xff]  ;;  %v6049_v55 = vld [vmem:[#allocation6 + $0x330] sm:$0xff]  ;;  %v4104_v49 = vpack.c.bf16 %v4055_v25, %v4054_v16  ;;  %v2892_v13 = vld [vmem:[#allocation3 + $0xd9] sm:$0xff]  ;;  %7421 = vmatpush1.bf16.msra.mxu1 %v10348_v62  ;;  %4672 = vrot.lane.b32.xlu0 %v4605_v47, %s10465_s9  ;;  %v12029_v45 = vpack.c.bf16 %v4163_v37, %v4162_v26  ;;  %2260 = vst [vmem:[#allocation3 + $0x1e2] ss:$2 sm:$0xff] %v2212_v40  ;;  %v3931_v56 = vpop.permute.xlu1 %3930 }
 0x2f2   :  { %4520 = vst.msk [vmem:[#allocation6 + $0x418] sm:$0xff] %vm1929_vm0, %v4488_v43  ;;  %v3672_v63 = vld [vmem:[#allocation3 + $0x180] sm:$0xff]  ;;  %v3673_v17 = vld [vmem:[#allocation3 + $0x188] sm:$0xff]  ;;  %7227 = vmatprep.mubr.bf16.mxu1 %v6049_v55  ;;  %v4606_v38 = vpack.c.bf16 %v4547_v12, %v12003_v52  ;;  %v4548_v57 = vld [vmem:[#allocation4 + $0x92] sm:$0xff]  ;;  %7422 = vmatprep.subr.bf16.mxu1 %v10464_v33 }
 0x2f3   :  { %4136 = vst.msk [vmem:[#allocation6 + $0x410] sm:$0xff] %vm1929_vm0, %v4104_v49  ;;  %v4440_v31 = vld [vmem:[#allocation3 + $0x182] sm:$0xff]  ;;  %v3721_v41 = vpack.c.bf16 %v3673_v17, %v3672_v63  ;;  %v4441_v18 = vld [vmem:[#allocation3 + $0x18a] sm:$0xff]  ;;  %6833 = vmatpush1.bf16.msra.mxu0 %v10350_v48  ;;  %4288 = vrot.lane.b32.xlu1 %v12015_v23, %s10465_s9  ;;  %v4549_v59 = vld [vmem:[#allocation4 + $0x9a] sm:$0xff] }
 0x2f4   :  { %v4056_v35 = vld [vmem:[#allocation3 + $0x181] sm:$0xff]  ;;  %v4057_v30 = vld [vmem:[#allocation3 + $0x189] sm:$0xff]  ;;  %v4489_v53 = vpack.c.bf16 %v4441_v18, %v4440_v31  ;;  %6834 = vmatprep.subr.bf16.mxu0 %v10464_v33  ;;  %v4164_v5 = vld [vmem:[#allocation4 + $0x91] sm:$0xff]  ;;  %v4607_v20 = vpack.c.bf16 %v4549_v59, %v4548_v57  ;;  %v3547_v10 = vpop.permute.xlu0 %3546 }
 0x2f5   :  { %v10351_v60 = vld [vmem:[%s14754_s3 + $0x40] sm:$0xff]   ;;  %v4105_v3 = vpack.c.bf16 %v4057_v30, %v4056_v35  ;;  %3753 = vst.msk [vmem:[#allocation6 + $0x450] sm:$0xff] %vm1929_vm0, %v3721_v41  ;;  %v6048_v27 = vld [vmem:[#allocation6 + $0x328] sm:$0xff]  ;;  %v3675_v8 = vld [vmem:[#allocation3 + $0x1d0] sm:$0xff]  ;;  %4674 = vrot.lane.b32.xlu0 %v4606_v38, %s10465_s9  ;;  %v2085_v11 = vpop.permute.xlu1 %2084 }
 0x2f6   :  { %v2893_v0 = vld [vmem:[#allocation3 + $0xe1] sm:$0xff]  ;;  %4009 = vst.msk [vmem:[#allocation6 + $0x450] sm:$0xff] %vm2841_vm3, %v3929_v34  ;;  %v4165_v32 = vld [vmem:[#allocation4 + $0x99] sm:$0xff]  ;;  %v3292_v61 = vld [vmem:[#allocation3 + $0x1ca] sm:$0xff] }
 0x2f7   :  { %4521 = vst.msk [vmem:[#allocation6 + $0x460] sm:$0xff] %vm1929_vm0, %v4489_v53  ;;  %4137 = vst.msk [vmem:[#allocation6 + $0x458] sm:$0xff] %vm1929_vm0, %v4105_v3  ;;  %v2947_v46 = vpack.c.bf16 %v2893_v0, %v2892_v13  ;;  %v3674_v39 = vld [vmem:[#allocation3 + $0x1c8] sm:$0xff]  ;;  %v3293_v24 = vld [vmem:[#allocation3 + $0x1d2] sm:$0xff]  ;;  %6835 = vmatpush1.bf16.msra.mxu0 %v10351_v60  ;;  %4290 = vrot.lane.b32.xlu1 %v12029_v45, %s10465_s9  ;;  %v12040_v14 = vpack.c.bf16 %v4165_v32, %v4164_v5 }
 0x2f8   :  { %v4550_v50 = vld [vmem:[#allocation4 + $0xaa] sm:$0xff]  ;;  %v3722_v54 = vpack.c.bf16 %v3675_v8, %v3674_v39  ;;  %v4551_v58 = vld [vmem:[#allocation4 + $0xb2] sm:$0xff]  ;;  %v3339_v2 = vpack.c.bf16 %v3293_v24, %v3292_v61  ;;  %6836 = vmatprep.subr.bf16.mxu0 %v10464_v33  ;;  %7228 = vmatmul.mubr.bf16.gmra.mrb[28].mxu1 %v6048_v27  ;;  %3626 = vst.msk [vmem:[#allocation6 + $0x490] sm:$0xff] %vm2841_vm3, %v3547_v10  ;;  %2133 = vst [vmem:[#allocation3 + $0x1fa] ss:$2 sm:$0xff] %v2085_v11  ;;  %v3933_v26 = vpop.permute.xlu0 %3932 }
 0x2f9   :  { %v6058_v1 = vld [vmem:[#allocation6 + $0x378] sm:$0xff]  ;;  %2979 = vst.msk [vmem:[#allocation6 + $0x290] sm:$0xff] %vm1929_vm0, %v2947_v46  ;;  %v4166_v28 = vld [vmem:[#allocation4 + $0xa9] sm:$0xff]  ;;  %4676 = vrot.lane.b32.xlu0 %v4607_v20, %s10465_s9  ;;  %v4608_v15 = vpack.c.bf16 %v4551_v58, %v4550_v50  ;;  %v4168_v12 = vld [vmem:[#allocation4 + $0xc1] sm:$0xff]  ;;  %v3549_v63 = vpop.permute.xlu1 %3548 }
 0x2fa   :  { %v10352_v6 = vld [vmem:[%s14754_s3 + $0x48] sm:$0xff]   ;;  %3754 = vst.msk [vmem:[#allocation6 + $0x498] sm:$0xff] %vm1929_vm0, %v3722_v54  ;;  %v4167_v42 = vld [vmem:[#allocation4 + $0xb1] sm:$0xff]  ;;  %3371 = vst.msk [vmem:[#allocation6 + $0x4d8] sm:$0xff] %vm1929_vm0, %v3339_v2  ;;  %7235 = vmatprep.mubr.bf16.mxu1 %v6058_v1 }
 0x2fb   :  { %v10353_v22 = vld [vmem:[%s14754_s3 + $0x168] sm:$0xff]   ;;  %v4443_v4 = vld [vmem:[#allocation3 + $0x1d2] sm:$0xff]  ;;  %4010 = vst.msk [vmem:[#allocation6 + $0x498] sm:$0xff] %vm2841_vm3, %v3931_v56  ;;  %6837 = vmatpush1.bf16.msra.mxu0 %v10352_v6  ;;  %4292 = vrot.lane.b32.xlu1 %v12040_v14, %s10465_s9  ;;  %v12059_v25 = vpack.c.bf16 %v4167_v42, %v4166_v28  ;;  %v3676_v48 = vld [vmem:[#allocation3 + $0x1e0] sm:$0xff] }
 0x2fc   :  { %v4442_v51 = vld [vmem:[#allocation3 + $0x1ca] sm:$0xff]  ;;  %7423 = vmatpush1.bf16.msra.mxu1 %v10353_v22  ;;  %v4552_v52 = vld [vmem:[#allocation4 + $0xc2] sm:$0xff]  ;;  %6838 = vmatprep.subr.bf16.mxu0 %v10464_v33  ;;  %3627 = vst.msk [vmem:[#allocation6 + $0x4d8] sm:$0xff] %vm2841_vm3, %v3549_v63  ;;  %v10355_v35 = vld [vmem:[%s14754_s3 + $0x58] sm:$0xff]   ;;  %v2214_v57 = vpop.permute.xlu0 %2213 }
 0x2fd   :  { %v4490_v7 = vpack.c.bf16 %v4443_v4, %v4442_v51  ;;  %v4058_v21 = vld [vmem:[#allocation3 + $0x1c9] sm:$0xff]  ;;  %v4059_v29 = vld [vmem:[#allocation3 + $0x1d1] sm:$0xff]  ;;  %7424 = vmatprep.subr.bf16.mxu1 %v10464_v33  ;;  %4678 = vrot.lane.b32.xlu0 %v4608_v15, %s10465_s9  ;;  %v6067_v18 = vld [vmem:[#allocation6 + $0x3c0] sm:$0xff]  ;;  %2262 = vst [vmem:[#allocation3 + $0x212] ss:$2 sm:$0xff] %v2214_v57  ;;  %v3935_v32 = vpop.permute.xlu1 %3934 }
 0x2fe   :  { %v4553_v62 = vld [vmem:[#allocation4 + $0xca] sm:$0xff]  ;;  %v4106_v16 = vpack.c.bf16 %v4059_v29, %v4058_v21  ;;  %v3294_v37 = vld [vmem:[#allocation3 + $0x1e2] sm:$0xff]  ;;  %v4554_v60 = vld [vmem:[#allocation4 + $0xda] sm:$0xff] }
 0x2ff   :  { %v10354_v43 = vld [vmem:[%s14754_s3 + $0x50] sm:$0xff]   ;;  %4522 = vst.msk [vmem:[#allocation6 + $0x4a8] sm:$0xff] %vm1929_vm0, %v4490_v7  ;;  %v3677_v49 = vld [vmem:[#allocation3 + $0x1e8] sm:$0xff]  ;;  %v4609_v41 = vpack.c.bf16 %v4553_v62, %v4552_v52  ;;  %4294 = vrot.lane.b32.xlu1 %v12059_v25, %s10465_s9  ;;  %v4170_v59 = vld [vmem:[#allocation4 + $0xd9] sm:$0xff] }
 0x300   :  { %v6057_v47 = vld [vmem:[#allocation6 + $0x370] sm:$0xff]  ;;  %4138 = vst.msk [vmem:[#allocation6 + $0x4a0] sm:$0xff] %vm1929_vm0, %v4106_v16  ;;  %v3723_v13 = vpack.c.bf16 %v3677_v49, %v3676_v48  ;;  %v4444_v34 = vld [vmem:[#allocation3 + $0x1e2] sm:$0xff]  ;;  %6839 = vmatpush1.bf16.msra.mxu0 %v10354_v43  ;;  %v3678_v27 = vld [vmem:[#allocation3 + $0x1f8] sm:$0xff]  ;;  %v3551_v28 = vpop.permute.xlu0 %3550 }
 0x301   :  { %v4169_v55 = vld [vmem:[#allocation4 + $0xc9] sm:$0xff]  ;;  %6840 = vmatprep.subr.bf16.mxu0 %v10464_v33  ;;  %v4060_v3 = vld [vmem:[#allocation3 + $0x1e1] sm:$0xff]  ;;  %7236 = vmatmul.mubr.bf16.gmra.mrb[32].mxu1 %v6057_v47  ;;  %v4556_v50 = vld [vmem:[#allocation4 + $0xf2] sm:$0xff]  ;;  %v2087_v42 = vpop.permute.xlu1 %2086 }
 0x302   :  { %v3295_v17 = vld [vmem:[#allocation3 + $0x1ea] sm:$0xff]  ;;  %3755 = vst.msk [vmem:[#allocation6 + $0x4e0] sm:$0xff] %vm1929_vm0, %v3723_v13  ;;  %v12073_v38 = vpack.c.bf16 %v4169_v55, %v4168_v12  ;;  %v4555_v53 = vld [vmem:[#allocation4 + $0xe2] sm:$0xff]  ;;  %7243 = vmatprep.mubr.bf16.mxu1 %v6067_v18  ;;  %v3296_v46 = vld [vmem:[#allocation3 + $0x1fa] sm:$0xff]  ;;  %4680 = vrot.lane.b32.xlu0 %v4609_v41, %s10465_s9 }
 0x303   :  { %v4445_v31 = vld [vmem:[#allocation3 + $0x1ea] sm:$0xff]  ;;  %v3340_v36 = vpack.c.bf16 %v3295_v17, %v3294_v37  ;;  %4011 = vst.msk [vmem:[#allocation6 + $0x4e0] sm:$0xff] %vm2841_vm3, %v3933_v26  ;;  %v4171_v0 = vld [vmem:[#allocation4 + $0xe1] sm:$0xff]  ;;  %v4610_v56 = vpack.c.bf16 %v4555_v53, %v4554_v60  ;;  %v4173_v1 = vld [vmem:[#allocation4 + $0xf9] sm:$0xff] }
 0x304   :  { %v4491_v30 = vpack.c.bf16 %v4445_v31, %v4444_v34  ;;  %v4061_v40 = vld [vmem:[#allocation3 + $0x1e9] sm:$0xff]  ;;  %v3679_v5 = vld [vmem:[#allocation3 + $0x200] sm:$0xff]  ;;  %6841 = vmatpush1.bf16.msra.mxu0 %v10355_v35  ;;  %4296 = vrot.lane.b32.xlu1 %v12073_v38, %s10465_s9  ;;  %v12082_v20 = vpack.c.bf16 %v4171_v0, %v4170_v59  ;;  %v4172_v58 = vld [vmem:[#allocation4 + $0xf1] sm:$0xff]  ;;  %2135 = vst [vmem:[#allocation3 + $0x22a] ss:$2 sm:$0xff] %v2087_v42  ;;  %v3937_v49 = vpop.permute.xlu0 %3936 }
 0x305   :  { %3372 = vst.msk [vmem:[#allocation6 + $0x520] sm:$0xff] %vm1929_vm0, %v3340_v36  ;;  %v4107_v39 = vpack.c.bf16 %v4061_v40, %v4060_v3  ;;  %v3724_v8 = vpack.c.bf16 %v3679_v5, %v3678_v27  ;;  %v3297_v61 = vld [vmem:[#allocation3 + $0x202] sm:$0xff]  ;;  %v4557_v54 = vld [vmem:[#allocation4 + $0xfa] sm:$0xff]  ;;  %6842 = vmatprep.subr.bf16.mxu0 %v10464_v33  ;;  %v10357_v4 = vld [vmem:[%s14754_s3 + $0x170] sm:$0xff]   ;;  %v12102_v43 = vpack.c.bf16 %v4173_v1, %v4172_v58  ;;  %v3553_v13 = vpop.permute.xlu1 %3552 }
 0x306   :  { %4523 = vst.msk [vmem:[#allocation6 + $0x4f0] sm:$0xff] %vm1929_vm0, %v4491_v30  ;;  %v3341_v24 = vpack.c.bf16 %v3297_v61, %v3296_v46  ;;  %v10356_v2 = vld [vmem:[%s14754_s3 + $0x60] sm:$0xff]   ;;  %v6066_v51 = vld [vmem:[#allocation6 + $0x3b8] sm:$0xff]  ;;  %4682 = vrot.lane.b32.xlu0 %v4610_v56, %s10465_s9  ;;  %v4611_v21 = vpack.c.bf16 %v4557_v54, %v4556_v50  ;;  %v4558_v29 = vld [vmem:[#allocation4 + $0x10a] sm:$0xff]  ;;  %7425 = vmatpush1.bf16.msra.mxu1 %v10357_v4 }
 0x307   :  { %4139 = vst.msk [vmem:[#allocation6 + $0x4e8] sm:$0xff] %vm1929_vm0, %v4107_v39  ;;  %3756 = vst.msk [vmem:[#allocation6 + $0x528] sm:$0xff] %vm1929_vm0, %v3724_v8  ;;  %v4446_v6 = vld [vmem:[#allocation3 + $0x1fa] sm:$0xff]  ;;  %v4447_v22 = vld [vmem:[#allocation3 + $0x202] sm:$0xff]  ;;  %7426 = vmatprep.subr.bf16.mxu1 %v10464_v33 }
 0x308   :  { %v4062_v10 = vld [vmem:[#allocation3 + $0x1f9] sm:$0xff]  ;;  %4012 = vst.msk [vmem:[#allocation6 + $0x528] sm:$0xff] %vm2841_vm3, %v3935_v32  ;;  %3628 = vst.msk [vmem:[#allocation6 + $0x520] sm:$0xff] %vm2841_vm3, %v3551_v28  ;;  %v4492_v11 = vpack.c.bf16 %v4447_v22, %v4446_v6  ;;  %v4063_v7 = vld [vmem:[#allocation3 + $0x201] sm:$0xff]  ;;  %6843 = vmatpush1.bf16.msra.mxu0 %v10356_v2  ;;  %4298 = vrot.lane.b32.xlu1 %v12082_v20, %s10465_s9  ;;  %v2216_v59 = vpop.permute.xlu0 %2215 }
 0x309   :  { %3373 = vst.msk [vmem:[#allocation6 + $0x568] sm:$0xff] %vm1929_vm0, %v3341_v24  ;;  %v6076_v15 = vld [vmem:[#allocation6 + $0x408] sm:$0xff]  ;;  %v4108_v62 = vpack.c.bf16 %v4063_v7, %v4062_v10  ;;  %v4559_v16 = vld [vmem:[#allocation4 + $0x112] sm:$0xff]  ;;  %7244 = vmatmul.mubr.bf16.gmra.mrb[36].mxu1 %v6066_v51  ;;  %6844 = vmatprep.subr.bf16.mxu0 %v10464_v33  ;;  %v3299_v63 = vld [vmem:[#allocation3 + $0x21a] sm:$0xff]  ;;  %v3939_v46 = vpop.permute.xlu1 %3938 }
 0x30a   :  { %v10358_v52 = vld [vmem:[%s14754_s3 + $0x68] sm:$0xff]   ;;  %v4175_v12 = vld [vmem:[#allocation4 + $0x111] sm:$0xff]  ;;  %4524 = vst.msk [vmem:[#allocation6 + $0x538] sm:$0xff] %vm1929_vm0, %v4492_v11  ;;  %7251 = vmatprep.mubr.bf16.mxu1 %v6076_v15  ;;  %4684 = vrot.lane.b32.xlu0 %v4611_v21, %s10465_s9  ;;  %v4612_v31 = vpack.c.bf16 %v4559_v16, %v4558_v29  ;;  %v2489_v18 = vld [vmem:[#allocation3] sm:$0xff] }
 0x30b   :  { %v4174_v47 = vld [vmem:[#allocation4 + $0x109] sm:$0xff]  ;;  %v3681_v48 = vld [vmem:[#allocation3 + $0x218] sm:$0xff]  ;;  %4140 = vst.msk [vmem:[#allocation6 + $0x530] sm:$0xff] %vm1929_vm0, %v4108_v62  ;;  %v2874_v17 = vld [vmem:[#allocation3 + $0x1] sm:$0xff] }
 0x30c   :  { %v3680_v55 = vld [vmem:[#allocation3 + $0x210] sm:$0xff]  ;;  %3629 = vst.msk [vmem:[#allocation6 + $0x568] sm:$0xff] %vm2841_vm3, %v3553_v13  ;;  %6845 = vmatpush1.bf16.msra.mxu0 %v10358_v52  ;;  %v2490_v35 = vld [vmem:[#allocation3 + $0x8] sm:$0xff]  ;;  %4300 = vrot.lane.b32.xlu1 %v12102_v43, %s10465_s9  ;;  %v4228_v30 = vpack.c.bf16 %v4175_v12, %v4174_v47  ;;  %v6075_v0 = vld [vmem:[#allocation6 + $0x400] sm:$0xff]  ;;  %v3555_v22 = vpop.permute.xlu0 %3554 }
 0x30d   :  { %v3298_v26 = vld [vmem:[#allocation3 + $0x212] sm:$0xff]  ;;  %v3725_v37 = vpack.c.bf16 %v3681_v48, %v3680_v55  ;;  %v2875_v34 = vld [vmem:[#allocation3 + $0x9] sm:$0xff]  ;;  %v2553_v3 = vpack.c.bf16 %v2490_v35, %v2489_v18  ;;  %6846 = vmatprep.subr.bf16.mxu0 %v10464_v33  ;;  %v4176_v40 = vld [vmem:[#allocation4 + $0x121] sm:$0xff]  ;;  %2264 = vst [vmem:[#allocation3 + $0x242] ss:$2 sm:$0xff] %v2216_v59  ;;  %v2089_v4 = vpop.permute.xlu1 %2088 }
 0x30e   :  { %v3342_v41 = vpack.c.bf16 %v3299_v63, %v3298_v26  ;;  %v2938_v36 = vpack.c.bf16 %v2875_v34, %v2874_v17  ;;  %v4560_v60 = vld [vmem:[#allocation4 + $0x122] sm:$0xff]  ;;  %v4561_v53 = vld [vmem:[#allocation4 + $0x12a] sm:$0xff]  ;;  %4686 = vrot.lane.b32.xlu0 %v4612_v31, %s10465_s9  ;;  %v3301_v50 = vld [vmem:[#allocation3 + $0x232] sm:$0xff]  ;;  %2137 = vst [vmem:[#allocation3 + $0x25a] ss:$2 sm:$0xff] %v2089_v4 }
 0x30f   :  { %3757 = vst.msk [vmem:[#allocation6 + $0x570] sm:$0xff] %vm1929_vm0, %v3725_v37  ;;  %v10359_v57 = vld [vmem:[%s14754_s3 + $0x70] sm:$0xff]   ;;  %v3682_v5 = vld [vmem:[#allocation3 + $0x228] sm:$0xff]  ;;  %2585 = vst.msk [vmem:[#allocation6] sm:$0xff] %vm1929_vm0, %v2553_v3  ;;  %v4613_v61 = vpack.c.bf16 %v4561_v53, %v4560_v60 }
 0x310   :  { %4013 = vst.msk [vmem:[#allocation6 + $0x570] sm:$0xff] %vm2841_vm3, %v3937_v49  ;;  %v4177_v27 = vld [vmem:[#allocation4 + $0x129] sm:$0xff]  ;;  %v3002_v8 = vld [vmem:[#allocation4 + $0x1] sm:$0xff]  ;;  %6847 = vmatpush1.bf16.msra.mxu0 %v10359_v57  ;;  %4302 = vrot.lane.b32.xlu1 %v4228_v30, %s10465_s9  ;;  %v10360_v6 = vld [vmem:[%s14754_s3 + $0x78] sm:$0xff]   ;;  %v3941_v13 = vpop.permute.xlu0 %3940 }
 0x311   :  { %3374 = vst.msk [vmem:[#allocation6 + $0x5b0] sm:$0xff] %vm1929_vm0, %v3342_v41  ;;  %2970 = vst.msk [vmem:[#allocation6 + $0x8] sm:$0xff] %vm1929_vm0, %v2938_v36  ;;  %v3683_v32 = vld [vmem:[#allocation3 + $0x230] sm:$0xff]  ;;  %v4229_v58 = vpack.c.bf16 %v4177_v27, %v4176_v40  ;;  %v2617_v2 = vld [vmem:[#allocation4] sm:$0xff]  ;;  %6848 = vmatprep.subr.bf16.mxu0 %v10464_v33  ;;  %7252 = vmatmul.mubr.bf16.gmra.mrb[40].mxu1 %v6075_v0  ;;  %v3557_v34 = vpop.permute.xlu1 %3556 }
 0x312   :  { %v3300_v39 = vld [vmem:[#allocation3 + $0x22a] sm:$0xff]  ;;  %v3726_v56 = vpack.c.bf16 %v3683_v32, %v3682_v5  ;;  %v4448_v10 = vld [vmem:[#allocation3 + $0x212] sm:$0xff]  ;;  %v4449_v42 = vld [vmem:[#allocation3 + $0x21a] sm:$0xff]  ;;  %3630 = vst.msk [vmem:[#allocation6 + $0x5b0] sm:$0xff] %vm2841_vm3, %v3555_v22  ;;  %4688 = vrot.lane.b32.xlu0 %v4613_v61, %s10465_s9 }
 0x313   :  { %v3003_v54 = vld [vmem:[#allocation4 + $0x9] sm:$0xff]  ;;  %v3343_v1 = vpack.c.bf16 %v3301_v50, %v3300_v39  ;;  %v4064_v51 = vld [vmem:[#allocation3 + $0x211] sm:$0xff]  ;;  %v4562_v11 = vld [vmem:[#allocation4 + $0x13a] sm:$0xff]  ;;  %v4493_v21 = vpack.c.bf16 %v4449_v42, %v4448_v10 }
 0x314   :  { %v6085_v24 = vld [vmem:[#allocation6 + $0x450] sm:$0xff]  ;;  %v2618_v28 = vld [vmem:[#allocation4 + $0x8] sm:$0xff]  ;;  %3758 = vst.msk [vmem:[#allocation6 + $0x5b8] sm:$0xff] %vm1929_vm0, %v3726_v56  ;;  %v4065_v29 = vld [vmem:[#allocation3 + $0x219] sm:$0xff]  ;;  %v3066_v15 = vpack.c.bf16 %v3003_v54, %v3002_v8  ;;  %6849 = vmatpush1.bf16.msra.mxu0 %v10360_v6  ;;  %4304 = vrot.lane.b32.xlu1 %v4229_v58, %s10465_s9  ;;  %v2218_v59 = vpop.permute.xlu0 %2217 }
 0x315   :  { %4014 = vst.msk [vmem:[#allocation6 + $0x5b8] sm:$0xff] %vm2841_vm3, %v3939_v46  ;;  %7259 = vmatprep.mubr.bf16.mxu1 %v6085_v24  ;;  %v4563_v7 = vld [vmem:[#allocation4 + $0x142] sm:$0xff]  ;;  %v4178_v52 = vld [vmem:[#allocation4 + $0x139] sm:$0xff]  ;;  %v4109_v47 = vpack.c.bf16 %v4065_v29, %v4064_v51  ;;  %v2681_v12 = vpack.c.bf16 %v2618_v28, %v2617_v2  ;;  %v4450_v48 = vld [vmem:[#allocation3 + $0x22a] sm:$0xff]  ;;  %7107 = vmatprep.subr.bf16.mxu0 %v10464_v33  ;;  %v3943_v8 = vpop.permute.xlu1 %3942 }
 0x316   :  { %3375 = vst.msk [vmem:[#allocation6 + $0x5f8] sm:$0xff] %vm1929_vm0, %v3343_v1  ;;  %v4179_v62 = vld [vmem:[#allocation4 + $0x141] sm:$0xff]  ;;  %v10361_v16 = vld [vmem:[%s14754_s3 + $0x178] sm:$0xff]   ;;  %4525 = vst.msk [vmem:[#allocation6 + $0x580] sm:$0xff] %vm1929_vm0, %v4493_v21  ;;  %3130 = vrot.lane.b32.xlu0 %v3066_v15, %s10465_s9  ;;  %v4614_v18 = vpack.c.bf16 %v4563_v7, %v4562_v11 }
 0x317   :  { %v6084_v55 = vld [vmem:[#allocation6 + $0x448] sm:$0xff]  ;;  %v2507_v49 = vld [vmem:[#allocation3 + $0xd8] sm:$0xff]  ;;  %v3684_v26 = vld [vmem:[#allocation3 + $0x240] sm:$0xff]  ;;  %7427 = vmatpush1.bf16.msra.mxu1 %v10361_v16  ;;  %4141 = vst.msk [vmem:[#allocation6 + $0x578] sm:$0xff] %vm1929_vm0, %v4109_v47  ;;  %v4230_v53 = vpack.c.bf16 %v4179_v62, %v4178_v52 }
 0x318   :  { %v3685_v37 = vld [vmem:[#allocation3 + $0x248] sm:$0xff]  ;;  %7685 = vmatprep.subr.bf16.mxu1 %v10464_v33  ;;  %v4451_v41 = vld [vmem:[#allocation3 + $0x232] sm:$0xff]  ;;  %3631 = vst.msk [vmem:[#allocation6 + $0x5f8] sm:$0xff] %vm2841_vm3, %v3557_v34  ;;  %2745 = vrot.lane.b32.xlu1 %v2681_v12, %s10465_s9  ;;  %v2508_v57 = vld [vmem:[#allocation3 + $0xe0] sm:$0xff]  ;;  %v3559_v22 = vpop.permute.xlu0 %3558 }
 0x319   :  { %v3302_v63 = vld [vmem:[#allocation3 + $0x242] sm:$0xff]  ;;  %v3727_v17 = vpack.c.bf16 %v3685_v37, %v3684_v26  ;;  %v3303_v31 = vld [vmem:[#allocation3 + $0x24a] sm:$0xff]  ;;  %v6094_v30 = vld [vmem:[#allocation6 + $0x498] sm:$0xff]  ;;  %v4494_v60 = vpack.c.bf16 %v4451_v41, %v4450_v48  ;;  %7260 = vmatmul.mubr.bf16.gmra.mrb[44].mxu1 %v6084_v55  ;;  %v2562_v5 = vpack.c.bf16 %v2508_v57, %v2507_v49  ;;  %2266 = vst [vmem:[#allocation3 + $0x272] ss:$2 sm:$0xff] %v2218_v59  ;;  %v2091_v11 = vpop.permute.xlu1 %2090 }
 0x31a   :  { %v4066_v36 = vld [vmem:[#allocation3 + $0x229] sm:$0xff]  ;;  %v3344_v35 = vpack.c.bf16 %v3303_v31, %v3302_v63  ;;  %v4067_v3 = vld [vmem:[#allocation3 + $0x231] sm:$0xff]  ;;  %v2620_v40 = vld [vmem:[#allocation4 + $0x20] sm:$0xff]  ;;  %7267 = vmatprep.mubr.bf16.mxu1 %v6094_v30  ;;  %4690 = vrot.lane.b32.xlu0 %v4614_v18, %s10465_s9  ;;  %2139 = vst [vmem:[#allocation3 + $0x28a] ss:$2 sm:$0xff] %v2091_v11 }
 0x31b   :  { %3759 = vst.msk [vmem:[#allocation6 + $0x600] sm:$0xff] %vm1929_vm0, %v3727_v17  ;;  %v2619_v0 = vld [vmem:[#allocation4 + $0x18] sm:$0xff]  ;;  %4526 = vst.msk [vmem:[#allocation6 + $0x5c8] sm:$0xff] %vm1929_vm0, %v4494_v60  ;;  %v4110_v27 = vpack.c.bf16 %v4067_v3, %v4066_v36  ;;  %v4452_v32 = vld [vmem:[#allocation3 + $0x242] sm:$0xff] }
 0x31c   :  { %4015 = vst.msk [vmem:[#allocation6 + $0x600] sm:$0xff] %vm2841_vm3, %v3941_v13  ;;  %v3686_v46 = vld [vmem:[#allocation3 + $0x258] sm:$0xff]  ;;  %v3687_v39 = vld [vmem:[#allocation3 + $0x260] sm:$0xff]  ;;  %4306 = vrot.lane.b32.xlu1 %v4230_v53, %s10465_s9  ;;  %v2682_v58 = vpack.c.bf16 %v2620_v40, %v2619_v0  ;;  %v4453_v6 = vld [vmem:[#allocation3 + $0x24a] sm:$0xff]  ;;  %v3945_v37 = vpop.permute.xlu0 %3944 }
 0x31d   :  { %3376 = vst.msk [vmem:[#allocation6 + $0x640] sm:$0xff] %vm1929_vm0, %v3344_v35  ;;  %v3304_v56 = vld [vmem:[#allocation3 + $0x25a] sm:$0xff]  ;;  %v3728_v61 = vpack.c.bf16 %v3687_v39, %v3686_v46  ;;  %v3305_v50 = vld [vmem:[#allocation3 + $0x262] sm:$0xff]  ;;  %v4564_v54 = vld [vmem:[#allocation4 + $0x152] sm:$0xff]  ;;  %v4495_v10 = vpack.c.bf16 %v4453_v6, %v4452_v32  ;;  %v3561_v17 = vpop.permute.xlu1 %3560 }
 0x31e   :  { %v4565_v24 = vld [vmem:[#allocation4 + $0x15a] sm:$0xff]  ;;  %4142 = vst.msk [vmem:[#allocation6 + $0x5c0] sm:$0xff] %vm1929_vm0, %v4110_v27  ;;  %2594 = vst.msk [vmem:[#allocation6 + $0x288] sm:$0xff] %vm1929_vm0, %v2562_v5  ;;  %v3345_v1 = vpack.c.bf16 %v3305_v50, %v3304_v56  ;;  %v4180_v2 = vld [vmem:[#allocation4 + $0x151] sm:$0xff]  ;;  %3132 = vrot.lane.b32.xlu0 %v11945_v19, %s10465_s9 }
 0x31f   :  { %v4181_v28 = vld [vmem:[#allocation4 + $0x159] sm:$0xff]  ;;  %3760 = vst.msk [vmem:[#allocation6 + $0x648] sm:$0xff] %vm1929_vm0, %v3728_v61  ;;  %v4068_v42 = vld [vmem:[#allocation3 + $0x241] sm:$0xff]  ;;  %v4069_v51 = vld [vmem:[#allocation3 + $0x249] sm:$0xff]  ;;  %v4615_v52 = vpack.c.bf16 %v4565_v24, %v4564_v54 }
 0x320   :  { %v2894_v4 = vld [vmem:[#allocation3 + $0xf1] sm:$0xff]  ;;  %4016 = vst.msk [vmem:[#allocation6 + $0x648] sm:$0xff] %vm2841_vm3, %v3943_v8  ;;  %3632 = vst.msk [vmem:[#allocation6 + $0x640] sm:$0xff] %vm2841_vm3, %v3559_v22  ;;  %v4111_v21 = vpack.c.bf16 %v4069_v51, %v4068_v42  ;;  %v2895_v29 = vld [vmem:[#allocation3 + $0xf9] sm:$0xff]  ;;  %2747 = vrot.lane.b32.xlu1 %v2682_v58, %s10465_s9  ;;  %v4231_v47 = vpack.c.bf16 %v4181_v28, %v4180_v2  ;;  %v2220_v57 = vpop.permute.xlu0 %2219 }
 0x321   :  { %v6093_v7 = vld [vmem:[#allocation6 + $0x490] sm:$0xff]  ;;  %3377 = vst.msk [vmem:[#allocation6 + $0x688] sm:$0xff] %vm1929_vm0, %v3345_v1  ;;  %v6103_v62 = vld [vmem:[#allocation6 + $0x4e0] sm:$0xff]  ;;  %4527 = vst.msk [vmem:[#allocation6 + $0x610] sm:$0xff] %vm1929_vm0, %v4495_v10  ;;  %v2948_v16 = vpack.c.bf16 %v2895_v29, %v2894_v4  ;;  %v3947_v32 = vpop.permute.xlu1 %3946 }
 0x322   :  { %v2509_v15 = vld [vmem:[#allocation3 + $0xf0] sm:$0xff]  ;;  %v2622_v55 = vld [vmem:[#allocation4 + $0x38] sm:$0xff]  ;;  %4143 = vst.msk [vmem:[#allocation6 + $0x608] sm:$0xff] %vm1929_vm0, %v4111_v21  ;;  %7268 = vmatmul.mubr.bf16.gmra.mrb[48].mxu1 %v6093_v7  ;;  %v4455_v41 = vld [vmem:[#allocation3 + $0x262] sm:$0xff]  ;;  %4692 = vrot.lane.b32.xlu0 %v4615_v52, %s10465_s9 }
 0x323   :  { %v2621_v12 = vld [vmem:[#allocation4 + $0x30] sm:$0xff]  ;;  %v2510_v48 = vld [vmem:[#allocation3 + $0xf8] sm:$0xff]  ;;  %2980 = vst.msk [vmem:[#allocation6 + $0x2d8] sm:$0xff] %vm1929_vm0, %v2948_v16  ;;  %7275 = vmatprep.mubr.bf16.mxu1 %v6103_v62  ;;  %v4071_v40 = vld [vmem:[#allocation3 + $0x261] sm:$0xff] }
 0x324   :  { %v3688_v49 = vld [vmem:[#allocation3 + $0x270] sm:$0xff]  ;;  %v3689_v26 = vld [vmem:[#allocation3 + $0x278] sm:$0xff]  ;;  %v2563_v19 = vpack.c.bf16 %v2510_v48, %v2509_v15  ;;  %3633 = vst.msk [vmem:[#allocation6 + $0x688] sm:$0xff] %vm2841_vm3, %v3561_v17  ;;  %4308 = vrot.lane.b32.xlu1 %v4231_v47, %s10465_s9  ;;  %v2683_v30 = vpack.c.bf16 %v2622_v55, %v2621_v12  ;;  %2268 = vst [vmem:[#allocation3 + $0x2a2] ss:$2 sm:$0xff] %v2220_v57  ;;  %v3563_v28 = vpop.permute.xlu0 %3562 }
 0x325   :  { %v3306_v13 = vld [vmem:[#allocation3 + $0x272] sm:$0xff]  ;;  %v3729_v63 = vpack.c.bf16 %v3689_v26, %v3688_v49  ;;  %v3307_v34 = vld [vmem:[#allocation3 + $0x27a] sm:$0xff]  ;;  %v4566_v18 = vld [vmem:[#allocation4 + $0x16a] sm:$0xff] }
 0x326   :  { %v4454_v31 = vld [vmem:[#allocation3 + $0x25a] sm:$0xff]  ;;  %v3346_v36 = vpack.c.bf16 %v3307_v34, %v3306_v13  ;;  %2595 = vst.msk [vmem:[#allocation6 + $0x2d0] sm:$0xff] %vm1929_vm0, %v2563_v19  ;;  %v4567_v60 = vld [vmem:[#allocation4 + $0x172] sm:$0xff]  ;;  %v4182_v53 = vld [vmem:[#allocation4 + $0x169] sm:$0xff]  ;;  %3134 = vrot.lane.b32.xlu0 %v11977_v44, %s10465_s9  ;;  %v2093_v44 = vpop.permute.xlu1 %2092 }
 0x327   :  { %v4496_v35 = vpack.c.bf16 %v4455_v41, %v4454_v31  ;;  %3761 = vst.msk [vmem:[#allocation6 + $0x690] sm:$0xff] %vm1929_vm0, %v3729_v63  ;;  %v4070_v3 = vld [vmem:[#allocation3 + $0x259] sm:$0xff]  ;;  %v4183_v0 = vld [vmem:[#allocation4 + $0x171] sm:$0xff]  ;;  %v3690_v27 = vld [vmem:[#allocation3 + $0x288] sm:$0xff]  ;;  %v4616_v56 = vpack.c.bf16 %v4567_v60, %v4566_v18 }
 0x328   :  { %4017 = vst.msk [vmem:[#allocation6 + $0x690] sm:$0xff] %vm2841_vm3, %v3945_v37  ;;  %v6102_v59 = vld [vmem:[#allocation6 + $0x4d8] sm:$0xff]  ;;  %v3691_v5 = vld [vmem:[#allocation3 + $0x290] sm:$0xff]  ;;  %v4112_v39 = vpack.c.bf16 %v4071_v40, %v4070_v3  ;;  %v6112_v50 = vld [vmem:[#allocation6 + $0x528] sm:$0xff]  ;;  %2749 = vrot.lane.b32.xlu1 %v2683_v30, %s10465_s9  ;;  %v4232_v54 = vpack.c.bf16 %v4183_v0, %v4182_v53  ;;  %v3949_v48 = vpop.permute.xlu0 %3948 }
 0x329   :  { %3378 = vst.msk [vmem:[#allocation6 + $0x6d0] sm:$0xff] %vm1929_vm0, %v3346_v36  ;;  %4528 = vst.msk [vmem:[#allocation6 + $0x658] sm:$0xff] %vm1929_vm0, %v4496_v35  ;;  %v3308_v46 = vld [vmem:[#allocation3 + $0x28a] sm:$0xff]  ;;  %v3730_v8 = vpack.c.bf16 %v3691_v5, %v3690_v27  ;;  %v3309_v61 = vld [vmem:[#allocation3 + $0x292] sm:$0xff] }
 0x32a   :  { %v3347_v24 = vpack.c.bf16 %v3309_v61, %v3308_v46  ;;  %v2623_v58 = vld [vmem:[#allocation4 + $0x48] sm:$0xff]  ;;  %v2624_v1 = vld [vmem:[#allocation4 + $0x50] sm:$0xff]  ;;  %4144 = vst.msk [vmem:[#allocation6 + $0x650] sm:$0xff] %vm1929_vm0, %v4112_v39  ;;  %7276 = vmatmul.mubr.bf16.gmra.mrb[52].mxu1 %v6102_v59  ;;  %v4457_v11 = vld [vmem:[#allocation3 + $0x27a] sm:$0xff]  ;;  %4694 = vrot.lane.b32.xlu0 %v4616_v56, %s10465_s9  ;;  %v3565_v37 = vpop.permute.xlu1 %3564 }
 0x32b   :  { %v2896_v2 = vld [vmem:[#allocation3 + $0x109] sm:$0xff]  ;;  %3762 = vst.msk [vmem:[#allocation6 + $0x6d8] sm:$0xff] %vm1929_vm0, %v3730_v8  ;;  %v2897_v6 = vld [vmem:[#allocation3 + $0x111] sm:$0xff]  ;;  %7283 = vmatprep.mubr.bf16.mxu1 %v6112_v50  ;;  %2141 = vst [vmem:[#allocation3 + $0x2ba] ss:$2 sm:$0xff] %v2093_v44  ;;  %v2684_v52 = vpack.c.bf16 %v2624_v1, %v2623_v58 }
 0x32c   :  { %v2511_v22 = vld [vmem:[#allocation3 + $0x108] sm:$0xff]  ;;  %v2512_v10 = vld [vmem:[#allocation3 + $0x110] sm:$0xff]  ;;  %4018 = vst.msk [vmem:[#allocation6 + $0x6d8] sm:$0xff] %vm2841_vm3, %v3947_v32  ;;  %3634 = vst.msk [vmem:[#allocation6 + $0x6d0] sm:$0xff] %vm2841_vm3, %v3563_v28  ;;  %v2949_v42 = vpack.c.bf16 %v2897_v6, %v2896_v2  ;;  %4310 = vrot.lane.b32.xlu1 %v4232_v54, %s10465_s9  ;;  %v2222_v30 = vpop.permute.xlu0 %2221 }
 0x32d   :  { %3379 = vst.msk [vmem:[#allocation6 + $0x718] sm:$0xff] %vm1929_vm0, %v3347_v24  ;;  %v2564_v51 = vpack.c.bf16 %v2512_v10, %v2511_v22  ;;  %v4456_v4 = vld [vmem:[#allocation3 + $0x272] sm:$0xff]  ;;  %v4568_v7 = vld [vmem:[#allocation4 + $0x182] sm:$0xff]  ;;  %v4569_v21 = vld [vmem:[#allocation4 + $0x18a] sm:$0xff] }
 0x32e   :  { %v4184_v29 = vld [vmem:[#allocation4 + $0x181] sm:$0xff]  ;;  %v4497_v15 = vpack.c.bf16 %v4457_v11, %v4456_v4  ;;  %v4185_v16 = vld [vmem:[#allocation4 + $0x189] sm:$0xff]  ;;  %2981 = vst.msk [vmem:[#allocation6 + $0x320] sm:$0xff] %vm1929_vm0, %v2949_v42  ;;  %v4072_v47 = vld [vmem:[#allocation3 + $0x271] sm:$0xff]  ;;  %3136 = vrot.lane.b32.xlu0 %v11993_v9, %s10465_s9  ;;  %v4617_v17 = vpack.c.bf16 %v4569_v21, %v4568_v7  ;;  %v3951_v0 = vpop.permute.xlu1 %3950 }
 0x32f   :  { %v6111_v62 = vld [vmem:[#allocation6 + $0x520] sm:$0xff]  ;;  %2596 = vst.msk [vmem:[#allocation6 + $0x318] sm:$0xff] %vm1929_vm0, %v2564_v51  ;;  %v3693_v55 = vld [vmem:[#allocation3 + $0x2a8] sm:$0xff]  ;;  %v6121_v31 = vld [vmem:[#allocation6 + $0x570] sm:$0xff]  ;;  %v4233_v36 = vpack.c.bf16 %v4185_v16, %v4184_v29 }
 0x330   :  { %v3692_v12 = vld [vmem:[#allocation3 + $0x2a0] sm:$0xff]  ;;  %4529 = vst.msk [vmem:[#allocation6 + $0x6a0] sm:$0xff] %vm1929_vm0, %v4497_v15  ;;  %v3311_v13 = vld [vmem:[#allocation3 + $0x2aa] sm:$0xff]  ;;  %2751 = vrot.lane.b32.xlu1 %v2684_v52, %s10465_s9  ;;  %2270 = vst [vmem:[#allocation3 + $0x2d2] ss:$2 sm:$0xff] %v2222_v30 }
 0x331   :  { %v3310_v49 = vld [vmem:[#allocation3 + $0x2a2] sm:$0xff]  ;;  %v3731_v26 = vpack.c.bf16 %v3693_v55, %v3692_v12  ;;  %v4073_v19 = vld [vmem:[#allocation3 + $0x279] sm:$0xff]  ;;  %3635 = vst.msk [vmem:[#allocation6 + $0x718] sm:$0xff] %vm2841_vm3, %v3565_v37  ;;  %v4570_v46 = vld [vmem:[#allocation4 + $0x1ca] sm:$0xff]  ;;  %v3567_v54 = vpop.permute.xlu0 %3566 }
 0x332   :  { %v2898_v63 = vld [vmem:[#allocation3 + $0x121] sm:$0xff]  ;;  %v3348_v34 = vpack.c.bf16 %v3311_v13, %v3310_v49  ;;  %v4113_v41 = vpack.c.bf16 %v4073_v19, %v4072_v47  ;;  %v2899_v18 = vld [vmem:[#allocation3 + $0x129] sm:$0xff]  ;;  %7284 = vmatmul.mubr.bf16.gmra.mrb[56].mxu1 %v6111_v62  ;;  %v3694_v57 = vld [vmem:[#allocation3 + $0x2b8] sm:$0xff]  ;;  %4696 = vrot.lane.b32.xlu0 %v4617_v17, %s10465_s9  ;;  %v2095_v2 = vpop.permute.xlu1 %2094 }
 0x333   :  { %3763 = vst.msk [vmem:[#allocation6 + $0x720] sm:$0xff] %vm1929_vm0, %v3731_v26  ;;  %v2513_v35 = vld [vmem:[#allocation3 + $0x120] sm:$0xff]  ;;  %v2626_v53 = vld [vmem:[#allocation4 + $0x68] sm:$0xff]  ;;  %v2950_v9 = vpack.c.bf16 %v2899_v18, %v2898_v63  ;;  %7291 = vmatprep.mubr.bf16.mxu1 %v6121_v31  ;;  %v4571_v56 = vld [vmem:[#allocation4 + $0x1d2] sm:$0xff] }
 0x334   :  { %4019 = vst.msk [vmem:[#allocation6 + $0x720] sm:$0xff] %vm2841_vm3, %v3949_v48  ;;  %v2625_v60 = vld [vmem:[#allocation4 + $0x60] sm:$0xff]  ;;  %v2514_v3 = vld [vmem:[#allocation3 + $0x128] sm:$0xff]  ;;  %4312 = vrot.lane.b32.xlu1 %v4233_v36, %s10465_s9  ;;  %v4187_v50 = vld [vmem:[#allocation4 + $0x1d1] sm:$0xff]  ;;  %v4618_v44 = vpack.c.bf16 %v4571_v56, %v4570_v46 }
 0x335   :  { %3380 = vst.msk [vmem:[#allocation6 + $0x760] sm:$0xff] %vm1929_vm0, %v3348_v34  ;;  %4145 = vst.msk [vmem:[#allocation6 + $0x698] sm:$0xff] %vm1929_vm0, %v4113_v41  ;;  %v3695_v59 = vld [vmem:[#allocation3 + $0x2c0] sm:$0xff]  ;;  %v2565_v27 = vpack.c.bf16 %v2514_v3, %v2513_v35  ;;  %v2685_v39 = vpack.c.bf16 %v2626_v53, %v2625_v60  ;;  %v4186_v61 = vld [vmem:[#allocation4 + $0x1c9] sm:$0xff]  ;;  %v3953_v52 = vpop.permute.xlu0 %3952 }
 0x336   :  { %v3312_v40 = vld [vmem:[#allocation3 + $0x2ba] sm:$0xff]  ;;  %v3732_v5 = vpack.c.bf16 %v3695_v59, %v3694_v57  ;;  %v3313_v32 = vld [vmem:[#allocation3 + $0x2c2] sm:$0xff]  ;;  %2982 = vst.msk [vmem:[#allocation6 + $0x368] sm:$0xff] %vm1929_vm0, %v2950_v9  ;;  %v4458_v24 = vld [vmem:[#allocation3 + $0x28a] sm:$0xff]  ;;  %3138 = vrot.lane.b32.xlu0 %v12015_v23, %s10465_s9  ;;  %v4234_v4 = vpack.c.bf16 %v4187_v50, %v4186_v61  ;;  %v3569_v47 = vpop.permute.xlu1 %3568 }
 0x337   :  { %v3349_v8 = vpack.c.bf16 %v3313_v32, %v3312_v40  ;;  %2597 = vst.msk [vmem:[#allocation6 + $0x360] sm:$0xff] %vm1929_vm0, %v2565_v27  ;;  %v4459_v58 = vld [vmem:[#allocation3 + $0x292] sm:$0xff]  ;;  %v4074_v1 = vld [vmem:[#allocation3 + $0x289] sm:$0xff]  ;;  %2143 = vst [vmem:[#allocation3 + $0x2ea] ss:$2 sm:$0xff] %v2095_v2 }
 0x338   :  { %3764 = vst.msk [vmem:[#allocation6 + $0x768] sm:$0xff] %vm1929_vm0, %v3732_v5  ;;  %v6120_v28 = vld [vmem:[#allocation6 + $0x568] sm:$0xff]  ;;  %v4498_v6 = vpack.c.bf16 %v4459_v58, %v4458_v24  ;;  %v4075_v22 = vld [vmem:[#allocation3 + $0x291] sm:$0xff]  ;;  %v2900_v10 = vld [vmem:[#allocation3 + $0x139] sm:$0xff]  ;;  %2753 = vrot.lane.b32.xlu1 %v2685_v39, %s10465_s9 }
 0x339   :  { %4020 = vst.msk [vmem:[#allocation6 + $0x768] sm:$0xff] %vm2841_vm3, %v3951_v0  ;;  %3636 = vst.msk [vmem:[#allocation6 + $0x760] sm:$0xff] %vm2841_vm3, %v3567_v54  ;;  %v6130_v42 = vld [vmem:[#allocation6 + $0x5b8] sm:$0xff]  ;;  %v4114_v51 = vpack.c.bf16 %v4075_v22, %v4074_v1  ;;  %v2628_v7 = vld [vmem:[#allocation4 + $0x80] sm:$0xff]  ;;  %v2224_v31 = vpop.permute.xlu0 %2223 }
 0x33a   :  { %3381 = vst.msk [vmem:[#allocation6 + $0x7a8] sm:$0xff] %vm1929_vm0, %v3349_v8  ;;  %v2627_v11 = vld [vmem:[#allocation4 + $0x78] sm:$0xff]  ;;  %4530 = vst.msk [vmem:[#allocation6 + $0x6e8] sm:$0xff] %vm1929_vm0, %v4498_v6  ;;  %v2901_v21 = vld [vmem:[#allocation3 + $0x141] sm:$0xff]  ;;  %7292 = vmatmul.mubr.bf16.gmra.mrb[60].mxu1 %v6120_v28  ;;  %4698 = vrot.lane.b32.xlu0 %v4618_v44, %s10465_s9  ;;  %v3955_v53 = vpop.permute.xlu1 %3954 }
 0x33b   :  { %v3696_v29 = vld [vmem:[#allocation3 + $0x2d0] sm:$0xff]  ;;  %v3697_v15 = vld [vmem:[#allocation3 + $0x2d8] sm:$0xff]  ;;  %4146 = vst.msk [vmem:[#allocation6 + $0x6e0] sm:$0xff] %vm1929_vm0, %v4114_v51  ;;  %v2951_v16 = vpack.c.bf16 %v2901_v21, %v2900_v10  ;;  %7299 = vmatprep.mubr.bf16.mxu1 %v6130_v42  ;;  %v2516_v48 = vld [vmem:[#allocation3 + $0x140] sm:$0xff]  ;;  %v2686_v19 = vpack.c.bf16 %v2628_v7, %v2627_v11 }
 0x33c   :  { %v3314_v62 = vld [vmem:[#allocation3 + $0x2d2] sm:$0xff]  ;;  %v3733_v23 = vpack.c.bf16 %v3697_v15, %v3696_v29  ;;  %v3315_v12 = vld [vmem:[#allocation3 + $0x2da] sm:$0xff]  ;;  %3637 = vst.msk [vmem:[#allocation6 + $0x7a8] sm:$0xff] %vm2841_vm3, %v3569_v47  ;;  %v4572_v26 = vld [vmem:[#allocation4 + $0x1e2] sm:$0xff]  ;;  %4314 = vrot.lane.b32.xlu1 %v4234_v4, %s10465_s9 }
 0x33d   :  { %v2515_v55 = vld [vmem:[#allocation3 + $0x138] sm:$0xff]  ;;  %v3350_v49 = vpack.c.bf16 %v3315_v12, %v3314_v62  ;;  %v4573_v37 = vld [vmem:[#allocation4 + $0x1ea] sm:$0xff]  ;;  %2983 = vst.msk [vmem:[#allocation6 + $0x3b0] sm:$0xff] %vm1929_vm0, %v2951_v16  ;;  %v4188_v63 = vld [vmem:[#allocation4 + $0x1e1] sm:$0xff]  ;;  %v3571_v39 = vpop.permute.xlu0 %3570 }
 0x33e   :  { %v2566_v13 = vpack.c.bf16 %v2516_v48, %v2515_v55  ;;  %3765 = vst.msk [vmem:[#allocation6 + $0x7b0] sm:$0xff] %vm1929_vm0, %v3733_v23  ;;  %v4460_v17 = vld [vmem:[#allocation3 + $0x2a2] sm:$0xff]  ;;  %v4461_v34 = vld [vmem:[#allocation3 + $0x2aa] sm:$0xff]  ;;  %2272 = vst [vmem:[#allocation3 + $0x302] ss:$2 sm:$0xff] %v2224_v31  ;;  %3140 = vrot.lane.b32.xlu0 %v12029_v45, %s10465_s9  ;;  %v4619_v57 = vpack.c.bf16 %v4573_v37, %v4572_v26  ;;  %v2097_v50 = vpop.permute.xlu1 %2096 }
 0x33f   :  { %4021 = vst.msk [vmem:[#allocation6 + $0x7b0] sm:$0xff] %vm2841_vm3, %v3953_v52  ;;  %v6129_v41 = vld [vmem:[#allocation6 + $0x5b0] sm:$0xff]  ;;  %v4499_v18 = vpack.c.bf16 %v4461_v34, %v4460_v17  ;;  %v4076_v35 = vld [vmem:[#allocation3 + $0x2a1] sm:$0xff]  ;;  %v2630_v32 = vld [vmem:[#allocation4 + $0x98] sm:$0xff] }
 0x340   :  { %3382 = vst.msk [vmem:[#allocation6 + $0x7f0] sm:$0xff] %vm1929_vm0, %v3350_v49  ;;  %v4189_v36 = vld [vmem:[#allocation4 + $0x1e9] sm:$0xff]  ;;  %2598 = vst.msk [vmem:[#allocation6 + $0x3a8] sm:$0xff] %vm1929_vm0, %v2566_v13  ;;  %v3317_v59 = vld [vmem:[#allocation3 + $0x2f2] sm:$0xff]  ;;  %2755 = vrot.lane.b32.xlu1 %v2686_v19, %s10465_s9 }
 0x341   :  { %v3698_v30 = vld [vmem:[#allocation3 + $0x2e8] sm:$0xff]  ;;  %v3699_v60 = vld [vmem:[#allocation3 + $0x2f0] sm:$0xff]  ;;  %v6139_v0 = vld [vmem:[#allocation6 + $0x600] sm:$0xff]  ;;  %4531 = vst.msk [vmem:[#allocation6 + $0x730] sm:$0xff] %vm1929_vm0, %v4499_v18  ;;  %v4235_v40 = vpack.c.bf16 %v4189_v36, %v4188_v63  ;;  %v3957_v4 = vpop.permute.xlu0 %3956 }
 0x342   :  { %v3316_v9 = vld [vmem:[#allocation3 + $0x2ea] sm:$0xff]  ;;  %v3734_v3 = vpack.c.bf16 %v3699_v60, %v3698_v30  ;;  %7300 = vmatmul.mubr.bf16.gmra.mrb[64].mxu1 %v6129_v41  ;;  %v2903_v61 = vld [vmem:[#allocation3 + $0x159] sm:$0xff]  ;;  %3638 = vst.msk [vmem:[#allocation6 + $0x7f0] sm:$0xff] %vm2841_vm3, %v3571_v39  ;;  %2145 = vst [vmem:[#allocation3 + $0x31a] ss:$2 sm:$0xff] %v2097_v50  ;;  %4700 = vrot.lane.b32.xlu0 %v4619_v57, %s10465_s9  ;;  %v3573_v21 = vpop.permute.xlu1 %3572 }
 0x343   :  { %v3351_v27 = vpack.c.bf16 %v3317_v59, %v3316_v9  ;;  %v2629_v5 = vld [vmem:[#allocation4 + $0x90] sm:$0xff]  ;;  %7307 = vmatprep.mubr.bf16.mxu1 %v6139_v0  ;;  %v2518_v24 = vld [vmem:[#allocation3 + $0x158] sm:$0xff]  ;;  %v4575_v1 = vld [vmem:[#allocation4 + $0x202] sm:$0xff] }
 0x344   :  { %v4077_v46 = vld [vmem:[#allocation3 + $0x2a9] sm:$0xff]  ;;  %3766 = vst.msk [vmem:[#allocation6 + $0x7f8] sm:$0xff] %vm1929_vm0, %v3734_v3  ;;  %v2902_v56 = vld [vmem:[#allocation3 + $0x151] sm:$0xff]  ;;  %v4574_v58 = vld [vmem:[#allocation4 + $0x1fa] sm:$0xff]  ;;  %4316 = vrot.lane.b32.xlu1 %v4235_v40, %s10465_s9  ;;  %v2687_v6 = vpack.c.bf16 %v2630_v32, %v2629_v5 }
 0x345   :  { %v4115_v8 = vpack.c.bf16 %v4077_v46, %v4076_v35  ;;  %v2517_v45 = vld [vmem:[#allocation3 + $0x150] sm:$0xff]  ;;  %4022 = vst.msk [vmem:[#allocation6 + $0x7f8] sm:$0xff] %vm2841_vm3, %v3955_v53  ;;  %v2952_v54 = vpack.c.bf16 %v2903_v61, %v2902_v56  ;;  %v4190_v2 = vld [vmem:[#allocation4 + $0x1f9] sm:$0xff]  ;;  %v4191_v10 = vld [vmem:[#allocation4 + $0x201] sm:$0xff]  ;;  %v4620_v62 = vpack.c.bf16 %v4575_v1, %v4574_v58  ;;  %v2226_v49 = vpop.permute.xlu0 %2225 }
 0x346   :  { %3383 = vst.msk [vmem:[#allocation6 + $0x838] sm:$0xff] %vm1929_vm0, %v3351_v27  ;;  %v2567_v28 = vpack.c.bf16 %v2518_v24, %v2517_v45  ;;  %v6138_v22 = vld [vmem:[#allocation6 + $0x5f8] sm:$0xff]  ;;  %v3700_v42 = vld [vmem:[#allocation3 + $0x300] sm:$0xff]  ;;  %v3701_v51 = vld [vmem:[#allocation3 + $0x308] sm:$0xff]  ;;  %3142 = vrot.lane.b32.xlu0 %v12040_v14, %s10465_s9  ;;  %v4236_v12 = vpack.c.bf16 %v4191_v10, %v4190_v2  ;;  %v3959_v17 = vpop.permute.xlu1 %3958 }
 0x347   :  { %4147 = vst.msk [vmem:[#allocation6 + $0x728] sm:$0xff] %vm1929_vm0, %v4115_v8  ;;  %2984 = vst.msk [vmem:[#allocation6 + $0x3f8] sm:$0xff] %vm1929_vm0, %v2952_v54  ;;  %v4462_v44 = vld [vmem:[#allocation3 + $0x2ba] sm:$0xff]  ;;  %v3318_v11 = vld [vmem:[#allocation3 + $0x302] sm:$0xff]  ;;  %v3735_v7 = vpack.c.bf16 %v3701_v51, %v3700_v42 }
 0x348   :  { %2599 = vst.msk [vmem:[#allocation6 + $0x3f0] sm:$0xff] %vm1929_vm0, %v2567_v28  ;;  %v3319_v29 = vld [vmem:[#allocation3 + $0x30a] sm:$0xff]  ;;  %v4463_v15 = vld [vmem:[#allocation3 + $0x2c2] sm:$0xff]  ;;  %v4078_v52 = vld [vmem:[#allocation3 + $0x2b9] sm:$0xff]  ;;  %2757 = vrot.lane.b32.xlu1 %v2687_v6, %s10465_s9 }
 0x349   :  { %3639 = vst.msk [vmem:[#allocation6 + $0x838] sm:$0xff] %vm2841_vm3, %v3573_v21  ;;  %v3352_v16 = vpack.c.bf16 %v3319_v29, %v3318_v11  ;;  %v6148_v23 = vld [vmem:[#allocation6 + $0x648] sm:$0xff]  ;;  %v4500_v47 = vpack.c.bf16 %v4463_v15, %v4462_v44  ;;  %v2632_v37 = vld [vmem:[#allocation4 + $0xb0] sm:$0xff]  ;;  %2274 = vst [vmem:[#allocation3 + $0x332] ss:$2 sm:$0xff] %v2226_v49 }
 0x34a   :  { %3767 = vst.msk [vmem:[#allocation6 + $0x840] sm:$0xff] %vm1929_vm0, %v3735_v7  ;;  %v4079_v55 = vld [vmem:[#allocation3 + $0x2c1] sm:$0xff]  ;;  %v2904_v48 = vld [vmem:[#allocation3 + $0x169] sm:$0xff]  ;;  %7308 = vmatmul.mubr.bf16.gmra.mrb[68].mxu1 %v6138_v22  ;;  %v2905_v13 = vld [vmem:[#allocation3 + $0x171] sm:$0xff]  ;;  %4702 = vrot.lane.b32.xlu0 %v4620_v62, %s10465_s9  ;;  %v3575_v57 = vpop.permute.xlu0 %3574 }
 0x34b   :  { %4023 = vst.msk [vmem:[#allocation6 + $0x840] sm:$0xff] %vm2841_vm3, %v3957_v4  ;;  %v2631_v26 = vld [vmem:[#allocation4 + $0xa8] sm:$0xff]  ;;  %v4116_v14 = vpack.c.bf16 %v4079_v55, %v4078_v52  ;;  %v3702_v19 = vld [vmem:[#allocation3 + $0x318] sm:$0xff]  ;;  %v3703_v63 = vld [vmem:[#allocation3 + $0x320] sm:$0xff]  ;;  %7315 = vmatprep.mubr.bf16.mxu1 %v6148_v23  ;;  %v2953_v31 = vpack.c.bf16 %v2905_v13, %v2904_v48  ;;  %v2067_v27 = vpop.permute.xlu1 %2066 }
 0x34c   :  { %3384 = vst.msk [vmem:[#allocation6 + $0x880] sm:$0xff] %vm1929_vm0, %v3352_v16  ;;  %4532 = vst.msk [vmem:[#allocation6 + $0x778] sm:$0xff] %vm1929_vm0, %v4500_v47  ;;  %v3320_v34 = vld [vmem:[#allocation3 + $0x31a] sm:$0xff]  ;;  %v3736_v41 = vpack.c.bf16 %v3703_v63, %v3702_v19  ;;  %v3321_v36 = vld [vmem:[#allocation3 + $0x322] sm:$0xff]  ;;  %4318 = vrot.lane.b32.xlu1 %v4236_v12, %s10465_s9  ;;  %v2688_v30 = vpack.c.bf16 %v2632_v37, %v2631_v26 }
 0x34d   :  { %v4576_v18 = vld [vmem:[#allocation4 + $0x212] sm:$0xff]  ;;  %v4577_v35 = vld [vmem:[#allocation4 + $0x21a] sm:$0xff]  ;;  %4148 = vst.msk [vmem:[#allocation6 + $0x770] sm:$0xff] %vm1929_vm0, %v4116_v14  ;;  %v3353_v60 = vpack.c.bf16 %v3321_v36, %v3320_v34  ;;  %2985 = vst.msk [vmem:[#allocation6 + $0x440] sm:$0xff] %vm1929_vm0, %v2953_v31 }
 0x34e   :  { %v4192_v53 = vld [vmem:[#allocation4 + $0x211] sm:$0xff]  ;;  %v4193_v9 = vld [vmem:[#allocation4 + $0x219] sm:$0xff]  ;;  %v2519_v3 = vld [vmem:[#allocation3 + $0x168] sm:$0xff]  ;;  %3768 = vst.msk [vmem:[#allocation6 + $0x888] sm:$0xff] %vm1929_vm0, %v3736_v41  ;;  %3144 = vrot.lane.b32.xlu0 %v12059_v25, %s10465_s9  ;;  %v4621_v56 = vpack.c.bf16 %v4577_v35, %v4576_v18 }
 0x34f   :  { %v2520_v59 = vld [vmem:[#allocation3 + $0x170] sm:$0xff]  ;;  %v4465_v40 = vld [vmem:[#allocation3 + $0x2da] sm:$0xff]  ;;  %4024 = vst.msk [vmem:[#allocation6 + $0x888] sm:$0xff] %vm2841_vm3, %v3959_v17  ;;  %3640 = vst.msk [vmem:[#allocation6 + $0x880] sm:$0xff] %vm2841_vm3, %v3575_v57  ;;  %v4237_v50 = vpack.c.bf16 %v4193_v9, %v4192_v53  ;;  %v3961_v28 = vpop.permute.xlu0 %3960 }
 0x350   :  { %v4464_v0 = vld [vmem:[#allocation3 + $0x2d2] sm:$0xff]  ;;  %v6147_v5 = vld [vmem:[#allocation6 + $0x640] sm:$0xff]  ;;  %3385 = vst.msk [vmem:[#allocation6 + $0x8c8] sm:$0xff] %vm1929_vm0, %v3353_v60  ;;  %v2568_v32 = vpack.c.bf16 %v2520_v59, %v2519_v3  ;;  %2115 = vst [vmem:[#allocation3 + $0x1a] ss:$2 sm:$0xff] %v2067_v27  ;;  %2759 = vrot.lane.b32.xlu1 %v2688_v30, %s10465_s9  ;;  %v3577_v22 = vpop.permute.xlu1 %3576 }
 0x351   :  { %v4501_v46 = vpack.c.bf16 %v4465_v40, %v4464_v0  ;;  %v4080_v39 = vld [vmem:[#allocation3 + $0x2d1] sm:$0xff]  ;;  %v4081_v8 = vld [vmem:[#allocation3 + $0x2d9] sm:$0xff]  ;;  %v2634_v24 = vld [vmem:[#allocation4 + $0xc8] sm:$0xff]  ;;  %3641 = vst.msk [vmem:[#allocation6 + $0x8c8] sm:$0xff] %vm2841_vm3, %v3577_v22 }
 0x352   :  { %v6157_v61 = vld [vmem:[#allocation6 + $0x690] sm:$0xff]  ;;  %v4117_v45 = vpack.c.bf16 %v4081_v8, %v4080_v39  ;;  %v2633_v54 = vld [vmem:[#allocation4 + $0xc0] sm:$0xff]  ;;  %2600 = vst.msk [vmem:[#allocation6 + $0x438] sm:$0xff] %vm1929_vm0, %v2568_v32  ;;  %v3705_v2 = vld [vmem:[#allocation3 + $0x338] sm:$0xff]  ;;  %7316 = vmatmul.mubr.bf16.gmra.mrb[72].mxu1 %v6147_v5  ;;  %4704 = vrot.lane.b32.xlu0 %v4621_v56, %s10465_s9 }
 0x353   :  { %4533 = vst.msk [vmem:[#allocation6 + $0x7c0] sm:$0xff] %vm1929_vm0, %v4501_v46  ;;  %v4466_v58 = vld [vmem:[#allocation3 + $0x2ea] sm:$0xff]  ;;  %v4467_v25 = vld [vmem:[#allocation3 + $0x2f2] sm:$0xff]  ;;  %7323 = vmatprep.mubr.bf16.mxu1 %v6157_v61  ;;  %v2689_v21 = vpack.c.bf16 %v2634_v24, %v2633_v54  ;;  %v2196_v62 = vpop.permute.xlu0 %2195  ;;  %v2636_v18 = vld [vmem:[#allocation4 + $0xe0] sm:$0xff] }
 0x354   :  { %v3704_v1 = vld [vmem:[#allocation3 + $0x330] sm:$0xff]  ;;  %4149 = vst.msk [vmem:[#allocation6 + $0x7b8] sm:$0xff] %vm1929_vm0, %v4117_v45  ;;  %v4502_v10 = vpack.c.bf16 %v4467_v25, %v4466_v58  ;;  %4320 = vrot.lane.b32.xlu1 %v4237_v50, %s10465_s9  ;;  %v6156_v16 = vld [vmem:[#allocation6 + $0x688] sm:$0xff]  ;;  %v6166_v23 = vld [vmem:[#allocation6 + $0x6d8] sm:$0xff]  ;;  %v4667_v55 = vpop.permute.xlu1 %4666 }
 0x355   :  { %v3737_v6 = vpack.c.bf16 %v3705_v2, %v3704_v1  ;;  %v4082_v44 = vld [vmem:[#allocation3 + $0x2e9] sm:$0xff]  ;;  %v4083_v42 = vld [vmem:[#allocation3 + $0x2f1] sm:$0xff]  ;;  %2244 = vst [vmem:[#allocation3 + $0x32] ss:$2 sm:$0xff] %v2196_v62  ;;  %v4084_v9 = vld [vmem:[#allocation3 + $0x301] sm:$0xff] }
 0x356   :  { %v2908_v51 = vld [vmem:[#allocation3 + $0x1c9] sm:$0xff]  ;;  %v4579_v11 = vld [vmem:[#allocation4 + $0x232] sm:$0xff]  ;;  %v4118_v7 = vpack.c.bf16 %v4083_v42, %v4082_v44  ;;  %4534 = vst.msk [vmem:[#allocation6 + $0x808] sm:$0xff] %vm1929_vm0, %v4502_v10  ;;  %3146 = vrot.lane.b32.xlu0 %v12073_v38, %s10465_s9  ;;  %v4196_v59 = vld [vmem:[#allocation4 + $0x241] sm:$0xff] }
 0x357   :  { %v4578_v4 = vld [vmem:[#allocation4 + $0x22a] sm:$0xff]  ;;  %3769 = vst.msk [vmem:[#allocation6 + $0x8d0] sm:$0xff] %vm1929_vm0, %v3737_v6  ;;  %v4410_v48 = vld [vmem:[#allocation3 + $0x1a] sm:$0xff]  ;;  %v4411_v49 = vld [vmem:[#allocation3 + $0x22] sm:$0xff]  ;;  %v4283_v36 = vpop.permute.xlu0 %4282 }
 0x358   :  { %v4194_v29 = vld [vmem:[#allocation4 + $0x229] sm:$0xff]  ;;  %v4195_v15 = vld [vmem:[#allocation4 + $0x231] sm:$0xff]  ;;  %4025 = vst.msk [vmem:[#allocation6 + $0x8d0] sm:$0xff] %vm2841_vm3, %v3961_v28  ;;  %v4026_v26 = vld [vmem:[#allocation3 + $0x19] sm:$0xff]  ;;  %v4474_v37 = vpack.c.bf16 %v4411_v49, %v4410_v48  ;;  %v4622_v13 = vpack.c.bf16 %v4579_v11, %v4578_v4  ;;  %2761 = vrot.lane.b32.xlu1 %v2689_v21, %s10465_s9 }
 0x359   :  { %v2909_v52 = vld [vmem:[#allocation3 + $0x1d1] sm:$0xff]  ;;  %4150 = vst.msk [vmem:[#allocation6 + $0x800] sm:$0xff] %vm1929_vm0, %v4118_v7  ;;  %v2523_v12 = vld [vmem:[#allocation3 + $0x1c8] sm:$0xff]  ;;  %v2492_v63 = vld [vmem:[#allocation3 + $0x20] sm:$0xff]  ;;  %v4238_v34 = vpack.c.bf16 %v4195_v15, %v4194_v29  ;;  %v2069_v38 = vpop.permute.xlu1 %2068 }
 0x35a   :  { %v2955_v47 = vpack.c.bf16 %v2909_v52, %v2908_v51  ;;  %v4027_v14 = vld [vmem:[#allocation3 + $0x21] sm:$0xff]  ;;  %v2491_v19 = vld [vmem:[#allocation3 + $0x18] sm:$0xff]  ;;  %4506 = vst.msk [vmem:[#allocation6 + $0x28] sm:$0xff] %vm1929_vm0, %v4474_v37  ;;  %7324 = vmatmul.mubr.bf16.gmra.mrb[76].mxu1 %v6156_v16  ;;  %v2524_v35 = vld [vmem:[#allocation3 + $0x1d0] sm:$0xff]  ;;  %4706 = vrot.lane.b32.xlu0 %v4622_v13, %s10465_s9 }
 0x35b   :  { %v4090_v17 = vpack.c.bf16 %v4027_v14, %v4026_v26  ;;  %v2635_v31 = vld [vmem:[#allocation4 + $0xd8] sm:$0xff]  ;;  %v2554_v41 = vpack.c.bf16 %v2492_v63, %v2491_v19  ;;  %v4468_v30 = vld [vmem:[#allocation3 + $0x302] sm:$0xff]  ;;  %4762 = vst.msk [vmem:[#allocation6 + $0x28] sm:$0xff] %vm2841_vm3, %v4667_v55  ;;  %7331 = vmatprep.mubr.bf16.mxu1 %v6166_v23  ;;  %v2570_v60 = vpack.c.bf16 %v2524_v35, %v2523_v12  ;;  %v4469_v53 = vld [vmem:[#allocation3 + $0x30a] sm:$0xff]  ;;  %v4669_v46 = vpop.permute.xlu0 %4668 }
 0x35c   :  { %2987 = vst.msk [vmem:[#allocation6 + $0x4d0] sm:$0xff] %vm1929_vm0, %v2955_v47  ;;  %2117 = vst [vmem:[#allocation3 + $0x4a] ss:$2 sm:$0xff] %v2069_v38  ;;  %v4580_v3 = vld [vmem:[#allocation4 + $0x242] sm:$0xff]  ;;  %v4581_v57 = vld [vmem:[#allocation4 + $0x24a] sm:$0xff]  ;;  %v4503_v0 = vpack.c.bf16 %v4469_v53, %v4468_v30  ;;  %4322 = vrot.lane.b32.xlu1 %v4238_v34, %s10465_s9  ;;  %v2690_v40 = vpack.c.bf16 %v2636_v18, %v2635_v31 }
 0x35d   :  { %4122 = vst.msk [vmem:[#allocation6 + $0x20] sm:$0xff] %vm1929_vm0, %v4090_v17  ;;  %2971 = vst.msk [vmem:[#allocation6 + $0x50] sm:$0xff] %vm1929_vm0, %v4090_v17  ;;  %v6165_v27 = vld [vmem:[#allocation6 + $0x6d0] sm:$0xff]  ;;  %v4413_v8 = vld [vmem:[#allocation3 + $0x3a] sm:$0xff]  ;;  %v4285_v54 = vpop.permute.xlu1 %4284  ;;  %v4623_v2 = vpack.c.bf16 %v4581_v57, %v4580_v3 }
 0x35e   :  { %2586 = vst.msk [vmem:[#allocation6 + $0x48] sm:$0xff] %vm1929_vm0, %v2554_v41  ;;  %v4197_v5 = vld [vmem:[#allocation4 + $0x249] sm:$0xff]  ;;  %2602 = vst.msk [vmem:[#allocation6 + $0x4c8] sm:$0xff] %vm1929_vm0, %v2570_v60  ;;  %v4412_v39 = vld [vmem:[#allocation3 + $0x32] sm:$0xff]  ;;  %3148 = vrot.lane.b32.xlu0 %v12082_v20, %s10465_s9 }
 0x35f   :  { %4378 = vst.msk [vmem:[#allocation6 + $0x20] sm:$0xff] %vm2841_vm3, %v4283_v36  ;;  %v4085_v32 = vld [vmem:[#allocation3 + $0x309] sm:$0xff]  ;;  %v4028_v56 = vld [vmem:[#allocation3 + $0x31] sm:$0xff]  ;;  %v4475_v45 = vpack.c.bf16 %v4413_v8, %v4412_v39  ;;  %v4029_v50 = vld [vmem:[#allocation3 + $0x39] sm:$0xff]  ;;  %v4239_v6 = vpack.c.bf16 %v4197_v5, %v4196_v59  ;;  %v4671_v42 = vpop.permute.xlu0 %4670 }
 0x360   :  { %4535 = vst.msk [vmem:[#allocation6 + $0x850] sm:$0xff] %vm1929_vm0, %v4503_v0  ;;  %v4119_v61 = vpack.c.bf16 %v4085_v32, %v4084_v9  ;;  %v2493_v24 = vld [vmem:[#allocation3 + $0x30] sm:$0xff]  ;;  %v2494_v58 = vld [vmem:[#allocation3 + $0x38] sm:$0xff]  ;;  %v4091_v1 = vpack.c.bf16 %v4029_v50, %v4028_v56  ;;  %v6175_v28 = vld [vmem:[#allocation6 + $0x720] sm:$0xff]  ;;  %2763 = vrot.lane.b32.xlu1 %v2690_v40, %s10465_s9 }
 0x361   :  { %v2555_v25 = vpack.c.bf16 %v2494_v58, %v2493_v24  ;;  %4507 = vst.msk [vmem:[#allocation6 + $0x70] sm:$0xff] %vm1929_vm0, %v4475_v45  ;;  %v2637_v22 = vld [vmem:[#allocation4 + $0xf0] sm:$0xff]  ;;  %v2910_v10 = vld [vmem:[#allocation3 + $0x1e1] sm:$0xff]  ;;  %v2638_v20 = vld [vmem:[#allocation4 + $0xf8] sm:$0xff]  ;;  %v4287_v15 = vpop.permute.xlu1 %4286 }
 0x362   :  { %4151 = vst.msk [vmem:[#allocation6 + $0x848] sm:$0xff] %vm1929_vm0, %v4119_v61  ;;  %v2911_v44 = vld [vmem:[#allocation3 + $0x1e9] sm:$0xff]  ;;  %4123 = vst.msk [vmem:[#allocation6 + $0x68] sm:$0xff] %vm1929_vm0, %v4091_v1  ;;  %7332 = vmatmul.mubr.bf16.gmra.mrb[80].mxu1 %v6165_v27  ;;  %v2525_v4 = vld [vmem:[#allocation3 + $0x1e0] sm:$0xff]  ;;  %4708 = vrot.lane.b32.xlu0 %v4623_v2, %s10465_s9  ;;  %v2691_v12 = vpack.c.bf16 %v2638_v20, %v2637_v22 }
 0x363   :  { %4763 = vst.msk [vmem:[#allocation6 + $0x70] sm:$0xff] %vm2841_vm3, %v4669_v46  ;;  %v2956_v51 = vpack.c.bf16 %v2911_v44, %v2910_v10  ;;  %v2526_v11 = vld [vmem:[#allocation3 + $0x1e8] sm:$0xff]  ;;  %4379 = vst.msk [vmem:[#allocation6 + $0x68] sm:$0xff] %vm2841_vm3, %v4285_v54  ;;  %v4415_v21 = vld [vmem:[#allocation3 + $0x52] sm:$0xff]  ;;  %7339 = vmatprep.mubr.bf16.mxu1 %v6175_v28  ;;  %v4673_v26 = vpop.permute.xlu0 %4672 }
 0x364   :  { %2972 = vst.msk [vmem:[#allocation6 + $0x98] sm:$0xff] %vm1929_vm0, %v4091_v1  ;;  %2587 = vst.msk [vmem:[#allocation6 + $0x90] sm:$0xff] %vm1929_vm0, %v2555_v25  ;;  %v4414_v7 = vld [vmem:[#allocation3 + $0x4a] sm:$0xff]  ;;  %v2571_v52 = vpack.c.bf16 %v2526_v11, %v2525_v4  ;;  %4324 = vrot.lane.b32.xlu1 %v4239_v6, %s10465_s9  ;;  %v4582_v55 = vld [vmem:[#allocation4 + $0x25a] sm:$0xff] }
 0x365   :  { %v4030_v29 = vld [vmem:[#allocation3 + $0x49] sm:$0xff]  ;;  %v4476_v62 = vpack.c.bf16 %v4415_v21, %v4414_v7  ;;  %v4031_v16 = vld [vmem:[#allocation3 + $0x51] sm:$0xff]  ;;  %2988 = vst.msk [vmem:[#allocation6 + $0x518] sm:$0xff] %vm1929_vm0, %v2956_v51  ;;  %v4198_v14 = vld [vmem:[#allocation4 + $0x259] sm:$0xff]  ;;  %v4289_v63 = vpop.permute.xlu1 %4288 }
 0x366   :  { %v2495_v23 = vld [vmem:[#allocation3 + $0x48] sm:$0xff]  ;;  %v4092_v47 = vpack.c.bf16 %v4031_v16, %v4030_v29  ;;  %v2496_v49 = vld [vmem:[#allocation3 + $0x50] sm:$0xff]  ;;  %2603 = vst.msk [vmem:[#allocation6 + $0x510] sm:$0xff] %vm1929_vm0, %v2571_v52  ;;  %v6174_v37 = vld [vmem:[#allocation6 + $0x718] sm:$0xff]  ;;  %3150 = vrot.lane.b32.xlu0 %v12102_v43, %s10465_s9 }
 0x367   :  { %v4583_v48 = vld [vmem:[#allocation4 + $0x262] sm:$0xff]  ;;  %4508 = vst.msk [vmem:[#allocation6 + $0xb8] sm:$0xff] %vm1929_vm0, %v4476_v62  ;;  %v2556_v19 = vpack.c.bf16 %v2496_v49, %v2495_v23  ;;  %v4470_v17 = vld [vmem:[#allocation3 + $0x31a] sm:$0xff]  ;;  %v3025_v38 = vld [vmem:[#allocation4 + $0x111] sm:$0xff]  ;;  %v4675_v9 = vpop.permute.xlu0 %4674 }
 0x368   :  { %v4199_v13 = vld [vmem:[#allocation4 + $0x261] sm:$0xff]  ;;  %4764 = vst.msk [vmem:[#allocation6 + $0xb8] sm:$0xff] %vm2841_vm3, %v4671_v42  ;;  %4765 = vst.msk [vmem:[#allocation6 + $0x100] sm:$0xff] %vm2841_vm3, %v4673_v26  ;;  %v4086_v31 = vld [vmem:[#allocation3 + $0x319] sm:$0xff]  ;;  %v4624_v41 = vpack.c.bf16 %v4583_v48, %v4582_v55  ;;  %2765 = vrot.lane.b32.xlu1 %v2691_v12, %s10465_s9 }
 0x369   :  { %4124 = vst.msk [vmem:[#allocation6 + $0xb0] sm:$0xff] %vm1929_vm0, %v4092_v47  ;;  %2973 = vst.msk [vmem:[#allocation6 + $0xe0] sm:$0xff] %vm1929_vm0, %v4092_v47  ;;  %v4471_v34 = vld [vmem:[#allocation3 + $0x322] sm:$0xff]  ;;  %v4240_v30 = vpack.c.bf16 %v4199_v13, %v4198_v14  ;;  %v2640_v3 = vld [vmem:[#allocation4 + $0x110] sm:$0xff]  ;;  %v4291_v0 = vpop.permute.xlu1 %4290 }
 0x36a   :  { %4380 = vst.msk [vmem:[#allocation6 + $0xb0] sm:$0xff] %vm2841_vm3, %v4287_v15  ;;  %4381 = vst.msk [vmem:[#allocation6 + $0xf8] sm:$0xff] %vm2841_vm3, %v4289_v63  ;;  %v3024_v36 = vld [vmem:[#allocation4 + $0x109] sm:$0xff]  ;;  %v4504_v35 = vpack.c.bf16 %v4471_v34, %v4470_v17  ;;  %v4087_v53 = vld [vmem:[#allocation3 + $0x321] sm:$0xff]  ;;  %7340 = vmatmul.mubr.bf16.gmra.mrb[84].mxu1 %v6174_v37  ;;  %4710 = vrot.lane.b32.xlu0 %v4624_v41, %s10465_s9 }
 0x36b   :  { %v6184_v18 = vld [vmem:[#allocation6 + $0x768] sm:$0xff]  ;;  %2588 = vst.msk [vmem:[#allocation6 + $0xd8] sm:$0xff] %vm1929_vm0, %v2556_v19  ;;  %v4120_v57 = vpack.c.bf16 %v4087_v53, %v4086_v31  ;;  %v2912_v59 = vld [vmem:[#allocation3 + $0x1f9] sm:$0xff]  ;;  %v3077_v46 = vpack.c.bf16 %v3025_v38, %v3024_v36  ;;  %v4088_v50 = vld [vmem:[#allocation3 + $0x331] sm:$0xff]  ;;  %v4677_v54 = vpop.permute.xlu0 %4676 }
 0x36c   :  { %v2639_v60 = vld [vmem:[#allocation4 + $0x108] sm:$0xff]  ;;  %4536 = vst.msk [vmem:[#allocation6 + $0x898] sm:$0xff] %vm1929_vm0, %v4504_v35  ;;  %7347 = vmatprep.mubr.bf16.mxu1 %v6184_v18  ;;  %v2527_v27 = vld [vmem:[#allocation3 + $0x1f8] sm:$0xff]  ;;  %v2528_v5 = vld [vmem:[#allocation3 + $0x200] sm:$0xff]  ;;  %4326 = vrot.lane.b32.xlu1 %v4240_v30, %s10465_s9 }
 0x36d   :  { %v2913_v43 = vld [vmem:[#allocation3 + $0x201] sm:$0xff]  ;;  %4766 = vst.msk [vmem:[#allocation6 + $0x148] sm:$0xff] %vm2841_vm3, %v4675_v9  ;;  %v4472_v32 = vld [vmem:[#allocation3 + $0x332] sm:$0xff]  ;;  %4382 = vst.msk [vmem:[#allocation6 + $0x140] sm:$0xff] %vm2841_vm3, %v4291_v0  ;;  %v2572_v8 = vpack.c.bf16 %v2528_v5, %v2527_v27  ;;  %v2692_v56 = vpack.c.bf16 %v2640_v3, %v2639_v60  ;;  %v4293_v28 = vpop.permute.xlu1 %4292 }
 0x36e   :  { %v2957_v40 = vpack.c.bf16 %v2913_v43, %v2912_v59  ;;  %v4584_v39 = vld [vmem:[#allocation4 + $0x272] sm:$0xff]  ;;  %4152 = vst.msk [vmem:[#allocation6 + $0x890] sm:$0xff] %vm1929_vm0, %v4120_v57  ;;  %v4585_v61 = vld [vmem:[#allocation4 + $0x27a] sm:$0xff]  ;;  %3152 = vrot.lane.b32.xlu0 %v3077_v46, %s10465_s9  ;;  %v3027_v42 = vld [vmem:[#allocation4 + $0x129] sm:$0xff] }
 0x36f   :  { %v4473_v45 = vld [vmem:[#allocation3 + $0x33a] sm:$0xff]  ;;  %v4200_v24 = vld [vmem:[#allocation4 + $0x271] sm:$0xff]  ;;  %2604 = vst.msk [vmem:[#allocation6 + $0x558] sm:$0xff] %vm1929_vm0, %v2572_v8  ;;  %v4625_v10 = vpack.c.bf16 %v4585_v61, %v4584_v39  ;;  %v4679_v21 = vpop.permute.xlu0 %4678  ;;  %v2642_v29 = vld [vmem:[#allocation4 + $0x128] sm:$0xff] }
 0x370   :  { %2989 = vst.msk [vmem:[#allocation6 + $0x560] sm:$0xff] %vm1929_vm0, %v2957_v40  ;;  %v4201_v58 = vld [vmem:[#allocation4 + $0x279] sm:$0xff]  ;;  %v4505_v1 = vpack.c.bf16 %v4473_v45, %v4472_v32  ;;  %v2914_v22 = vld [vmem:[#allocation3 + $0x211] sm:$0xff]  ;;  %v3026_v44 = vld [vmem:[#allocation4 + $0x121] sm:$0xff]  ;;  %2767 = vrot.lane.b32.xlu1 %v2692_v56, %s10465_s9 }
 0x371   :  { %v4089_v2 = vld [vmem:[#allocation3 + $0x339] sm:$0xff]  ;;  %4767 = vst.msk [vmem:[#allocation6 + $0x190] sm:$0xff] %vm2841_vm3, %v4677_v54  ;;  %4383 = vst.msk [vmem:[#allocation6 + $0x188] sm:$0xff] %vm2841_vm3, %v4293_v28  ;;  %v6193_v20 = vld [vmem:[#allocation6 + $0x7b0] sm:$0xff]  ;;  %v4241_v51 = vpack.c.bf16 %v4201_v58, %v4200_v24  ;;  %v4295_v16 = vpop.permute.xlu1 %4294  ;;  %v3078_v55 = vpack.c.bf16 %v3027_v42, %v3026_v44 }
 0x372   :  { %v6183_v25 = vld [vmem:[#allocation6 + $0x760] sm:$0xff]  ;;  %v4121_v6 = vpack.c.bf16 %v4089_v2, %v4088_v50  ;;  %4537 = vst.msk [vmem:[#allocation6 + $0x8e0] sm:$0xff] %vm1929_vm0, %v4505_v1  ;;  %v2529_v7 = vld [vmem:[#allocation3 + $0x210] sm:$0xff]  ;;  %v2530_v52 = vld [vmem:[#allocation3 + $0x218] sm:$0xff]  ;;  %4712 = vrot.lane.b32.xlu0 %v4625_v10, %s10465_s9 }
 0x373   :  { %v2641_v4 = vld [vmem:[#allocation4 + $0x120] sm:$0xff]  ;;  %7348 = vmatmul.mubr.bf16.gmra.mrb[88].mxu1 %v6183_v25  ;;  %v5179_v62 = vld [vmem:[#allocation3 + $0x31] sm:$0xff]  ;;  %4768 = vst.msk [vmem:[#allocation6 + $0x1d8] sm:$0xff] %vm2841_vm3, %v4679_v21  ;;  %v2573_v23 = vpack.c.bf16 %v2530_v52, %v2529_v7  ;;  %4384 = vst.msk [vmem:[#allocation6 + $0x1d0] sm:$0xff] %vm2841_vm3, %v4295_v16 }
 0x374   :  { %4153 = vst.msk [vmem:[#allocation6 + $0x8d8] sm:$0xff] %vm1929_vm0, %v4121_v6  ;;  %v2915_v11 = vld [vmem:[#allocation3 + $0x219] sm:$0xff]  ;;  %7355 = vmatprep.mubr.bf16.mxu1 %v6193_v20  ;;  %v4794_v12 = vld [vmem:[#allocation3 + $0x30] sm:$0xff]  ;;  %4328 = vrot.lane.b32.xlu1 %v4241_v51, %s10465_s9  ;;  %v2693_v26 = vpack.c.bf16 %v2642_v29, %v2641_v4  ;;  %v4681_v19 = vpop.permute.xlu0 %4680  ;;  %v6192_v36 = vld [vmem:[#allocation6 + $0x7a8] sm:$0xff] }
 0x375   :  { %v2958_v15 = vpack.c.bf16 %v2915_v11, %v2914_v22  ;;  %v5180_v47 = vld [vmem:[#allocation3 + $0x39] sm:$0xff]  ;;  %v4586_v48 = vld [vmem:[#allocation4 + $0x28a] sm:$0xff]  ;;  %2605 = vst.msk [vmem:[#allocation6 + $0x5a0] sm:$0xff] %vm1929_vm0, %v2573_v23  ;;  %v3029_v53 = vld [vmem:[#allocation4 + $0x141] sm:$0xff] }
 0x376   :  { %v5243_v49 = vpack.c.bf16 %v5180_v47, %v5179_v62  ;;  %v4587_v37 = vld [vmem:[#allocation4 + $0x292] sm:$0xff]  ;;  %v4202_v14 = vld [vmem:[#allocation4 + $0x289] sm:$0xff]  ;;  %4769 = vst.msk [vmem:[#allocation6 + $0x220] sm:$0xff] %vm2841_vm3, %v4681_v19  ;;  %v4297_v41 = vpop.permute.xlu1 %4296  ;;  %3154 = vrot.lane.b32.xlu0 %v3078_v55, %s10465_s9  ;;  %v2644_v27 = vld [vmem:[#allocation4 + $0x140] sm:$0xff] }
 0x377   :  { %2990 = vst.msk [vmem:[#allocation6 + $0x5a8] sm:$0xff] %vm1929_vm0, %v2958_v15  ;;  %v4795_v13 = vld [vmem:[#allocation3 + $0x38] sm:$0xff]  ;;  %v2916_v34 = vld [vmem:[#allocation3 + $0x229] sm:$0xff]  ;;  %v4626_v38 = vpack.c.bf16 %v4587_v37, %v4586_v48  ;;  %v2918_v56 = vld [vmem:[#allocation3 + $0x241] sm:$0xff] }
 0x378   :  { %v4203_v63 = vld [vmem:[#allocation4 + $0x291] sm:$0xff]  ;;  %5275 = vst.msk [vmem:[#allocation6 + $0x38] sm:$0xff] %vm1929_vm0, %v5243_v49  ;;  %v4858_v17 = vpack.c.bf16 %v4795_v13, %v4794_v12  ;;  %v2531_v35 = vld [vmem:[#allocation3 + $0x228] sm:$0xff]  ;;  %v3028_v60 = vld [vmem:[#allocation4 + $0x139] sm:$0xff]  ;;  %2769 = vrot.lane.b32.xlu1 %v2693_v26, %s10465_s9  ;;  %v4683_v40 = vpop.permute.xlu0 %4682 }
 0x379   :  { %v2917_v31 = vld [vmem:[#allocation3 + $0x231] sm:$0xff]  ;;  %4385 = vst.msk [vmem:[#allocation6 + $0x218] sm:$0xff] %vm2841_vm3, %v4297_v41  ;;  %v4242_v57 = vpack.c.bf16 %v4203_v63, %v4202_v14  ;;  %v5181_v43 = vld [vmem:[#allocation3 + $0x49] sm:$0xff]  ;;  %4770 = vst.msk [vmem:[#allocation6 + $0x268] sm:$0xff] %vm2841_vm3, %v4683_v40  ;;  %v3079_v45 = vpack.c.bf16 %v3029_v53, %v3028_v60 }
 0x37a   :  { %v2959_v18 = vpack.c.bf16 %v2917_v31, %v2916_v34  ;;  %v2532_v30 = vld [vmem:[#allocation3 + $0x230] sm:$0xff]  ;;  %v6202_v9 = vld [vmem:[#allocation6 + $0x7f8] sm:$0xff]  ;;  %4890 = vst.msk [vmem:[#allocation6 + $0x30] sm:$0xff] %vm1929_vm0, %v4858_v17  ;;  %v4796_v32 = vld [vmem:[#allocation3 + $0x48] sm:$0xff]  ;;  %v4299_v39 = vpop.permute.xlu1 %4298  ;;  %4714 = vrot.lane.b32.xlu0 %v4626_v38, %s10465_s9 }
 0x37b   :  { %v2574_v3 = vpack.c.bf16 %v2532_v30, %v2531_v35  ;;  %v2643_v59 = vld [vmem:[#allocation4 + $0x138] sm:$0xff]  ;;  %7356 = vmatmul.mubr.bf16.gmra.mrb[92].mxu1 %v6192_v36  ;;  %v4797_v46 = vld [vmem:[#allocation3 + $0x50] sm:$0xff]  ;;  %4386 = vst.msk [vmem:[#allocation6 + $0x260] sm:$0xff] %vm2841_vm3, %v4299_v39  ;;  %v4588_v50 = vld [vmem:[#allocation4 + $0x2a2] sm:$0xff] }
 0x37c   :  { %2991 = vst.msk [vmem:[#allocation6 + $0x5f0] sm:$0xff] %vm1929_vm0, %v2959_v18  ;;  %v5182_v0 = vld [vmem:[#allocation3 + $0x51] sm:$0xff]  ;;  %7363 = vmatprep.mubr.bf16.mxu1 %v6202_v9  ;;  %v4859_v8 = vpack.c.bf16 %v4797_v46, %v4796_v32  ;;  %v2919_v61 = vld [vmem:[#allocation3 + $0x249] sm:$0xff]  ;;  %4330 = vrot.lane.b32.xlu1 %v4242_v57, %s10465_s9  ;;  %v2694_v58 = vpack.c.bf16 %v2644_v27, %v2643_v59  ;;  %v4204_v1 = vld [vmem:[#allocation4 + $0x2a1] sm:$0xff]  ;;  %v4685_v25 = vpop.permute.xlu0 %4684 }
 0x37d   :  { %2606 = vst.msk [vmem:[#allocation6 + $0x5e8] sm:$0xff] %vm1929_vm0, %v2574_v3  ;;  %v5244_v5 = vpack.c.bf16 %v5182_v0, %v5181_v43  ;;  %v4589_v54 = vld [vmem:[#allocation4 + $0x2aa] sm:$0xff]  ;;  %v2960_v24 = vpack.c.bf16 %v2919_v61, %v2918_v56  ;;  %v2533_v2 = vld [vmem:[#allocation3 + $0x240] sm:$0xff]  ;;  %v2646_v55 = vld [vmem:[#allocation4 + $0x158] sm:$0xff] }
 0x37e   :  { %4891 = vst.msk [vmem:[#allocation6 + $0x78] sm:$0xff] %vm1929_vm0, %v4859_v8  ;;  %v2534_v28 = vld [vmem:[#allocation3 + $0x248] sm:$0xff]  ;;  %v4301_v42 = vpop.permute.xlu1 %4300  ;;  %v6201_v20 = vld [vmem:[#allocation6 + $0x7f0] sm:$0xff]  ;;  %v4798_v4 = vld [vmem:[#allocation3 + $0x60] sm:$0xff]  ;;  %3156 = vrot.lane.b32.xlu0 %v3079_v45, %s10465_s9  ;;  %v4627_v7 = vpack.c.bf16 %v4589_v54, %v4588_v50 }
 0x37f   :  { %5276 = vst.msk [vmem:[#allocation6 + $0x80] sm:$0xff] %vm1929_vm0, %v5244_v5  ;;  %v4205_v6 = vld [vmem:[#allocation4 + $0x2a9] sm:$0xff]  ;;  %2992 = vst.msk [vmem:[#allocation6 + $0x638] sm:$0xff] %vm1929_vm0, %v2960_v24  ;;  %v2575_v22 = vpack.c.bf16 %v2534_v28, %v2533_v2  ;;  %v5183_v10 = vld [vmem:[#allocation3 + $0x61] sm:$0xff] }
 0x380   :  { %v5184_v44 = vld [vmem:[#allocation3 + $0x69] sm:$0xff]  ;;  %4771 = vst.msk [vmem:[#allocation6 + $0x2b0] sm:$0xff] %vm2841_vm3, %v4685_v25  ;;  %4387 = vst.msk [vmem:[#allocation6 + $0x2a8] sm:$0xff] %vm2841_vm3, %v4301_v42  ;;  %v3030_v21 = vld [vmem:[#allocation4 + $0x151] sm:$0xff]  ;;  %2771 = vrot.lane.b32.xlu1 %v2694_v58, %s10465_s9  ;;  %v4243_v62 = vpack.c.bf16 %v4205_v6, %v4204_v1  ;;  %v4687_v12 = vpop.permute.xlu0 %4686 }
 0x381   :  { %v5245_v51 = vpack.c.bf16 %v5184_v44, %v5183_v10  ;;  %v4799_v11 = vld [vmem:[#allocation3 + $0x68] sm:$0xff]  ;;  %v3031_v29 = vld [vmem:[#allocation4 + $0x159] sm:$0xff]  ;;  %2607 = vst.msk [vmem:[#allocation6 + $0x630] sm:$0xff] %vm1929_vm0, %v2575_v22  ;;  %v2645_v16 = vld [vmem:[#allocation4 + $0x150] sm:$0xff] }
 0x382   :  { %v6211_v15 = vld [vmem:[#allocation6 + $0x840] sm:$0xff]  ;;  %v4860_v52 = vpack.c.bf16 %v4799_v11, %v4798_v4  ;;  %v2535_v49 = vld [vmem:[#allocation3 + $0x258] sm:$0xff]  ;;  %4772 = vst.msk [vmem:[#allocation6 + $0x2f8] sm:$0xff] %vm2841_vm3, %v4687_v12  ;;  %v4303_v37 = vpop.permute.xlu1 %4302  ;;  %4716 = vrot.lane.b32.xlu0 %v4627_v7, %s10465_s9  ;;  %v3080_v63 = vpack.c.bf16 %v3031_v29, %v3030_v21  ;;  %v2695_v31 = vpack.c.bf16 %v2646_v55, %v2645_v16  ;;  %v3032_v43 = vld [vmem:[#allocation4 + $0x169] sm:$0xff] }
 0x383   :  { %5277 = vst.msk [vmem:[#allocation6 + $0xc8] sm:$0xff] %vm1929_vm0, %v5245_v51  ;;  %v2920_v23 = vld [vmem:[#allocation3 + $0x259] sm:$0xff]  ;;  %v2921_v47 = vld [vmem:[#allocation3 + $0x261] sm:$0xff]  ;;  %7364 = vmatmul.mubr.bf16.gmra.mrb[96].mxu1 %v6201_v20  ;;  %v2922_v60 = vld [vmem:[#allocation3 + $0x271] sm:$0xff] }
 0x384   :  { %4892 = vst.msk [vmem:[#allocation6 + $0xc0] sm:$0xff] %vm1929_vm0, %v4860_v52  ;;  %v2961_v48 = vpack.c.bf16 %v2921_v47, %v2920_v23  ;;  %v2536_v26 = vld [vmem:[#allocation3 + $0x260] sm:$0xff]  ;;  %7371 = vmatprep.mubr.bf16.mxu1 %v6211_v15  ;;  %4332 = vrot.lane.b32.xlu1 %v4243_v62, %s10465_s9  ;;  %v4800_v18 = vld [vmem:[#allocation3 + $0x78] sm:$0xff]  ;;  %v4689_v35 = vpop.permute.xlu0 %4688  ;;  %v6220_v0 = vld [vmem:[#allocation6 + $0x888] sm:$0xff] }
 0x385   :  { %v2576_v14 = vpack.c.bf16 %v2536_v26, %v2535_v49  ;;  %v5185_v13 = vld [vmem:[#allocation3 + $0x79] sm:$0xff]  ;;  %v5186_v19 = vld [vmem:[#allocation3 + $0x81] sm:$0xff]  ;;  %4388 = vst.msk [vmem:[#allocation6 + $0x2f0] sm:$0xff] %vm2841_vm3, %v4303_v37  ;;  %4773 = vst.msk [vmem:[#allocation6 + $0x340] sm:$0xff] %vm2841_vm3, %v4689_v35 }
 0x386   :  { %v4590_v17 = vld [vmem:[#allocation4 + $0x2ba] sm:$0xff]  ;;  %2993 = vst.msk [vmem:[#allocation6 + $0x680] sm:$0xff] %vm1929_vm0, %v2961_v48  ;;  %v5246_v34 = vpack.c.bf16 %v5186_v19, %v5185_v13  ;;  %v4591_v41 = vld [vmem:[#allocation4 + $0x2c2] sm:$0xff]  ;;  %v4305_v53 = vpop.permute.xlu1 %4304  ;;  %3158 = vrot.lane.b32.xlu0 %v3080_v63, %s10465_s9  ;;  %v2537_v27 = vld [vmem:[#allocation3 + $0x270] sm:$0xff] }
 0x387   :  { %v4206_v36 = vld [vmem:[#allocation4 + $0x2b9] sm:$0xff]  ;;  %2608 = vst.msk [vmem:[#allocation6 + $0x678] sm:$0xff] %vm1929_vm0, %v2576_v14  ;;  %v4207_v30 = vld [vmem:[#allocation4 + $0x2c1] sm:$0xff]  ;;  %v4628_v59 = vpack.c.bf16 %v4591_v41, %v4590_v17  ;;  %v3033_v32 = vld [vmem:[#allocation4 + $0x171] sm:$0xff] }
 0x388   :  { %5278 = vst.msk [vmem:[#allocation6 + $0x110] sm:$0xff] %vm1929_vm0, %v5246_v34  ;;  %v4801_v38 = vld [vmem:[#allocation3 + $0x80] sm:$0xff]  ;;  %v6210_v9 = vld [vmem:[#allocation6 + $0x838] sm:$0xff]  ;;  %2773 = vrot.lane.b32.xlu1 %v2695_v31, %s10465_s9  ;;  %v4244_v5 = vpack.c.bf16 %v4207_v30, %v4206_v36  ;;  %v3131_v8 = vpop.permute.xlu0 %3130  ;;  %v2647_v56 = vld [vmem:[#allocation4 + $0x168] sm:$0xff]  ;;  %v3081_v28 = vpack.c.bf16 %v3033_v32, %v3032_v43 }
 0x389   :  { %v4861_v3 = vpack.c.bf16 %v4801_v38, %v4800_v18  ;;  %v2923_v57 = vld [vmem:[#allocation3 + $0x279] sm:$0xff]  ;;  %4389 = vst.msk [vmem:[#allocation6 + $0x338] sm:$0xff] %vm2841_vm3, %v4305_v53  ;;  %v2906_v46 = vld [vmem:[#allocation3 + $0x1b1] sm:$0xff]  ;;  %3226 = vst.msk [vmem:[#allocation6 + $0x8] sm:$0xff] %vm2841_vm3, %v3131_v8 }
 0x38a   :  { %v2962_v40 = vpack.c.bf16 %v2923_v57, %v2922_v60  ;;  %v2907_v39 = vld [vmem:[#allocation3 + $0x1b9] sm:$0xff]  ;;  %v2648_v61 = vld [vmem:[#allocation4 + $0x170] sm:$0xff]  ;;  %v2746_v54 = vpop.permute.xlu1 %2745  ;;  %4718 = vrot.lane.b32.xlu0 %v4628_v59, %s10465_s9  ;;  %v2539_v23 = vld [vmem:[#allocation3 + $0x288] sm:$0xff] }
 0x38b   :  { %4893 = vst.msk [vmem:[#allocation6 + $0x108] sm:$0xff] %vm1929_vm0, %v4861_v3  ;;  %7372 = vmatmul.mubr.bf16.gmra.mrb[100].mxu1 %v6210_v9  ;;  %v2954_v45 = vpack.c.bf16 %v2907_v39, %v2906_v46  ;;  %v2538_v50 = vld [vmem:[#allocation3 + $0x278] sm:$0xff]  ;;  %v2521_v24 = vld [vmem:[#allocation3 + $0x1b0] sm:$0xff]  ;;  %v2696_v10 = vpack.c.bf16 %v2648_v61, %v2647_v56  ;;  %v6219_v15 = vld [vmem:[#allocation6 + $0x880] sm:$0xff] }
 0x38c   :  { %2994 = vst.msk [vmem:[#allocation6 + $0x6c8] sm:$0xff] %vm1929_vm0, %v2962_v40  ;;  %7379 = vmatprep.mubr.bf16.mxu1 %v6220_v0  ;;  %v2522_v58 = vld [vmem:[#allocation3 + $0x1b8] sm:$0xff]  ;;  %v2577_v1 = vpack.c.bf16 %v2538_v50, %v2537_v27  ;;  %4334 = vrot.lane.b32.xlu1 %v4244_v5, %s10465_s9  ;;  %v4802_v20 = vld [vmem:[#allocation3 + $0x90] sm:$0xff]  ;;  %v4691_v51 = vpop.permute.xlu0 %4690  ;;  %v4804_v31 = vld [vmem:[#allocation3 + $0xa8] sm:$0xff] }
 0x38d   :  { %v5187_v2 = vld [vmem:[#allocation3 + $0x91] sm:$0xff]  ;;  %2842 = vst.msk [vmem:[#allocation6] sm:$0xff] %vm2841_vm3, %v2746_v54  ;;  %v4593_v6 = vld [vmem:[#allocation4 + $0x2da] sm:$0xff]  ;;  %v2569_v22 = vpack.c.bf16 %v2522_v58, %v2521_v24  ;;  %v2924_v21 = vld [vmem:[#allocation3 + $0x289] sm:$0xff] }
 0x38e   :  { %v4592_v25 = vld [vmem:[#allocation4 + $0x2d2] sm:$0xff]  ;;  %2986 = vst.msk [vmem:[#allocation6 + $0x488] sm:$0xff] %vm1929_vm0, %v2954_v45  ;;  %2609 = vst.msk [vmem:[#allocation6 + $0x6c0] sm:$0xff] %vm1929_vm0, %v2577_v1  ;;  %v4307_v29 = vpop.permute.xlu1 %4306  ;;  %3160 = vrot.lane.b32.xlu0 %v3081_v28, %s10465_s9  ;;  %v5189_v13 = vld [vmem:[#allocation3 + $0xa9] sm:$0xff] }
 0x38f   :  { %v4208_v44 = vld [vmem:[#allocation4 + $0x2d1] sm:$0xff]  ;;  %v5188_v42 = vld [vmem:[#allocation3 + $0x99] sm:$0xff]  ;;  %2601 = vst.msk [vmem:[#allocation6 + $0x480] sm:$0xff] %vm1929_vm0, %v2569_v22  ;;  %v4629_v47 = vpack.c.bf16 %v4593_v6, %v4592_v25  ;;  %v2926_v30 = vld [vmem:[#allocation3 + $0x2a1] sm:$0xff] }
 0x390   :  { %v4209_v4 = vld [vmem:[#allocation4 + $0x2d9] sm:$0xff]  ;;  %v5247_v11 = vpack.c.bf16 %v5188_v42, %v5187_v2  ;;  %4774 = vst.msk [vmem:[#allocation6 + $0x388] sm:$0xff] %vm2841_vm3, %v4691_v51  ;;  %v12355_v52 = vld [vmem:[#allocation4 + $0x1b1] sm:$0xff]  ;;  %4390 = vst.msk [vmem:[#allocation6 + $0x380] sm:$0xff] %vm2841_vm3, %v4307_v29  ;;  %2775 = vrot.lane.b32.xlu1 %v2696_v10, %s10465_s9  ;;  %v3133_v19 = vpop.permute.xlu0 %3132 }
 0x391   :  { %v4803_v7 = vld [vmem:[#allocation3 + $0x98] sm:$0xff]  ;;  %v6229_v55 = vld [vmem:[#allocation6 + $0x8d0] sm:$0xff]  ;;  %v4245_v26 = vpack.c.bf16 %v4209_v4, %v4208_v44  ;;  %v5948_v63 = vld [vmem:[#allocation6 + $0x8] sm:$0xff]  ;;  %3227 = vst.msk [vmem:[#allocation6 + $0x50] sm:$0xff] %vm2841_vm3, %v3133_v19 }
 0x392   :  { %v4862_v62 = vpack.c.bf16 %v4803_v7, %v4802_v20  ;;  %v2925_v16 = vld [vmem:[#allocation3 + $0x291] sm:$0xff]  ;;  %v3035_v12 = vld [vmem:[#allocation4 + $0x1b9] sm:$0xff]  ;;  %5279 = vst.msk [vmem:[#allocation6 + $0x158] sm:$0xff] %vm1929_vm0, %v5247_v11  ;;  %6850 = vmatprep.mubr.bf16.mxu0 %v5948_v63  ;;  %v2748_v41 = vpop.permute.xlu1 %2747  ;;  %4720 = vrot.lane.b32.xlu0 %v4629_v47, %s10465_s9  ;;  %v4210_v57 = vld [vmem:[#allocation4 + $0x2e9] sm:$0xff] }
 0x393   :  { %v2649_v48 = vld [vmem:[#allocation4 + $0x1b0] sm:$0xff]  ;;  %v2963_v49 = vpack.c.bf16 %v2925_v16, %v2924_v21  ;;  %v2650_v37 = vld [vmem:[#allocation4 + $0x1b8] sm:$0xff]  ;;  %7380 = vmatmul.mubr.bf16.gmra.mrb[104].mxu1 %v6219_v15  ;;  %2843 = vst.msk [vmem:[#allocation6 + $0x48] sm:$0xff] %vm2841_vm3, %v2748_v41  ;;  %v3082_v38 = vpack.c.bf16 %v3035_v12, %v12355_v52  ;;  %v10394_v59 = vld [vmem:[%s14754_s3 + $0x80] sm:$0xff]  }
 0x394   :  { %4894 = vst.msk [vmem:[#allocation6 + $0x150] sm:$0xff] %vm1929_vm0, %v4862_v62  ;;  %v2540_v14 = vld [vmem:[#allocation3 + $0x290] sm:$0xff]  ;;  %v5947_v36 = vld [vmem:[#allocation6] sm:$0xff]  ;;  %7387 = vmatprep.mubr.bf16.mxu1 %v6229_v55  ;;  %4336 = vrot.lane.b32.xlu1 %v4245_v26, %s10465_s9  ;;  %v2697_v9 = vpack.c.bf16 %v2650_v37, %v2649_v48  ;;  %v4693_v0 = vpop.permute.xlu0 %4692  ;;  %v2542_v32 = vld [vmem:[#allocation3 + $0x2a8] sm:$0xff] }
 0x395   :  { %2995 = vst.msk [vmem:[#allocation6 + $0x710] sm:$0xff] %vm1929_vm0, %v2963_v49  ;;  %v2578_v17 = vpack.c.bf16 %v2540_v14, %v2539_v23  ;;  %v5190_v34 = vld [vmem:[#allocation3 + $0xb1] sm:$0xff]  ;;  %6851 = vmatmul.mubr.bf16.vlgmr.msra.gmra.mrb[32].mxu0 %v5947_v36  ;;  %v2927_v43 = vld [vmem:[#allocation3 + $0x2a9] sm:$0xff]  ;;  %v2541_v5 = vld [vmem:[#allocation3 + $0x2a0] sm:$0xff] }
 0x396   :  { %v5248_v18 = vpack.c.bf16 %v5190_v34, %v5189_v13  ;;  %v4805_v35 = vld [vmem:[#allocation3 + $0xb0] sm:$0xff]  ;;  %7108 = vmatpush1.bf16.msra.mxu0 %v10394_v59  ;;  %v2964_v27 = vpack.c.bf16 %v2927_v43, %v2926_v30  ;;  %4775 = vst.msk [vmem:[#allocation6 + $0x3d0] sm:$0xff] %vm2841_vm3, %v4693_v0  ;;  %v4309_v46 = vpop.permute.xlu1 %4308  ;;  %v6228_v39 = vld [vmem:[#allocation6 + $0x8c8] sm:$0xff]  ;;  %v2579_v56 = vpack.c.bf16 %v2542_v32, %v2541_v5  ;;  %v4806_v6 = vld [vmem:[#allocation3 + $0xc0] sm:$0xff] }
 0x397   :  { %v4594_v60 = vld [vmem:[#allocation4 + $0x2ea] sm:$0xff]  ;;  %2610 = vst.msk [vmem:[#allocation6 + $0x708] sm:$0xff] %vm1929_vm0, %v2578_v17  ;;  %v4863_v53 = vpack.c.bf16 %v4805_v35, %v4804_v31  ;;  %v4595_v3 = vld [vmem:[#allocation4 + $0x2f2] sm:$0xff]  ;;  %7109 = vmatprep.subr.bf16.mxu0 %v10464_v33  ;;  %v5191_v61 = vld [vmem:[#allocation3 + $0xc1] sm:$0xff]  ;;  %3162 = vrot.lane.b32.xlu0 %v3082_v38, %s10465_s9 }
 0x398   :  { %5280 = vst.msk [vmem:[#allocation6 + $0x1a0] sm:$0xff] %vm1929_vm0, %v5248_v18  ;;  %v4211_v40 = vld [vmem:[#allocation4 + $0x2f1] sm:$0xff]  ;;  %v12376_v8 = vld [vmem:[#allocation4 + $0x1c9] sm:$0xff]  ;;  %v4630_v50 = vpack.c.bf16 %v4595_v3, %v4594_v60  ;;  %2996 = vst.msk [vmem:[#allocation6 + $0x758] sm:$0xff] %vm1929_vm0, %v2964_v27  ;;  %2777 = vrot.lane.b32.xlu1 %v2697_v9, %s10465_s9  ;;  %v3135_v10 = vpop.permute.xlu0 %3134 }
 0x399   :  { %4895 = vst.msk [vmem:[#allocation6 + $0x198] sm:$0xff] %vm1929_vm0, %v4863_v53  ;;  %v5192_v45 = vld [vmem:[#allocation3 + $0xc9] sm:$0xff]  ;;  %v3037_v54 = vld [vmem:[#allocation4 + $0x1d1] sm:$0xff]  ;;  %v4246_v2 = vpack.c.bf16 %v4211_v40, %v4210_v57  ;;  %2611 = vst.msk [vmem:[#allocation6 + $0x750] sm:$0xff] %vm1929_vm0, %v2579_v56 }
 0x39a   :  { %4391 = vst.msk [vmem:[#allocation6 + $0x3c8] sm:$0xff] %vm2841_vm3, %v4309_v46  ;;  %v12380_v24 = vld [vmem:[#allocation4 + $0x1c8] sm:$0xff]  ;;  %v5249_v1 = vpack.c.bf16 %v5192_v45, %v5191_v61  ;;  %v2652_v28 = vld [vmem:[#allocation4 + $0x1d0] sm:$0xff]  ;;  %v2928_v20 = vld [vmem:[#allocation3 + $0x2b9] sm:$0xff]  ;;  %v2750_v4 = vpop.permute.xlu1 %2749  ;;  %v3083_v15 = vpack.c.bf16 %v3037_v54, %v12376_v8 }
 0x39b   :  { %v5952_v58 = vld [vmem:[#allocation6 + $0x28] sm:$0xff]  ;;  %7388 = vmatmul.mubr.bf16.gmra.mrb[108].mxu1 %v6228_v39  ;;  %v5957_v44 = vld [vmem:[#allocation6 + $0x50] sm:$0xff]  ;;  %3228 = vst.msk [vmem:[#allocation6 + $0x98] sm:$0xff] %vm2841_vm3, %v3135_v10  ;;  %v2543_v21 = vld [vmem:[#allocation3 + $0x2b8] sm:$0xff]  ;;  %4722 = vrot.lane.b32.xlu0 %v4630_v50, %s10465_s9  ;;  %v2698_v23 = vpack.c.bf16 %v2652_v28, %v12380_v24 }
 0x39c   :  { %v10395_v25 = vld [vmem:[%s14754_s3 + $0x88] sm:$0xff]   ;;  %5281 = vst.msk [vmem:[#allocation6 + $0x1e8] sm:$0xff] %vm1929_vm0, %v5249_v1  ;;  %6858 = vmatprep.mubr.bf16.mxu0 %v5957_v44  ;;  %7428 = vmatprep.mubr.bf16.mxu1 %v5952_v58  ;;  %v2544_v29 = vld [vmem:[#allocation3 + $0x2c0] sm:$0xff]  ;;  %v10396_v55 = vld [vmem:[%s14754_s3 + $0x90] sm:$0xff]   ;;  %v4695_v26 = vpop.permute.xlu0 %4694 }
 0x39d   :  { %7110 = vmatpush1.bf16.msra.mxu0 %v10395_v25  ;;  %v4807_v22 = vld [vmem:[#allocation3 + $0xc8] sm:$0xff]  ;;  %2844 = vst.msk [vmem:[#allocation6 + $0x90] sm:$0xff] %vm2841_vm3, %v2750_v4  ;;  %v2580_v16 = vpack.c.bf16 %v2544_v29, %v2543_v21  ;;  %4338 = vrot.lane.b32.xlu1 %v4246_v2, %s10465_s9  ;;  %v10362_v47 = vld [vmem:[%s14754_s3 + $0x180] sm:$0xff]   ;;  %v4808_v13 = vld [vmem:[#allocation3 + $0xd8] sm:$0xff] }
 0x39e   :  { %7111 = vmatprep.subr.bf16.mxu0 %v10464_v33  ;;  %v4864_v42 = vpack.c.bf16 %v4807_v22, %v4806_v6  ;;  %v2929_v51 = vld [vmem:[#allocation3 + $0x2c1] sm:$0xff]  ;;  %v4597_v62 = vld [vmem:[#allocation4 + $0x30a] sm:$0xff]  ;;  %v5193_v48 = vld [vmem:[#allocation3 + $0xd9] sm:$0xff]  ;;  %4776 = vst.msk [vmem:[#allocation6 + $0x418] sm:$0xff] %vm2841_vm3, %v4695_v26  ;;  %v4311_v63 = vpop.permute.xlu1 %4310 }
 0x39f   :  { %v5956_v11 = vld [vmem:[#allocation6 + $0x48] sm:$0xff]  ;;  %v2965_v7 = vpack.c.bf16 %v2929_v51, %v2928_v20  ;;  %2612 = vst.msk [vmem:[#allocation6 + $0x798] sm:$0xff] %vm1929_vm0, %v2580_v16  ;;  %v4809_v19 = vld [vmem:[#allocation3 + $0xe0] sm:$0xff]  ;;  %v2930_v41 = vld [vmem:[#allocation3 + $0x2d1] sm:$0xff]  ;;  %3164 = vrot.lane.b32.xlu0 %v3083_v15, %s10465_s9 }
 0x3a0   :  { %6859 = vmatmul.mubr.bf16.gmra.mrb[36].mxu0 %v5956_v11  ;;  %v4596_v52 = vld [vmem:[#allocation4 + $0x302] sm:$0xff]  ;;  %4896 = vst.msk [vmem:[#allocation6 + $0x1e0] sm:$0xff] %vm1929_vm0, %v4864_v42  ;;  %v4865_v31 = vpack.c.bf16 %v4809_v19, %v4808_v13  ;;  %v2931_v36 = vld [vmem:[#allocation3 + $0x2d9] sm:$0xff]  ;;  %v5961_v9 = vld [vmem:[#allocation6 + $0x70] sm:$0xff]  ;;  %v3137_v0 = vpop.permute.xlu0 %3136 }
 0x3a1   :  { %v4212_v12 = vld [vmem:[#allocation4 + $0x301] sm:$0xff]  ;;  %7112 = vmatpush1.bf16.msra.mxu0 %v10396_v55  ;;  %2997 = vst.msk [vmem:[#allocation6 + $0x7a0] sm:$0xff] %vm1929_vm0, %v2965_v7  ;;  %v4213_v37 = vld [vmem:[#allocation4 + $0x309] sm:$0xff]  ;;  %v4631_v18 = vpack.c.bf16 %v4597_v62, %v4596_v52  ;;  %v2966_v60 = vpack.c.bf16 %v2931_v36, %v2930_v41  ;;  %2779 = vrot.lane.b32.xlu1 %v2698_v23, %s10465_s9  ;;  %v10397_v57 = vld [vmem:[%s14754_s3 + $0x98] sm:$0xff]  }
 0x3a2   :  { %v5194_v49 = vld [vmem:[#allocation3 + $0xe1] sm:$0xff]  ;;  %7113 = vmatprep.subr.bf16.mxu0 %v10464_v33  ;;  %4392 = vst.msk [vmem:[#allocation6 + $0x410] sm:$0xff] %vm2841_vm3, %v4311_v63  ;;  %v12411_v35 = vld [vmem:[#allocation4 + $0x1e9] sm:$0xff]  ;;  %v4247_v53 = vpack.c.bf16 %v4213_v37, %v4212_v12  ;;  %v2546_v43 = vld [vmem:[#allocation3 + $0x2d8] sm:$0xff]  ;;  %v2752_v46 = vpop.permute.xlu1 %2751 }
 0x3a3   :  { %v5250_v14 = vpack.c.bf16 %v5194_v49, %v5193_v48  ;;  %v5951_v17 = vld [vmem:[#allocation6 + $0x20] sm:$0xff]  ;;  %v12415_v38 = vld [vmem:[#allocation4 + $0x1e8] sm:$0xff]  ;;  %4897 = vst.msk [vmem:[#allocation6 + $0x228] sm:$0xff] %vm1929_vm0, %v4865_v31  ;;  %v2545_v59 = vld [vmem:[#allocation3 + $0x2d0] sm:$0xff]  ;;  %4724 = vrot.lane.b32.xlu0 %v4631_v18, %s10465_s9 }
 0x3a4   :  { %v12407_v34 = vld [vmem:[#allocation4 + $0x1e1] sm:$0xff]  ;;  %7429 = vmatmul.mubr.bf16.vlgmr.msra.gmra.mrb[112].mxu1 %v5951_v17  ;;  %v5966_v40 = vld [vmem:[#allocation6 + $0x98] sm:$0xff]  ;;  %2998 = vst.msk [vmem:[#allocation6 + $0x7e8] sm:$0xff] %vm1929_vm0, %v2966_v60  ;;  %v2581_v27 = vpack.c.bf16 %v2546_v43, %v2545_v59  ;;  %v5965_v39 = vld [vmem:[#allocation6 + $0x90] sm:$0xff]  ;;  %v4697_v28 = vpop.permute.xlu0 %4696 }
 0x3a5   :  { %v12413_v30 = vld [vmem:[#allocation4 + $0x1e0] sm:$0xff]  ;;  %5282 = vst.msk [vmem:[#allocation6 + $0x230] sm:$0xff] %vm1929_vm0, %v5250_v14  ;;  %v10363_v3 = vld [vmem:[%s14754_s3 + $0x188] sm:$0xff]   ;;  %7114 = vmatpush1.bf16.msra.mxu0 %v10397_v57  ;;  %v5195_v5 = vld [vmem:[#allocation3 + $0xf1] sm:$0xff]  ;;  %6866 = vmatprep.mubr.bf16.mxu0 %v5966_v40  ;;  %v3084_v45 = vpack.c.bf16 %v12411_v35, %v12407_v34 }
 0x3a6   :  { %7115 = vmatprep.subr.bf16.mxu0 %v10464_v33  ;;  %v5196_v32 = vld [vmem:[#allocation3 + $0xf9] sm:$0xff]  ;;  %3229 = vst.msk [vmem:[#allocation6 + $0xe0] sm:$0xff] %vm2841_vm3, %v3137_v0  ;;  %7686 = vmatpush1.bf16.msra.mxu1 %v10362_v47  ;;  %v4810_v56 = vld [vmem:[#allocation3 + $0xf0] sm:$0xff]  ;;  %2845 = vst.msk [vmem:[#allocation6 + $0xd8] sm:$0xff] %vm2841_vm3, %v2752_v46  ;;  %v2699_v24 = vpack.c.bf16 %v12415_v38, %v12413_v30  ;;  %v4313_v44 = vpop.permute.xlu1 %4312 }
 0x3a7   :  { %v5251_v8 = vpack.c.bf16 %v5196_v32, %v5195_v5  ;;  %v4811_v61 = vld [vmem:[#allocation3 + $0xf8] sm:$0xff]  ;;  %2613 = vst.msk [vmem:[#allocation6 + $0x7e0] sm:$0xff] %vm1929_vm0, %v2581_v27  ;;  %4340 = vrot.lane.b32.xlu1 %v4247_v53, %s10465_s9  ;;  %7436 = vmatprep.mubr.bf16.mxu1 %v5961_v9  ;;  %v4599_v58 = vld [vmem:[#allocation4 + $0x322] sm:$0xff]  ;;  %v2548_v11 = vld [vmem:[#allocation3 + $0x2f0] sm:$0xff] }
 0x3a8   :  { %6867 = vmatmul.mubr.bf16.gmra.mrb[40].mxu0 %v5965_v39  ;;  %v4598_v50 = vld [vmem:[#allocation4 + $0x31a] sm:$0xff]  ;;  %v4866_v54 = vpack.c.bf16 %v4811_v61, %v4810_v56  ;;  %v2932_v2 = vld [vmem:[#allocation3 + $0x2e9] sm:$0xff]  ;;  %7687 = vmatprep.subr.bf16.mxu1 %v10464_v33  ;;  %v2933_v22 = vld [vmem:[#allocation3 + $0x2f1] sm:$0xff]  ;;  %4777 = vst.msk [vmem:[#allocation6 + $0x460] sm:$0xff] %vm2841_vm3, %v4697_v28  ;;  %v3139_v55 = vpop.permute.xlu0 %3138 }
 0x3a9   :  { %v4214_v1 = vld [vmem:[#allocation4 + $0x319] sm:$0xff]  ;;  %5283 = vst.msk [vmem:[#allocation6 + $0x278] sm:$0xff] %vm1929_vm0, %v5251_v8  ;;  %v4215_v25 = vld [vmem:[#allocation4 + $0x321] sm:$0xff]  ;;  %v2967_v4 = vpack.c.bf16 %v2933_v22, %v2932_v2  ;;  %v5197_v7 = vld [vmem:[#allocation3 + $0x109] sm:$0xff]  ;;  %3166 = vrot.lane.b32.xlu0 %v3084_v45, %s10465_s9  ;;  %v4632_v21 = vpack.c.bf16 %v4599_v58, %v4598_v50 }
 0x3aa   :  { %v10398_v6 = vld [vmem:[%s14754_s3 + $0xa0] sm:$0xff]   ;;  %4898 = vst.msk [vmem:[#allocation6 + $0x270] sm:$0xff] %vm1929_vm0, %v4866_v54  ;;  %v2547_v10 = vld [vmem:[#allocation3 + $0x2e8] sm:$0xff]  ;;  %7688 = vmatpush1.bf16.msra.mxu1 %v10363_v3  ;;  %v12451_v29 = vld [vmem:[#allocation4 + $0x1f8] sm:$0xff]  ;;  %v4248_v16 = vpack.c.bf16 %v4215_v25, %v4214_v1  ;;  %v2754_v13 = vpop.permute.xlu1 %2753 }
 0x3ab   :  { %7116 = vmatpush1.bf16.msra.mxu0 %v10398_v6  ;;  %v5960_v42 = vld [vmem:[#allocation6 + $0x68] sm:$0xff]  ;;  %v12444_v20 = vld [vmem:[#allocation4 + $0x1f9] sm:$0xff]  ;;  %4393 = vst.msk [vmem:[#allocation6 + $0x458] sm:$0xff] %vm2841_vm3, %v4313_v44  ;;  %7689 = vmatprep.subr.bf16.mxu1 %v10464_v33  ;;  %v2582_v62 = vpack.c.bf16 %v2548_v11, %v2547_v10  ;;  %v10364_v23 = vld [vmem:[%s14754_s3 + $0x190] sm:$0xff]  }
 0x3ac   :  { %v12446_v51 = vld [vmem:[#allocation4 + $0x201] sm:$0xff]  ;;  %7117 = vmatprep.subr.bf16.mxu0 %v10464_v33  ;;  %v5970_v52 = vld [vmem:[#allocation6 + $0xb8] sm:$0xff]  ;;  %2781 = vrot.lane.b32.xlu1 %v2699_v24, %s10465_s9  ;;  %2999 = vst.msk [vmem:[#allocation6 + $0x830] sm:$0xff] %vm1929_vm0, %v2967_v4  ;;  %v4813_v37 = vld [vmem:[#allocation3 + $0x110] sm:$0xff]  ;;  %v4699_v9 = vpop.permute.xlu0 %4698 }
 0x3ad   :  { %v12453_v15 = vld [vmem:[#allocation4 + $0x200] sm:$0xff]  ;;  %v5198_v47 = vld [vmem:[#allocation3 + $0x111] sm:$0xff]  ;;  %v4812_v12 = vld [vmem:[#allocation3 + $0x108] sm:$0xff]  ;;  %7437 = vmatmul.mubr.bf16.gmra.mrb[116].mxu1 %v5960_v42  ;;  %2614 = vst.msk [vmem:[#allocation6 + $0x828] sm:$0xff] %vm1929_vm0, %v2582_v62  ;;  %4726 = vrot.lane.b32.xlu0 %v4632_v21, %s10465_s9  ;;  %v3085_v31 = vpack.c.bf16 %v12446_v51, %v12444_v20 }
 0x3ae   :  { %v5975_v48 = vld [vmem:[#allocation6 + $0xe0] sm:$0xff]  ;;  %v10399_v49 = vld [vmem:[%s14754_s3 + $0xa8] sm:$0xff]   ;;  %v5252_v26 = vpack.c.bf16 %v5198_v47, %v5197_v7  ;;  %3230 = vst.msk [vmem:[#allocation6 + $0x128] sm:$0xff] %vm2841_vm3, %v3139_v55  ;;  %v5974_v19 = vld [vmem:[#allocation6 + $0xd8] sm:$0xff]  ;;  %7444 = vmatprep.mubr.bf16.mxu1 %v5970_v52  ;;  %v4867_v63 = vpack.c.bf16 %v4813_v37, %v4812_v12  ;;  %v2700_v30 = vpack.c.bf16 %v12453_v15, %v12451_v29  ;;  %v4315_v0 = vpop.permute.xlu1 %4314 }
 0x3af   :  { %7118 = vmatpush1.bf16.msra.mxu0 %v10399_v49  ;;  %v2934_v14 = vld [vmem:[#allocation3 + $0x301] sm:$0xff]  ;;  %6874 = vmatprep.mubr.bf16.mxu0 %v5975_v48  ;;  %v2935_v17 = vld [vmem:[#allocation3 + $0x309] sm:$0xff]  ;;  %2846 = vst.msk [vmem:[#allocation6 + $0x120] sm:$0xff] %vm2841_vm3, %v2754_v13  ;;  %v12470_v41 = vld [vmem:[#allocation4 + $0x332] sm:$0xff] }
 0x3b0   :  { %v2549_v34 = vld [vmem:[#allocation3 + $0x300] sm:$0xff]  ;;  %6875 = vmatmul.mubr.bf16.gmra.mrb[44].mxu0 %v5974_v19  ;;  %v12474_v18 = vld [vmem:[#allocation4 + $0x331] sm:$0xff]  ;;  %5284 = vst.msk [vmem:[#allocation6 + $0x2c0] sm:$0xff] %vm1929_vm0, %v5252_v26  ;;  %v2968_v35 = vpack.c.bf16 %v2935_v17, %v2934_v14  ;;  %4342 = vrot.lane.b32.xlu1 %v4248_v16, %s10465_s9  ;;  %4899 = vst.msk [vmem:[#allocation6 + $0x2b8] sm:$0xff] %vm1929_vm0, %v4867_v63  ;;  %v3141_v28 = vpop.permute.xlu0 %3140 }
 0x3b1   :  { %v12472_v36 = vld [vmem:[#allocation4 + $0x33a] sm:$0xff]  ;;  %7690 = vmatpush1.bf16.msra.mxu1 %v10364_v23  ;;  %v2550_v60 = vld [vmem:[#allocation3 + $0x308] sm:$0xff]  ;;  %7119 = vmatprep.subr.bf16.mxu0 %v10464_v33  ;;  %4778 = vst.msk [vmem:[#allocation6 + $0x4a8] sm:$0xff] %vm2841_vm3, %v4699_v9  ;;  %v5969_v40 = vld [vmem:[#allocation6 + $0xb0] sm:$0xff] }
 0x3b2   :  { %v10365_v38 = vld [vmem:[%s14754_s3 + $0x198] sm:$0xff]   ;;  %v5199_v53 = vld [vmem:[#allocation3 + $0x121] sm:$0xff]  ;;  %7691 = vmatprep.subr.bf16.mxu1 %v10464_v33  ;;  %3000 = vst.msk [vmem:[#allocation6 + $0x878] sm:$0xff] %vm1929_vm0, %v2968_v35  ;;  %v2583_v57 = vpack.c.bf16 %v2550_v60, %v2549_v34  ;;  %v5200_v59 = vld [vmem:[#allocation3 + $0x129] sm:$0xff]  ;;  %3168 = vrot.lane.b32.xlu0 %v3085_v31, %s10465_s9  ;;  %v4633_v56 = vpack.c.bf16 %v12472_v36, %v12470_v41  ;;  %v2756_v44 = vpop.permute.xlu1 %2755 }
 0x3b3   :  { %v4217_v3 = vld [vmem:[#allocation4 + $0x339] sm:$0xff]  ;;  %v12488_v27 = vld [vmem:[#allocation4 + $0x211] sm:$0xff]  ;;  %v5253_v46 = vpack.c.bf16 %v5200_v59, %v5199_v53  ;;  %v4815_v39 = vld [vmem:[#allocation3 + $0x128] sm:$0xff]  ;;  %4394 = vst.msk [vmem:[#allocation6 + $0x4a0] sm:$0xff] %vm2841_vm3, %v4315_v0 }
 0x3b4   :  { %v4814_v43 = vld [vmem:[#allocation3 + $0x120] sm:$0xff]  ;;  %v10400_v32 = vld [vmem:[%s14754_s3 + $0xb0] sm:$0xff]   ;;  %v12501_v45 = vld [vmem:[#allocation4 + $0x218] sm:$0xff]  ;;  %2615 = vst.msk [vmem:[#allocation6 + $0x870] sm:$0xff] %vm1929_vm0, %v2583_v57  ;;  %2783 = vrot.lane.b32.xlu1 %v2700_v30, %s10465_s9  ;;  %v4249_v24 = vpack.c.bf16 %v4217_v3, %v12474_v18  ;;  %v4701_v12 = vpop.permute.xlu0 %4700 }
 0x3b5   :  { %v12490_v5 = vld [vmem:[#allocation4 + $0x219] sm:$0xff]  ;;  %7120 = vmatpush1.bf16.msra.mxu0 %v10400_v32  ;;  %v12499_v61 = vld [vmem:[#allocation4 + $0x210] sm:$0xff]  ;;  %v4868_v54 = vpack.c.bf16 %v4815_v39, %v4814_v43  ;;  %7692 = vmatpush1.bf16.msra.mxu1 %v10365_v38  ;;  %5285 = vst.msk [vmem:[#allocation6 + $0x308] sm:$0xff] %vm1929_vm0, %v5253_v46  ;;  %v2937_v1 = vld [vmem:[#allocation3 + $0x321] sm:$0xff] }
 0x3b6   :  { %v2936_v8 = vld [vmem:[#allocation3 + $0x319] sm:$0xff]  ;;  %7121 = vmatprep.subr.bf16.mxu0 %v10464_v33  ;;  %7445 = vmatmul.mubr.bf16.gmra.mrb[120].mxu1 %v5969_v40  ;;  %v5984_v25 = vld [vmem:[#allocation6 + $0x128] sm:$0xff]  ;;  %3231 = vst.msk [vmem:[#allocation6 + $0x170] sm:$0xff] %vm2841_vm3, %v3141_v28  ;;  %v12514_v20 = vld [vmem:[#allocation4 + $0x31] sm:$0xff]  ;;  %v3086_v7 = vpack.c.bf16 %v12490_v5, %v12488_v27  ;;  %v2701_v62 = vpack.c.bf16 %v12501_v45, %v12499_v61  ;;  %v4317_v14 = vpop.permute.xlu1 %4316 }
 0x3b7   :  { %v5979_v50 = vld [vmem:[#allocation6 + $0x100] sm:$0xff]  ;;  %v2551_v2 = vld [vmem:[#allocation3 + $0x318] sm:$0xff]  ;;  %7693 = vmatprep.subr.bf16.mxu1 %v10464_v33  ;;  %4900 = vst.msk [vmem:[#allocation6 + $0x300] sm:$0xff] %vm1929_vm0, %v4868_v54  ;;  %v2969_v6 = vpack.c.bf16 %v2937_v1, %v2936_v8  ;;  %6882 = vmatprep.mubr.bf16.mxu0 %v5984_v25  ;;  %v12522_v29 = vld [vmem:[#allocation4 + $0x30] sm:$0xff] }
 0x3b8   :  { %v10366_v58 = vld [vmem:[%s14754_s3 + $0x1a0] sm:$0xff]   ;;  %7452 = vmatprep.mubr.bf16.mxu1 %v5979_v50  ;;  %v4816_v11 = vld [vmem:[#allocation3 + $0x138] sm:$0xff]  ;;  %2847 = vst.msk [vmem:[#allocation6 + $0x168] sm:$0xff] %vm2841_vm3, %v2756_v44  ;;  %4728 = vrot.lane.b32.xlu0 %v4633_v56, %s10465_s9  ;;  %v10367_v23 = vld [vmem:[%s14754_s3 + $0x1a8] sm:$0xff]   ;;  %v3143_v43 = vpop.permute.xlu0 %3142 }
 0x3b9   :  { %v2552_v22 = vld [vmem:[#allocation3 + $0x320] sm:$0xff]  ;;  %v12524_v15 = vld [vmem:[#allocation4 + $0x38] sm:$0xff]  ;;  %3001 = vst.msk [vmem:[#allocation6 + $0x8c0] sm:$0xff] %vm1929_vm0, %v2969_v6  ;;  %4344 = vrot.lane.b32.xlu1 %v4249_v24, %s10465_s9  ;;  %7694 = vmatpush1.bf16.msra.mxu1 %v10366_v58  ;;  %v5988_v55 = vld [vmem:[#allocation6 + $0x148] sm:$0xff] }
 0x3ba   :  { %v5201_v10 = vld [vmem:[#allocation3 + $0x139] sm:$0xff]  ;;  %v2584_v51 = vpack.c.bf16 %v2552_v22, %v2551_v2  ;;  %v5202_v4 = vld [vmem:[#allocation3 + $0x141] sm:$0xff]  ;;  %7695 = vmatprep.subr.bf16.mxu1 %v10464_v33  ;;  %4779 = vst.msk [vmem:[#allocation6 + $0x4f0] sm:$0xff] %vm2841_vm3, %v4701_v12  ;;  %v12540_v13 = vld [vmem:[#allocation4 + $0x229] sm:$0xff]  ;;  %v4987_v53 = vpack.c.bf16 %v12524_v15, %v12522_v29  ;;  %v2758_v46 = vpop.permute.xlu1 %2757 }
 0x3bb   :  { %v5983_v42 = vld [vmem:[#allocation6 + $0x120] sm:$0xff]  ;;  %v5254_v52 = vpack.c.bf16 %v5202_v4, %v5201_v10  ;;  %v5978_v16 = vld [vmem:[#allocation6 + $0xf8] sm:$0xff]  ;;  %v10368_v63 = vld [vmem:[%s14754_s3 + $0x1b0] sm:$0xff]   ;;  %4395 = vst.msk [vmem:[#allocation6 + $0x4e8] sm:$0xff] %vm2841_vm3, %v4317_v14 }
 0x3bc   :  { %6883 = vmatmul.mubr.bf16.gmra.mrb[48].mxu0 %v5983_v42  ;;  %v12520_v21 = vld [vmem:[#allocation4 + $0x39] sm:$0xff]  ;;  %2616 = vst.msk [vmem:[#allocation6 + $0x8b8] sm:$0xff] %vm1929_vm0, %v2584_v51  ;;  %v12542_v19 = vld [vmem:[#allocation4 + $0x231] sm:$0xff]  ;;  %3170 = vrot.lane.b32.xlu0 %v3086_v7, %s10465_s9  ;;  %v12552_v36 = vld [vmem:[#allocation4 + $0x228] sm:$0xff]  ;;  %v4703_v6 = vpop.permute.xlu0 %4702 }
 0x3bd   :  { %v4817_v47 = vld [vmem:[#allocation3 + $0x140] sm:$0xff]  ;;  %v10401_v48 = vld [vmem:[%s14754_s3 + $0xb8] sm:$0xff]   ;;  %5286 = vst.msk [vmem:[#allocation6 + $0x350] sm:$0xff] %vm1929_vm0, %v5254_v52  ;;  %v5371_v41 = vpack.c.bf16 %v12520_v21, %v12514_v20  ;;  %v12554_v18 = vld [vmem:[#allocation4 + $0x230] sm:$0xff]  ;;  %2785 = vrot.lane.b32.xlu1 %v2701_v62, %s10465_s9  ;;  %7696 = vmatpush1.bf16.msra.mxu1 %v10367_v23  ;;  %v3087_v45 = vpack.c.bf16 %v12542_v19, %v12540_v13 }
 0x3be   :  { %7122 = vmatpush1.bf16.msra.mxu0 %v10401_v48  ;;  %v4869_v49 = vpack.c.bf16 %v4817_v47, %v4816_v11  ;;  %v3642_v26 = vld [vmem:[#allocation3 + $0x18] sm:$0xff]  ;;  %v3643_v37 = vld [vmem:[#allocation3 + $0x20] sm:$0xff]  ;;  %v4818_v30 = vld [vmem:[#allocation3 + $0x150] sm:$0xff]  ;;  %7453 = vmatmul.mubr.bf16.gmra.mrb[124].mxu1 %v5978_v16  ;;  %3232 = vst.msk [vmem:[#allocation6 + $0x1b8] sm:$0xff] %vm2841_vm3, %v3143_v43  ;;  %v2702_v1 = vpack.c.bf16 %v12554_v18, %v12552_v36  ;;  %v4319_v51 = vpop.permute.xlu1 %4318 }
 0x3bf   :  { %7123 = vmatprep.subr.bf16.mxu0 %v10464_v33  ;;  %v3706_v17 = vpack.c.bf16 %v3643_v37, %v3642_v26  ;;  %v5203_v34 = vld [vmem:[#allocation3 + $0x151] sm:$0xff]  ;;  %v5204_v31 = vld [vmem:[#allocation3 + $0x159] sm:$0xff]  ;;  %v3261_v59 = vld [vmem:[#allocation3 + $0x22] sm:$0xff]  ;;  %7697 = vmatprep.subr.bf16.mxu1 %v10464_v33  ;;  %2848 = vst.msk [vmem:[#allocation6 + $0x1b0] sm:$0xff] %vm2841_vm3, %v2758_v46 }
 0x3c0   :  { %4901 = vst.msk [vmem:[#allocation6 + $0x348] sm:$0xff] %vm1929_vm0, %v4869_v49  ;;  %v5255_v35 = vpack.c.bf16 %v5204_v31, %v5203_v34  ;;  %v4819_v38 = vld [vmem:[#allocation3 + $0x158] sm:$0xff]  ;;  %v3644_v3 = vld [vmem:[#allocation3 + $0x30] sm:$0xff]  ;;  %v5992_v39 = vld [vmem:[#allocation6 + $0x168] sm:$0xff]  ;;  %7460 = vmatprep.mubr.bf16.mxu1 %v5988_v55  ;;  %5435 = vrot.lane.b32.xlu0 %v5371_v41, %s10465_s9  ;;  %v3145_v26 = vpop.permute.xlu0 %3144 }
 0x3c1   :  { %v3260_v60 = vld [vmem:[#allocation3 + $0x1a] sm:$0xff]  ;;  %3738 = vst.msk [vmem:[#allocation6 + $0x18] sm:$0xff] %vm1929_vm0, %v3706_v17  ;;  %v4870_v9 = vpack.c.bf16 %v4819_v38, %v4818_v30  ;;  %v5993_v0 = vld [vmem:[#allocation6 + $0x170] sm:$0xff]  ;;  %v4820_v56 = vld [vmem:[#allocation3 + $0x168] sm:$0xff]  ;;  %5051 = vrot.lane.b32.xlu1 %v4987_v53, %s10465_s9  ;;  %7698 = vmatpush1.bf16.msra.mxu1 %v10368_v63 }
 0x3c2   :  { %v3645_v57 = vld [vmem:[#allocation3 + $0x38] sm:$0xff]  ;;  %5287 = vst.msk [vmem:[#allocation6 + $0x398] sm:$0xff] %vm1929_vm0, %v5255_v35  ;;  %v3323_v27 = vpack.c.bf16 %v3261_v59, %v3260_v60  ;;  %v5205_v5 = vld [vmem:[#allocation3 + $0x169] sm:$0xff]  ;;  %6890 = vmatprep.mubr.bf16.mxu0 %v5993_v0  ;;  %7699 = vmatprep.subr.bf16.mxu1 %v10464_v33  ;;  %v10402_v10 = vld [vmem:[%s14754_s3 + $0xc0] sm:$0xff]   ;;  %v2760_v63 = vpop.permute.xlu1 %2759 }
 0x3c3   :  { %v3707_v40 = vpack.c.bf16 %v3645_v57, %v3644_v3  ;;  %v5206_v32 = vld [vmem:[#allocation3 + $0x171] sm:$0xff]  ;;  %4902 = vst.msk [vmem:[#allocation6 + $0x390] sm:$0xff] %vm1929_vm0, %v4870_v9  ;;  %v12569_v50 = vld [vmem:[#allocation4 + $0x49] sm:$0xff]  ;;  %v3263_v25 = vld [vmem:[#allocation3 + $0x3a] sm:$0xff]  ;;  %7124 = vmatpush1.bf16.msra.mxu0 %v10402_v10 }
 0x3c4   :  { %v5256_v8 = vpack.c.bf16 %v5206_v32, %v5205_v5  ;;  %v4821_v61 = vld [vmem:[#allocation3 + $0x170] sm:$0xff]  ;;  %6891 = vmatmul.mubr.bf16.gmra.mrb[52].mxu0 %v5992_v39  ;;  %v12573_v24 = vld [vmem:[#allocation4 + $0x48] sm:$0xff]  ;;  %3355 = vst.msk [vmem:[#allocation6 + $0x58] sm:$0xff] %vm1929_vm0, %v3323_v27  ;;  %v10369_v2 = vld [vmem:[%s14754_s3 + $0x1b8] sm:$0xff]   ;;  %7125 = vmatprep.subr.bf16.mxu0 %v10464_v33  ;;  %v4705_v3 = vpop.permute.xlu0 %4704 }
 0x3c5   :  { %v12571_v54 = vld [vmem:[#allocation4 + $0x51] sm:$0xff]  ;;  %3739 = vst.msk [vmem:[#allocation6 + $0x60] sm:$0xff] %vm1929_vm0, %v3707_v40  ;;  %v4871_v58 = vpack.c.bf16 %v4821_v61, %v4820_v56  ;;  %v3646_v44 = vld [vmem:[#allocation3 + $0x48] sm:$0xff]  ;;  %v5987_v4 = vld [vmem:[#allocation6 + $0x140] sm:$0xff]  ;;  %3172 = vrot.lane.b32.xlu0 %v3087_v45, %s10465_s9  ;;  %2787 = vrot.lane.b32.xlu1 %v2702_v1, %s10465_s9 }
 0x3c6   :  { %5288 = vst.msk [vmem:[#allocation6 + $0x3e0] sm:$0xff] %vm1929_vm0, %v5256_v8  ;;  %v3262_v28 = vld [vmem:[#allocation3 + $0x32] sm:$0xff]  ;;  %v12590_v11 = vld [vmem:[#allocation4 + $0x241] sm:$0xff]  ;;  %v12592_v7 = vld [vmem:[#allocation4 + $0x249] sm:$0xff]  ;;  %v5372_v52 = vpack.c.bf16 %v12571_v54, %v12569_v50  ;;  %7700 = vmatpush1.bf16.msra.mxu1 %v10369_v2  ;;  %v4321_v40 = vpop.permute.xlu1 %4320 }
 0x3c7   :  { %v4926_v22 = vld [vmem:[#allocation4 + $0x50] sm:$0xff]  ;;  %4903 = vst.msk [vmem:[#allocation6 + $0x3d8] sm:$0xff] %vm1929_vm0, %v4871_v58  ;;  %v3324_v20 = vpack.c.bf16 %v3263_v25, %v3262_v28  ;;  %v5207_v29 = vld [vmem:[#allocation3 + $0x181] sm:$0xff]  ;;  %7461 = vmatmul.mubr.bf16.gmra.mrb[0].mxu1 %v5987_v4  ;;  %v6002_v37 = vld [vmem:[#allocation6 + $0x1b8] sm:$0xff]  ;;  %7701 = vmatprep.subr.bf16.mxu1 %v10464_v33  ;;  %v3088_v36 = vpack.c.bf16 %v12592_v7, %v12590_v11 }
 0x3c8   :  { %v3647_v42 = vld [vmem:[#allocation3 + $0x50] sm:$0xff]  ;;  %4780 = vst.msk [vmem:[#allocation6 + $0x538] sm:$0xff] %vm2841_vm3, %v4703_v6  ;;  %4396 = vst.msk [vmem:[#allocation6 + $0x530] sm:$0xff] %vm2841_vm3, %v4319_v51  ;;  %v12599_v62 = vld [vmem:[#allocation4 + $0x240] sm:$0xff]  ;;  %v4988_v12 = vpack.c.bf16 %v4926_v22, %v12573_v24  ;;  %6898 = vmatprep.mubr.bf16.mxu0 %v6002_v37  ;;  %v3147_v28 = vpop.permute.xlu0 %3146 }
 0x3c9   :  { %v3708_v21 = vpack.c.bf16 %v3647_v42, %v3646_v44  ;;  %v5208_v15 = vld [vmem:[#allocation3 + $0x189] sm:$0xff]  ;;  %3356 = vst.msk [vmem:[#allocation6 + $0xa0] sm:$0xff] %vm1929_vm0, %v3324_v20  ;;  %5659 = vst.msk [vmem:[#allocation6 + $0x40] sm:$0xff] %vm1929_vm0, %v3324_v20  ;;  %v10370_v55 = vld [vmem:[%s14754_s3 + $0x1c0] sm:$0xff]   ;;  %5437 = vrot.lane.b32.xlu0 %v5372_v52, %s10465_s9 }
 0x3ca   :  { %v12601_v16 = vld [vmem:[#allocation4 + $0x248] sm:$0xff]  ;;  %v5997_v23 = vld [vmem:[#allocation6 + $0x190] sm:$0xff]  ;;  %v5257_v47 = vpack.c.bf16 %v5208_v15, %v5207_v29  ;;  %v4822_v48 = vld [vmem:[#allocation3 + $0x180] sm:$0xff]  ;;  %3233 = vst.msk [vmem:[#allocation6 + $0x200] sm:$0xff] %vm2841_vm3, %v3145_v26  ;;  %5053 = vrot.lane.b32.xlu1 %v4988_v12, %s10465_s9  ;;  %7702 = vmatpush1.bf16.msra.mxu1 %v10370_v55  ;;  %v2762_v44 = vpop.permute.xlu1 %2761 }
 0x3cb   :  { %3740 = vst.msk [vmem:[#allocation6 + $0xa8] sm:$0xff] %vm1929_vm0, %v3708_v21  ;;  %v4823_v49 = vld [vmem:[#allocation3 + $0x188] sm:$0xff]  ;;  %v3648_v13 = vld [vmem:[#allocation3 + $0x60] sm:$0xff]  ;;  %v6001_v17 = vld [vmem:[#allocation6 + $0x1b0] sm:$0xff]  ;;  %7468 = vmatprep.mubr.bf16.mxu1 %v5997_v23  ;;  %v2703_v38 = vpack.c.bf16 %v12601_v16, %v12599_v62  ;;  %7703 = vmatprep.subr.bf16.mxu1 %v10464_v33 }
 0x3cc   :  { %5289 = vst.msk [vmem:[#allocation6 + $0x428] sm:$0xff] %vm1929_vm0, %v5257_v47  ;;  %v4872_v14 = vpack.c.bf16 %v4823_v49, %v4822_v48  ;;  %v3649_v19 = vld [vmem:[#allocation3 + $0x68] sm:$0xff]  ;;  %6899 = vmatmul.mubr.bf16.gmra.mrb[56].mxu0 %v6001_v17  ;;  %v12622_v60 = vld [vmem:[#allocation4 + $0x60] sm:$0xff]  ;;  %v12641_v61 = vld [vmem:[#allocation4 + $0x258] sm:$0xff]  ;;  %v4707_v37 = vpop.permute.xlu0 %4706 }
 0x3cd   :  { %v3709_v34 = vpack.c.bf16 %v3649_v19, %v3648_v13  ;;  %v5211_v31 = vld [vmem:[#allocation3 + $0x1e1] sm:$0xff]  ;;  %v5212_v41 = vld [vmem:[#allocation3 + $0x1e9] sm:$0xff]  ;;  %2849 = vst.msk [vmem:[#allocation6 + $0x1f8] sm:$0xff] %vm2841_vm3, %v2760_v63  ;;  %4781 = vst.msk [vmem:[#allocation6 + $0x580] sm:$0xff] %vm2841_vm3, %v4705_v3  ;;  %3174 = vrot.lane.b32.xlu0 %v3088_v36, %s10465_s9 }
 0x3ce   :  { %v5311_v18 = vld [vmem:[#allocation4 + $0x61] sm:$0xff]  ;;  %v5312_v35 = vld [vmem:[#allocation4 + $0x69] sm:$0xff]  ;;  %4904 = vst.msk [vmem:[#allocation6 + $0x420] sm:$0xff] %vm1929_vm0, %v4872_v14  ;;  %v5259_v30 = vpack.c.bf16 %v5212_v41, %v5211_v31  ;;  %v12634_v5 = vld [vmem:[#allocation4 + $0x259] sm:$0xff]  ;;  %2789 = vrot.lane.b32.xlu1 %v2703_v38, %s10465_s9 }
 0x3cf   :  { %v10371_v53 = vld [vmem:[%s14754_s3 + $0x1c8] sm:$0xff]   ;;  %3741 = vst.msk [vmem:[#allocation6 + $0xf0] sm:$0xff] %vm1929_vm0, %v3709_v34  ;;  %v4826_v9 = vld [vmem:[#allocation3 + $0x1e0] sm:$0xff]  ;;  %v5373_v56 = vpack.c.bf16 %v5312_v35, %v5311_v18  ;;  %v6006_v50 = vld [vmem:[#allocation6 + $0x1d8] sm:$0xff]  ;;  %v4323_v34 = vpop.permute.xlu1 %4322 }
 0x3d0   :  { %v4928_v57 = vld [vmem:[#allocation4 + $0x68] sm:$0xff]  ;;  %5291 = vst.msk [vmem:[#allocation6 + $0x4b8] sm:$0xff] %vm1929_vm0, %v5259_v30  ;;  %v5569_v8 = vld [vmem:[#allocation3 + $0x7a] sm:$0xff]  ;;  %7704 = vmatpush1.bf16.msra.mxu1 %v10371_v53  ;;  %v10372_v58 = vld [vmem:[%s14754_s3 + $0x1d0] sm:$0xff]  }
 0x3d1   :  { %v10403_v59 = vld [vmem:[%s14754_s3 + $0xc8] sm:$0xff]   ;;  %4397 = vst.msk [vmem:[#allocation6 + $0x578] sm:$0xff] %vm2841_vm3, %v4321_v40  ;;  %v12643_v45 = vld [vmem:[#allocation4 + $0x260] sm:$0xff]  ;;  %v4989_v24 = vpack.c.bf16 %v4928_v57, %v12622_v60  ;;  %7705 = vmatprep.subr.bf16.mxu1 %v10464_v33  ;;  %v4828_v10 = vld [vmem:[#allocation3 + $0x1f8] sm:$0xff]  ;;  %5439 = vrot.lane.b32.xlu0 %v5373_v56, %s10465_s9 }
 0x3d2   :  { %7126 = vmatpush1.bf16.msra.mxu0 %v10403_v59  ;;  %v4827_v43 = vld [vmem:[#allocation3 + $0x1e8] sm:$0xff]  ;;  %v5213_v2 = vld [vmem:[#allocation3 + $0x1f9] sm:$0xff]  ;;  %3234 = vst.msk [vmem:[#allocation6 + $0x248] sm:$0xff] %vm2841_vm3, %v3147_v28  ;;  %2850 = vst.msk [vmem:[#allocation6 + $0x240] sm:$0xff] %vm2841_vm3, %v2762_v44  ;;  %v2704_v47 = vpack.c.bf16 %v12643_v45, %v12641_v61 }
 0x3d3   :  { %v5567_v0 = vld [vmem:[#allocation3 + $0x62] sm:$0xff]  ;;  %7127 = vmatprep.subr.bf16.mxu0 %v10464_v33  ;;  %v4874_v46 = vpack.c.bf16 %v4827_v43, %v4826_v9  ;;  %v5568_v39 = vld [vmem:[#allocation3 + $0x6a] sm:$0xff]  ;;  %v12654_v20 = vld [vmem:[#allocation4 + $0x79] sm:$0xff]  ;;  %5055 = vrot.lane.b32.xlu1 %v4989_v24, %s10465_s9  ;;  %4782 = vst.msk [vmem:[#allocation6 + $0x5c8] sm:$0xff] %vm2841_vm3, %v4707_v37  ;;  %v2764_v45 = vpop.permute.xlu1 %2763 }
 0x3d4   :  { %v5996_v27 = vld [vmem:[#allocation6 + $0x188] sm:$0xff]  ;;  %v5629_v54 = vpack.c.bf16 %v5568_v39, %v5567_v0  ;;  %v6011_v25 = vld [vmem:[#allocation6 + $0x200] sm:$0xff]  ;;  %v6010_v42 = vld [vmem:[#allocation6 + $0x1f8] sm:$0xff]  ;;  %7706 = vmatpush1.bf16.msra.mxu1 %v10372_v58  ;;  %4398 = vst.msk [vmem:[#allocation6 + $0x5c0] sm:$0xff] %vm2841_vm3, %v4323_v34 }
 0x3d5   :  { %v12636_v32 = vld [vmem:[#allocation4 + $0x261] sm:$0xff]  ;;  %4906 = vst.msk [vmem:[#allocation6 + $0x4b0] sm:$0xff] %vm1929_vm0, %v4874_v46  ;;  %7469 = vmatmul.mubr.bf16.gmra.mrb[4].mxu1 %v5996_v27  ;;  %6906 = vmatprep.mubr.bf16.mxu0 %v6011_v25  ;;  %v5571_v7 = vld [vmem:[#allocation3 + $0x92] sm:$0xff]  ;;  %v5573_v16 = vld [vmem:[#allocation3 + $0xaa] sm:$0xff] }
 0x3d6   :  { %v5570_v1 = vld [vmem:[#allocation3 + $0x82] sm:$0xff]  ;;  %5661 = vst.msk [vmem:[#allocation6 + $0xd0] sm:$0xff] %vm1929_vm0, %v5629_v54  ;;  %7476 = vmatprep.mubr.bf16.mxu1 %v6006_v50  ;;  %6907 = vmatmul.mubr.bf16.gmra.mrb[60].mxu0 %v6010_v42  ;;  %v3089_v21 = vpack.c.bf16 %v12636_v32, %v12634_v5  ;;  %v12662_v29 = vld [vmem:[#allocation4 + $0x78] sm:$0xff]  ;;  %v4830_v26 = vld [vmem:[#allocation3 + $0x210] sm:$0xff]  ;;  %v3149_v32 = vpop.permute.xlu0 %3148 }
 0x3d7   :  { %v5630_v6 = vpack.c.bf16 %v5570_v1, %v5569_v8  ;;  %v5214_v22 = vld [vmem:[#allocation3 + $0x201] sm:$0xff]  ;;  %v5574_v23 = vld [vmem:[#allocation3 + $0xb2] sm:$0xff]  ;;  %7707 = vmatprep.subr.bf16.mxu1 %v10464_v33  ;;  %v5576_v35 = vld [vmem:[#allocation3 + $0xca] sm:$0xff]  ;;  %2791 = vrot.lane.b32.xlu1 %v2704_v47, %s10465_s9  ;;  %3235 = vst.msk [vmem:[#allocation6 + $0x290] sm:$0xff] %vm2841_vm3, %v3149_v32 }
 0x3d8   :  { %v12656_v51 = vld [vmem:[#allocation4 + $0x81] sm:$0xff]  ;;  %v5260_v4 = vpack.c.bf16 %v5214_v22, %v5213_v2  ;;  %v5632_v55 = vpack.c.bf16 %v5574_v23, %v5573_v16  ;;  %v5215_v48 = vld [vmem:[#allocation3 + $0x211] sm:$0xff]  ;;  %v5216_v49 = vld [vmem:[#allocation3 + $0x219] sm:$0xff]  ;;  %3176 = vrot.lane.b32.xlu0 %v3089_v21, %s10465_s9  ;;  %2851 = vst.msk [vmem:[#allocation6 + $0x288] sm:$0xff] %vm2841_vm3, %v2764_v45 }
 0x3d9   :  { %v4829_v11 = vld [vmem:[#allocation3 + $0x200] sm:$0xff]  ;;  %5662 = vst.msk [vmem:[#allocation6 + $0x118] sm:$0xff] %vm1929_vm0, %v5630_v6  ;;  %v6005_v14 = vld [vmem:[#allocation6 + $0x1d0] sm:$0xff]  ;;  %v5261_v19 = vpack.c.bf16 %v5216_v49, %v5215_v48  ;;  %v4831_v63 = vld [vmem:[#allocation3 + $0x218] sm:$0xff]  ;;  %v5374_v38 = vpack.c.bf16 %v12656_v51, %v12654_v20 }
 0x3da   :  { %v12664_v15 = vld [vmem:[#allocation4 + $0x80] sm:$0xff]  ;;  %v4875_v52 = vpack.c.bf16 %v4829_v11, %v4828_v10  ;;  %5292 = vst.msk [vmem:[#allocation6 + $0x500] sm:$0xff] %vm1929_vm0, %v5260_v4  ;;  %v10404_v13 = vld [vmem:[%s14754_s3 + $0xd0] sm:$0xff]   ;;  %5664 = vst.msk [vmem:[#allocation6 + $0x1a8] sm:$0xff] %vm1929_vm0, %v5632_v55  ;;  %v4876_v18 = vpack.c.bf16 %v4831_v63, %v4830_v26  ;;  %v4709_v42 = vpop.permute.xlu0 %4708 }
 0x3db   :  { %v5572_v62 = vld [vmem:[#allocation3 + $0x9a] sm:$0xff]  ;;  %7128 = vmatpush1.bf16.msra.mxu0 %v10404_v13  ;;  %v5575_v17 = vld [vmem:[#allocation3 + $0xc2] sm:$0xff]  ;;  %v12677_v31 = vld [vmem:[#allocation4 + $0x271] sm:$0xff]  ;;  %5293 = vst.msk [vmem:[#allocation6 + $0x548] sm:$0xff] %vm1929_vm0, %v5261_v19  ;;  %v4990_v59 = vpack.c.bf16 %v12664_v15, %v12662_v29  ;;  %v4325_v29 = vpop.permute.xlu1 %4324 }
 0x3dc   :  { %v5631_v12 = vpack.c.bf16 %v5572_v62, %v5571_v7  ;;  %4907 = vst.msk [vmem:[#allocation6 + $0x4f8] sm:$0xff] %vm1929_vm0, %v4875_v52  ;;  %v12679_v41 = vld [vmem:[#allocation4 + $0x279] sm:$0xff]  ;;  %7129 = vmatprep.subr.bf16.mxu0 %v10464_v33  ;;  %v12688_v60 = vld [vmem:[#allocation4 + $0x270] sm:$0xff]  ;;  %v5633_v53 = vpack.c.bf16 %v5576_v35, %v5575_v17  ;;  %v5578_v9 = vld [vmem:[#allocation3 + $0xe2] sm:$0xff]  ;;  %5441 = vrot.lane.b32.xlu0 %v5374_v38, %s10465_s9 }
 0x3dd   :  { %v6015_v36 = vld [vmem:[#allocation6 + $0x220] sm:$0xff]  ;;  %v5217_v3 = vld [vmem:[#allocation3 + $0x229] sm:$0xff]  ;;  %v5218_v57 = vld [vmem:[#allocation3 + $0x231] sm:$0xff]  ;;  %4908 = vst.msk [vmem:[#allocation6 + $0x540] sm:$0xff] %vm1929_vm0, %v4876_v18  ;;  %7477 = vmatmul.mubr.bf16.gmra.mrb[8].mxu1 %v6005_v14  ;;  %v3090_v1 = vpack.c.bf16 %v12679_v41, %v12677_v31  ;;  %5057 = vrot.lane.b32.xlu1 %v4990_v59, %s10465_s9 }
 0x3de   :  { %5663 = vst.msk [vmem:[#allocation6 + $0x160] sm:$0xff] %vm1929_vm0, %v5631_v12  ;;  %v5577_v30 = vld [vmem:[#allocation3 + $0xda] sm:$0xff]  ;;  %v5262_v0 = vpack.c.bf16 %v5218_v57, %v5217_v3  ;;  %v4832_v40 = vld [vmem:[#allocation3 + $0x228] sm:$0xff]  ;;  %v4833_v27 = vld [vmem:[#allocation3 + $0x230] sm:$0xff]  ;;  %7484 = vmatprep.mubr.bf16.mxu1 %v6015_v36  ;;  %v3151_v13 = vpop.permute.xlu0 %3150 }
 0x3df   :  { %v5634_v43 = vpack.c.bf16 %v5578_v9, %v5577_v30  ;;  %v5579_v5 = vld [vmem:[#allocation3 + $0xf2] sm:$0xff]  ;;  %v6020_v46 = vld [vmem:[#allocation6 + $0x248] sm:$0xff]  ;;  %5665 = vst.msk [vmem:[#allocation6 + $0x1f0] sm:$0xff] %vm1929_vm0, %v5633_v53  ;;  %v4877_v56 = vpack.c.bf16 %v4833_v27, %v4832_v40  ;;  %v5580_v61 = vld [vmem:[#allocation3 + $0xfa] sm:$0xff]  ;;  %v2766_v36 = vpop.permute.xlu1 %2765 }
 0x3e0   :  { %v2666_v39 = vld [vmem:[#allocation4 + $0x278] sm:$0xff]  ;;  %6914 = vmatprep.mubr.bf16.mxu0 %v6020_v46  ;;  %v6019_v50 = vld [vmem:[#allocation6 + $0x240] sm:$0xff]  ;;  %5294 = vst.msk [vmem:[#allocation6 + $0x590] sm:$0xff] %vm1929_vm0, %v5262_v0  ;;  %v5635_v24 = vpack.c.bf16 %v5580_v61, %v5579_v5  ;;  %v5581_v58 = vld [vmem:[#allocation3 + $0x10a] sm:$0xff]  ;;  %3178 = vrot.lane.b32.xlu0 %v3090_v1, %s10465_s9 }
 0x3e1   :  { %v10405_v8 = vld [vmem:[%s14754_s3 + $0xd8] sm:$0xff]   ;;  %5666 = vst.msk [vmem:[#allocation6 + $0x238] sm:$0xff] %vm1929_vm0, %v5634_v43  ;;  %6915 = vmatmul.mubr.bf16.gmra.mrb[64].mxu0 %v6019_v50  ;;  %v12710_v28 = vld [vmem:[#allocation4 + $0x90] sm:$0xff]  ;;  %4909 = vst.msk [vmem:[#allocation6 + $0x588] sm:$0xff] %vm1929_vm0, %v4877_v56  ;;  %v2705_v6 = vpack.c.bf16 %v2666_v39, %v12688_v60 }
 0x3e2   :  { %7130 = vmatpush1.bf16.msra.mxu0 %v10405_v8  ;;  %v12700_v54 = vld [vmem:[#allocation4 + $0x91] sm:$0xff]  ;;  %v12708_v2 = vld [vmem:[#allocation4 + $0x99] sm:$0xff]  ;;  %5667 = vst.msk [vmem:[#allocation6 + $0x280] sm:$0xff] %vm1929_vm0, %v5635_v24  ;;  %v5219_v10 = vld [vmem:[#allocation3 + $0x241] sm:$0xff]  ;;  %v4711_v8 = vpop.permute.xlu0 %4710 }
 0x3e3   :  { %v10373_v25 = vld [vmem:[%s14754_s3 + $0x1d8] sm:$0xff]   ;;  %7131 = vmatprep.subr.bf16.mxu0 %v10464_v33  ;;  %v5220_v44 = vld [vmem:[#allocation3 + $0x249] sm:$0xff]  ;;  %v10406_v51 = vld [vmem:[%s14754_s3 + $0xe0] sm:$0xff]   ;;  %4783 = vst.msk [vmem:[#allocation6 + $0x610] sm:$0xff] %vm2841_vm3, %v4709_v42  ;;  %v5375_v23 = vpack.c.bf16 %v12708_v2, %v12700_v54  ;;  %2793 = vrot.lane.b32.xlu1 %v2705_v6, %s10465_s9 }
 0x3e4   :  { %v5582_v22 = vld [vmem:[#allocation3 + $0x112] sm:$0xff]  ;;  %7708 = vmatpush1.bf16.msra.mxu1 %v10373_v25  ;;  %v5263_v11 = vpack.c.bf16 %v5220_v44, %v5219_v10  ;;  %v4834_v7 = vld [vmem:[#allocation3 + $0x240] sm:$0xff]  ;;  %v4835_v21 = vld [vmem:[#allocation3 + $0x248] sm:$0xff]  ;;  %4399 = vst.msk [vmem:[#allocation6 + $0x608] sm:$0xff] %vm2841_vm3, %v4325_v29 }
 0x3e5   :  { %v4932_v20 = vld [vmem:[#allocation4 + $0x98] sm:$0xff]  ;;  %v5636_v4 = vpack.c.bf16 %v5582_v22, %v5581_v58  ;;  %v12724_v52 = vld [vmem:[#allocation4 + $0x289] sm:$0xff]  ;;  %7709 = vmatprep.subr.bf16.mxu1 %v10464_v33  ;;  %v4878_v16 = vpack.c.bf16 %v4835_v21, %v4834_v7  ;;  %v5222_v41 = vld [vmem:[#allocation3 + $0x261] sm:$0xff]  ;;  %3236 = vst.msk [vmem:[#allocation6 + $0x2d8] sm:$0xff] %vm2841_vm3, %v3151_v13  ;;  %5443 = vrot.lane.b32.xlu0 %v5375_v23, %s10465_s9  ;;  %v4327_v58 = vpop.permute.xlu1 %4326 }
 0x3e6   :  { %7132 = vmatpush1.bf16.msra.mxu0 %v10406_v51  ;;  %v6014_v15 = vld [vmem:[#allocation6 + $0x218] sm:$0xff]  ;;  %v12734_v47 = vld [vmem:[#allocation4 + $0x288] sm:$0xff]  ;;  %v12736_v12 = vld [vmem:[#allocation4 + $0x290] sm:$0xff]  ;;  %5295 = vst.msk [vmem:[#allocation6 + $0x5d8] sm:$0xff] %vm1929_vm0, %v5263_v11  ;;  %v4991_v49 = vpack.c.bf16 %v4932_v20, %v12710_v28 }
 0x3e7   :  { %v12726_v62 = vld [vmem:[#allocation4 + $0x291] sm:$0xff]  ;;  %7133 = vmatprep.subr.bf16.mxu0 %v10464_v33  ;;  %v6024_v55 = vld [vmem:[#allocation6 + $0x268] sm:$0xff]  ;;  %5668 = vst.msk [vmem:[#allocation6 + $0x2c8] sm:$0xff] %vm1929_vm0, %v5636_v4  ;;  %4910 = vst.msk [vmem:[#allocation6 + $0x5d0] sm:$0xff] %vm1929_vm0, %v4878_v16  ;;  %7485 = vmatmul.mubr.bf16.gmra.mrb[12].mxu1 %v6014_v15  ;;  %v2706_v27 = vpack.c.bf16 %v12736_v12, %v12734_v47 }
 0x3e8   :  { %v5583_v48 = vld [vmem:[#allocation3 + $0x122] sm:$0xff]  ;;  %v5584_v26 = vld [vmem:[#allocation3 + $0x12a] sm:$0xff]  ;;  %v5585_v37 = vld [vmem:[#allocation3 + $0x13a] sm:$0xff]  ;;  %7492 = vmatprep.mubr.bf16.mxu1 %v6024_v55  ;;  %2852 = vst.msk [vmem:[#allocation6 + $0x2d0] sm:$0xff] %vm2841_vm3, %v2766_v36  ;;  %v3091_v9 = vpack.c.bf16 %v12726_v62, %v12724_v52  ;;  %5059 = vrot.lane.b32.xlu1 %v4991_v49, %s10465_s9  ;;  %v3153_v62 = vpop.permute.xlu0 %3152 }
 0x3e9   :  { %v5586_v14 = vld [vmem:[#allocation3 + $0x142] sm:$0xff]  ;;  %v6029_v19 = vld [vmem:[#allocation6 + $0x290] sm:$0xff]  ;;  %v5637_v17 = vpack.c.bf16 %v5584_v26, %v5583_v48  ;;  %v5221_v31 = vld [vmem:[#allocation3 + $0x259] sm:$0xff]  ;;  %4784 = vst.msk [vmem:[#allocation6 + $0x658] sm:$0xff] %vm2841_vm3, %v4711_v8  ;;  %v2768_v49 = vpop.permute.xlu1 %2767 }
 0x3ea   :  { %v10407_v63 = vld [vmem:[%s14754_s3 + $0xe8] sm:$0xff]   ;;  %v5638_v34 = vpack.c.bf16 %v5586_v14, %v5585_v37  ;;  %6922 = vmatprep.mubr.bf16.mxu0 %v6029_v19  ;;  %v12749_v30 = vld [vmem:[#allocation4 + $0xb1] sm:$0xff]  ;;  %v5264_v38 = vpack.c.bf16 %v5222_v41, %v5221_v31  ;;  %v4837_v53 = vld [vmem:[#allocation3 + $0x260] sm:$0xff]  ;;  %4400 = vst.msk [vmem:[#allocation6 + $0x650] sm:$0xff] %vm2841_vm3, %v4327_v58  ;;  %3180 = vrot.lane.b32.xlu0 %v3091_v9, %s10465_s9 }
 0x3eb   :  { %7134 = vmatpush1.bf16.msra.mxu0 %v10407_v63  ;;  %v6028_v18 = vld [vmem:[#allocation6 + $0x288] sm:$0xff]  ;;  %v4836_v60 = vld [vmem:[#allocation3 + $0x258] sm:$0xff]  ;;  %v12757_v57 = vld [vmem:[#allocation4 + $0xb0] sm:$0xff]  ;;  %5669 = vst.msk [vmem:[#allocation6 + $0x310] sm:$0xff] %vm1929_vm0, %v5637_v17 }
 0x3ec   :  { %v12747_v35 = vld [vmem:[#allocation4 + $0xa9] sm:$0xff]  ;;  %6923 = vmatmul.mubr.bf16.gmra.mrb[68].mxu0 %v6028_v18  ;;  %5670 = vst.msk [vmem:[#allocation6 + $0x358] sm:$0xff] %vm1929_vm0, %v5638_v34  ;;  %v4879_v59 = vpack.c.bf16 %v4837_v53, %v4836_v60  ;;  %v5587_v43 = vld [vmem:[#allocation3 + $0x152] sm:$0xff]  ;;  %v5588_v0 = vld [vmem:[#allocation3 + $0x15a] sm:$0xff]  ;;  %7135 = vmatprep.subr.bf16.mxu0 %v10464_v33  ;;  %v4713_v18 = vpop.permute.xlu0 %4712 }
 0x3ed   :  { %v12755_v3 = vld [vmem:[#allocation4 + $0xa8] sm:$0xff]  ;;  %5296 = vst.msk [vmem:[#allocation6 + $0x620] sm:$0xff] %vm1929_vm0, %v5264_v38  ;;  %v5639_v5 = vpack.c.bf16 %v5588_v0, %v5587_v43  ;;  %v5590_v32 = vld [vmem:[#allocation3 + $0x172] sm:$0xff]  ;;  %v6023_v56 = vld [vmem:[#allocation6 + $0x260] sm:$0xff]  ;;  %v5376_v10 = vpack.c.bf16 %v12749_v30, %v12747_v35  ;;  %2795 = vrot.lane.b32.xlu1 %v2706_v27, %s10465_s9  ;;  %v4329_v53 = vpop.permute.xlu1 %4328 }
 0x3ee   :  { %v5589_v40 = vld [vmem:[#allocation3 + $0x16a] sm:$0xff]  ;;  %v5224_v39 = vld [vmem:[#allocation3 + $0x279] sm:$0xff]  ;;  %4911 = vst.msk [vmem:[#allocation6 + $0x618] sm:$0xff] %vm1929_vm0, %v4879_v59  ;;  %v12771_v1 = vld [vmem:[#allocation4 + $0x2a1] sm:$0xff]  ;;  %v4992_v7 = vpack.c.bf16 %v12757_v57, %v12755_v3 }
 0x3ef   :  { %v5223_v46 = vld [vmem:[#allocation3 + $0x271] sm:$0xff]  ;;  %v5640_v45 = vpack.c.bf16 %v5590_v32, %v5589_v40  ;;  %v12773_v2 = vld [vmem:[#allocation4 + $0x2a9] sm:$0xff]  ;;  %5671 = vst.msk [vmem:[#allocation6 + $0x3a0] sm:$0xff] %vm1929_vm0, %v5639_v5  ;;  %v12781_v44 = vld [vmem:[#allocation4 + $0x2a0] sm:$0xff]  ;;  %7493 = vmatmul.mubr.bf16.gmra.mrb[16].mxu1 %v6023_v56  ;;  %5445 = vrot.lane.b32.xlu0 %v5376_v10, %s10465_s9 }
 0x3f0   :  { %v10408_v61 = vld [vmem:[%s14754_s3 + $0xf0] sm:$0xff]   ;;  %v5265_v50 = vpack.c.bf16 %v5224_v39, %v5223_v46  ;;  %v4839_v24 = vld [vmem:[#allocation3 + $0x278] sm:$0xff]  ;;  %v5591_v6 = vld [vmem:[#allocation3 + $0x182] sm:$0xff]  ;;  %3237 = vst.msk [vmem:[#allocation6 + $0x320] sm:$0xff] %vm2841_vm3, %v3153_v62  ;;  %v3092_v13 = vpack.c.bf16 %v12773_v2, %v12771_v1 }
 0x3f1   :  { %7136 = vmatpush1.bf16.msra.mxu0 %v10408_v61  ;;  %v4838_v54 = vld [vmem:[#allocation3 + $0x270] sm:$0xff]  ;;  %v12783_v42 = vld [vmem:[#allocation4 + $0x2a8] sm:$0xff]  ;;  %5672 = vst.msk [vmem:[#allocation6 + $0x3e8] sm:$0xff] %vm1929_vm0, %v5640_v45  ;;  %v6038_v16 = vld [vmem:[#allocation6 + $0x2d8] sm:$0xff]  ;;  %5061 = vrot.lane.b32.xlu1 %v4992_v7, %s10465_s9  ;;  %v3155_v61 = vpop.permute.xlu0 %3154  ;;  %v2770_v58 = vpop.permute.xlu1 %2769 }
 0x3f2   :  { %v6033_v28 = vld [vmem:[#allocation6 + $0x2b0] sm:$0xff]  ;;  %7137 = vmatprep.subr.bf16.mxu0 %v10464_v33  ;;  %v4880_v25 = vpack.c.bf16 %v4839_v24, %v4838_v54  ;;  %5297 = vst.msk [vmem:[#allocation6 + $0x668] sm:$0xff] %vm1929_vm0, %v5265_v50  ;;  %v4840_v11 = vld [vmem:[#allocation3 + $0x288] sm:$0xff]  ;;  %v10409_v23 = vld [vmem:[%s14754_s3 + $0xf8] sm:$0xff]   ;;  %6930 = vmatprep.mubr.bf16.mxu0 %v6038_v16  ;;  %v2707_v34 = vpack.c.bf16 %v12783_v42, %v12781_v44 }
 0x3f3   :  { %v5592_v22 = vld [vmem:[#allocation3 + $0x18a] sm:$0xff]  ;;  %v5595_v15 = vld [vmem:[#allocation3 + $0x1e2] sm:$0xff]  ;;  %v5597_v55 = vld [vmem:[#allocation3 + $0x1fa] sm:$0xff]  ;;  %7500 = vmatprep.mubr.bf16.mxu1 %v6033_v28  ;;  %2853 = vst.msk [vmem:[#allocation6 + $0x318] sm:$0xff] %vm2841_vm3, %v2768_v49  ;;  %3182 = vrot.lane.b32.xlu0 %v3092_v13, %s10465_s9 }
 0x3f4   :  { %v5641_v20 = vpack.c.bf16 %v5592_v22, %v5591_v6  ;;  %v5225_v51 = vld [vmem:[#allocation3 + $0x289] sm:$0xff]  ;;  %v5226_v4 = vld [vmem:[#allocation3 + $0x291] sm:$0xff]  ;;  %4912 = vst.msk [vmem:[#allocation6 + $0x660] sm:$0xff] %vm1929_vm0, %v4880_v25  ;;  %v12796_v37 = vld [vmem:[#allocation4 + $0xc1] sm:$0xff] }
 0x3f5   :  { %v5266_v21 = vpack.c.bf16 %v5226_v4, %v5225_v51  ;;  %v4841_v29 = vld [vmem:[#allocation3 + $0x290] sm:$0xff]  ;;  %7138 = vmatpush1.bf16.msra.mxu0 %v10409_v23  ;;  %v5598_v48 = vld [vmem:[#allocation3 + $0x202] sm:$0xff]  ;;  %4785 = vst.msk [vmem:[#allocation6 + $0x6a0] sm:$0xff] %vm2841_vm3, %v4713_v18  ;;  %v12815_v3 = vld [vmem:[#allocation4 + $0x2b9] sm:$0xff]  ;;  %2797 = vrot.lane.b32.xlu1 %v2707_v34, %s10465_s9  ;;  %v4715_v16 = vpop.permute.xlu0 %4714 }
 0x3f6   :  { %v5596_v52 = vld [vmem:[#allocation3 + $0x1ea] sm:$0xff]  ;;  %5673 = vst.msk [vmem:[#allocation6 + $0x430] sm:$0xff] %vm1929_vm0, %v5641_v20  ;;  %v4881_v47 = vpack.c.bf16 %v4841_v29, %v4840_v11  ;;  %v5644_v14 = vpack.c.bf16 %v5598_v48, %v5597_v55  ;;  %v12803_v63 = vld [vmem:[#allocation4 + $0xc0] sm:$0xff]  ;;  %v5599_v60 = vld [vmem:[#allocation3 + $0x212] sm:$0xff]  ;;  %v4331_v48 = vpop.permute.xlu1 %4330 }
 0x3f7   :  { %v5643_v12 = vpack.c.bf16 %v5596_v52, %v5595_v15  ;;  %v6037_v26 = vld [vmem:[#allocation6 + $0x2d0] sm:$0xff]  ;;  %5298 = vst.msk [vmem:[#allocation6 + $0x6b0] sm:$0xff] %vm1929_vm0, %v5266_v21  ;;  %v10374_v17 = vld [vmem:[%s14754_s3 + $0x1e0] sm:$0xff]   ;;  %v4936_v35 = vld [vmem:[#allocation4 + $0xc8] sm:$0xff] }
 0x3f8   :  { %6931 = vmatmul.mubr.bf16.gmra.mrb[72].mxu0 %v6037_v26  ;;  %v5320_v19 = vld [vmem:[#allocation4 + $0xc9] sm:$0xff]  ;;  %4913 = vst.msk [vmem:[#allocation6 + $0x6a8] sm:$0xff] %vm1929_vm0, %v4881_v47  ;;  %5676 = vst.msk [vmem:[#allocation6 + $0x508] sm:$0xff] %vm1929_vm0, %v5644_v14  ;;  %v5227_v31 = vld [vmem:[#allocation3 + $0x2a1] sm:$0xff]  ;;  %7710 = vmatpush1.bf16.msra.mxu1 %v10374_v17  ;;  %v4993_v32 = vpack.c.bf16 %v4936_v35, %v12803_v63 }
 0x3f9   :  { %5675 = vst.msk [vmem:[#allocation6 + $0x4c0] sm:$0xff] %vm1929_vm0, %v5643_v12  ;;  %v5228_v41 = vld [vmem:[#allocation3 + $0x2a9] sm:$0xff]  ;;  %v4842_v36 = vld [vmem:[#allocation3 + $0x2a0] sm:$0xff]  ;;  %7711 = vmatprep.subr.bf16.mxu1 %v10464_v33  ;;  %v5377_v43 = vpack.c.bf16 %v5320_v19, %v12796_v37  ;;  %v12823_v0 = vld [vmem:[#allocation4 + $0x2b8] sm:$0xff] }
 0x3fa   :  { %v5267_v30 = vpack.c.bf16 %v5228_v41, %v5227_v31  ;;  %v4843_v38 = vld [vmem:[#allocation3 + $0x2a8] sm:$0xff]  ;;  %4401 = vst.msk [vmem:[#allocation6 + $0x698] sm:$0xff] %vm2841_vm3, %v4329_v53  ;;  %v12825_v40 = vld [vmem:[#allocation4 + $0x2c0] sm:$0xff]  ;;  %v6042_v27 = vld [vmem:[#allocation6 + $0x2f8] sm:$0xff]  ;;  %5063 = vrot.lane.b32.xlu1 %v4993_v32, %s10465_s9 }
 0x3fb   :  { %v6032_v9 = vld [vmem:[#allocation6 + $0x2a8] sm:$0xff]  ;;  %v4882_v59 = vpack.c.bf16 %v4843_v38, %v4842_v36  ;;  %v5600_v5 = vld [vmem:[#allocation3 + $0x21a] sm:$0xff]  ;;  %v5602_v8 = vld [vmem:[#allocation3 + $0x232] sm:$0xff]  ;;  %3238 = vst.msk [vmem:[#allocation6 + $0x368] sm:$0xff] %vm2841_vm3, %v3155_v61  ;;  %5447 = vrot.lane.b32.xlu0 %v5377_v43, %s10465_s9  ;;  %v2708_v7 = vpack.c.bf16 %v12825_v40, %v12823_v0  ;;  %v2772_v0 = vpop.permute.xlu1 %2771 }
 0x3fc   :  { %v12817_v57 = vld [vmem:[#allocation4 + $0x2c1] sm:$0xff]  ;;  %5299 = vst.msk [vmem:[#allocation6 + $0x6f8] sm:$0xff] %vm1929_vm0, %v5267_v30  ;;  %v5645_v46 = vpack.c.bf16 %v5600_v5, %v5599_v60  ;;  %v5601_v39 = vld [vmem:[#allocation3 + $0x22a] sm:$0xff]  ;;  %v5229_v56 = vld [vmem:[#allocation3 + $0x2b9] sm:$0xff]  ;;  %7501 = vmatmul.mubr.bf16.gmra.mrb[20].mxu1 %v6032_v9  ;;  %v3157_v9 = vpop.permute.xlu0 %3156 }
 0x3fd   :  { %4914 = vst.msk [vmem:[#allocation6 + $0x6f0] sm:$0xff] %vm1929_vm0, %v4882_v59  ;;  %v6047_v45 = vld [vmem:[#allocation6 + $0x320] sm:$0xff]  ;;  %v5646_v50 = vpack.c.bf16 %v5602_v8, %v5601_v39  ;;  %v4844_v24 = vld [vmem:[#allocation3 + $0x2b8] sm:$0xff]  ;;  %7508 = vmatprep.mubr.bf16.mxu1 %v6042_v27  ;;  %v3093_v10 = vpack.c.bf16 %v12817_v57, %v12815_v3  ;;  %v5604_v51 = vld [vmem:[#allocation3 + $0x24a] sm:$0xff] }
 0x3fe   :  { %v5230_v54 = vld [vmem:[#allocation3 + $0x2c1] sm:$0xff]  ;;  %6938 = vmatprep.mubr.bf16.mxu0 %v6047_v45  ;;  %v6046_v1 = vld [vmem:[#allocation6 + $0x318] sm:$0xff]  ;;  %5677 = vst.msk [vmem:[#allocation6 + $0x550] sm:$0xff] %vm1929_vm0, %v5645_v46  ;;  %v4846_v62 = vld [vmem:[#allocation3 + $0x2d0] sm:$0xff]  ;;  %2799 = vrot.lane.b32.xlu1 %v2708_v7, %s10465_s9 }
 0x3ff   :  { %v12832_v2 = vld [vmem:[#allocation4 + $0xd9] sm:$0xff]  ;;  %v12834_v28 = vld [vmem:[#allocation4 + $0xe1] sm:$0xff]  ;;  %v5268_v25 = vpack.c.bf16 %v5230_v54, %v5229_v56  ;;  %2854 = vst.msk [vmem:[#allocation6 + $0x360] sm:$0xff] %vm2841_vm3, %v2770_v58  ;;  %v5231_v15 = vld [vmem:[#allocation3 + $0x2d1] sm:$0xff]  ;;  %3184 = vrot.lane.b32.xlu0 %v3093_v10, %s10465_s9 }
 0x400   :  { %v4845_v6 = vld [vmem:[#allocation3 + $0x2c0] sm:$0xff]  ;;  %6939 = vmatmul.mubr.bf16.gmra.mrb[76].mxu0 %v6046_v1  ;;  %v12841_v44 = vld [vmem:[#allocation4 + $0xd8] sm:$0xff]  ;;  %5678 = vst.msk [vmem:[#allocation6 + $0x598] sm:$0xff] %vm1929_vm0, %v5646_v50  ;;  %v6041_v23 = vld [vmem:[#allocation6 + $0x2f0] sm:$0xff]  ;;  %v5378_v63 = vpack.c.bf16 %v12834_v28, %v12832_v2 }
 0x401   :  { %v5603_v22 = vld [vmem:[#allocation3 + $0x242] sm:$0xff]  ;;  %v4883_v20 = vpack.c.bf16 %v4845_v6, %v4844_v24  ;;  %v5605_v4 = vld [vmem:[#allocation3 + $0x25a] sm:$0xff]  ;;  %5300 = vst.msk [vmem:[#allocation6 + $0x740] sm:$0xff] %vm1929_vm0, %v5268_v25  ;;  %v5607_v55 = vld [vmem:[#allocation3 + $0x272] sm:$0xff]  ;;  %v4717_v24 = vpop.permute.xlu0 %4716  ;;  %v4333_v6 = vpop.permute.xlu1 %4332 }
 0x402   :  { %v12843_v42 = vld [vmem:[#allocation4 + $0xe0] sm:$0xff]  ;;  %v5647_v21 = vpack.c.bf16 %v5604_v51, %v5603_v22  ;;  %v4847_v12 = vld [vmem:[#allocation3 + $0x2d8] sm:$0xff]  ;;  %4786 = vst.msk [vmem:[#allocation6 + $0x6e8] sm:$0xff] %vm2841_vm3, %v4715_v16  ;;  %v3264_v14 = vld [vmem:[#allocation3 + $0x4a] sm:$0xff] }
 0x403   :  { %v5606_v11 = vld [vmem:[#allocation3 + $0x262] sm:$0xff]  ;;  %v5232_v52 = vld [vmem:[#allocation3 + $0x2d9] sm:$0xff]  ;;  %4915 = vst.msk [vmem:[#allocation6 + $0x738] sm:$0xff] %vm1929_vm0, %v4883_v20  ;;  %v12852_v49 = vld [vmem:[#allocation4 + $0x2d1] sm:$0xff]  ;;  %v4884_v19 = vpack.c.bf16 %v4847_v12, %v4846_v62  ;;  %v4994_v18 = vpack.c.bf16 %v12843_v42, %v12841_v44  ;;  %5449 = vrot.lane.b32.xlu0 %v5378_v63, %s10465_s9 }
 0x404   :  { %v5648_v29 = vpack.c.bf16 %v5606_v11, %v5605_v4  ;;  %v5269_v47 = vpack.c.bf16 %v5232_v52, %v5231_v15  ;;  %v12854_v26 = vld [vmem:[#allocation4 + $0x2d9] sm:$0xff]  ;;  %5679 = vst.msk [vmem:[#allocation6 + $0x5e0] sm:$0xff] %vm1929_vm0, %v5647_v21  ;;  %v12862_v17 = vld [vmem:[#allocation4 + $0x2d0] sm:$0xff]  ;;  %v4848_v53 = vld [vmem:[#allocation3 + $0x2e8] sm:$0xff]  ;;  %7509 = vmatmul.mubr.bf16.gmra.mrb[24].mxu1 %v6041_v23 }
 0x405   :  { %v6051_v37 = vld [vmem:[#allocation6 + $0x340] sm:$0xff]  ;;  %v3265_v13 = vld [vmem:[#allocation3 + $0x52] sm:$0xff]  ;;  %4402 = vst.msk [vmem:[#allocation6 + $0x6e0] sm:$0xff] %vm2841_vm3, %v4331_v48  ;;  %v5609_v41 = vld [vmem:[#allocation3 + $0x28a] sm:$0xff]  ;;  %v3094_v46 = vpack.c.bf16 %v12854_v26, %v12852_v49  ;;  %5065 = vrot.lane.b32.xlu1 %v4994_v18, %s10465_s9  ;;  %v3159_v62 = vpop.permute.xlu0 %3158  ;;  %v2774_v48 = vpop.permute.xlu1 %2773 }
 0x406   :  { %5680 = vst.msk [vmem:[#allocation6 + $0x628] sm:$0xff] %vm1929_vm0, %v5648_v29  ;;  %v3325_v34 = vpack.c.bf16 %v3265_v13, %v3264_v14  ;;  %5301 = vst.msk [vmem:[#allocation6 + $0x788] sm:$0xff] %vm1929_vm0, %v5269_v47  ;;  %v5608_v31 = vld [vmem:[#allocation3 + $0x27a] sm:$0xff]  ;;  %v5610_v36 = vld [vmem:[#allocation3 + $0x292] sm:$0xff]  ;;  %7516 = vmatprep.mubr.bf16.mxu1 %v6051_v37 }
 0x407   :  { %4916 = vst.msk [vmem:[#allocation6 + $0x780] sm:$0xff] %vm1929_vm0, %v4884_v19  ;;  %v5649_v35 = vpack.c.bf16 %v5608_v31, %v5607_v55  ;;  %v5650_v30 = vpack.c.bf16 %v5610_v36, %v5609_v41  ;;  %v5233_v38 = vld [vmem:[#allocation3 + $0x2e9] sm:$0xff]  ;;  %v5234_v60 = vld [vmem:[#allocation3 + $0x2f1] sm:$0xff]  ;;  %v6055_v40 = vld [vmem:[#allocation6 + $0x360] sm:$0xff]  ;;  %3186 = vrot.lane.b32.xlu0 %v3094_v46, %s10465_s9 }
 0x408   :  { %v6056_v3 = vld [vmem:[#allocation6 + $0x368] sm:$0xff]  ;;  %v2674_v57 = vld [vmem:[#allocation4 + $0x2d8] sm:$0xff]  ;;  %3357 = vst.msk [vmem:[#allocation6 + $0xe8] sm:$0xff] %vm1929_vm0, %v3325_v34  ;;  %5660 = vst.msk [vmem:[#allocation6 + $0x88] sm:$0xff] %vm1929_vm0, %v3325_v34  ;;  %v5270_v59 = vpack.c.bf16 %v5234_v60, %v5233_v38 }
 0x409   :  { %v4849_v43 = vld [vmem:[#allocation3 + $0x2f0] sm:$0xff]  ;;  %3239 = vst.msk [vmem:[#allocation6 + $0x3b0] sm:$0xff] %vm2841_vm3, %v3157_v9  ;;  %6946 = vmatprep.mubr.bf16.mxu0 %v6056_v3  ;;  %v5611_v32 = vld [vmem:[#allocation3 + $0x2a2] sm:$0xff]  ;;  %2855 = vst.msk [vmem:[#allocation6 + $0x3a8] sm:$0xff] %vm2841_vm3, %v2772_v0  ;;  %v2709_v61 = vpack.c.bf16 %v2674_v57, %v12862_v17  ;;  %v4335_v0 = vpop.permute.xlu1 %4334 }
 0x40a   :  { %v12872_v27 = vld [vmem:[#allocation4 + $0xf1] sm:$0xff]  ;;  %5681 = vst.msk [vmem:[#allocation6 + $0x670] sm:$0xff] %vm1929_vm0, %v5649_v35  ;;  %5682 = vst.msk [vmem:[#allocation6 + $0x6b8] sm:$0xff] %vm1929_vm0, %v5650_v30  ;;  %v4885_v5 = vpack.c.bf16 %v4849_v43, %v4848_v53  ;;  %6947 = vmatmul.mubr.bf16.gmra.mrb[80].mxu0 %v6055_v40  ;;  %v5324_v39 = vld [vmem:[#allocation4 + $0xf9] sm:$0xff]  ;;  %v4719_v53 = vpop.permute.xlu0 %4718 }
 0x40b   :  { %v12880_v8 = vld [vmem:[#allocation4 + $0xf0] sm:$0xff]  ;;  %v10375_v56 = vld [vmem:[%s14754_s3 + $0x1e8] sm:$0xff]   ;;  %5302 = vst.msk [vmem:[#allocation6 + $0x7d0] sm:$0xff] %vm1929_vm0, %v5270_v59  ;;  %v5613_v50 = vld [vmem:[#allocation3 + $0x2ba] sm:$0xff]  ;;  %v5379_v20 = vpack.c.bf16 %v5324_v39, %v12872_v27  ;;  %2801 = vrot.lane.b32.xlu1 %v2709_v61, %s10465_s9 }
 0x40c   :  { %4917 = vst.msk [vmem:[#allocation6 + $0x7c8] sm:$0xff] %vm1929_vm0, %v4885_v5  ;;  %v5612_v45 = vld [vmem:[#allocation3 + $0x2aa] sm:$0xff]  ;;  %v5614_v54 = vld [vmem:[#allocation3 + $0x2c2] sm:$0xff]  ;;  %v4940_v58 = vld [vmem:[#allocation4 + $0xf8] sm:$0xff]  ;;  %7712 = vmatpush1.bf16.msra.mxu1 %v10375_v56 }
 0x40d   :  { %v5651_v1 = vpack.c.bf16 %v5612_v45, %v5611_v32  ;;  %v5652_v2 = vpack.c.bf16 %v5614_v54, %v5613_v50  ;;  %v5235_v28 = vld [vmem:[#allocation3 + $0x301] sm:$0xff]  ;;  %v5236_v25 = vld [vmem:[#allocation3 + $0x309] sm:$0xff]  ;;  %4787 = vst.msk [vmem:[#allocation6 + $0x730] sm:$0xff] %vm2841_vm3, %v4717_v24  ;;  %v6050_v22 = vld [vmem:[#allocation6 + $0x338] sm:$0xff]  ;;  %7713 = vmatprep.subr.bf16.mxu1 %v10464_v33  ;;  %v4995_v21 = vpack.c.bf16 %v4940_v58, %v12880_v8 }
 0x40e   :  { %v12890_v10 = vld [vmem:[#allocation4 + $0x2e9] sm:$0xff]  ;;  %v12892_v44 = vld [vmem:[#allocation4 + $0x2f1] sm:$0xff]  ;;  %v5271_v42 = vpack.c.bf16 %v5236_v25, %v5235_v28  ;;  %4403 = vst.msk [vmem:[#allocation6 + $0x728] sm:$0xff] %vm2841_vm3, %v4333_v6  ;;  %v4850_v7 = vld [vmem:[#allocation3 + $0x300] sm:$0xff]  ;;  %7517 = vmatmul.mubr.bf16.gmra.mrb[28].mxu1 %v6050_v22  ;;  %5451 = vrot.lane.b32.xlu0 %v5379_v20, %s10465_s9  ;;  %v3161_v58 = vpop.permute.xlu0 %3160  ;;  %v2776_v25 = vpop.permute.xlu1 %2775 }
 0x40f   :  { %v12898_v51 = vld [vmem:[#allocation4 + $0x2e8] sm:$0xff]  ;;  %v12900_v4 = vld [vmem:[#allocation4 + $0x2f0] sm:$0xff]  ;;  %5683 = vst.msk [vmem:[#allocation6 + $0x700] sm:$0xff] %vm1929_vm0, %v5651_v1  ;;  %5684 = vst.msk [vmem:[#allocation6 + $0x748] sm:$0xff] %vm1929_vm0, %v5652_v2  ;;  %v3095_v63 = vpack.c.bf16 %v12892_v44, %v12890_v10  ;;  %5067 = vrot.lane.b32.xlu1 %v4995_v21, %s10465_s9 }
 0x410   :  { %v6060_v11 = vld [vmem:[#allocation6 + $0x388] sm:$0xff]  ;;  %5303 = vst.msk [vmem:[#allocation6 + $0x818] sm:$0xff] %vm1929_vm0, %v5271_v42  ;;  %v5615_v15 = vld [vmem:[#allocation3 + $0x2d2] sm:$0xff]  ;;  %v5616_v52 = vld [vmem:[#allocation3 + $0x2da] sm:$0xff]  ;;  %v2710_v18 = vpack.c.bf16 %v12900_v4, %v12898_v51 }
 0x411   :  { %v4851_v29 = vld [vmem:[#allocation3 + $0x308] sm:$0xff]  ;;  %v6065_v16 = vld [vmem:[#allocation6 + $0x3b0] sm:$0xff]  ;;  %v5653_v47 = vpack.c.bf16 %v5616_v52, %v5615_v15  ;;  %3240 = vst.msk [vmem:[#allocation6 + $0x3f8] sm:$0xff] %vm2841_vm3, %v3159_v62  ;;  %7524 = vmatprep.mubr.bf16.mxu1 %v6060_v11  ;;  %v5237_v13 = vld [vmem:[#allocation3 + $0x319] sm:$0xff] }
 0x412   :  { %v4886_v23 = vpack.c.bf16 %v4851_v29, %v4850_v7  ;;  %v5617_v12 = vld [vmem:[#allocation3 + $0x2ea] sm:$0xff]  ;;  %v5618_v55 = vld [vmem:[#allocation3 + $0x2f2] sm:$0xff]  ;;  %6954 = vmatprep.mubr.bf16.mxu0 %v6065_v16  ;;  %v5238_v19 = vld [vmem:[#allocation3 + $0x321] sm:$0xff]  ;;  %2856 = vst.msk [vmem:[#allocation6 + $0x3f0] sm:$0xff] %vm2841_vm3, %v2774_v48  ;;  %3188 = vrot.lane.b32.xlu0 %v3095_v63, %s10465_s9  ;;  %v4721_v51 = vpop.permute.xlu0 %4720  ;;  %v4337_v7 = vpop.permute.xlu1 %4336 }
 0x413   :  { %v6064_v49 = vld [vmem:[#allocation6 + $0x3a8] sm:$0xff]  ;;  %v12910_v37 = vld [vmem:[#allocation4 + $0x111] sm:$0xff]  ;;  %v5654_v14 = vpack.c.bf16 %v5618_v55, %v5617_v12  ;;  %5685 = vst.msk [vmem:[#allocation6 + $0x790] sm:$0xff] %vm1929_vm0, %v5653_v47  ;;  %v5272_v34 = vpack.c.bf16 %v5238_v19, %v5237_v13  ;;  %v4853_v41 = vld [vmem:[#allocation3 + $0x320] sm:$0xff]  ;;  %2803 = vrot.lane.b32.xlu1 %v2710_v18, %s10465_s9 }
 0x414   :  { %v12908_v26 = vld [vmem:[#allocation4 + $0x109] sm:$0xff]  ;;  %6955 = vmatmul.mubr.bf16.gmra.mrb[84].mxu0 %v6064_v49  ;;  %4918 = vst.msk [vmem:[#allocation6 + $0x810] sm:$0xff] %vm1929_vm0, %v4886_v23  ;;  %v4852_v31 = vld [vmem:[#allocation3 + $0x318] sm:$0xff]  ;;  %v6059_v40 = vld [vmem:[#allocation6 + $0x380] sm:$0xff] }
 0x415   :  { %v4941_v17 = vld [vmem:[#allocation4 + $0x108] sm:$0xff]  ;;  %5686 = vst.msk [vmem:[#allocation6 + $0x7d8] sm:$0xff] %vm1929_vm0, %v5654_v14  ;;  %v4887_v35 = vpack.c.bf16 %v4853_v41, %v4852_v31  ;;  %v5621_v38 = vld [vmem:[#allocation3 + $0x31a] sm:$0xff]  ;;  %v4942_v9 = vld [vmem:[#allocation4 + $0x110] sm:$0xff]  ;;  %v5380_v46 = vpack.c.bf16 %v12910_v37, %v12908_v26 }
 0x416   :  { %v5619_v36 = vld [vmem:[#allocation3 + $0x302] sm:$0xff]  ;;  %v5620_v30 = vld [vmem:[#allocation3 + $0x30a] sm:$0xff]  ;;  %5304 = vst.msk [vmem:[#allocation6 + $0x860] sm:$0xff] %vm1929_vm0, %v5272_v34  ;;  %v5240_v43 = vld [vmem:[#allocation3 + $0x339] sm:$0xff]  ;;  %v4996_v45 = vpack.c.bf16 %v4942_v9, %v4941_v17  ;;  %7525 = vmatmul.mubr.bf16.gmra.mrb[32].mxu1 %v6059_v40  ;;  %v3163_v23 = vpop.permute.xlu0 %3162  ;;  %v2778_v48 = vpop.permute.xlu1 %2777 }
 0x417   :  { %v5622_v60 = vld [vmem:[#allocation3 + $0x322] sm:$0xff]  ;;  %v5655_v3 = vpack.c.bf16 %v5620_v30, %v5619_v36  ;;  %v5239_v59 = vld [vmem:[#allocation3 + $0x331] sm:$0xff]  ;;  %4788 = vst.msk [vmem:[#allocation6 + $0x778] sm:$0xff] %vm2841_vm3, %v4719_v53  ;;  %4404 = vst.msk [vmem:[#allocation6 + $0x770] sm:$0xff] %vm2841_vm3, %v4335_v0  ;;  %5453 = vrot.lane.b32.xlu0 %v5380_v46, %s10465_s9 }
 0x418   :  { %v5656_v57 = vpack.c.bf16 %v5622_v60, %v5621_v38  ;;  %4919 = vst.msk [vmem:[#allocation6 + $0x858] sm:$0xff] %vm1929_vm0, %v4887_v35  ;;  %v5273_v27 = vpack.c.bf16 %v5240_v43, %v5239_v59  ;;  %v4854_v5 = vld [vmem:[#allocation3 + $0x330] sm:$0xff]  ;;  %v4855_v32 = vld [vmem:[#allocation3 + $0x338] sm:$0xff]  ;;  %v3062_v50 = vld [vmem:[#allocation4 + $0x301] sm:$0xff]  ;;  %5069 = vrot.lane.b32.xlu1 %v4996_v45, %s10465_s9 }
 0x419   :  { %v6069_v39 = vld [vmem:[#allocation6 + $0x3d0] sm:$0xff]  ;;  %5687 = vst.msk [vmem:[#allocation6 + $0x820] sm:$0xff] %vm1929_vm0, %v5655_v3  ;;  %v4888_v8 = vpack.c.bf16 %v4855_v32, %v4854_v5  ;;  %v5624_v61 = vld [vmem:[#allocation3 + $0x33a] sm:$0xff]  ;;  %v2678_v28 = vld [vmem:[#allocation4 + $0x308] sm:$0xff] }
 0x41a   :  { %5688 = vst.msk [vmem:[#allocation6 + $0x868] sm:$0xff] %vm1929_vm0, %v5656_v57  ;;  %v5623_v56 = vld [vmem:[#allocation3 + $0x332] sm:$0xff]  ;;  %v3063_v54 = vld [vmem:[#allocation4 + $0x309] sm:$0xff]  ;;  %5305 = vst.msk [vmem:[#allocation6 + $0x8a8] sm:$0xff] %vm1929_vm0, %v5273_v27  ;;  %7532 = vmatprep.mubr.bf16.mxu1 %v6069_v39  ;;  %v4723_v17 = vpop.permute.xlu0 %4722  ;;  %v4339_v41 = vpop.permute.xlu1 %4338 }
 0x41b   :  { %v5657_v24 = vpack.c.bf16 %v5624_v61, %v5623_v56  ;;  %v6074_v1 = vld [vmem:[#allocation6 + $0x3f8] sm:$0xff]  ;;  %v2677_v2 = vld [vmem:[#allocation4 + $0x300] sm:$0xff]  ;;  %4920 = vst.msk [vmem:[#allocation6 + $0x8a0] sm:$0xff] %vm1929_vm0, %v4888_v8  ;;  %v6073_v6 = vld [vmem:[#allocation6 + $0x3f0] sm:$0xff]  ;;  %v3096_v22 = vpack.c.bf16 %v3063_v54, %v3062_v50 }
 0x41c   :  { %3241 = vst.msk [vmem:[#allocation6 + $0x440] sm:$0xff] %vm2841_vm3, %v3161_v58  ;;  %6962 = vmatprep.mubr.bf16.mxu0 %v6074_v1  ;;  %2857 = vst.msk [vmem:[#allocation6 + $0x438] sm:$0xff] %vm2841_vm3, %v2776_v25  ;;  %v10376_v10 = vld [vmem:[%s14754_s3 + $0x1f0] sm:$0xff]   ;;  %v2711_v44 = vpack.c.bf16 %v2678_v28, %v2677_v2  ;;  %v5327_v42 = vld [vmem:[#allocation4 + $0x121] sm:$0xff] }
 0x41d   :  { %5689 = vst.msk [vmem:[#allocation6 + $0x8b0] sm:$0xff] %vm1929_vm0, %v5657_v24  ;;  %6963 = vmatmul.mubr.bf16.gmra.mrb[88].mxu0 %v6073_v6  ;;  %v5328_v20 = vld [vmem:[#allocation4 + $0x129] sm:$0xff]  ;;  %v4943_v4 = vld [vmem:[#allocation4 + $0x120] sm:$0xff]  ;;  %7714 = vmatpush1.bf16.msra.mxu1 %v10376_v10  ;;  %v6078_v15 = vld [vmem:[#allocation6 + $0x418] sm:$0xff] }
 0x41e   :  { %v4944_v11 = vld [vmem:[#allocation4 + $0x128] sm:$0xff]  ;;  %4789 = vst.msk [vmem:[#allocation6 + $0x7c0] sm:$0xff] %vm2841_vm3, %v4721_v51  ;;  %7715 = vmatprep.subr.bf16.mxu1 %v10464_v33  ;;  %4405 = vst.msk [vmem:[#allocation6 + $0x7b8] sm:$0xff] %vm2841_vm3, %v4337_v7  ;;  %3190 = vrot.lane.b32.xlu0 %v3096_v22, %s10465_s9  ;;  %v5381_v29 = vpack.c.bf16 %v5328_v20, %v5327_v42  ;;  %v3064_v62 = vld [vmem:[#allocation4 + $0x319] sm:$0xff]  ;;  %v3165_v53 = vpop.permute.xlu0 %3164  ;;  %v2780_v59 = vpop.permute.xlu1 %2779 }
 0x41f   :  { %v6068_v21 = vld [vmem:[#allocation6 + $0x3c8] sm:$0xff]  ;;  %2805 = vrot.lane.b32.xlu1 %v2711_v44, %s10465_s9  ;;  %v4997_v52 = vpack.c.bf16 %v4944_v11, %v4943_v4  ;;  %v2679_v12 = vld [vmem:[#allocation4 + $0x318] sm:$0xff]  ;;  %v2680_v55 = vld [vmem:[#allocation4 + $0x320] sm:$0xff]  ;;  %3242 = vst.msk [vmem:[#allocation6 + $0x488] sm:$0xff] %vm2841_vm3, %v3163_v23 }
 0x420   :  { %v3065_v16 = vld [vmem:[#allocation4 + $0x321] sm:$0xff]  ;;  %7533 = vmatmul.mubr.bf16.gmra.mrb[36].mxu1 %v6068_v21  ;;  %v3259_v26 = vld [vmem:[#allocation3 + $0xa] sm:$0xff]  ;;  %2858 = vst.msk [vmem:[#allocation6 + $0x480] sm:$0xff] %vm2841_vm3, %v2778_v48  ;;  %v2712_v13 = vpack.c.bf16 %v2680_v55, %v2679_v12  ;;  %v5329_v19 = vld [vmem:[#allocation4 + $0x139] sm:$0xff] }
 0x421   :  { %7540 = vmatprep.mubr.bf16.mxu1 %v6078_v15  ;;  %v3258_v49 = vld [vmem:[#allocation3 + $0x2] sm:$0xff]  ;;  %v3097_v37 = vpack.c.bf16 %v3065_v16, %v3064_v62  ;;  %v4945_v34 = vld [vmem:[#allocation4 + $0x138] sm:$0xff]  ;;  %4790 = vst.msk [vmem:[#allocation6 + $0x808] sm:$0xff] %vm2841_vm3, %v4723_v17  ;;  %v6077_v36 = vld [vmem:[#allocation6 + $0x410] sm:$0xff] }
 0x422   :  { %5455 = vrot.lane.b32.xlu0 %v5381_v29, %s10465_s9  ;;  %v3322_v14 = vpack.c.bf16 %v3259_v26, %v3258_v49  ;;  %v5330_v63 = vld [vmem:[#allocation4 + $0x141] sm:$0xff]  ;;  %4406 = vst.msk [vmem:[#allocation6 + $0x800] sm:$0xff] %vm2841_vm3, %v4339_v41  ;;  %v3770_v38 = vld [vmem:[#allocation4 + $0x18] sm:$0xff]  ;;  %v3387_v57 = vld [vmem:[#allocation4 + $0xa] sm:$0xff]  ;;  %v4725_v39 = vpop.permute.xlu0 %4724  ;;  %v4341_v61 = vpop.permute.xlu1 %4340 }
 0x423   :  { %v6083_v47 = vld [vmem:[#allocation6 + $0x440] sm:$0xff]  ;;  %v6082_v33 = vld [vmem:[#allocation6 + $0x438] sm:$0xff]  ;;  %5071 = vrot.lane.b32.xlu1 %v4997_v52, %s10465_s9  ;;  %v5382_v18 = vpack.c.bf16 %v5330_v63, %v5329_v19  ;;  %3243 = vst.msk [vmem:[#allocation6 + $0x4d0] sm:$0xff] %vm2841_vm3, %v3165_v53  ;;  %2859 = vst.msk [vmem:[#allocation6 + $0x4c8] sm:$0xff] %vm2841_vm3, %v2780_v59 }
 0x424   :  { %6970 = vmatprep.mubr.bf16.mxu0 %v6083_v47  ;;  %v4946_v31 = vld [vmem:[#allocation4 + $0x140] sm:$0xff]  ;;  %3354 = vst.msk [vmem:[#allocation6 + $0x10] sm:$0xff] %vm1929_vm0, %v3322_v14  ;;  %v10377_v40 = vld [vmem:[%s14754_s3 + $0x1f8] sm:$0xff]   ;;  %v4947_v8 = vld [vmem:[#allocation4 + $0x150] sm:$0xff] }
 0x425   :  { %6971 = vmatmul.mubr.bf16.gmra.mrb[92].mxu0 %v6082_v33  ;;  %v6087_v35 = vld [vmem:[#allocation6 + $0x460] sm:$0xff]  ;;  %v4998_v30 = vpack.c.bf16 %v4946_v31, %v4945_v34  ;;  %v5331_v32 = vld [vmem:[#allocation4 + $0x151] sm:$0xff]  ;;  %7716 = vmatpush1.bf16.msra.mxu1 %v10377_v40  ;;  %4791 = vst.msk [vmem:[#allocation6 + $0x850] sm:$0xff] %vm2841_vm3, %v4725_v39  ;;  %4407 = vst.msk [vmem:[#allocation6 + $0x848] sm:$0xff] %vm2841_vm3, %v4341_v61 }
 0x426   :  { %3192 = vrot.lane.b32.xlu0 %v3097_v37, %s10465_s9  ;;  %v3771_v60 = vld [vmem:[#allocation4 + $0x20] sm:$0xff]  ;;  %v6092_v9 = vld [vmem:[#allocation6 + $0x488] sm:$0xff]  ;;  %v4948_v56 = vld [vmem:[#allocation4 + $0x158] sm:$0xff]  ;;  %v3167_v2 = vpop.permute.xlu0 %3166  ;;  %v2782_v22 = vpop.permute.xlu1 %2781 }
 0x427   :  { %2807 = vrot.lane.b32.xlu1 %v2712_v13, %s10465_s9  ;;  %v3386_v3 = vld [vmem:[#allocation4 + $0x2] sm:$0xff]  ;;  %6978 = vmatprep.mubr.bf16.mxu0 %v6092_v9  ;;  %v3834_v0 = vpack.c.bf16 %v3771_v60, %v3770_v38  ;;  %v5332_v46 = vld [vmem:[#allocation4 + $0x159] sm:$0xff]  ;;  %v4999_v24 = vpack.c.bf16 %v4948_v56, %v4947_v8  ;;  %v3772_v58 = vld [vmem:[#allocation4 + $0x30] sm:$0xff]  ;;  %3244 = vst.msk [vmem:[#allocation6 + $0x518] sm:$0xff] %vm2841_vm3, %v3167_v2 }
 0x428   :  { %7541 = vmatmul.mubr.bf16.gmra.mrb[40].mxu1 %v6077_v36  ;;  %v6091_v43 = vld [vmem:[#allocation6 + $0x480] sm:$0xff]  ;;  %v3450_v5 = vpack.c.bf16 %v3387_v57, %v3386_v3  ;;  %v6086_v45 = vld [vmem:[#allocation6 + $0x458] sm:$0xff]  ;;  %v5383_v50 = vpack.c.bf16 %v5332_v46, %v5331_v32  ;;  %v6096_v54 = vld [vmem:[#allocation6 + $0x4a8] sm:$0xff]  ;;  %2860 = vst.msk [vmem:[#allocation6 + $0x510] sm:$0xff] %vm2841_vm3, %v2782_v22 }
 0x429   :  { %7548 = vmatprep.mubr.bf16.mxu1 %v6087_v35  ;;  %v10378_v27 = vld [vmem:[%s14754_s3 + $0x200] sm:$0xff]   ;;  %v3773_v1 = vld [vmem:[#allocation4 + $0x38] sm:$0xff]  ;;  %v5333_v20 = vld [vmem:[#allocation4 + $0x169] sm:$0xff] }
 0x42a   :  { %5457 = vrot.lane.b32.xlu0 %v5382_v18, %s10465_s9  ;;  %9433 = vmatprep.subr.bf16.mxu0 %v10378_v27  ;;  %v6101_v28 = vld [vmem:[#allocation6 + $0x4d0] sm:$0xff]  ;;  %v3388_v25 = vld [vmem:[#allocation4 + $0x1a] sm:$0xff]  ;;  %v3389_v6 = vld [vmem:[#allocation4 + $0x22] sm:$0xff]  ;;  %v3835_v44 = vpack.c.bf16 %v3773_v1, %v3772_v58  ;;  %v4727_v4 = vpop.permute.xlu0 %4726  ;;  %v4343_v21 = vpop.permute.xlu1 %4342 }
 0x42b   :  { %5073 = vrot.lane.b32.xlu1 %v4998_v30, %s10465_s9  ;;  %v6100_v10 = vld [vmem:[#allocation6 + $0x4c8] sm:$0xff]  ;;  %v3451_v42 = vpack.c.bf16 %v3389_v6, %v3388_v25  ;;  %v5334_v51 = vld [vmem:[#allocation4 + $0x171] sm:$0xff]  ;;  %4792 = vst.msk [vmem:[#allocation6 + $0x898] sm:$0xff] %vm2841_vm3, %v4727_v4  ;;  %v6095_v29 = vld [vmem:[#allocation6 + $0x4a0] sm:$0xff] }
 0x42c   :  { %v4949_v11 = vld [vmem:[#allocation4 + $0x168] sm:$0xff]  ;;  %v4950_v7 = vld [vmem:[#allocation4 + $0x170] sm:$0xff]  ;;  %4408 = vst.msk [vmem:[#allocation6 + $0x890] sm:$0xff] %vm2841_vm3, %v4343_v21  ;;  %v5384_v15 = vpack.c.bf16 %v5334_v51, %v5333_v20  ;;  %v3391_v48 = vld [vmem:[#allocation4 + $0x3a] sm:$0xff] }
 0x42d   :  { %6979 = vmatmul.mubr.bf16.gmra.mrb[96].mxu0 %v6091_v43  ;;  %v6105_v52 = vld [vmem:[#allocation6 + $0x4f0] sm:$0xff]  ;;  %v5000_v62 = vpack.c.bf16 %v4950_v7, %v4949_v11  ;;  %v3774_v16 = vld [vmem:[#allocation4 + $0x48] sm:$0xff]  ;;  %v5209_v19 = vld [vmem:[#allocation3 + $0x199] sm:$0xff] }
 0x42e   :  { %3898 = vrot.lane.b32.xlu0 %v3834_v0, %s10465_s9  ;;  %6986 = vmatprep.mubr.bf16.mxu0 %v6101_v28  ;;  %v3775_v23 = vld [vmem:[#allocation4 + $0x50] sm:$0xff]  ;;  %v3169_v47 = vpop.permute.xlu0 %3168  ;;  %v6110_v12 = vld [vmem:[#allocation6 + $0x518] sm:$0xff]  ;;  %v2784_v33 = vpop.permute.xlu1 %2783  ;;  %v5335_v37 = vld [vmem:[#allocation4 + $0x181] sm:$0xff] }
 0x42f   :  { %3514 = vrot.lane.b32.xlu1 %v3450_v5, %s10465_s9  ;;  %v3390_v55 = vld [vmem:[#allocation4 + $0x32] sm:$0xff]  ;;  %3245 = vst.msk [vmem:[#allocation6 + $0x560] sm:$0xff] %vm2841_vm3, %v3169_v47  ;;  %2861 = vst.msk [vmem:[#allocation6 + $0x558] sm:$0xff] %vm2841_vm3, %v2784_v33  ;;  %v3836_v26 = vpack.c.bf16 %v3775_v23, %v3774_v16  ;;  %v5336_v13 = vld [vmem:[#allocation4 + $0x189] sm:$0xff] }
 0x430   :  { %7549 = vmatmul.mubr.bf16.gmra.mrb[44].mxu1 %v6086_v45  ;;  %v6109_v49 = vld [vmem:[#allocation6 + $0x510] sm:$0xff]  ;;  %v12982_v14 = vpack.c.bf16 %v3391_v48, %v3390_v55  ;;  %v5210_v63 = vld [vmem:[#allocation3 + $0x1a1] sm:$0xff]  ;;  %v5385_v35 = vpack.c.bf16 %v5336_v13, %v5335_v37  ;;  %v6114_v30 = vld [vmem:[#allocation6 + $0x538] sm:$0xff] }
 0x431   :  { %7556 = vmatprep.mubr.bf16.mxu1 %v6096_v54  ;;  %v4951_v34 = vld [vmem:[#allocation4 + $0x180] sm:$0xff]  ;;  %v4952_v31 = vld [vmem:[#allocation4 + $0x188] sm:$0xff]  ;;  %v5258_v41 = vpack.c.bf16 %v5210_v63, %v5209_v19  ;;  %v4824_v38 = vld [vmem:[#allocation3 + $0x198] sm:$0xff] }
 0x432   :  { %5459 = vrot.lane.b32.xlu0 %v5383_v50, %s10465_s9  ;;  %v4729_v17 = vpop.permute.xlu0 %4728  ;;  %v4345_v36 = vpop.permute.xlu1 %4344  ;;  %v6104_v18 = vld [vmem:[#allocation6 + $0x4e8] sm:$0xff]  ;;  %v4825_v60 = vld [vmem:[#allocation3 + $0x1a0] sm:$0xff]  ;;  %v5001_v53 = vpack.c.bf16 %v4952_v31, %v4951_v34  ;;  %v3393_v40 = vld [vmem:[#allocation4 + $0x52] sm:$0xff] }
 0x433   :  { %5075 = vrot.lane.b32.xlu1 %v4999_v24, %s10465_s9  ;;  %4793 = vst.msk [vmem:[#allocation6 + $0x8e0] sm:$0xff] %vm2841_vm3, %v4729_v17  ;;  %4409 = vst.msk [vmem:[#allocation6 + $0x8d8] sm:$0xff] %vm2841_vm3, %v4345_v36  ;;  %v3776_v9 = vld [vmem:[#allocation4 + $0x60] sm:$0xff]  ;;  %v3777_v3 = vld [vmem:[#allocation4 + $0x68] sm:$0xff]  ;;  %v4873_v57 = vpack.c.bf16 %v4825_v60, %v4824_v38 }
 0x434   :  { %5290 = vst.msk [vmem:[#allocation6 + $0x470] sm:$0xff] %vm1929_vm0, %v5258_v41  ;;  %v3392_v0 = vld [vmem:[#allocation4 + $0x4a] sm:$0xff]  ;;  %v3837_v32 = vpack.c.bf16 %v3777_v3, %v3776_v9  ;;  %v5337_v39 = vld [vmem:[#allocation4 + $0x199] sm:$0xff]  ;;  %v5338_v8 = vld [vmem:[#allocation4 + $0x1a1] sm:$0xff] }
 0x435   :  { %6987 = vmatmul.mubr.bf16.gmra.mrb[100].mxu0 %v6100_v10  ;;  %4905 = vst.msk [vmem:[#allocation6 + $0x468] sm:$0xff] %vm1929_vm0, %v4873_v57  ;;  %v3453_v46 = vpack.c.bf16 %v3393_v40, %v3392_v0  ;;  %v4953_v61 = vld [vmem:[#allocation4 + $0x198] sm:$0xff]  ;;  %v4954_v45 = vld [vmem:[#allocation4 + $0x1a0] sm:$0xff]  ;;  %v6113_v54 = vld [vmem:[#allocation6 + $0x530] sm:$0xff]  ;;  %v5386_v24 = vpack.c.bf16 %v5338_v8, %v5337_v39 }
 0x436   :  { %3900 = vrot.lane.b32.xlu0 %v3835_v44, %s10465_s9  ;;  %6994 = vmatprep.mubr.bf16.mxu0 %v6110_v12  ;;  %v3171_v59 = vpop.permute.xlu0 %3170  ;;  %v6119_v43 = vld [vmem:[#allocation6 + $0x560] sm:$0xff]  ;;  %v2786_v27 = vpop.permute.xlu1 %2785  ;;  %v6118_v5 = vld [vmem:[#allocation6 + $0x558] sm:$0xff]  ;;  %v5002_v1 = vpack.c.bf16 %v4954_v45, %v4953_v61  ;;  %v5340_v10 = vld [vmem:[#allocation4 + $0x1e9] sm:$0xff] }
 0x437   :  { %3516 = vrot.lane.b32.xlu1 %v3451_v42, %s10465_s9  ;;  %3246 = vst.msk [vmem:[#allocation6 + $0x5a8] sm:$0xff] %vm2841_vm3, %v3171_v59  ;;  %2862 = vst.msk [vmem:[#allocation6 + $0x5a0] sm:$0xff] %vm2841_vm3, %v2786_v27  ;;  %v6123_v58 = vld [vmem:[#allocation6 + $0x580] sm:$0xff]  ;;  %v4956_v20 = vld [vmem:[#allocation4 + $0x1e8] sm:$0xff] }
 0x438   :  { %7557 = vmatmul.mubr.bf16.gmra.mrb[48].mxu1 %v6095_v29  ;;  %v5339_v22 = vld [vmem:[#allocation4 + $0x1e1] sm:$0xff]  ;;  %v6122_v4 = vld [vmem:[#allocation6 + $0x578] sm:$0xff]  ;;  %v6141_v17 = vld [vmem:[#allocation6 + $0x610] sm:$0xff] }
 0x439   :  { %7564 = vmatprep.mubr.bf16.mxu1 %v6105_v52  ;;  %v4955_v42 = vld [vmem:[#allocation4 + $0x1e0] sm:$0xff]  ;;  %v5387_v11 = vpack.c.bf16 %v5340_v10, %v5339_v22  ;;  %v6132_v7 = vld [vmem:[#allocation6 + $0x5c8] sm:$0xff]  ;;  %v4957_v37 = vld [vmem:[#allocation4 + $0x1f8] sm:$0xff] }
 0x43a   :  { %5461 = vrot.lane.b32.xlu0 %v5384_v15, %s10465_s9  ;;  %v5436_v56 = vpop.permute.xlu0 %5435  ;;  %v5052_v50 = vpop.permute.xlu1 %5051  ;;  %v5003_v21 = vpack.c.bf16 %v4956_v20, %v4955_v42  ;;  %v5695_v29 = vld [vmem:[#allocation4 + $0x62] sm:$0xff]  ;;  %v5696_v15 = vld [vmem:[#allocation4 + $0x6a] sm:$0xff]  ;;  %v5697_v16 = vld [vmem:[#allocation4 + $0x7a] sm:$0xff] }
 0x43b   :  { %5077 = vrot.lane.b32.xlu1 %v5000_v62, %s10465_s9  ;;  %5531 = vst.msk [vmem:[#allocation6 + $0x38] sm:$0xff] %vm2841_vm3, %v5436_v56  ;;  %5147 = vst.msk [vmem:[#allocation6 + $0x30] sm:$0xff] %vm2841_vm3, %v5052_v50  ;;  %v5698_v23 = vld [vmem:[#allocation4 + $0x82] sm:$0xff]  ;;  %v5757_v55 = vpack.c.bf16 %v5696_v15, %v5695_v29  ;;  %v5341_v33 = vld [vmem:[#allocation4 + $0x1f9] sm:$0xff] }
 0x43c   :  { %v5758_v48 = vpack.c.bf16 %v5698_v23, %v5697_v16  ;;  %v6131_v19 = vld [vmem:[#allocation6 + $0x5c0] sm:$0xff]  ;;  %v5699_v31 = vld [vmem:[#allocation4 + $0x92] sm:$0xff]  ;;  %v6140_v27 = vld [vmem:[#allocation6 + $0x608] sm:$0xff] }
 0x43d   :  { %6995 = vmatmul.mubr.bf16.gmra.mrb[104].mxu0 %v6109_v49  ;;  %v5342_v49 = vld [vmem:[#allocation4 + $0x201] sm:$0xff]  ;;  %v5343_v3 = vld [vmem:[#allocation4 + $0x211] sm:$0xff]  ;;  %v5344_v57 = vld [vmem:[#allocation4 + $0x219] sm:$0xff] }
 0x43e   :  { %3902 = vrot.lane.b32.xlu0 %v3836_v26, %s10465_s9  ;;  %7002 = vmatprep.mubr.bf16.mxu0 %v6119_v43  ;;  %v3173_v2 = vpop.permute.xlu0 %3172  ;;  %v6128_v28 = vld [vmem:[#allocation6 + $0x5a8] sm:$0xff]  ;;  %v2788_v25 = vpop.permute.xlu1 %2787  ;;  %v6127_v6 = vld [vmem:[#allocation6 + $0x5a0] sm:$0xff]  ;;  %v5388_v63 = vpack.c.bf16 %v5342_v49, %v5341_v33  ;;  %v4959_v43 = vld [vmem:[#allocation4 + $0x210] sm:$0xff] }
 0x43f   :  { %3518 = vrot.lane.b32.xlu1 %v12982_v14, %s10465_s9  ;;  %3247 = vst.msk [vmem:[#allocation6 + $0x5f0] sm:$0xff] %vm2841_vm3, %v3173_v2  ;;  %2863 = vst.msk [vmem:[#allocation6 + $0x5e8] sm:$0xff] %vm2841_vm3, %v2788_v25  ;;  %v5700_v41 = vld [vmem:[#allocation4 + $0x9a] sm:$0xff]  ;;  %v5703_v39 = vld [vmem:[#allocation4 + $0xc2] sm:$0xff] }
 0x440   :  { %7565 = vmatmul.mubr.bf16.gmra.mrb[52].mxu1 %v6104_v18  ;;  %v4960_v0 = vld [vmem:[#allocation4 + $0x218] sm:$0xff]  ;;  %v5704_v8 = vld [vmem:[#allocation4 + $0xca] sm:$0xff]  ;;  %v5706_v50 = vld [vmem:[#allocation4 + $0xe2] sm:$0xff] }
 0x441   :  { %7572 = vmatprep.mubr.bf16.mxu1 %v6114_v30  ;;  %v5702_v30 = vld [vmem:[#allocation4 + $0xb2] sm:$0xff]  ;;  %v5705_v45 = vld [vmem:[#allocation4 + $0xda] sm:$0xff]  ;;  %v5345_v2 = vld [vmem:[#allocation4 + $0x229] sm:$0xff] }
 0x442   :  { %5463 = vrot.lane.b32.xlu0 %v5385_v35, %s10465_s9  ;;  %v5438_v44 = vpop.permute.xlu0 %5437  ;;  %v5054_v51 = vpop.permute.xlu1 %5053  ;;  %v5701_v35 = vld [vmem:[#allocation4 + $0xaa] sm:$0xff]  ;;  %v6159_v42 = vld [vmem:[#allocation6 + $0x6a0] sm:$0xff]  ;;  %v5710_v15 = vld [vmem:[#allocation4 + $0x112] sm:$0xff] }
 0x443   :  { %5079 = vrot.lane.b32.xlu1 %v5001_v53, %s10465_s9  ;;  %5532 = vst.msk [vmem:[#allocation6 + $0x80] sm:$0xff] %vm2841_vm3, %v5438_v44  ;;  %5148 = vst.msk [vmem:[#allocation6 + $0x78] sm:$0xff] %vm2841_vm3, %v5054_v51  ;;  %v5759_v53 = vpack.c.bf16 %v5700_v41, %v5699_v31  ;;  %v5760_v9 = vpack.c.bf16 %v5702_v30, %v5701_v35  ;;  %v4962_v22 = vld [vmem:[#allocation4 + $0x230] sm:$0xff]  ;;  %v4964_v33 = vld [vmem:[#allocation4 + $0x248] sm:$0xff] }
 0x444   :  { %v6149_v44 = vld [vmem:[#allocation6 + $0x650] sm:$0xff]  ;;  %v5713_v31 = vld [vmem:[#allocation4 + $0x13a] sm:$0xff]  ;;  %v5714_v41 = vld [vmem:[#allocation4 + $0x142] sm:$0xff] }
 0x445   :  { %7003 = vmatmul.mubr.bf16.gmra.mrb[108].mxu0 %v6118_v5  ;;  %v6150_v5 = vld [vmem:[#allocation6 + $0x658] sm:$0xff]  ;;  %v5709_v29 = vld [vmem:[#allocation4 + $0x10a] sm:$0xff]  ;;  %v5766_v30 = vpack.c.bf16 %v5714_v41, %v5713_v31 }
 0x446   :  { %3904 = vrot.lane.b32.xlu0 %v3837_v32, %s10465_s9  ;;  %7010 = vmatprep.mubr.bf16.mxu0 %v6128_v28  ;;  %v3175_v52 = vpop.permute.xlu0 %3174  ;;  %v6137_v62 = vld [vmem:[#allocation6 + $0x5f0] sm:$0xff]  ;;  %v2790_v47 = vpop.permute.xlu1 %2789  ;;  %v6136_v12 = vld [vmem:[#allocation6 + $0x5e8] sm:$0xff]  ;;  %v5389_v32 = vpack.c.bf16 %v5344_v57, %v5343_v3  ;;  %v5764_v23 = vpack.c.bf16 %v5710_v15, %v5709_v29  ;;  %v4966_v3 = vld [vmem:[#allocation4 + $0x260] sm:$0xff] }
 0x447   :  { %3520 = vrot.lane.b32.xlu1 %v3453_v46, %s10465_s9  ;;  %3248 = vst.msk [vmem:[#allocation6 + $0x638] sm:$0xff] %vm2841_vm3, %v3175_v52  ;;  %2864 = vst.msk [vmem:[#allocation6 + $0x630] sm:$0xff] %vm2841_vm3, %v2790_v47  ;;  %v5346_v28 = vld [vmem:[#allocation4 + $0x231] sm:$0xff]  ;;  %v5347_v47 = vld [vmem:[#allocation4 + $0x241] sm:$0xff] }
 0x448   :  { %7573 = vmatmul.mubr.bf16.gmra.mrb[56].mxu1 %v6113_v54  ;;  %v5390_v20 = vpack.c.bf16 %v5346_v28, %v5345_v2  ;;  %v4968_v2 = vld [vmem:[#allocation4 + $0x278] sm:$0xff] }
 0x449   :  { %7580 = vmatprep.mubr.bf16.mxu1 %v6123_v58  ;;  %v5761_v58 = vpack.c.bf16 %v5704_v8, %v5703_v39  ;;  %v5717_v39 = vld [vmem:[#allocation4 + $0x16a] sm:$0xff]  ;;  %v5718_v8 = vld [vmem:[#allocation4 + $0x172] sm:$0xff] }
 0x44a   :  { %5465 = vrot.lane.b32.xlu0 %v5386_v24, %s10465_s9  ;;  %v5440_v26 = vpop.permute.xlu0 %5439  ;;  %v5056_v13 = vpop.permute.xlu1 %5055 }
 0x44b   :  { %5081 = vrot.lane.b32.xlu1 %v5002_v1, %s10465_s9  ;;  %5533 = vst.msk [vmem:[#allocation6 + $0xc8] sm:$0xff] %vm2841_vm3, %v5440_v26  ;;  %5149 = vst.msk [vmem:[#allocation6 + $0xc0] sm:$0xff] %vm2841_vm3, %v5056_v13  ;;  %v5762_v1 = vpack.c.bf16 %v5706_v50, %v5705_v45  ;;  %v6158_v26 = vld [vmem:[#allocation6 + $0x698] sm:$0xff]  ;;  %v5768_v50 = vpack.c.bf16 %v5718_v8, %v5717_v39 }
 0x44d   :  { %7011 = vmatmul.mubr.bf16.gmra.mrb[112].mxu0 %v6127_v6  ;;  %v4961_v6 = vld [vmem:[#allocation4 + $0x228] sm:$0xff] }
 0x44e   :  { %5819 = vrot.lane.b32.xlu0 %v12982_v14, %s10465_s9  ;;  %7018 = vmatprep.mubr.bf16.mxu0 %v6137_v62  ;;  %v4958_v14 = vld [vmem:[#allocation4 + $0x200] sm:$0xff]  ;;  %v3177_v36 = vpop.permute.xlu0 %3176  ;;  %v6146_v18 = vld [vmem:[#allocation6 + $0x638] sm:$0xff]  ;;  %v2792_v38 = vpop.permute.xlu1 %2791  ;;  %v6145_v60 = vld [vmem:[#allocation6 + $0x630] sm:$0xff]  ;;  %v5006_v51 = vpack.c.bf16 %v4962_v22, %v4961_v6 }
 0x44f   :  { %5821 = vrot.lane.b32.xlu1 %v3453_v46, %s10465_s9  ;;  %v5004_v34 = vpack.c.bf16 %v4958_v14, %v4957_v37  ;;  %3249 = vst.msk [vmem:[#allocation6 + $0x680] sm:$0xff] %vm2841_vm3, %v3177_v36  ;;  %2865 = vst.msk [vmem:[#allocation6 + $0x678] sm:$0xff] %vm2841_vm3, %v2792_v38  ;;  %v5005_v46 = vpack.c.bf16 %v4960_v0, %v4959_v43  ;;  %v6168_v37 = vld [vmem:[#allocation6 + $0x6e8] sm:$0xff]  ;;  %v5349_v38 = vld [vmem:[#allocation4 + $0x259] sm:$0xff] }
 0x450   :  { %7581 = vmatmul.mubr.bf16.gmra.mrb[60].mxu1 %v6122_v4  ;;  %v5707_v4 = vld [vmem:[#allocation4 + $0xf2] sm:$0xff] }
 0x451   :  { %7588 = vmatprep.mubr.bf16.mxu1 %v6132_v7  ;;  %v6177_v43 = vld [vmem:[#allocation6 + $0x730] sm:$0xff]  ;;  %v6186_v6 = vld [vmem:[#allocation6 + $0x778] sm:$0xff] }
 0x452   :  { %5467 = vrot.lane.b32.xlu0 %v5387_v11, %s10465_s9  ;;  %v5442_v59 = vpop.permute.xlu0 %5441  ;;  %v5058_v40 = vpop.permute.xlu1 %5057  ;;  %v5708_v11 = vld [vmem:[#allocation4 + $0xfa] sm:$0xff] }
 0x453   :  { %5083 = vrot.lane.b32.xlu1 %v5003_v21, %s10465_s9  ;;  %5534 = vst.msk [vmem:[#allocation6 + $0x110] sm:$0xff] %vm2841_vm3, %v5442_v59  ;;  %5150 = vst.msk [vmem:[#allocation6 + $0x108] sm:$0xff] %vm2841_vm3, %v5058_v40  ;;  %v5763_v16 = vpack.c.bf16 %v5708_v11, %v5707_v4  ;;  %v6167_v59 = vld [vmem:[#allocation6 + $0x6e0] sm:$0xff] }
 0x454   :  { %v5721_v4 = vld [vmem:[#allocation4 + $0x19a] sm:$0xff]  ;;  %v5722_v11 = vld [vmem:[#allocation4 + $0x1a2] sm:$0xff] }
 0x455   :  { %7019 = vmatmul.mubr.bf16.gmra.mrb[116].mxu0 %v6136_v12  ;;  %v5348_v12 = vld [vmem:[#allocation4 + $0x249] sm:$0xff]  ;;  %v5770_v15 = vpack.c.bf16 %v5722_v11, %v5721_v4  ;;  %v5359_v11 = vld [vmem:[#allocation4 + $0x2d1] sm:$0xff] }
 0x456   :  { %5823 = vrot.lane.b32.xlu0 %v5757_v55, %s10465_s9  ;;  %7026 = vmatprep.mubr.bf16.mxu0 %v6146_v18  ;;  %v3179_v56 = vpop.permute.xlu0 %3178  ;;  %v6155_v61 = vld [vmem:[#allocation6 + $0x680] sm:$0xff]  ;;  %v2794_v54 = vpop.permute.xlu1 %2793  ;;  %v6154_v24 = vld [vmem:[#allocation6 + $0x678] sm:$0xff]  ;;  %v5391_v14 = vpack.c.bf16 %v5348_v12, %v5347_v47  ;;  %v4970_v47 = vld [vmem:[#allocation4 + $0x290] sm:$0xff] }
 0x457   :  { %5825 = vrot.lane.b32.xlu1 %v5758_v48, %s10465_s9  ;;  %3250 = vst.msk [vmem:[#allocation6 + $0x6c8] sm:$0xff] %vm2841_vm3, %v3179_v56  ;;  %2866 = vst.msk [vmem:[#allocation6 + $0x6c0] sm:$0xff] %vm2841_vm3, %v2794_v54  ;;  %v4963_v48 = vld [vmem:[#allocation4 + $0x240] sm:$0xff]  ;;  %v5351_v54 = vld [vmem:[#allocation4 + $0x271] sm:$0xff] }
 0x458   :  { %7589 = vmatmul.mubr.bf16.gmra.mrb[64].mxu1 %v6131_v19  ;;  %v5007_v13 = vpack.c.bf16 %v4964_v33, %v4963_v48  ;;  %v5711_v19 = vld [vmem:[#allocation4 + $0x122] sm:$0xff] }
 0x459   :  { %7596 = vmatprep.mubr.bf16.mxu1 %v6141_v17  ;;  %v6195_v48 = vld [vmem:[#allocation6 + $0x7c0] sm:$0xff] }
 0x45a   :  { %5469 = vrot.lane.b32.xlu0 %v5388_v63, %s10465_s9  ;;  %v5444_v25 = vpop.permute.xlu0 %5443  ;;  %v5060_v10 = vpop.permute.xlu1 %5059  ;;  %v5712_v63 = vld [vmem:[#allocation4 + $0x12a] sm:$0xff] }
 0x45b   :  { %5085 = vrot.lane.b32.xlu1 %v5004_v34, %s10465_s9  ;;  %5535 = vst.msk [vmem:[#allocation6 + $0x158] sm:$0xff] %vm2841_vm3, %v5444_v25  ;;  %5151 = vst.msk [vmem:[#allocation6 + $0x150] sm:$0xff] %vm2841_vm3, %v5060_v10  ;;  %v5765_v35 = vpack.c.bf16 %v5712_v63, %v5711_v19  ;;  %v6176_v25 = vld [vmem:[#allocation6 + $0x728] sm:$0xff]  ;;  %v5725_v19 = vld [vmem:[#allocation4 + $0x1fa] sm:$0xff] }
 0x45c   :  { %v5726_v63 = vld [vmem:[#allocation4 + $0x202] sm:$0xff] }
 0x45d   :  { %7027 = vmatmul.mubr.bf16.gmra.mrb[120].mxu0 %v6145_v60  ;;  %v5350_v60 = vld [vmem:[#allocation4 + $0x261] sm:$0xff]  ;;  %v5772_v41 = vpack.c.bf16 %v5726_v63, %v5725_v19 }
 0x45e   :  { %5827 = vrot.lane.b32.xlu0 %v5759_v53, %s10465_s9  ;;  %7034 = vmatprep.mubr.bf16.mxu0 %v6155_v61  ;;  %v3181_v7 = vpop.permute.xlu0 %3180  ;;  %v6164_v21 = vld [vmem:[#allocation6 + $0x6c8] sm:$0xff]  ;;  %v6163_v62 = vld [vmem:[#allocation6 + $0x6c0] sm:$0xff]  ;;  %v5392_v0 = vpack.c.bf16 %v5350_v60, %v5349_v38 }
 0x45f   :  { %5829 = vrot.lane.b32.xlu1 %v5760_v9, %s10465_s9  ;;  %3251 = vst.msk [vmem:[#allocation6 + $0x710] sm:$0xff] %vm2841_vm3, %v3181_v7  ;;  %v2796_v52 = vpop.permute.xlu1 %2795  ;;  %v4965_v9 = vld [vmem:[#allocation4 + $0x258] sm:$0xff]  ;;  %v4972_v38 = vld [vmem:[#allocation4 + $0x2a8] sm:$0xff] }
 0x460   :  { %7597 = vmatmul.mubr.bf16.gmra.mrb[68].mxu1 %v6140_v27  ;;  %2867 = vst.msk [vmem:[#allocation6 + $0x708] sm:$0xff] %vm2841_vm3, %v2796_v52  ;;  %v5008_v40 = vpack.c.bf16 %v4966_v3, %v4965_v9  ;;  %v5715_v27 = vld [vmem:[#allocation4 + $0x152] sm:$0xff]  ;;  %v5353_v52 = vld [vmem:[#allocation4 + $0x289] sm:$0xff] }
 0x461   :  { %7604 = vmatprep.mubr.bf16.mxu1 %v6150_v5  ;;  %v5716_v5 = vld [vmem:[#allocation4 + $0x15a] sm:$0xff]  ;;  %v6204_v9 = vld [vmem:[#allocation6 + $0x808] sm:$0xff] }
 0x462   :  { %5471 = vrot.lane.b32.xlu0 %v5389_v32, %s10465_s9  ;;  %v5446_v55 = vpop.permute.xlu0 %5445  ;;  %v5767_v45 = vpack.c.bf16 %v5716_v5, %v5715_v27  ;;  %v5729_v27 = vld [vmem:[#allocation4 + $0x22a] sm:$0xff]  ;;  %v5730_v5 = vld [vmem:[#allocation4 + $0x232] sm:$0xff] }
 0x463   :  { %5087 = vrot.lane.b32.xlu1 %v5005_v46, %s10465_s9  ;;  %5536 = vst.msk [vmem:[#allocation6 + $0x1a0] sm:$0xff] %vm2841_vm3, %v5446_v55  ;;  %v5062_v49 = vpop.permute.xlu1 %5061  ;;  %v6185_v55 = vld [vmem:[#allocation6 + $0x770] sm:$0xff]  ;;  %v5774_v8 = vpack.c.bf16 %v5730_v5, %v5729_v27  ;;  %v10379_v27 = vld [vmem:[%s14754_s3 + $0x208] sm:$0xff]  }
 0x464   :  { %5152 = vst.msk [vmem:[#allocation6 + $0x198] sm:$0xff] %vm2841_vm3, %v5062_v49 }
 0x465   :  { %7035 = vmatmul.mubr.bf16.gmra.mrb[124].mxu0 %v6154_v24  ;;  %v5352_v24 = vld [vmem:[#allocation4 + $0x279] sm:$0xff] }
 0x466   :  { %5831 = vrot.lane.b32.xlu0 %v5761_v58, %s10465_s9  ;;  %7042 = vmatprep.mubr.bf16.mxu0 %v6164_v21  ;;  %v3183_v17 = vpop.permute.xlu0 %3182  ;;  %v6173_v34 = vld [vmem:[#allocation6 + $0x710] sm:$0xff]  ;;  %v5393_v22 = vpack.c.bf16 %v5352_v24, %v5351_v54  ;;  %v4974_v54 = vld [vmem:[#allocation4 + $0x2c0] sm:$0xff] }
 0x467   :  { %5833 = vrot.lane.b32.xlu1 %v5762_v1, %s10465_s9  ;;  %3252 = vst.msk [vmem:[#allocation6 + $0x758] sm:$0xff] %vm2841_vm3, %v3183_v17  ;;  %v2798_v36 = vpop.permute.xlu1 %2797  ;;  %v6172_v18 = vld [vmem:[#allocation6 + $0x708] sm:$0xff]  ;;  %v4967_v1 = vld [vmem:[#allocation4 + $0x270] sm:$0xff] }
 0x468   :  { %7605 = vmatmul.mubr.bf16.gmra.mrb[72].mxu1 %v6149_v44  ;;  %2868 = vst.msk [vmem:[#allocation6 + $0x750] sm:$0xff] %vm2841_vm3, %v2798_v36  ;;  %v5009_v10 = vpack.c.bf16 %v4968_v2, %v4967_v1  ;;  %v5719_v44 = vld [vmem:[#allocation4 + $0x182] sm:$0xff]  ;;  %v6213_v1 = vld [vmem:[#allocation6 + $0x850] sm:$0xff] }
 0x469   :  { %7612 = vmatprep.mubr.bf16.mxu1 %v6159_v42  ;;  %v5720_v42 = vld [vmem:[#allocation4 + $0x18a] sm:$0xff]  ;;  %v5355_v36 = vld [vmem:[#allocation4 + $0x2a1] sm:$0xff] }
 0x46a   :  { %5473 = vrot.lane.b32.xlu0 %v5390_v20, %s10465_s9  ;;  %v5769_v29 = vpack.c.bf16 %v5720_v42, %v5719_v44  ;;  %v5733_v44 = vld [vmem:[#allocation4 + $0x25a] sm:$0xff]  ;;  %v5734_v42 = vld [vmem:[#allocation4 + $0x262] sm:$0xff] }
 0x46b   :  { %5089 = vrot.lane.b32.xlu1 %v5006_v51, %s10465_s9 }
 0x46c   :  { %v5064_v57 = vpop.permute.xlu1 %5063 }
 0x46d   :  { %7043 = vmatmul.mubr.bf16.gmra.mrb[128].mxu0 %v6163_v62  ;;  %v5448_v53 = vpop.permute.xlu0 %5447  ;;  %5153 = vst.msk [vmem:[#allocation6 + $0x1e0] sm:$0xff] %vm2841_vm3, %v5064_v57  ;;  %v5354_v62 = vld [vmem:[#allocation4 + $0x291] sm:$0xff] }
 0x46e   :  { %5835 = vrot.lane.b32.xlu0 %v5763_v16, %s10465_s9  ;;  %7050 = vmatprep.mubr.bf16.mxu0 %v6173_v34  ;;  %5537 = vst.msk [vmem:[#allocation6 + $0x1e8] sm:$0xff] %vm2841_vm3, %v5448_v53  ;;  %v6182_v46 = vld [vmem:[#allocation6 + $0x758] sm:$0xff]  ;;  %v5394_v33 = vpack.c.bf16 %v5354_v62, %v5353_v52  ;;  %v4975_v62 = vld [vmem:[#allocation4 + $0x2d0] sm:$0xff] }
 0x46f   :  { %5837 = vrot.lane.b32.xlu1 %v5764_v23, %s10465_s9  ;;  %v6181_v61 = vld [vmem:[#allocation6 + $0x750] sm:$0xff]  ;;  %v4969_v23 = vld [vmem:[#allocation4 + $0x288] sm:$0xff]  ;;  %v6194_v53 = vld [vmem:[#allocation6 + $0x7b8] sm:$0xff] }
 0x470   :  { %7613 = vmatmul.mubr.bf16.gmra.mrb[76].mxu1 %v6158_v26  ;;  %v2800_v56 = vpop.permute.xlu1 %2799  ;;  %v5010_v49 = vpack.c.bf16 %v4970_v47, %v4969_v23  ;;  %v5723_v26 = vld [vmem:[#allocation4 + $0x1e2] sm:$0xff] }
 0x471   :  { %7620 = vmatprep.mubr.bf16.mxu1 %v6168_v37  ;;  %v3185_v32 = vpop.permute.xlu0 %3184  ;;  %2869 = vst.msk [vmem:[#allocation6 + $0x798] sm:$0xff] %vm2841_vm3, %v2800_v56  ;;  %v5724_v37 = vld [vmem:[#allocation4 + $0x1ea] sm:$0xff]  ;;  %v5357_v56 = vld [vmem:[#allocation4 + $0x2b9] sm:$0xff] }
 0x472   :  { %5475 = vrot.lane.b32.xlu0 %v5391_v14, %s10465_s9  ;;  %3253 = vst.msk [vmem:[#allocation6 + $0x7a0] sm:$0xff] %vm2841_vm3, %v3185_v32  ;;  %v5771_v31 = vpack.c.bf16 %v5724_v37, %v5723_v26  ;;  %v5735_v37 = vld [vmem:[#allocation4 + $0x272] sm:$0xff] }
 0x473   :  { %5091 = vrot.lane.b32.xlu1 %v5007_v13, %s10465_s9 }
 0x475   :  { %7051 = vmatmul.mubr.bf16.gmra.mrb[132].mxu0 %v6172_v18  ;;  %v5450_v58 = vpop.permute.xlu0 %5449  ;;  %v5356_v18 = vld [vmem:[#allocation4 + $0x2a9] sm:$0xff] }
 0x476   :  { %5839 = vrot.lane.b32.xlu0 %v5765_v35, %s10465_s9  ;;  %7058 = vmatprep.mubr.bf16.mxu0 %v6182_v46  ;;  %5538 = vst.msk [vmem:[#allocation6 + $0x230] sm:$0xff] %vm2841_vm3, %v5450_v58  ;;  %v5395_v3 = vpack.c.bf16 %v5356_v18, %v5355_v36  ;;  %v6203_v58 = vld [vmem:[#allocation6 + $0x800] sm:$0xff] }
 0x477   :  { %5841 = vrot.lane.b32.xlu1 %v5766_v30, %s10465_s9  ;;  %v5066_v28 = vpop.permute.xlu1 %5065  ;;  %v4971_v30 = vld [vmem:[#allocation4 + $0x2a0] sm:$0xff] }
 0x478   :  { %7621 = vmatmul.mubr.bf16.gmra.mrb[80].mxu1 %v6167_v59  ;;  %5154 = vst.msk [vmem:[#allocation6 + $0x228] sm:$0xff] %vm2841_vm3, %v5066_v28  ;;  %v6190_v21 = vld [vmem:[#allocation6 + $0x798] sm:$0xff]  ;;  %v5011_v57 = vpack.c.bf16 %v4972_v38, %v4971_v30  ;;  %v5361_v30 = vld [vmem:[#allocation4 + $0x2e9] sm:$0xff] }
 0x479   :  { %7628 = vmatprep.mubr.bf16.mxu1 %v6177_v43  ;;  %v3187_v20 = vpop.permute.xlu0 %3186  ;;  %v6191_v51 = vld [vmem:[#allocation6 + $0x7a0] sm:$0xff]  ;;  %v5727_v59 = vld [vmem:[#allocation4 + $0x212] sm:$0xff] }
 0x47a   :  { %5477 = vrot.lane.b32.xlu0 %v5392_v0, %s10465_s9  ;;  %3254 = vst.msk [vmem:[#allocation6 + $0x7e8] sm:$0xff] %vm2841_vm3, %v3187_v20  ;;  %v5728_v43 = vld [vmem:[#allocation4 + $0x21a] sm:$0xff]  ;;  %v5362_v38 = vld [vmem:[#allocation4 + $0x2f1] sm:$0xff] }
 0x47b   :  { %5093 = vrot.lane.b32.xlu1 %v5008_v40, %s10465_s9  ;;  %v5773_v39 = vpack.c.bf16 %v5728_v43, %v5727_v59  ;;  %v6231_v43 = vld [vmem:[#allocation6 + $0x8e0] sm:$0xff] }
 0x47d   :  { %7059 = vmatmul.mubr.bf16.gmra.mrb[136].mxu0 %v6181_v61  ;;  %v2802_v7 = vpop.permute.xlu1 %2801  ;;  %v5358_v61 = vld [vmem:[#allocation4 + $0x2c1] sm:$0xff] }
 0x47e   :  { %5843 = vrot.lane.b32.xlu0 %v5767_v45, %s10465_s9  ;;  %7066 = vmatprep.mubr.bf16.mxu0 %v6191_v51  ;;  %2870 = vst.msk [vmem:[#allocation6 + $0x7e0] sm:$0xff] %vm2841_vm3, %v2802_v7  ;;  %v5396_v2 = vpack.c.bf16 %v5358_v61, %v5357_v56  ;;  %v5776_v7 = vpack.c.bf16 %v5734_v42, %v5733_v44  ;;  %v5741_v61 = vld [vmem:[#allocation4 + $0x2ba] sm:$0xff]  ;;  %v4980_v44 = vld [vmem:[#allocation4 + $0x308] sm:$0xff] }
 0x47f   :  { %5845 = vrot.lane.b32.xlu1 %v5768_v50, %s10465_s9  ;;  %v4973_v50 = vld [vmem:[#allocation4 + $0x2b8] sm:$0xff] }
 0x480   :  { %7629 = vmatmul.mubr.bf16.gmra.mrb[84].mxu1 %v6176_v25  ;;  %v5452_v16 = vpop.permute.xlu0 %5451  ;;  %v5012_v28 = vpack.c.bf16 %v4974_v54, %v4973_v50  ;;  %v5731_v25 = vld [vmem:[#allocation4 + $0x242] sm:$0xff] }
 0x481   :  { %7636 = vmatprep.mubr.bf16.mxu1 %v6186_v6  ;;  %5539 = vst.msk [vmem:[#allocation6 + $0x278] sm:$0xff] %vm2841_vm3, %v5452_v16  ;;  %v5068_v12 = vpop.permute.xlu1 %5067  ;;  %v6200_v13 = vld [vmem:[#allocation6 + $0x7e8] sm:$0xff]  ;;  %v4976_v16 = vld [vmem:[#allocation4 + $0x2d8] sm:$0xff] }
 0x482   :  { %5479 = vrot.lane.b32.xlu0 %v5393_v22, %s10465_s9  ;;  %5155 = vst.msk [vmem:[#allocation6 + $0x270] sm:$0xff] %vm2841_vm3, %v5068_v12  ;;  %v5732_v6 = vld [vmem:[#allocation4 + $0x24a] sm:$0xff]  ;;  %v5013_v26 = vpack.c.bf16 %v4976_v16, %v4975_v62 }
 0x483   :  { %5095 = vrot.lane.b32.xlu1 %v5009_v10, %s10465_s9  ;;  %v5775_v4 = vpack.c.bf16 %v5732_v6, %v5731_v25  ;;  %v6212_v12 = vld [vmem:[#allocation6 + $0x848] sm:$0xff] }
 0x484   :  { %v3189_v14 = vpop.permute.xlu0 %3188  ;;  %v5364_v25 = vld [vmem:[#allocation4 + $0x309] sm:$0xff] }
 0x485   :  { %7067 = vmatmul.mubr.bf16.gmra.mrb[140].mxu0 %v6190_v21  ;;  %3255 = vst.msk [vmem:[#allocation6 + $0x830] sm:$0xff] %vm2841_vm3, %v3189_v14  ;;  %v2804_v17 = vpop.permute.xlu1 %2803  ;;  %v6199_v34 = vld [vmem:[#allocation6 + $0x7e0] sm:$0xff] }
 0x486   :  { %5847 = vrot.lane.b32.xlu0 %v5769_v29, %s10465_s9  ;;  %7074 = vmatprep.mubr.bf16.mxu0 %v6200_v13  ;;  %2871 = vst.msk [vmem:[#allocation6 + $0x828] sm:$0xff] %vm2841_vm3, %v2804_v17  ;;  %v5360_v21 = vld [vmem:[#allocation4 + $0x2d9] sm:$0xff]  ;;  %v5737_v17 = vld [vmem:[#allocation4 + $0x28a] sm:$0xff] }
 0x487   :  { %5849 = vrot.lane.b32.xlu1 %v5770_v15, %s10465_s9  ;;  %v5593_v29 = vld [vmem:[#allocation3 + $0x19a] sm:$0xff]  ;;  %v5594_v15 = vld [vmem:[#allocation3 + $0x1a2] sm:$0xff] }
 0x488   :  { %7637 = vmatmul.mubr.bf16.gmra.mrb[88].mxu1 %v6185_v55  ;;  %v5642_v23 = vpack.c.bf16 %v5594_v15, %v5593_v29  ;;  %v5736_v14 = vld [vmem:[#allocation4 + $0x27a] sm:$0xff]  ;;  %v5743_v15 = vld [vmem:[#allocation4 + $0x2d2] sm:$0xff] }
 0x489   :  { %7644 = vmatprep.mubr.bf16.mxu1 %v6195_v48  ;;  %v5454_v35 = vpop.permute.xlu0 %5453  ;;  %v6222_v48 = vld [vmem:[#allocation6 + $0x898] sm:$0xff]  ;;  %v5777_v18 = vpack.c.bf16 %v5736_v14, %v5735_v37 }
 0x48a   :  { %5481 = vrot.lane.b32.xlu0 %v5394_v33, %s10465_s9  ;;  %5540 = vst.msk [vmem:[#allocation6 + $0x2c0] sm:$0xff] %vm2841_vm3, %v5454_v35  ;;  %v5070_v60 = vpop.permute.xlu1 %5069  ;;  %v5397_v33 = vpack.c.bf16 %v5360_v21, %v5359_v11  ;;  %v10381_v21 = vld [vmem:[%s14754_s3 + $0x218] sm:$0xff]  }
 0x48b   :  { %5097 = vrot.lane.b32.xlu1 %v5010_v49, %s10465_s9  ;;  %5156 = vst.msk [vmem:[#allocation6 + $0x2b8] sm:$0xff] %vm2841_vm3, %v5070_v60  ;;  %v5365_v14 = vld [vmem:[#allocation4 + $0x319] sm:$0xff] }
 0x48c   :  { %v6209_v40 = vld [vmem:[#allocation6 + $0x830] sm:$0xff]  ;;  %5674 = vst.msk [vmem:[#allocation6 + $0x478] sm:$0xff] %vm1929_vm0, %v5642_v23 }
 0x48d   :  { %7075 = vmatmul.mubr.bf16.gmra.mrb[144].mxu0 %v6199_v34  ;;  %v6208_v46 = vld [vmem:[#allocation6 + $0x828] sm:$0xff]  ;;  %v5738_v34 = vld [vmem:[#allocation4 + $0x292] sm:$0xff] }
 0x48e   :  { %5851 = vrot.lane.b32.xlu0 %v5771_v31, %s10465_s9  ;;  %7082 = vmatprep.mubr.bf16.mxu0 %v6209_v40  ;;  %v5778_v35 = vpack.c.bf16 %v5738_v34, %v5737_v17  ;;  %v10382_v17 = vld [vmem:[%s14754_s3 + $0x220] sm:$0xff]   ;;  %v4981_v34 = vld [vmem:[#allocation4 + $0x318] sm:$0xff] }
 0x48f   :  { %5853 = vrot.lane.b32.xlu1 %v5772_v41, %s10465_s9  ;;  %v13085_v55 = vpop.f32.mrb[48].mxu0 }
 0x490   :  { %v3191_v0 = vpop.permute.xlu0 %3190  ;;  %7645 = vmatmul.mubr.bf16.gmra.mrb[92].mxu1 %v6194_v53  ;;  %v6886_v49 = vpop.f32.mrb[49].mxu0  ;;  %v4977_v53 = vld [vmem:[#allocation4 + $0x2e8] sm:$0xff] }
 0x491   :  { %3256 = vst.msk [vmem:[#allocation6 + $0x878] sm:$0xff] %vm2841_vm3, %v3191_v0  ;;  %v2806_v32 = vpop.permute.xlu1 %2805  ;;  %7652 = vmatprep.mubr.bf16.mxu1 %v6204_v9  ;;  %v13091_v13 = vpop.f32.mrb[50].mxu0  ;;  %v4978_v9 = vld [vmem:[#allocation4 + $0x2f0] sm:$0xff]  ;;  %v5398_v0 = vpack.c.bf16 %v5362_v38, %v5361_v30 }
 0x492   :  { %2872 = vst.msk [vmem:[#allocation6 + $0x870] sm:$0xff] %vm2841_vm3, %v2806_v32  ;;  %5483 = vrot.lane.b32.xlu0 %v5395_v3, %s10465_s9  ;;  %v6889_v31 = vpop.f32.mrb[51].mxu0  ;;  %v5014_v5 = vpack.c.bf16 %v4978_v9, %v4977_v53  ;;  %v5739_v32 = vld [vmem:[#allocation4 + $0x2a2] sm:$0xff] }
 0x493   :  { %5099 = vrot.lane.b32.xlu1 %v5011_v57, %s10465_s9  ;;  %v6221_v57 = vld [vmem:[#allocation6 + $0x890] sm:$0xff]  ;;  %v4982_v31 = vld [vmem:[#allocation4 + $0x320] sm:$0xff] }
 0x494   :  { %v5456_v45 = vpop.permute.xlu0 %5455  ;;  %v5016_v53 = vpack.c.bf16 %v4982_v31, %v4981_v34 }
 0x495   :  { %7083 = vmatmul.mubr.bf16.gmra.mrb[148].mxu0 %v6208_v46  ;;  %5541 = vst.msk [vmem:[#allocation6 + $0x308] sm:$0xff] %vm2841_vm3, %v5456_v45  ;;  %v5072_v24 = vpop.permute.xlu1 %5071  ;;  %v5740_v46 = vld [vmem:[#allocation4 + $0x2aa] sm:$0xff]  ;;  %v5742_v45 = vld [vmem:[#allocation4 + $0x2c2] sm:$0xff] }
 0x496   :  { %5157 = vst.msk [vmem:[#allocation6 + $0x300] sm:$0xff] %vm2841_vm3, %v5072_v24  ;;  %5855 = vrot.lane.b32.xlu0 %v5773_v39, %s10465_s9 }
 0x497   :  { %5857 = vrot.lane.b32.xlu1 %v5774_v8, %s10465_s9  ;;  %v13098_v59 = vpop.f32.mrb[52].mxu0 }
 0x498   :  { %v3193_v22 = vpop.permute.xlu0 %3192  ;;  %7653 = vmatmul.mubr.bf16.gmra.mrb[96].mxu1 %v6203_v58  ;;  %v6218_v10 = vld [vmem:[#allocation6 + $0x878] sm:$0xff]  ;;  %v6894_v40 = vpop.f32.mrb[53].mxu0  ;;  %v5779_v58 = vpack.c.bf16 %v5740_v46, %v5739_v32 }
 0x499   :  { %3257 = vst.msk [vmem:[#allocation6 + $0x8c0] sm:$0xff] %vm2841_vm3, %v3193_v22  ;;  %v2808_v20 = vpop.permute.xlu1 %2807  ;;  %7090 = vmatprep.mubr.bf16.mxu0 %v6218_v10  ;;  %v6217_v51 = vld [vmem:[#allocation6 + $0x870] sm:$0xff]  ;;  %7660 = vmatprep.mubr.bf16.mxu1 %v6213_v1  ;;  %v13106_v39 = vpop.f32.mrb[54].mxu0  ;;  %v10410_v1 = vld [vmem:[%s14754_s3 + $0x200] sm:$0xff]  }
 0x49a   :  { %2873 = vst.msk [vmem:[#allocation6 + $0x8b8] sm:$0xff] %vm2841_vm3, %v2808_v20  ;;  %5485 = vrot.lane.b32.xlu0 %v5396_v2, %s10465_s9  ;;  %v6897_v50 = vpop.f32.mrb[55].mxu0  ;;  %v5780_v2 = vpack.c.bf16 %v5742_v45, %v5741_v61  ;;  %v10380_v22 = vld [vmem:[%s14754_s3 + $0x210] sm:$0xff]   ;;  %v4979_v10 = vld [vmem:[#allocation4 + $0x300] sm:$0xff]  ;;  %v6230_v20 = vld [vmem:[#allocation6 + $0x8d8] sm:$0xff] }
 0x49b   :  { %5101 = vrot.lane.b32.xlu1 %v5012_v28, %s10465_s9  ;;  %v5363_v28 = vld [vmem:[#allocation4 + $0x301] sm:$0xff]  ;;  %v5015_v29 = vpack.c.bf16 %v4980_v44, %v4979_v10  ;;  %v5367_v61 = vld [vmem:[#allocation4 + $0x331] sm:$0xff]  ;;  %v5368_v45 = vld [vmem:[#allocation4 + $0x339] sm:$0xff] }
 0x49c   :  { %v5458_v52 = vpop.permute.xlu0 %5457  ;;  %v5399_v11 = vpack.c.bf16 %v5364_v25, %v5363_v28  ;;  %v5972_v25 = vld [vmem:[#allocation6 + $0xc8] sm:$0xff]  ;;  %v10385_v10 = vld [vmem:[%s14754_s3 + $0x238] sm:$0xff]  }
 0x49d   :  { %7091 = vmatmul.mubr.bf16.gmra.mrb[152].mxu0 %v6217_v51  ;;  %5542 = vst.msk [vmem:[#allocation6 + $0x350] sm:$0xff] %vm2841_vm3, %v5458_v52  ;;  %v5074_v47 = vpop.permute.xlu1 %5073  ;;  %v5744_v52 = vld [vmem:[#allocation4 + $0x2da] sm:$0xff] }
 0x49e   :  { %5158 = vst.msk [vmem:[#allocation6 + $0x348] sm:$0xff] %vm2841_vm3, %v5074_v47  ;;  %5859 = vrot.lane.b32.xlu0 %v5775_v4, %s10465_s9  ;;  %v5954_v4 = vld [vmem:[#allocation6 + $0x38] sm:$0xff]  ;;  %v5745_v47 = vld [vmem:[#allocation4 + $0x2ea] sm:$0xff] }
 0x49f   :  { %5861 = vrot.lane.b32.xlu1 %v5776_v7, %s10465_s9  ;;  %v13119_v51 = vpop.f32.mrb[56].mxu0 }
 0x4a0   :  { %v3899_v19 = vpop.permute.xlu0 %3898  ;;  %7661 = vmatmul.mubr.bf16.gmra.mrb[100].mxu1 %v6212_v12  ;;  %v6227_v63 = vld [vmem:[#allocation6 + $0x8c0] sm:$0xff]  ;;  %v6902_v7 = vpop.f32.mrb[57].mxu0  ;;  %v5746_v12 = vld [vmem:[#allocation4 + $0x2f2] sm:$0xff] }
 0x4a1   :  { %3994 = vst.msk [vmem:[#allocation6 + $0x18] sm:$0xff] %vm2841_vm3, %v3899_v19  ;;  %v3515_v41 = vpop.permute.xlu1 %3514  ;;  %7098 = vmatprep.mubr.bf16.mxu0 %v6227_v63  ;;  %v6226_v36 = vld [vmem:[#allocation6 + $0x8b8] sm:$0xff]  ;;  %7668 = vmatprep.mubr.bf16.mxu1 %v6222_v48  ;;  %v13127_v62 = vpop.f32.mrb[58].mxu0  ;;  %v5782_v37 = vpack.c.bf16 %v5746_v12, %v5745_v47  ;;  %v5366_v19 = vld [vmem:[#allocation4 + $0x321] sm:$0xff]  ;;  %v5369_v12 = vld [vmem:[#allocation4 + $0x349] sm:$0xff] }
 0x4a2   :  { %3610 = vst.msk [vmem:[#allocation6 + $0x10] sm:$0xff] %vm2841_vm3, %v3515_v41  ;;  %5487 = vrot.lane.b32.xlu0 %v5397_v33, %s10465_s9  ;;  %v6905_v48 = vpop.f32.mrb[59].mxu0  ;;  %v5400_v30 = vpack.c.bf16 %v5366_v19, %v5365_v14  ;;  %v5971_v14 = vld [vmem:[#allocation6 + $0xc0] sm:$0xff] }
 0x4a3   :  { %5103 = vrot.lane.b32.xlu1 %v5013_v26, %s10465_s9  ;;  %v5781_v26 = vpack.c.bf16 %v5744_v52, %v5743_v15  ;;  %v5754_v15 = vld [vmem:[#allocation4 + $0x352] sm:$0xff] }
 0x4a4   :  { %v5460_v60 = vpop.permute.xlu0 %5459  ;;  %v5370_v48 = vld [vmem:[#allocation4 + $0x351] sm:$0xff] }
 0x4a5   :  { %7099 = vmatmul.mubr.bf16.gmra.mrb[156].mxu0 %v6226_v36  ;;  %5543 = vst.msk [vmem:[#allocation6 + $0x398] sm:$0xff] %vm2841_vm3, %v5460_v60  ;;  %v5076_v3 = vpop.permute.xlu1 %5075  ;;  %v5953_v36 = vld [vmem:[#allocation6 + $0x30] sm:$0xff]  ;;  %v10383_v60 = vld [vmem:[%s14754_s3 + $0x228] sm:$0xff]   ;;  %v5402_v34 = vpack.c.bf16 %v5370_v48, %v5369_v12  ;;  %v6007_v48 = vld [vmem:[#allocation6 + $0x1e0] sm:$0xff] }
 0x4a6   :  { %5159 = vst.msk [vmem:[#allocation6 + $0x390] sm:$0xff] %vm2841_vm3, %v5076_v3  ;;  %5863 = vrot.lane.b32.xlu0 %v5777_v18, %s10465_s9  ;;  %v5747_v3 = vld [vmem:[#allocation4 + $0x302] sm:$0xff] }
 0x4a7   :  { %5865 = vrot.lane.b32.xlu1 %v5778_v35, %s10465_s9  ;;  %v5963_v35 = vld [vmem:[#allocation6 + $0x80] sm:$0xff] }
 0x4a8   :  { %v3901_v8 = vpop.permute.xlu0 %3900  ;;  %7669 = vmatmul.mubr.bf16.gmra.mrb[104].mxu1 %v6221_v57  ;;  %v5950_v56 = vld [vmem:[#allocation6 + $0x18] sm:$0xff]  ;;  %v5748_v57 = vld [vmem:[#allocation4 + $0x30a] sm:$0xff] }
 0x4a9   :  { %3995 = vst.msk [vmem:[#allocation6 + $0x60] sm:$0xff] %vm2841_vm3, %v3901_v8  ;;  %v3517_v54 = vpop.permute.xlu1 %3516  ;;  %7139 = vmatprep.mubr.bf16.mxu0 %v5950_v56  ;;  %v5949_v24 = vld [vmem:[#allocation6 + $0x10] sm:$0xff]  ;;  %7676 = vmatprep.mubr.bf16.mxu1 %v6231_v43  ;;  %v13137_v18 = vpop.f32.mrb[60].mxu0  ;;  %v5783_v8 = vpack.c.bf16 %v5748_v57, %v5747_v3  ;;  %v5980_v57 = vld [vmem:[#allocation6 + $0x108] sm:$0xff] }
 0x4aa   :  { %3611 = vst.msk [vmem:[#allocation6 + $0x58] sm:$0xff] %vm2841_vm3, %v3517_v54  ;;  %5489 = vrot.lane.b32.xlu0 %v5398_v0, %s10465_s9  ;;  %v6910_v38 = vpop.f32.mrb[61].mxu0  ;;  %v10384_v54 = vld [vmem:[%s14754_s3 + $0x230] sm:$0xff]  }
 0x4ab   :  { %5105 = vrot.lane.b32.xlu1 %v5014_v5, %s10465_s9  ;;  %v13145_v9 = vpop.f32.mrb[62].mxu0  ;;  %v5750_v5 = vld [vmem:[#allocation4 + $0x322] sm:$0xff] }
 0x4ac   :  { %v5462_v6 = vpop.permute.xlu0 %5461  ;;  %v6913_v40 = vpop.f32.mrb[63].mxu0 }
 0x4ad   :  { %7140 = vmatmul.mubr.bf16.vlgmr.msra.gmra.mrb[32].mxu0 %v5949_v24  ;;  %5544 = vst.msk [vmem:[#allocation6 + $0x3e0] sm:$0xff] %vm2841_vm3, %v5462_v6  ;;  %v5078_v42 = vpop.permute.xlu1 %5077  ;;  %v4983_v24 = vld [vmem:[#allocation4 + $0x330] sm:$0xff] }
 0x4ae   :  { %9434 = vmatpush3.bf16.msra.mxu0 %v10410_v1  ;;  %5160 = vst.msk [vmem:[#allocation6 + $0x3d8] sm:$0xff] %vm2841_vm3, %v5078_v42  ;;  %5867 = vrot.lane.b32.xlu0 %v5779_v58, %s10465_s9  ;;  %v4984_v58 = vld [vmem:[#allocation4 + $0x338] sm:$0xff] }
 0x4af   :  { %9435 = vmatprep.subr.bf16.mxu0 %v10379_v27  ;;  %5869 = vrot.lane.b32.xlu1 %v5780_v2, %s10465_s9  ;;  %v5962_v2 = vld [vmem:[#allocation6 + $0x78] sm:$0xff]  ;;  %v5017_v42 = vpack.c.bf16 %v4984_v58, %v4983_v24  ;;  %v5999_v24 = vld [vmem:[#allocation6 + $0x1a0] sm:$0xff] }
 0x4b0   :  { %v3903_v16 = vpop.permute.xlu0 %3902  ;;  %7677 = vmatmul.mubr.bf16.gmra.mrb[108].mxu1 %v6230_v20  ;;  %v5959_v23 = vld [vmem:[#allocation6 + $0x60] sm:$0xff]  ;;  %v5751_v20 = vld [vmem:[#allocation4 + $0x332] sm:$0xff] }
 0x4b1   :  { %3996 = vst.msk [vmem:[#allocation6 + $0xa8] sm:$0xff] %vm2841_vm3, %v3903_v16  ;;  %v3519_v33 = vpop.permute.xlu1 %3518  ;;  %7147 = vmatprep.mubr.bf16.mxu0 %v5959_v23  ;;  %v5958_v49 = vld [vmem:[#allocation6 + $0x58] sm:$0xff]  ;;  %7717 = vmatprep.mubr.bf16.mxu1 %v5954_v4 }
 0x4b2   :  { %9436 = vmatpush3.bf16.msra.mxu0 %v10379_v27  ;;  %3612 = vst.msk [vmem:[#allocation6 + $0xa0] sm:$0xff] %vm2841_vm3, %v3519_v33  ;;  %5491 = vrot.lane.b32.xlu0 %v5399_v11, %s10465_s9  ;;  %v5749_v27 = vld [vmem:[#allocation4 + $0x31a] sm:$0xff] }
 0x4b3   :  { %9437 = vmatprep.subr.bf16.mxu0 %v10380_v22  ;;  %5107 = vrot.lane.b32.xlu1 %v5015_v29, %s10465_s9  ;;  %v5784_v56 = vpack.c.bf16 %v5750_v5, %v5749_v27  ;;  %v5752_v4 = vld [vmem:[#allocation4 + $0x33a] sm:$0xff]  ;;  %v5753_v29 = vld [vmem:[#allocation4 + $0x34a] sm:$0xff] }
 0x4b4   :  { %v5464_v63 = vpop.permute.xlu0 %5463  ;;  %v13155_v28 = vpop.f32.mrb[64].mxu0  ;;  %v5785_v23 = vpack.c.bf16 %v5752_v4, %v5751_v20  ;;  %v5786_v47 = vpack.c.bf16 %v5754_v15, %v5753_v29  ;;  %v5998_v20 = vld [vmem:[#allocation6 + $0x198] sm:$0xff] }
 0x4b5   :  { %7148 = vmatmul.mubr.bf16.gmra.mrb[36].mxu0 %v5958_v49  ;;  %5545 = vst.msk [vmem:[#allocation6 + $0x428] sm:$0xff] %vm2841_vm3, %v5464_v63  ;;  %v5080_v41 = vpop.permute.xlu1 %5079  ;;  %v6918_v6 = vpop.f32.mrb[65].mxu0  ;;  %v4985_v49 = vld [vmem:[#allocation4 + $0x348] sm:$0xff]  ;;  %v5981_v63 = vld [vmem:[#allocation6 + $0x110] sm:$0xff] }
 0x4b6   :  { %9438 = vmatpush3.bf16.msra.mxu0 %v10380_v22  ;;  %5161 = vst.msk [vmem:[#allocation6 + $0x420] sm:$0xff] %vm2841_vm3, %v5080_v41  ;;  %5871 = vrot.lane.b32.xlu0 %v5781_v26, %s10465_s9  ;;  %v5401_v22 = vpack.c.bf16 %v5368_v45, %v5367_v61  ;;  %v13163_v44 = vpop.f32.mrb[66].mxu0  ;;  %v4986_v26 = vld [vmem:[#allocation4 + $0x350] sm:$0xff] }
 0x4b7   :  { %9439 = vmatprep.subr.bf16.mxu0 %v10381_v21  ;;  %5873 = vrot.lane.b32.xlu1 %v5782_v37, %s10465_s9  ;;  %v5018_v41 = vpack.c.bf16 %v4986_v26, %v4985_v49  ;;  %v5989_v45 = vld [vmem:[#allocation6 + $0x150] sm:$0xff] }
 0x4b8   :  { %v3905_v43 = vpop.permute.xlu0 %3904  ;;  %7718 = vmatmul.mubr.bf16.vlgmr.msra.gmra.mrb[112].mxu1 %v5953_v36  ;;  %v5968_v0 = vld [vmem:[#allocation6 + $0xa8] sm:$0xff]  ;;  %v6017_v26 = vld [vmem:[#allocation6 + $0x230] sm:$0xff] }
 0x4b9   :  { %3997 = vst.msk [vmem:[#allocation6 + $0xf0] sm:$0xff] %vm2841_vm3, %v3905_v43  ;;  %v3521_v32 = vpop.permute.xlu1 %3520  ;;  %7155 = vmatprep.mubr.bf16.mxu0 %v5968_v0  ;;  %v5967_v46 = vld [vmem:[#allocation6 + $0xa0] sm:$0xff]  ;;  %7725 = vmatprep.mubr.bf16.mxu1 %v5963_v35  ;;  %v5990_v0 = vld [vmem:[#allocation6 + $0x158] sm:$0xff] }
 0x4ba   :  { %9440 = vmatpush3.bf16.msra.mxu0 %v10381_v21  ;;  %3613 = vst.msk [vmem:[#allocation6 + $0xe8] sm:$0xff] %vm2841_vm3, %v3521_v32  ;;  %5493 = vrot.lane.b32.xlu0 %v5400_v30, %s10465_s9  ;;  %v6921_v21 = vpop.f32.mrb[67].mxu0 }
 0x4bb   :  { %9441 = vmatprep.subr.bf16.mxu0 %v10382_v17  ;;  %5109 = vrot.lane.b32.xlu1 %v5016_v53, %s10465_s9 }
 0x4bc   :  { %v5466_v50 = vpop.permute.xlu0 %5465 }
 0x4bd   :  { %7156 = vmatmul.mubr.bf16.gmra.mrb[40].mxu0 %v5967_v46  ;;  %5546 = vst.msk [vmem:[#allocation6 + $0x470] sm:$0xff] %vm2841_vm3, %v5466_v50  ;;  %v5082_v1 = vpop.permute.xlu1 %5081 }
 0x4be   :  { %9442 = vmatpush3.bf16.msra.mxu0 %v10382_v17  ;;  %5162 = vst.msk [vmem:[#allocation6 + $0x468] sm:$0xff] %vm2841_vm3, %v5082_v1  ;;  %5875 = vrot.lane.b32.xlu0 %v5783_v8, %s10465_s9 }
 0x4bf   :  { %9443 = vmatprep.subr.bf16.mxu0 %v10383_v60  ;;  %5877 = vrot.lane.b32.xlu1 %v5784_v56, %s10465_s9  ;;  %v13170_v19 = vpop.f32.mrb[68].mxu0 }
 0x4c0   :  { %v5820_v11 = vpop.permute.xlu0 %5819  ;;  %7726 = vmatmul.mubr.bf16.gmra.mrb[116].mxu1 %v5962_v2  ;;  %v5977_v7 = vld [vmem:[#allocation6 + $0xf0] sm:$0xff]  ;;  %v6926_v17 = vpop.f32.mrb[69].mxu0 }
 0x4c1   :  { %5915 = vst.msk [vmem:[#allocation6 + $0x40] sm:$0xff] %vm2841_vm3, %v5820_v11  ;;  %v5822_v52 = vpop.permute.xlu1 %5821  ;;  %7163 = vmatprep.mubr.bf16.mxu0 %v5977_v7  ;;  %v5976_v16 = vld [vmem:[#allocation6 + $0xe8] sm:$0xff]  ;;  %7733 = vmatprep.mubr.bf16.mxu1 %v5972_v25  ;;  %v13174_v31 = vpop.f32.mrb[70].mxu0 }
 0x4c2   :  { %9444 = vmatpush3.bf16.msra.mxu0 %v10383_v60  ;;  %5916 = vst.msk [vmem:[#allocation6 + $0x88] sm:$0xff] %vm2841_vm3, %v5822_v52  ;;  %5495 = vrot.lane.b32.xlu0 %v5401_v22, %s10465_s9  ;;  %v6929_v30 = vpop.f32.mrb[71].mxu0  ;;  %v6008_v7 = vld [vmem:[#allocation6 + $0x1e8] sm:$0xff] }
 0x4c3   :  { %9445 = vmatprep.subr.bf16.mxu0 %v10384_v54  ;;  %5111 = vrot.lane.b32.xlu1 %v5017_v42, %s10465_s9  ;;  %v6016_v30 = vld [vmem:[#allocation6 + $0x228] sm:$0xff] }
 0x4c4   :  { %v5468_v33 = vpop.permute.xlu0 %5467 }
 0x4c5   :  { %7164 = vmatmul.mubr.bf16.gmra.mrb[44].mxu0 %v5976_v16  ;;  %5547 = vst.msk [vmem:[#allocation6 + $0x4b8] sm:$0xff] %vm2841_vm3, %v5468_v33  ;;  %v5084_v37 = vpop.permute.xlu1 %5083 }
 0x4c6   :  { %9446 = vmatpush3.bf16.msra.mxu0 %v10384_v54  ;;  %5163 = vst.msk [vmem:[#allocation6 + $0x4b0] sm:$0xff] %vm2841_vm3, %v5084_v37  ;;  %5879 = vrot.lane.b32.xlu0 %v5785_v23, %s10465_s9 }
 0x4c7   :  { %9447 = vmatprep.subr.bf16.mxu0 %v10385_v10  ;;  %5881 = vrot.lane.b32.xlu1 %v5786_v47, %s10465_s9 }
 0x4c8   :  { %v5824_v36 = vpop.permute.xlu0 %5823  ;;  %7734 = vmatmul.mubr.bf16.gmra.mrb[120].mxu1 %v5971_v14  ;;  %v5955_v35 = vld [vmem:[#allocation6 + $0x40] sm:$0xff] }
 0x4c9   :  { %5917 = vst.msk [vmem:[#allocation6 + $0xd0] sm:$0xff] %vm2841_vm3, %v5824_v36  ;;  %v5826_v38 = vpop.permute.xlu1 %5825  ;;  %9449 = vmatprep.mubr.bf16.mxu0 %v5955_v35  ;;  %v5964_v60 = vld [vmem:[#allocation6 + $0x88] sm:$0xff]  ;;  %7741 = vmatprep.mubr.bf16.mxu1 %v5981_v63 }
 0x4ca   :  { %9448 = vmatpush3.bf16.msra.mxu0 %v10385_v10  ;;  %5918 = vst.msk [vmem:[#allocation6 + $0x118] sm:$0xff] %vm2841_vm3, %v5826_v38  ;;  %5497 = vrot.lane.b32.xlu0 %v5402_v34, %s10465_s9 }
 0x4cb   :  { %5113 = vrot.lane.b32.xlu1 %v5018_v41, %s10465_s9  ;;  %v13182_v43 = vpop.f32.mrb[72].mxu0 }
 0x4cc   :  { %v5470_v53 = vpop.permute.xlu0 %5469  ;;  %v6934_v40 = vpop.f32.mrb[73].mxu0 }
 0x4cd   :  { %9450 = vmatmul.mubr.bf16.vlgmr.msra.gmra.mrb[160].mxu0 %v5964_v60  ;;  %5548 = vst.msk [vmem:[#allocation6 + $0x500] sm:$0xff] %vm2841_vm3, %v5470_v53  ;;  %v5086_v3 = vpop.permute.xlu1 %5085  ;;  %v13185_v27 = vpop.f32.mrb[74].mxu0  ;;  %v6026_v53 = vld [vmem:[#allocation6 + $0x278] sm:$0xff] }
 0x4ce   :  { %5164 = vst.msk [vmem:[#allocation6 + $0x4f8] sm:$0xff] %vm2841_vm3, %v5086_v3  ;;  %v6937_v46 = vpop.f32.mrb[75].mxu0 }
 0x4d0   :  { %v5828_v5 = vpop.permute.xlu0 %5827  ;;  %7742 = vmatmul.mubr.bf16.gmra.mrb[124].mxu1 %v5980_v57  ;;  %v5973_v32 = vld [vmem:[#allocation6 + $0xd0] sm:$0xff] }
 0x4d1   :  { %5919 = vst.msk [vmem:[#allocation6 + $0x160] sm:$0xff] %vm2841_vm3, %v5828_v5  ;;  %v5830_v8 = vpop.permute.xlu1 %5829  ;;  %9453 = vmatprep.mubr.bf16.mxu0 %v5973_v32  ;;  %v5982_v56 = vld [vmem:[#allocation6 + $0x118] sm:$0xff]  ;;  %7749 = vmatprep.mubr.bf16.mxu1 %v5990_v0 }
 0x4d2   :  { %5920 = vst.msk [vmem:[#allocation6 + $0x1a8] sm:$0xff] %vm2841_vm3, %v5830_v8 }
 0x4d3   :  { %v13190_v54 = vpop.f32.mrb[76].mxu0 }
 0x4d4   :  { %v5472_v61 = vpop.permute.xlu0 %5471  ;;  %v6942_v58 = vpop.f32.mrb[77].mxu0 }
 0x4d5   :  { %9454 = vmatmul.mubr.bf16.gmra.mrb[164].mxu0 %v5982_v56  ;;  %5549 = vst.msk [vmem:[#allocation6 + $0x548] sm:$0xff] %vm2841_vm3, %v5472_v61  ;;  %v5088_v50 = vpop.permute.xlu1 %5087  ;;  %v13193_v1 = vpop.f32.mrb[78].mxu0  ;;  %v6025_v56 = vld [vmem:[#allocation6 + $0x270] sm:$0xff] }
 0x4d6   :  { %5165 = vst.msk [vmem:[#allocation6 + $0x540] sm:$0xff] %vm2841_vm3, %v5088_v50  ;;  %v6945_v6 = vpop.f32.mrb[79].mxu0  ;;  %v6035_v50 = vld [vmem:[#allocation6 + $0x2c0] sm:$0xff] }
 0x4d8   :  { %7750 = vmatmul.mubr.bf16.gmra.mrb[0].mxu1 %v5989_v45  ;;  %v5991_v2 = vld [vmem:[#allocation6 + $0x160] sm:$0xff]  ;;  %v5832_v25 = vpop.permute.xlu0 %5831 }
 0x4d9   :  { %9457 = vmatprep.mubr.bf16.mxu0 %v5991_v2  ;;  %v6000_v22 = vld [vmem:[#allocation6 + $0x1a8] sm:$0xff]  ;;  %5921 = vst.msk [vmem:[#allocation6 + $0x1f0] sm:$0xff] %vm2841_vm3, %v5832_v25  ;;  %7757 = vmatprep.mubr.bf16.mxu1 %v5999_v24  ;;  %v5834_v10 = vpop.permute.xlu1 %5833 }
 0x4da   :  { %5922 = vst.msk [vmem:[#allocation6 + $0x238] sm:$0xff] %vm2841_vm3, %v5834_v10 }
 0x4dc   :  { %v5474_v42 = vpop.permute.xlu0 %5473 }
 0x4dd   :  { %9458 = vmatmul.mubr.bf16.gmra.mrb[168].mxu0 %v6000_v22  ;;  %5550 = vst.msk [vmem:[#allocation6 + $0x590] sm:$0xff] %vm2841_vm3, %v5474_v42  ;;  %v5090_v4 = vpop.permute.xlu1 %5089  ;;  %v13198_v11 = vpop.f32.mrb[80].mxu0 }
 0x4de   :  { %5166 = vst.msk [vmem:[#allocation6 + $0x588] sm:$0xff] %vm2841_vm3, %v5090_v4  ;;  %v6950_v21 = vpop.f32.mrb[81].mxu0 }
 0x4df   :  { %v13201_v29 = vpop.f32.mrb[82].mxu0  ;;  %v6044_v21 = vld [vmem:[#allocation6 + $0x308] sm:$0xff] }
 0x4e0   :  { %7758 = vmatmul.mubr.bf16.gmra.mrb[4].mxu1 %v5998_v20  ;;  %v6009_v15 = vld [vmem:[#allocation6 + $0x1f0] sm:$0xff]  ;;  %v5836_v52 = vpop.permute.xlu0 %5835  ;;  %v6953_v16 = vpop.f32.mrb[83].mxu0  ;;  %v6034_v20 = vld [vmem:[#allocation6 + $0x2b8] sm:$0xff] }
 0x4e1   :  { %7765 = vmatprep.mubr.bf16.mxu1 %v6008_v7  ;;  %9461 = vmatprep.mubr.bf16.mxu0 %v6009_v15  ;;  %v6018_v23 = vld [vmem:[#allocation6 + $0x238] sm:$0xff]  ;;  %5923 = vst.msk [vmem:[#allocation6 + $0x280] sm:$0xff] %vm2841_vm3, %v5836_v52  ;;  %v5838_v47 = vpop.permute.xlu1 %5837 }
 0x4e2   :  { %5924 = vst.msk [vmem:[#allocation6 + $0x2c8] sm:$0xff] %vm2841_vm3, %v5838_v47 }
 0x4e4   :  { %v5476_v12 = vpop.permute.xlu0 %5475 }
 0x4e5   :  { %9462 = vmatmul.mubr.bf16.gmra.mrb[172].mxu0 %v6018_v23  ;;  %5551 = vst.msk [vmem:[#allocation6 + $0x5d8] sm:$0xff] %vm2841_vm3, %v5476_v12  ;;  %v5092_v33 = vpop.permute.xlu1 %5091 }
 0x4e6   :  { %5167 = vst.msk [vmem:[#allocation6 + $0x5d0] sm:$0xff] %vm2841_vm3, %v5092_v33 }
 0x4e7   :  { %v13206_v49 = vpop.f32.mrb[84].mxu0 }
 0x4e8   :  { %v6958_v37 = vpop.f32.mrb[85].mxu0  ;;  %7766 = vmatmul.mubr.bf16.gmra.mrb[8].mxu1 %v6007_v48  ;;  %v6027_v63 = vld [vmem:[#allocation6 + $0x280] sm:$0xff]  ;;  %v5840_v17 = vpop.permute.xlu0 %5839 }
 0x4e9   :  { %v13209_v14 = vpop.f32.mrb[86].mxu0  ;;  %7773 = vmatprep.mubr.bf16.mxu1 %v6017_v26  ;;  %9465 = vmatprep.mubr.bf16.mxu0 %v6027_v63  ;;  %v6036_v41 = vld [vmem:[#allocation6 + $0x2c8] sm:$0xff]  ;;  %5925 = vst.msk [vmem:[#allocation6 + $0x310] sm:$0xff] %vm2841_vm3, %v5840_v17  ;;  %v5842_v36 = vpop.permute.xlu1 %5841  ;;  %v6043_v26 = vld [vmem:[#allocation6 + $0x300] sm:$0xff]  ;;  %v6053_v17 = vld [vmem:[#allocation6 + $0x350] sm:$0xff] }
 0x4ea   :  { %v6961_v34 = vpop.f32.mrb[87].mxu0  ;;  %5926 = vst.msk [vmem:[#allocation6 + $0x358] sm:$0xff] %vm2841_vm3, %v5842_v36 }
 0x4ec   :  { %v5478_v35 = vpop.permute.xlu0 %5477 }
 0x4ed   :  { %9466 = vmatmul.mubr.bf16.gmra.mrb[176].mxu0 %v6036_v41  ;;  %5552 = vst.msk [vmem:[#allocation6 + $0x620] sm:$0xff] %vm2841_vm3, %v5478_v35  ;;  %v5094_v38 = vpop.permute.xlu1 %5093 }
 0x4ee   :  { %5168 = vst.msk [vmem:[#allocation6 + $0x618] sm:$0xff] %vm2841_vm3, %v5094_v38 }
 0x4f0   :  { %v13214_v60 = vpop.f32.mrb[88].mxu0  ;;  %7774 = vmatmul.mubr.bf16.gmra.mrb[12].mxu1 %v6016_v30  ;;  %v6045_v0 = vld [vmem:[#allocation6 + $0x310] sm:$0xff]  ;;  %v5844_v40 = vpop.permute.xlu0 %5843 }
 0x4f1   :  { %v6966_v3 = vpop.f32.mrb[89].mxu0  ;;  %7781 = vmatprep.mubr.bf16.mxu1 %v6026_v53  ;;  %9469 = vmatprep.mubr.bf16.mxu0 %v6045_v0  ;;  %v6054_v32 = vld [vmem:[#allocation6 + $0x358] sm:$0xff]  ;;  %5927 = vst.msk [vmem:[#allocation6 + $0x3a0] sm:$0xff] %vm2841_vm3, %v5844_v40  ;;  %v5846_v46 = vpop.permute.xlu1 %5845  ;;  %v6052_v0 = vld [vmem:[#allocation6 + $0x348] sm:$0xff] }
 0x4f2   :  { %v13217_v57 = vpop.f32.mrb[90].mxu0  ;;  %5928 = vst.msk [vmem:[#allocation6 + $0x3e8] sm:$0xff] %vm2841_vm3, %v5846_v46 }
 0x4f3   :  { %v6969_v5 = vpop.f32.mrb[91].mxu0 }
 0x4f4   :  { %v5480_v8 = vpop.permute.xlu0 %5479 }
 0x4f5   :  { %9470 = vmatmul.mubr.bf16.gmra.mrb[180].mxu0 %v6054_v32  ;;  %5553 = vst.msk [vmem:[#allocation6 + $0x668] sm:$0xff] %vm2841_vm3, %v5480_v8  ;;  %v5096_v61 = vpop.permute.xlu1 %5095  ;;  %v6062_v32 = vld [vmem:[#allocation6 + $0x398] sm:$0xff] }
 0x4f6   :  { %5169 = vst.msk [vmem:[#allocation6 + $0x660] sm:$0xff] %vm2841_vm3, %v5096_v61 }
 0x4f8   :  { %v13222_v45 = vpop.f32.mrb[92].mxu0  ;;  %7782 = vmatmul.mubr.bf16.gmra.mrb[16].mxu1 %v6025_v56  ;;  %v6063_v2 = vld [vmem:[#allocation6 + $0x3a0] sm:$0xff]  ;;  %v5848_v25 = vpop.permute.xlu0 %5847 }
 0x4f9   :  { %v6974_v24 = vpop.f32.mrb[93].mxu0  ;;  %7789 = vmatprep.mubr.bf16.mxu1 %v6035_v50  ;;  %9473 = vmatprep.mubr.bf16.mxu0 %v6063_v2  ;;  %v6072_v22 = vld [vmem:[#allocation6 + $0x3e8] sm:$0xff]  ;;  %5929 = vst.msk [vmem:[#allocation6 + $0x430] sm:$0xff] %vm2841_vm3, %v5848_v25  ;;  %v5850_v10 = vpop.permute.xlu1 %5849 }
 0x4fa   :  { %v13225_v58 = vpop.f32.mrb[94].mxu0  ;;  %5930 = vst.msk [vmem:[#allocation6 + $0x478] sm:$0xff] %vm2841_vm3, %v5850_v10 }
 0x4fb   :  { %v6977_v6 = vpop.f32.mrb[95].mxu0 }
 0x4fc   :  { %v5482_v42 = vpop.permute.xlu0 %5481  ;;  %v6061_v6 = vld [vmem:[#allocation6 + $0x390] sm:$0xff] }
 0x4fd   :  { %9474 = vmatmul.mubr.bf16.gmra.mrb[184].mxu0 %v6072_v22  ;;  %5554 = vst.msk [vmem:[#allocation6 + $0x6b0] sm:$0xff] %vm2841_vm3, %v5482_v42  ;;  %v5098_v4 = vpop.permute.xlu1 %5097  ;;  %v6071_v42 = vld [vmem:[#allocation6 + $0x3e0] sm:$0xff] }
 0x4fe   :  { %5170 = vst.msk [vmem:[#allocation6 + $0x6a8] sm:$0xff] %vm2841_vm3, %v5098_v4 }
 0x500   :  { %v13230_v7 = vpop.f32.mrb[96].mxu0  ;;  %7790 = vmatmul.mubr.bf16.gmra.mrb[20].mxu1 %v6034_v20  ;;  %v6081_v16 = vld [vmem:[#allocation6 + $0x430] sm:$0xff]  ;;  %v5852_v23 = vpop.permute.xlu0 %5851 }
 0x501   :  { %v6982_v15 = vpop.f32.mrb[97].mxu0  ;;  %7797 = vmatprep.mubr.bf16.mxu1 %v6044_v21  ;;  %9477 = vmatprep.mubr.bf16.mxu0 %v6081_v16  ;;  %v6090_v12 = vld [vmem:[#allocation6 + $0x478] sm:$0xff]  ;;  %5931 = vst.msk [vmem:[#allocation6 + $0x4c0] sm:$0xff] %vm2841_vm3, %v5852_v23  ;;  %v5854_v48 = vpop.permute.xlu1 %5853 }
 0x502   :  { %v13233_v52 = vpop.f32.mrb[98].mxu0  ;;  %5932 = vst.msk [vmem:[#allocation6 + $0x508] sm:$0xff] %vm2841_vm3, %v5854_v48  ;;  %v6070_v48 = vld [vmem:[#allocation6 + $0x3d8] sm:$0xff] }
 0x503   :  { %v6985_v47 = vpop.f32.mrb[99].mxu0 }
 0x504   :  { %v5484_v33 = vpop.permute.xlu0 %5483 }
 0x505   :  { %9478 = vmatmul.mubr.bf16.gmra.mrb[188].mxu0 %v6090_v12  ;;  %5555 = vst.msk [vmem:[#allocation6 + $0x6f8] sm:$0xff] %vm2841_vm3, %v5484_v33  ;;  %v5100_v37 = vpop.permute.xlu1 %5099 }
 0x506   :  { %5171 = vst.msk [vmem:[#allocation6 + $0x6f0] sm:$0xff] %vm2841_vm3, %v5100_v37  ;;  %v6080_v37 = vld [vmem:[#allocation6 + $0x428] sm:$0xff] }
 0x508   :  { %v13238_v63 = vpop.f32.mrb[100].mxu0  ;;  %7798 = vmatmul.mubr.bf16.gmra.mrb[24].mxu1 %v6043_v26  ;;  %v6099_v36 = vld [vmem:[#allocation6 + $0x4c0] sm:$0xff]  ;;  %v5856_v35 = vpop.permute.xlu0 %5855 }
 0x509   :  { %v6990_v34 = vpop.f32.mrb[101].mxu0  ;;  %7805 = vmatprep.mubr.bf16.mxu1 %v6053_v17  ;;  %9481 = vmatprep.mubr.bf16.mxu0 %v6099_v36  ;;  %v6108_v38 = vld [vmem:[#allocation6 + $0x508] sm:$0xff]  ;;  %5933 = vst.msk [vmem:[#allocation6 + $0x550] sm:$0xff] %vm2841_vm3, %v5856_v35  ;;  %v5858_v53 = vpop.permute.xlu1 %5857 }
 0x50a   :  { %v13241_v41 = vpop.f32.mrb[102].mxu0  ;;  %5934 = vst.msk [vmem:[#allocation6 + $0x598] sm:$0xff] %vm2841_vm3, %v5858_v53 }
 0x50b   :  { %v6993_v30 = vpop.f32.mrb[103].mxu0 }
 0x50c   :  { %v5486_v3 = vpop.permute.xlu0 %5485 }
 0x50d   :  { %9482 = vmatmul.mubr.bf16.gmra.mrb[192].mxu0 %v6108_v38  ;;  %5556 = vst.msk [vmem:[#allocation6 + $0x740] sm:$0xff] %vm2841_vm3, %v5486_v3  ;;  %v5102_v5 = vpop.permute.xlu1 %5101  ;;  %v5625_v3 = vld [vmem:[#allocation3 + $0x34a] sm:$0xff] }
 0x50e   :  { %5172 = vst.msk [vmem:[#allocation6 + $0x738] sm:$0xff] %vm2841_vm3, %v5102_v5 }
 0x510   :  { %v13245_v40 = vpop.f32.mrb[104].mxu0  ;;  %7806 = vmatmul.mubr.bf16.gmra.mrb[28].mxu1 %v6052_v0  ;;  %v6117_v61 = vld [vmem:[#allocation6 + $0x550] sm:$0xff]  ;;  %v5860_v50 = vpop.permute.xlu0 %5859 }
 0x511   :  { %v6998_v46 = vpop.f32.mrb[105].mxu0  ;;  %7813 = vmatprep.mubr.bf16.mxu1 %v6062_v32  ;;  %9485 = vmatprep.mubr.bf16.mxu0 %v6117_v61  ;;  %v6126_v24 = vld [vmem:[#allocation6 + $0x598] sm:$0xff]  ;;  %5935 = vst.msk [vmem:[#allocation6 + $0x5e0] sm:$0xff] %vm2841_vm3, %v5860_v50  ;;  %v5862_v2 = vpop.permute.xlu1 %5861  ;;  %v6089_v50 = vld [vmem:[#allocation6 + $0x470] sm:$0xff] }
 0x512   :  { %v13249_v8 = vpop.f32.mrb[106].mxu0  ;;  %5936 = vst.msk [vmem:[#allocation6 + $0x628] sm:$0xff] %vm2841_vm3, %v5862_v2  ;;  %v5626_v0 = vld [vmem:[#allocation3 + $0x352] sm:$0xff]  ;;  %v6079_v46 = vld [vmem:[#allocation6 + $0x420] sm:$0xff] }
 0x513   :  { %v7001_v56 = vpop.f32.mrb[107].mxu0  ;;  %v5658_v5 = vpack.c.bf16 %v5626_v0, %v5625_v3 }
 0x514   :  { %v5488_v25 = vpop.permute.xlu0 %5487 }
 0x515   :  { %9486 = vmatmul.mubr.bf16.gmra.mrb[196].mxu0 %v6126_v24  ;;  %5557 = vst.msk [vmem:[#allocation6 + $0x788] sm:$0xff] %vm2841_vm3, %v5488_v25  ;;  %v5104_v10 = vpop.permute.xlu1 %5103 }
 0x516   :  { %5173 = vst.msk [vmem:[#allocation6 + $0x780] sm:$0xff] %vm2841_vm3, %v5104_v10 }
 0x517   :  { %5690 = vst.msk [vmem:[#allocation6 + $0x8f8] sm:$0xff] %vm1929_vm0, %v5658_v5 }
 0x518   :  { %v13253_v22 = vpop.f32.mrb[108].mxu0  ;;  %7814 = vmatmul.mubr.bf16.gmra.mrb[32].mxu1 %v6061_v6  ;;  %v6135_v15 = vld [vmem:[#allocation6 + $0x5e0] sm:$0xff]  ;;  %v5864_v16 = vpop.permute.xlu0 %5863 }
 0x519   :  { %v7006_v20 = vpop.f32.mrb[109].mxu0  ;;  %7821 = vmatprep.mubr.bf16.mxu1 %v6071_v42  ;;  %9489 = vmatprep.mubr.bf16.mxu0 %v6135_v15  ;;  %v6144_v23 = vld [vmem:[#allocation6 + $0x628] sm:$0xff]  ;;  %5937 = vst.msk [vmem:[#allocation6 + $0x670] sm:$0xff] %vm2841_vm3, %v5864_v16  ;;  %v5866_v47 = vpop.permute.xlu1 %5865 }
 0x51a   :  { %v13257_v4 = vpop.f32.mrb[110].mxu0  ;;  %5938 = vst.msk [vmem:[#allocation6 + $0x6b8] sm:$0xff] %vm2841_vm3, %v5866_v47  ;;  %v5241_v42 = vld [vmem:[#allocation3 + $0x349] sm:$0xff]  ;;  %v5242_v20 = vld [vmem:[#allocation3 + $0x351] sm:$0xff] }
 0x51b   :  { %v7009_v21 = vpop.f32.mrb[111].mxu0  ;;  %v5274_v16 = vpack.c.bf16 %v5242_v20, %v5241_v42  ;;  %v4857_v47 = vld [vmem:[#allocation3 + $0x350] sm:$0xff] }
 0x51c   :  { %v5490_v12 = vpop.permute.xlu0 %5489 }
 0x51d   :  { %9490 = vmatmul.mubr.bf16.gmra.mrb[200].mxu0 %v6144_v23  ;;  %5558 = vst.msk [vmem:[#allocation6 + $0x7d0] sm:$0xff] %vm2841_vm3, %v5490_v12  ;;  %v5106_v26 = vpop.permute.xlu1 %5105  ;;  %v4856_v23 = vld [vmem:[#allocation3 + $0x348] sm:$0xff] }
 0x51e   :  { %5174 = vst.msk [vmem:[#allocation6 + $0x7c8] sm:$0xff] %vm2841_vm3, %v5106_v26  ;;  %v4889_v12 = vpack.c.bf16 %v4857_v47, %v4856_v23  ;;  %v6088_v26 = vld [vmem:[#allocation6 + $0x468] sm:$0xff]  ;;  %v6106_v23 = vld [vmem:[#allocation6 + $0x4f8] sm:$0xff] }
 0x51f   :  { %5306 = vst.msk [vmem:[#allocation6 + $0x8f0] sm:$0xff] %vm1929_vm0, %v5274_v16 }
 0x520   :  { %v13261_v33 = vpop.f32.mrb[112].mxu0  ;;  %7822 = vmatmul.mubr.bf16.gmra.mrb[36].mxu1 %v6070_v48  ;;  %v6153_v35 = vld [vmem:[#allocation6 + $0x670] sm:$0xff]  ;;  %v5868_v30 = vpop.permute.xlu0 %5867  ;;  %4921 = vst.msk [vmem:[#allocation6 + $0x8e8] sm:$0xff] %vm1929_vm0, %v4889_v12 }
 0x521   :  { %v7014_v17 = vpop.f32.mrb[113].mxu0  ;;  %7829 = vmatprep.mubr.bf16.mxu1 %v6080_v37  ;;  %9493 = vmatprep.mubr.bf16.mxu0 %v6153_v35  ;;  %v6162_v38 = vld [vmem:[#allocation6 + $0x6b8] sm:$0xff]  ;;  %5939 = vst.msk [vmem:[#allocation6 + $0x700] sm:$0xff] %vm2841_vm3, %v5868_v30  ;;  %v5870_v53 = vpop.permute.xlu1 %5869 }
 0x522   :  { %v13265_v34 = vpop.f32.mrb[114].mxu0  ;;  %5940 = vst.msk [vmem:[#allocation6 + $0x748] sm:$0xff] %vm2841_vm3, %v5870_v53 }
 0x523   :  { %v7017_v36 = vpop.f32.mrb[115].mxu0 }
 0x524   :  { %v5492_v32 = vpop.permute.xlu0 %5491  ;;  %v6098_v36 = vld [vmem:[#allocation6 + $0x4b8] sm:$0xff] }
 0x525   :  { %9494 = vmatmul.mubr.bf16.gmra.mrb[204].mxu0 %v6162_v38  ;;  %5559 = vst.msk [vmem:[#allocation6 + $0x818] sm:$0xff] %vm2841_vm3, %v5492_v32  ;;  %v5108_v61 = vpop.permute.xlu1 %5107 }
 0x526   :  { %5175 = vst.msk [vmem:[#allocation6 + $0x810] sm:$0xff] %vm2841_vm3, %v5108_v61 }
 0x528   :  { %v13269_v56 = vpop.f32.mrb[116].mxu0  ;;  %7830 = vmatmul.mubr.bf16.gmra.mrb[40].mxu1 %v6079_v46  ;;  %v6171_v6 = vld [vmem:[#allocation6 + $0x700] sm:$0xff]  ;;  %v5872_v10 = vpop.permute.xlu0 %5871  ;;  %v6097_v46 = vld [vmem:[#allocation6 + $0x4b0] sm:$0xff] }
 0x529   :  { %v7022_v24 = vpop.f32.mrb[117].mxu0  ;;  %7837 = vmatprep.mubr.bf16.mxu1 %v6089_v50  ;;  %9497 = vmatprep.mubr.bf16.mxu0 %v6171_v6  ;;  %v6180_v21 = vld [vmem:[#allocation6 + $0x748] sm:$0xff]  ;;  %5941 = vst.msk [vmem:[#allocation6 + $0x790] sm:$0xff] %vm2841_vm3, %v5872_v10  ;;  %v5874_v15 = vpop.permute.xlu1 %5873 }
 0x52a   :  { %v13274_v2 = vpop.f32.mrb[118].mxu0  ;;  %5942 = vst.msk [vmem:[#allocation6 + $0x7d8] sm:$0xff] %vm2841_vm3, %v5874_v15  ;;  %v6107_v24 = vld [vmem:[#allocation6 + $0x500] sm:$0xff] }
 0x52b   :  { %14801 = vst [vmem:[#allocation13_spill] sm:$0xff] %v13274_v2  ;;  %v7025_v25 = vpop.f32.mrb[119].mxu0 }
 0x52c   :  { %v5494_v48 = vpop.permute.xlu0 %5493 }
 0x52d   :  { %9498 = vmatmul.mubr.bf16.gmra.mrb[208].mxu0 %v6180_v21  ;;  %5560 = vst.msk [vmem:[#allocation6 + $0x860] sm:$0xff] %vm2841_vm3, %v5494_v48  ;;  %v5110_v17 = vpop.permute.xlu1 %5109  ;;  %v6116_v48 = vld [vmem:[#allocation6 + $0x548] sm:$0xff] }
 0x52e   :  { %5176 = vst.msk [vmem:[#allocation6 + $0x858] sm:$0xff] %vm2841_vm3, %v5110_v17 }
 0x530   :  { %v13279_v37 = vpop.f32.mrb[120].mxu0  ;;  %7838 = vmatmul.mubr.bf16.gmra.mrb[44].mxu1 %v6088_v26  ;;  %v6189_v53 = vld [vmem:[#allocation6 + $0x790] sm:$0xff]  ;;  %v5876_v3 = vpop.permute.xlu0 %5875 }
 0x531   :  { %14802 = vst [vmem:[#allocation14_spill] sm:$0xff] %v13279_v37  ;;  %v7030_v35 = vpop.f32.mrb[121].mxu0  ;;  %7845 = vmatprep.mubr.bf16.mxu1 %v6098_v36  ;;  %9501 = vmatprep.mubr.bf16.mxu0 %v6189_v53  ;;  %v6198_v0 = vld [vmem:[#allocation6 + $0x7d8] sm:$0xff]  ;;  %5943 = vst.msk [vmem:[#allocation6 + $0x820] sm:$0xff] %vm2841_vm3, %v5876_v3  ;;  %v5878_v5 = vpop.permute.xlu1 %5877  ;;  %v6115_v53 = vld [vmem:[#allocation6 + $0x540] sm:$0xff] }
 0x532   :  { %v13284_v30 = vpop.f32.mrb[122].mxu0  ;;  %5944 = vst.msk [vmem:[#allocation6 + $0x868] sm:$0xff] %vm2841_vm3, %v5878_v5 }
 0x533   :  { %14803 = vst [vmem:[#allocation15_spill] sm:$0xff] %v13284_v30  ;;  %v7033_v38 = vpop.f32.mrb[123].mxu0 }
 0x534   :  { %v5496_v32 = vpop.permute.xlu0 %5495 }
 0x535   :  { %9502 = vmatmul.mubr.bf16.gmra.mrb[212].mxu0 %v6198_v0  ;;  %5561 = vst.msk [vmem:[#allocation6 + $0x8a8] sm:$0xff] %vm2841_vm3, %v5496_v32  ;;  %v5112_v50 = vpop.permute.xlu1 %5111  ;;  %v6125_v0 = vld [vmem:[#allocation6 + $0x590] sm:$0xff] }
 0x536   :  { %5177 = vst.msk [vmem:[#allocation6 + $0x8a0] sm:$0xff] %vm2841_vm3, %v5112_v50  ;;  %v6124_v50 = vld [vmem:[#allocation6 + $0x588] sm:$0xff] }
 0x538   :  { %v13288_v61 = vpop.f32.mrb[124].mxu0  ;;  %7846 = vmatmul.mubr.bf16.gmra.mrb[48].mxu1 %v6097_v46  ;;  %v6207_v42 = vld [vmem:[#allocation6 + $0x820] sm:$0xff]  ;;  %v5880_v20 = vpop.permute.xlu0 %5879 }
 0x539   :  { %14804 = vst [vmem:[#allocation16_spill] sm:$0xff] %v13288_v61  ;;  %v7038_v25 = vpop.f32.mrb[125].mxu0  ;;  %7853 = vmatprep.mubr.bf16.mxu1 %v6107_v24  ;;  %9505 = vmatprep.mubr.bf16.mxu0 %v6207_v42  ;;  %v6216_v21 = vld [vmem:[#allocation6 + $0x868] sm:$0xff]  ;;  %5945 = vst.msk [vmem:[#allocation6 + $0x8b0] sm:$0xff] %vm2841_vm3, %v5880_v20  ;;  %v5882_v15 = vpop.permute.xlu1 %5881 }
 0x53a   :  { %v13292_v6 = vpop.f32.mrb[126].mxu0  ;;  %5946 = vst.msk [vmem:[#allocation6 + $0x8f8] sm:$0xff] %vm2841_vm3, %v5882_v15  ;;  %v6134_v25 = vld [vmem:[#allocation6 + $0x5d8] sm:$0xff] }
 0x53b   :  { %14805 = vst [vmem:[#allocation17_spill] sm:$0xff] %v13292_v6  ;;  %v7041_v10 = vpop.f32.mrb[127].mxu0 }
 0x53c   :  { %v5498_v16 = vpop.permute.xlu0 %5497 }
 0x53d   :  { %9506 = vmatmul.mubr.bf16.gmra.mrb[216].mxu0 %v6216_v21  ;;  %5562 = vst.msk [vmem:[#allocation6 + $0x8f0] sm:$0xff] %vm2841_vm3, %v5498_v16  ;;  %v5114_v12 = vpop.permute.xlu1 %5113  ;;  %v6133_v21 = vld [vmem:[#allocation6 + $0x5d0] sm:$0xff]  ;;  %v6143_v16 = vld [vmem:[#allocation6 + $0x620] sm:$0xff] }
 0x53e   :  { %5178 = vst.msk [vmem:[#allocation6 + $0x8e8] sm:$0xff] %vm2841_vm3, %v5114_v12 }
 0x540   :  { %v13296_v47 = vpop.f32.mrb[128].mxu0  ;;  %7854 = vmatmul.mubr.bf16.gmra.mrb[52].mxu1 %v6106_v23  ;;  %v6225_v35 = vld [vmem:[#allocation6 + $0x8b0] sm:$0xff] }
 0x541   :  { %14806 = vst [vmem:[#allocation18_spill] sm:$0xff] %v13296_v47  ;;  %v7046_v26 = vpop.f32.mrb[129].mxu0  ;;  %7861 = vmatprep.mubr.bf16.mxu1 %v6116_v48  ;;  %9509 = vmatprep.mubr.bf16.mxu0 %v6225_v35  ;;  %v6234_v38 = vld [vmem:[#allocation6 + $0x8f8] sm:$0xff]  ;;  %v6152_v35 = vld [vmem:[#allocation6 + $0x668] sm:$0xff] }
 0x542   :  { %v13300_v17 = vpop.f32.mrb[130].mxu0  ;;  %v6142_v26 = vld [vmem:[#allocation6 + $0x618] sm:$0xff] }
 0x543   :  { %14807 = vst [vmem:[#allocation19_spill] sm:$0xff] %v13300_v17  ;;  %v7049_v36 = vpop.f32.mrb[131].mxu0 }
 0x545   :  { %9510 = vmatmul.mubr.bf16.gmra.mrb[220].mxu0 %v6234_v38 }
 0x548   :  { %v13302_v3 = vpop.f32.mrb[132].mxu0  ;;  %7862 = vmatmul.mubr.bf16.gmra.mrb[56].mxu1 %v6115_v53 }
 0x549   :  { %14808 = vst [vmem:[#allocation20_spill] sm:$0xff] %v13302_v3  ;;  %v7054_v5 = vpop.f32.mrb[133].mxu0  ;;  %7869 = vmatprep.mubr.bf16.mxu1 %v6125_v0 }
 0x54a   :  { %v13304_v32 = vpop.f32.mrb[134].mxu0  ;;  %v6151_v5 = vld [vmem:[#allocation6 + $0x660] sm:$0xff] }
 0x54b   :  { %14809 = vst [vmem:[#allocation21_spill] sm:$0xff] %v13304_v32  ;;  %v7057_v46 = vpop.f32.mrb[135].mxu0 }
 0x550   :  { %v13306_v24 = vpop.f32.mrb[136].mxu0  ;;  %7870 = vmatmul.mubr.bf16.gmra.mrb[60].mxu1 %v6124_v50  ;;  %v6161_v50 = vld [vmem:[#allocation6 + $0x6b0] sm:$0xff] }
 0x551   :  { %14810 = vst [vmem:[#allocation22_spill] sm:$0xff] %v13306_v24  ;;  %v7062_v10 = vpop.f32.mrb[137].mxu0  ;;  %7877 = vmatprep.mubr.bf16.mxu1 %v6134_v25 }
 0x552   :  { %v13308_v42 = vpop.f32.mrb[138].mxu0 }
 0x553   :  { %14811 = vst [vmem:[#allocation23_spill] sm:$0xff] %v13308_v42  ;;  %v7065_v20 = vpop.f32.mrb[139].mxu0 }
 0x558   :  { %v13310_v15 = vpop.f32.mrb[140].mxu0  ;;  %7878 = vmatmul.mubr.bf16.gmra.mrb[64].mxu1 %v6133_v21  ;;  %v6160_v21 = vld [vmem:[#allocation6 + $0x6a8] sm:$0xff] }
 0x559   :  { %14812 = vst [vmem:[#allocation24_spill] sm:$0xff] %v13310_v15  ;;  %v7070_v23 = vpop.f32.mrb[141].mxu0  ;;  %7885 = vmatprep.mubr.bf16.mxu1 %v6143_v16 }
 0x55a   :  { %v13312_v12 = vpop.f32.mrb[142].mxu0 }
 0x55b   :  { %14813 = vst [vmem:[#allocation25_spill] sm:$0xff] %v13312_v12  ;;  %v7073_v48 = vpop.f32.mrb[143].mxu0 }
 0x55c   :  { %v6170_v48 = vld [vmem:[#allocation6 + $0x6f8] sm:$0xff] }
 0x560   :  { %v13314_v36 = vpop.f32.mrb[144].mxu0  ;;  %7886 = vmatmul.mubr.bf16.gmra.mrb[68].mxu1 %v6142_v26 }
 0x561   :  { %14814 = vst [vmem:[#allocation26_spill] sm:$0xff] %v13314_v36  ;;  %v7078_v38 = vpop.f32.mrb[145].mxu0  ;;  %7893 = vmatprep.mubr.bf16.mxu1 %v6152_v35  ;;  %v6169_v35 = vld [vmem:[#allocation6 + $0x6f0] sm:$0xff] }
 0x562   :  { %v13316_v53 = vpop.f32.mrb[146].mxu0 }
 0x563   :  { %14815 = vst [vmem:[#allocation27_spill] sm:$0xff] %v13316_v53  ;;  %v7081_v0 = vpop.f32.mrb[147].mxu0 }
 0x568   :  { %v13318_v46 = vpop.f32.mrb[148].mxu0  ;;  %7894 = vmatmul.mubr.bf16.gmra.mrb[72].mxu1 %v6151_v5 }
 0x569   :  { %14816 = vst [vmem:[#allocation28_spill] sm:$0xff] %v13318_v46  ;;  %v7086_v25 = vpop.f32.mrb[149].mxu0  ;;  %7901 = vmatprep.mubr.bf16.mxu1 %v6161_v50 }
 0x56a   :  { %v13320_v10 = vpop.f32.mrb[150].mxu0  ;;  %v6179_v25 = vld [vmem:[#allocation6 + $0x740] sm:$0xff] }
 0x56b   :  { %14817 = vst [vmem:[#allocation29_spill] sm:$0xff] %v13320_v10  ;;  %v7089_v20 = vpop.f32.mrb[151].mxu0 }
 0x56c   :  { %v6178_v20 = vld [vmem:[#allocation6 + $0x738] sm:$0xff] }
 0x570   :  { %v13322_v16 = vpop.f32.mrb[152].mxu0  ;;  %7902 = vmatmul.mubr.bf16.gmra.mrb[76].mxu1 %v6160_v21 }
 0x571   :  { %14818 = vst [vmem:[#allocation30_spill] sm:$0xff] %v13322_v16  ;;  %v7094_v23 = vpop.f32.mrb[153].mxu0  ;;  %7909 = vmatprep.mubr.bf16.mxu1 %v6170_v48  ;;  %v6187_v48 = vld [vmem:[#allocation6 + $0x780] sm:$0xff] }
 0x572   :  { %v13324_v38 = vpop.f32.mrb[154].mxu0  ;;  %v6188_v23 = vld [vmem:[#allocation6 + $0x788] sm:$0xff] }
 0x573   :  { %14819 = vst [vmem:[#allocation31_spill] sm:$0xff] %v13324_v38  ;;  %v7097_v26 = vpop.f32.mrb[155].mxu0  ;;  %v6197_v38 = vld [vmem:[#allocation6 + $0x7d0] sm:$0xff] }
 0x578   :  { %v13326_v0 = vpop.f32.mrb[156].mxu0  ;;  %7910 = vmatmul.mubr.bf16.gmra.mrb[80].mxu1 %v6169_v35  ;;  %v13333_v35 = vld [vmem:[%s14756_s5] ss:$0 sm:$0xff] }
 0x579   :  { %14820 = vst [vmem:[#allocation32_spill] sm:$0xff] %v13326_v0  ;;  %v7102_v46 = vpop.f32.mrb[157].mxu0  ;;  %7917 = vmatprep.mubr.bf16.mxu1 %v6179_v25  ;;  %v6909_v37 = vadd.f32 %v13333_v35, %v13137_v18 }
 0x57a   :  { %v13328_v53 = vpop.f32.mrb[158].mxu0 }
 0x57b   :  { %14821 = vst [vmem:[#allocation33_spill] sm:$0xff] %v13328_v53  ;;  %v7105_v5 = vpop.f32.mrb[159].mxu0 }
 0x580   :  { %v7141_v50 = vpop.f32.mrb[32].mxu0  ;;  %7918 = vmatmul.mubr.bf16.gmra.mrb[84].mxu1 %v6178_v20 }
 0x581   :  { %v7143_v16 = vpop.f32.mrb[33].mxu0  ;;  %7925 = vmatprep.mubr.bf16.mxu1 %v6188_v23 }
 0x582   :  { %v7144_v10 = vpop.f32.mrb[34].mxu0  ;;  %v9577_v16 = vadd.f32 %v13333_v35, %v7141_v50 }
 0x583   :  { %v7146_v36 = vpop.f32.mrb[35].mxu0 }
 0x584   :  { %v9579_v36 = vadd.f32 %v13333_v35, %v7144_v10 }
 0x588   :  { %v7149_v21 = vpop.f32.mrb[36].mxu0  ;;  %7926 = vmatmul.mubr.bf16.gmra.mrb[88].mxu1 %v6187_v48  ;;  %v6206_v48 = vld [vmem:[#allocation6 + $0x818] sm:$0xff] }
 0x589   :  { %v7151_v26 = vpop.f32.mrb[37].mxu0  ;;  %7933 = vmatprep.mubr.bf16.mxu1 %v6197_v38  ;;  %v9581_v38 = vadd.f32 %v13333_v35, %v7149_v21 }
 0x58a   :  { %v7152_v0 = vpop.f32.mrb[38].mxu0  ;;  %v6196_v26 = vld [vmem:[#allocation6 + $0x7c8] sm:$0xff] }
 0x58b   :  { %v7154_v46 = vpop.f32.mrb[39].mxu0  ;;  %v7719_v25 = vpop.f32.mrb[112].mxu1  ;;  %v9583_v50 = vadd.f32 %v13333_v35, %v7152_v0 }
 0x58c   :  { %v9578_v5 = vadd.f32 %v9577_v16, %v7719_v25  ;;  %v7721_v20 = vpop.f32.mrb[113].mxu1 }
 0x58d   :  { %v7722_v53 = vpop.f32.mrb[114].mxu1  ;;  %v6205_v20 = vld [vmem:[#allocation6 + $0x810] sm:$0xff] }
 0x58e   :  { %v9580_v12 = vadd.f32 %v9579_v36, %v7722_v53  ;;  %v7724_v46 = vpop.f32.mrb[115].mxu1 }
 0x590   :  { %v7157_v23 = vpop.f32.mrb[40].mxu0  ;;  %7934 = vmatmul.mubr.bf16.gmra.mrb[92].mxu1 %v6196_v26 }
 0x591   :  { %v7159_v15 = vpop.f32.mrb[41].mxu0  ;;  %7941 = vmatprep.mubr.bf16.mxu1 %v6206_v48 }
 0x592   :  { %v7160_v42 = vpop.f32.mrb[42].mxu0  ;;  %v6215_v15 = vld [vmem:[#allocation6 + $0x860] sm:$0xff] }
 0x593   :  { %v7162_v24 = vpop.f32.mrb[43].mxu0  ;;  %v7727_v32 = vpop.f32.mrb[116].mxu1  ;;  %v9587_v21 = vadd.f32 %v13333_v35, %v7160_v42 }
 0x594   :  { %v9582_v3 = vadd.f32 %v9581_v38, %v7727_v32  ;;  %v7729_v10 = vpop.f32.mrb[117].mxu1  ;;  %v9585_v24 = vadd.f32 %v13333_v35, %v7157_v23 }
 0x595   :  { %v7730_v25 = vpop.f32.mrb[118].mxu1  ;;  %v6214_v10 = vld [vmem:[#allocation6 + $0x858] sm:$0xff] }
 0x596   :  { %v9584_v17 = vadd.f32 %v9583_v50, %v7730_v25  ;;  %v7732_v53 = vpop.f32.mrb[119].mxu1  ;;  %v6224_v25 = vld [vmem:[#allocation6 + $0x8a8] sm:$0xff] }
 0x598   :  { %v7165_v16 = vpop.f32.mrb[44].mxu0  ;;  %7942 = vmatmul.mubr.bf16.gmra.mrb[96].mxu1 %v6205_v20 }
 0x599   :  { %v7167_v47 = vpop.f32.mrb[45].mxu0  ;;  %7949 = vmatprep.mubr.bf16.mxu1 %v6215_v15  ;;  %v9589_v42 = vadd.f32 %v13333_v35, %v7165_v16 }
 0x59a   :  { %v7168_v36 = vpop.f32.mrb[46].mxu0 }
 0x59b   :  { %v7170_v46 = vpop.f32.mrb[47].mxu0  ;;  %v7735_v26 = vpop.f32.mrb[120].mxu1 }
 0x59c   :  { %v9586_v48 = vadd.f32 %v9585_v24, %v7735_v26  ;;  %v7737_v0 = vpop.f32.mrb[121].mxu1  ;;  %v9591_v26 = vadd.f32 %v13333_v35, %v7168_v36  ;;  %v6885_v36 = vadd.f32 %v13333_v35, %v13085_v55  ;;  %v6893_v55 = vadd.f32 %v13333_v35, %v13098_v59 }
 0x59d   :  { %v7738_v32 = vpop.f32.mrb[122].mxu1  ;;  %v6901_v59 = vadd.f32 %v13333_v35, %v13119_v51 }
 0x59e   :  { %v9588_v6 = vadd.f32 %v9587_v21, %v7738_v32  ;;  %v7740_v47 = vpop.f32.mrb[123].mxu1 }
 0x5a0   :  { %v9451_v38 = vpop.f32.mrb[160].mxu0  ;;  %7950 = vmatmul.mubr.bf16.gmra.mrb[100].mxu1 %v6214_v10  ;;  %v6233_v10 = vld [vmem:[#allocation6 + $0x8f0] sm:$0xff] }
 0x5a1   :  { %v13341_v61 = vadd.f32 %v9582_v3, %v9451_v38  ;;  %v8008_v50 = vpop.f32.mrb[161].mxu0  ;;  %7957 = vmatprep.mubr.bf16.mxu1 %v6224_v25  ;;  %v6223_v38 = vld [vmem:[#allocation6 + $0x8a0] sm:$0xff] }
 0x5a2   :  { %v13343_v53 = vadd.f32 %v9578_v5, %v8008_v50  ;;  %v9452_v20 = vpop.f32.mrb[162].mxu0 }
 0x5a3   :  { %v13345_v15 = vadd.f32 %v9584_v17, %v9452_v20  ;;  %v8011_v23 = vpop.f32.mrb[163].mxu0  ;;  %v7743_v24 = vpop.f32.mrb[124].mxu1 }
 0x5a4   :  { %14822 = vst [vmem:[#allocation34_spill] sm:$0xff] %v13343_v53  ;;  %v13347_v46 = vadd.f32 %v9580_v12, %v8011_v23  ;;  %v9590_v3 = vadd.f32 %v9589_v42, %v7743_v24  ;;  %v7745_v21 = vpop.f32.mrb[125].mxu1  ;;  %v6888_v24 = vadd.f32 %v13333_v35, %v13091_v13  ;;  %v6896_v13 = vadd.f32 %v13333_v35, %v13106_v39 }
 0x5a5   :  { %14823 = vst [vmem:[#allocation35_spill] sm:$0xff] %v13345_v15  ;;  %v7746_v0 = vpop.f32.mrb[126].mxu1  ;;  %v6904_v39 = vadd.f32 %v13333_v35, %v13127_v62  ;;  %v8263_v62 = vsel %vm1929_vm0, %v13343_v53, 0.0 }
 0x5a6   :  { %14824 = vst [vmem:[#allocation36_spill] sm:$0xff] %v13347_v46  ;;  %v9592_v5 = vadd.f32 %v9591_v26, %v7746_v0  ;;  %v7748_v17 = vpop.f32.mrb[127].mxu1  ;;  %v6232_v0 = vld [vmem:[#allocation6 + $0x8e8] sm:$0xff] }
 0x5a8   :  { %v9455_v32 = vpop.f32.mrb[164].mxu0  ;;  %7958 = vmatmul.mubr.bf16.gmra.mrb[104].mxu1 %v6223_v38 }
 0x5a9   :  { %v13351_v47 = vadd.f32 %v9590_v3, %v9455_v32  ;;  %v8024_v50 = vpop.f32.mrb[165].mxu0  ;;  %7965 = vmatprep.mubr.bf16.mxu1 %v6233_v10 }
 0x5aa   :  { %v13353_v20 = vadd.f32 %v9586_v48, %v8024_v50  ;;  %v9456_v12 = vpop.f32.mrb[166].mxu0 }
 0x5ab   :  { %14825 = vst [vmem:[#allocation37_spill] sm:$0xff] %v13351_v47  ;;  %v13355_v25 = vadd.f32 %v9592_v5, %v9456_v12  ;;  %v8027_v16 = vpop.f32.mrb[167].mxu0  ;;  %v7751_v42 = vpop.f32.mrb[0].mxu1 }
 0x5ac   :  { %14826 = vst [vmem:[#allocation38_spill] sm:$0xff] %v13353_v20  ;;  %v13357_v23 = vadd.f32 %v9588_v6, %v8027_v16  ;;  %v9594_v26 = vadd.f32 %v7751_v42, %v6885_v36  ;;  %v7753_v3 = vpop.f32.mrb[1].mxu1 }
 0x5ad   :  { %14827 = vst [vmem:[#allocation39_spill] sm:$0xff] %v13355_v25  ;;  %v7754_v21 = vpop.f32.mrb[2].mxu1 }
 0x5ae   :  { %14828 = vst [vmem:[#allocation40_spill] sm:$0xff] %v13357_v23  ;;  %v9596_v32 = vadd.f32 %v7754_v21, %v6888_v24  ;;  %v7756_v5 = vpop.f32.mrb[3].mxu1 }
 0x5b0   :  { %v9459_v48 = vpop.f32.mrb[168].mxu0  ;;  %7966 = vmatmul.mubr.bf16.gmra.mrb[108].mxu1 %v6232_v0 }
 0x5b1   :  { %v8040_v17 = vpop.f32.mrb[169].mxu0 }
 0x5b2   :  { %v13363_v38 = vadd.f32 %v9594_v26, %v8040_v17  ;;  %v9460_v6 = vpop.f32.mrb[170].mxu0 }
 0x5b3   :  { %v8043_v50 = vpop.f32.mrb[171].mxu0  ;;  %v7759_v12 = vpop.f32.mrb[4].mxu1 }
 0x5b4   :  { %14829 = vst [vmem:[#allocation41_spill] sm:$0xff] %v13363_v38  ;;  %v13365_v10 = vadd.f32 %v9596_v32, %v8043_v50  ;;  %v9598_v16 = vadd.f32 %v7759_v12, %v6893_v55  ;;  %v7761_v36 = vpop.f32.mrb[5].mxu1 }
 0x5b5   :  { %v7762_v42 = vpop.f32.mrb[6].mxu1 }
 0x5b6   :  { %14830 = vst [vmem:[#allocation42_spill] sm:$0xff] %v13365_v10  ;;  %v13371_v3 = vadd.f32 %v9598_v16, %v9459_v48  ;;  %v9600_v26 = vadd.f32 %v7762_v42, %v6896_v13  ;;  %v7764_v21 = vpop.f32.mrb[7].mxu1 }
 0x5b8   :  { %v9463_v24 = vpop.f32.mrb[172].mxu0  ;;  %14831 = vst [vmem:[#allocation43_spill] sm:$0xff] %v13371_v3  ;;  %v13373_v17 = vadd.f32 %v9600_v26, %v9460_v6  ;;  %v8264_v6 = vsel %vm1929_vm0, %v13347_v46, 0.0 }
 0x5b9   :  { %v8056_v5 = vpop.f32.mrb[173].mxu0 }
 0x5ba   :  { %v9464_v0 = vpop.f32.mrb[174].mxu0 }
 0x5bb   :  { %v8059_v32 = vpop.f32.mrb[175].mxu0  ;;  %v7767_v50 = vpop.f32.mrb[8].mxu1 }
 0x5bc   :  { %v9602_v55 = vadd.f32 %v7767_v50, %v6901_v59  ;;  %v7769_v12 = vpop.f32.mrb[9].mxu1  ;;  %v8265_v59 = vadd.f32 %v8264_v6, %v8263_v62 }
 0x5bd   :  { %v7770_v36 = vpop.f32.mrb[10].mxu1 }
 0x5be   :  { %v9604_v48 = vadd.f32 %v7770_v36, %v6904_v39  ;;  %v13379_v16 = vadd.f32 %v9602_v55, %v8056_v5  ;;  %v7772_v13 = vpop.f32.mrb[11].mxu1  ;;  %v6912_v5 = vadd.f32 %v13333_v35, %v13145_v9  ;;  %v6917_v9 = vadd.f32 %v13333_v35, %v13155_v28 }
 0x5c0   :  { %v9467_v30 = vpop.f32.mrb[176].mxu0  ;;  %14832 = vst [vmem:[#allocation44_spill] sm:$0xff] %v13379_v16  ;;  %v13383_v26 = vadd.f32 %v9604_v48, %v8059_v32  ;;  %v8266_v32 = vsel %vm1929_vm0, %v13341_v61, 0.0 }
 0x5c1   :  { %v8072_v42 = vpop.f32.mrb[177].mxu0  ;;  %v8267_v2 = vadd.f32 %v8266_v32, %v8265_v59 }
 0x5c2   :  { %v9468_v21 = vpop.f32.mrb[178].mxu0  ;;  %14833 = vst [vmem:[#allocation45_spill] sm:$0xff] %v13383_v26 }
 0x5c3   :  { %v8075_v51 = vpop.f32.mrb[179].mxu0  ;;  %v7775_v50 = vpop.f32.mrb[12].mxu1 }
 0x5c4   :  { %v9606_v39 = vadd.f32 %v7775_v50, %v6909_v37  ;;  %v7777_v55 = vpop.f32.mrb[13].mxu1  ;;  %v8268_v37 = vsel %vm1929_vm0, %v13345_v15, 0.0 }
 0x5c5   :  { %v7778_v12 = vpop.f32.mrb[14].mxu1  ;;  %v8269_v50 = vadd.f32 %v8268_v37, %v8267_v2 }
 0x5c6   :  { %v13395_v48 = vadd.f32 %v9606_v39, %v9463_v24  ;;  %v9608_v13 = vadd.f32 %v7778_v12, %v6912_v5  ;;  %v7780_v18 = vpop.f32.mrb[15].mxu1  ;;  %v6920_v24 = vadd.f32 %v13333_v35, %v13163_v44  ;;  %v8270_v5 = vsel %vm1929_vm0, %v13353_v20, 0.0 }
 0x5c7   :  { %v8271_v15 = vadd.f32 %v8270_v5, %v8269_v50  ;;  %v8272_v44 = vsel %vm1929_vm0, %v13357_v23, 0.0 }
 0x5c8   :  { %v13391_v36 = vpop.f32.mrb[180].mxu0  ;;  %14834 = vst [vmem:[#allocation46_spill] sm:$0xff] %v13395_v48  ;;  %v13399_v6 = vadd.f32 %v9608_v13, %v9464_v0 }
 0x5c9   :  { %v8088_v46 = vpop.f32.mrb[181].mxu0 }
 0x5ca   :  { %v13397_v53 = vpop.f32.mrb[182].mxu0  ;;  %14835 = vst [vmem:[#allocation47_spill] sm:$0xff] %v13399_v6 }
 0x5cb   :  { %v8091_v62 = vpop.f32.mrb[183].mxu0  ;;  %v7783_v55 = vpop.f32.mrb[16].mxu1 }
 0x5cc   :  { %v9610_v59 = vadd.f32 %v7783_v55, %v6917_v9  ;;  %v7785_v39 = vpop.f32.mrb[17].mxu1  ;;  %v6925_v9 = vadd.f32 %v13333_v35, %v13170_v19  ;;  %v8273_v55 = vadd.f32 %v8272_v44, %v8271_v15 }
 0x5cd   :  { %v7786_v12 = vpop.f32.mrb[18].mxu1 }
 0x5ce   :  { %v9612_v32 = vadd.f32 %v7786_v12, %v6920_v24  ;;  %v13411_v13 = vadd.f32 %v9610_v59, %v8072_v42  ;;  %v7788_v28 = vpop.f32.mrb[19].mxu1  ;;  %v6928_v42 = vadd.f32 %v13333_v35, %v13174_v31  ;;  %v8274_v12 = vsel %vm1929_vm0, %v13351_v47, 0.0 }
 0x5cf   :  { %v8275_v19 = vadd.f32 %v8274_v12, %v8273_v55  ;;  %v8278_v55 = vsel %vm1929_vm0, %v13363_v38, 0.0 }
 0x5d0   :  { %v13409_v0 = vpop.f32.mrb[184].mxu0  ;;  %v13419_v37 = vadd.f32 %v9612_v32, %v8075_v51 }
 0x5d1   :  { %v13413_v18 = vpop.f32.mrb[185].mxu0 }
 0x5d2   :  { %v13415_v2 = vpop.f32.mrb[186].mxu0  ;;  %14836 = vst [vmem:[#allocation48_spill] sm:$0xff] %v13419_v37 }
 0x5d3   :  { %v13421_v20 = vpop.f32.mrb[187].mxu0  ;;  %v7791_v24 = vpop.f32.mrb[20].mxu1 }
 0x5d4   :  { %v9614_v59 = vadd.f32 %v7791_v24, %v6925_v9  ;;  %v7793_v39 = vpop.f32.mrb[21].mxu1  ;;  %v6933_v9 = vadd.f32 %v13333_v35, %v13182_v43  ;;  %v8276_v24 = vsel %vm1929_vm0, %v13355_v25, 0.0 }
 0x5d5   :  { %v7794_v50 = vpop.f32.mrb[22].mxu1  ;;  %v8277_v39 = vadd.f32 %v8276_v24, %v8275_v19 }
 0x5d6   :  { %v13431_v51 = vadd.f32 %v9614_v59, %v9467_v30  ;;  %v9616_v32 = vadd.f32 %v7794_v50, %v6928_v42  ;;  %v7796_v28 = vpop.f32.mrb[23].mxu1  ;;  %v6936_v42 = vadd.f32 %v13333_v35, %v13185_v27  ;;  %v8280_v27 = vsel %vm1929_vm0, %v13365_v10, 0.0 }
 0x5d7   :  { %v8279_v25 = vadd.f32 %v8278_v55, %v8277_v39  ;;  %v6944_v39 = vadd.f32 %v13333_v35, %v13193_v1  ;;  %v8286_v1 = vsel %vm1929_vm0, %v13379_v16, 0.0 }
 0x5d8   :  { %v13427_v5 = vpop.f32.mrb[188].mxu0  ;;  %14837 = vst [vmem:[#allocation49_spill] sm:$0xff] %v13431_v51  ;;  %v13437_v44 = vadd.f32 %v9616_v32, %v9468_v21 }
 0x5d9   :  { %v13433_v23 = vpop.f32.mrb[189].mxu0 }
 0x5da   :  { %v13435_v15 = vpop.f32.mrb[190].mxu0 }
 0x5db   :  { %v13439_v31 = vpop.f32.mrb[191].mxu0  ;;  %v7799_v30 = vpop.f32.mrb[24].mxu1 }
 0x5dc   :  { %v9618_v59 = vadd.f32 %v7799_v30, %v6933_v9  ;;  %v7801_v50 = vpop.f32.mrb[25].mxu1  ;;  %v6941_v9 = vadd.f32 %v13333_v35, %v13190_v54  ;;  %v8281_v30 = vadd.f32 %v8280_v27, %v8279_v25 }
 0x5dd   :  { %v7802_v21 = vpop.f32.mrb[26].mxu1 }
 0x5de   :  { %v9620_v32 = vadd.f32 %v7802_v21, %v6936_v42  ;;  %v13451_v28 = vadd.f32 %v9618_v59, %v8088_v46  ;;  %v7804_v43 = vpop.f32.mrb[27].mxu1  ;;  %v8282_v46 = vsel %vm1929_vm0, %v13371_v3, 0.0 }
 0x5df   :  { %v8283_v50 = vadd.f32 %v8282_v46, %v8281_v30  ;;  %v6949_v30 = vadd.f32 %v13333_v35, %v13198_v11 }
 0x5e0   :  { %v13449_v12 = vpop.f32.mrb[192].mxu0  ;;  %14838 = vst [vmem:[#allocation50_spill] sm:$0xff] %v13451_v28  ;;  %v13459_v24 = vadd.f32 %v9620_v32, %v8091_v62  ;;  %v8284_v62 = vsel %vm1929_vm0, %v13373_v17, 0.0 }
 0x5e1   :  { %v13453_v47 = vpop.f32.mrb[193].mxu0  ;;  %v8285_v46 = vadd.f32 %v8284_v62, %v8283_v50 }
 0x5e2   :  { %v13455_v19 = vpop.f32.mrb[194].mxu0  ;;  %14839 = vst [vmem:[#allocation51_spill] sm:$0xff] %v13459_v24 }
 0x5e3   :  { %v13461_v38 = vpop.f32.mrb[195].mxu0  ;;  %v7807_v42 = vpop.f32.mrb[28].mxu1 }
 0x5e4   :  { %v9622_v55 = vadd.f32 %v7807_v42, %v6941_v9  ;;  %v7809_v59 = vpop.f32.mrb[29].mxu1 }
 0x5e5   :  { %v7810_v21 = vpop.f32.mrb[30].mxu1 }
 0x5e6   :  { %v13474_v32 = vadd.f32 %v9622_v55, %v13391_v36  ;;  %v9624_v54 = vadd.f32 %v7810_v21, %v6944_v39  ;;  %v7812_v10 = vpop.f32.mrb[31].mxu1  ;;  %v8287_v36 = vadd.f32 %v8286_v1, %v8285_v46  ;;  %v8288_v39 = vsel %vm1929_vm0, %v13383_v26, 0.0 }
 0x5e7   :  { %v6952_v10 = vadd.f32 %v13333_v35, %v13201_v29 }
 0x5e8   :  { %v13469_v43 = vpop.f32.mrb[196].mxu0  ;;  %14840 = vst [vmem:[#allocation52_spill] sm:$0xff] %v13474_v32  ;;  %v13483_v27 = vadd.f32 %v9624_v54, %v13397_v53  ;;  %v8290_v53 = vsel %vm1929_vm0, %v13395_v48, 0.0  ;;  %v8289_v1 = vadd.f32 %v8288_v39, %v8287_v36  ;;  %v8294_v36 = vsel %vm1929_vm0, %v13411_v13, 0.0 }
 0x5e9   :  { %v13476_v3 = vpop.f32.mrb[197].mxu0 }
 0x5ea   :  { %v13478_v25 = vpop.f32.mrb[198].mxu0  ;;  %14841 = vst [vmem:[#allocation53_spill] sm:$0xff] %v13483_v27 }
 0x5eb   :  { %v13485_v9 = vpop.f32.mrb[199].mxu0  ;;  %v7815_v42 = vpop.f32.mrb[32].mxu1 }
 0x5ec   :  { %v9626_v55 = vadd.f32 %v7815_v42, %v6949_v30  ;;  %v7817_v59 = vpop.f32.mrb[33].mxu1  ;;  %v8291_v42 = vadd.f32 %v8290_v53, %v8289_v1 }
 0x5ed   :  { %v7818_v21 = vpop.f32.mrb[34].mxu1  ;;  %v6957_v59 = vadd.f32 %v13333_v35, %v13206_v49 }
 0x5ee   :  { %v9628_v50 = vadd.f32 %v7818_v21, %v6952_v10  ;;  %v13498_v62 = vadd.f32 %v9626_v55, %v13413_v18  ;;  %v7820_v11 = vpop.f32.mrb[35].mxu1  ;;  %v8292_v10 = vsel %vm1929_vm0, %v13399_v6, 0.0  ;;  %v6960_v55 = vadd.f32 %v13333_v35, %v13209_v14 }
 0x5ef   :  { %v8296_v14 = vsel %vm1929_vm0, %v13419_v37, 0.0 }
 0x5f0   :  { %v13493_v16 = vpop.f32.mrb[200].mxu0  ;;  %v13505_v46 = vadd.f32 %v9628_v50, %v13421_v20  ;;  %v8293_v20 = vadd.f32 %v8292_v10, %v8291_v42  ;;  %v6965_v10 = vadd.f32 %v13333_v35, %v13214_v60 }
 0x5f1   :  { %v13500_v54 = vpop.f32.mrb[201].mxu0 }
 0x5f2   :  { %v13502_v29 = vpop.f32.mrb[202].mxu0  ;;  %14842 = vst [vmem:[#allocation54_spill] sm:$0xff] %v13505_v46  ;;  %v8295_v6 = vadd.f32 %v8294_v36, %v8293_v20  ;;  %v6968_v36 = vadd.f32 %v13333_v35, %v13217_v57  ;;  %v8302_v57 = vsel %vm1929_vm0, %v13451_v28, 0.0 }
 0x5f3   :  { %v13507_v30 = vpop.f32.mrb[203].mxu0  ;;  %v7823_v18 = vpop.f32.mrb[36].mxu1 }
 0x5f4   :  { %v9630_v39 = vadd.f32 %v7823_v18, %v6957_v59  ;;  %v7825_v21 = vpop.f32.mrb[37].mxu1  ;;  %v8297_v18 = vadd.f32 %v8296_v14, %v8295_v6 }
 0x5f5   :  { %v7826_v50 = vpop.f32.mrb[38].mxu1 }
 0x5f6   :  { %v13520_v53 = vadd.f32 %v9630_v39, %v13409_v0  ;;  %v9632_v49 = vadd.f32 %v7826_v50, %v6960_v55  ;;  %v7828_v1 = vpop.f32.mrb[39].mxu1  ;;  %v8298_v0 = vsel %vm1929_vm0, %v13431_v51, 0.0 }
 0x5f7   :  { %v8299_v20 = vadd.f32 %v8298_v0, %v8297_v18  ;;  %v6973_v18 = vadd.f32 %v13333_v35, %v13222_v45 }
 0x5f8   :  { %v13517_v11 = vpop.f32.mrb[204].mxu0  ;;  %14843 = vst [vmem:[#allocation55_spill] sm:$0xff] %v13520_v53  ;;  %v13529_v59 = vadd.f32 %v9632_v49, %v13415_v2  ;;  %v8300_v2 = vsel %vm1929_vm0, %v13437_v44, 0.0 }
 0x5f9   :  { %v13522_v48 = vpop.f32.mrb[205].mxu0  ;;  %v8301_v0 = vadd.f32 %v8300_v2, %v8299_v20 }
 0x5fa   :  { %v13524_v26 = vpop.f32.mrb[206].mxu0 }
 0x5fb   :  { %v13531_v42 = vpop.f32.mrb[207].mxu0  ;;  %v7831_v55 = vpop.f32.mrb[40].mxu1 }
 0x5fc   :  { %v9634_v39 = vadd.f32 %v7831_v55, %v6965_v10  ;;  %v7833_v21 = vpop.f32.mrb[41].mxu1  ;;  %v8303_v55 = vadd.f32 %v8302_v57, %v8301_v0 }
 0x5fd   :  { %v7834_v50 = vpop.f32.mrb[42].mxu1 }
 0x5fe   :  { %v9636_v49 = vadd.f32 %v7834_v50, %v6968_v36  ;;  %v13544_v60 = vadd.f32 %v9634_v39, %v13433_v23  ;;  %v7836_v37 = vpop.f32.mrb[43].mxu1  ;;  %v8304_v36 = vsel %vm1929_vm0, %v13459_v24, 0.0 }
 0x5ff   :  { %v6976_v37 = vadd.f32 %v13333_v35, %v13225_v58  ;;  %v8305_v57 = vadd.f32 %v8304_v36, %v8303_v55  ;;  %v8310_v55 = vsel %vm1929_vm0, %v13498_v62, 0.0 }
 0x600   :  { %v13539_v1 = vpop.f32.mrb[208].mxu0  ;;  %v13553_v14 = vadd.f32 %v9636_v49, %v13439_v31  ;;  %v8306_v31 = vsel %vm1929_vm0, %v13474_v32, 0.0 }
 0x601   :  { %v13546_v51 = vpop.f32.mrb[209].mxu0 }
 0x602   :  { %v13548_v6 = vpop.f32.mrb[210].mxu0 }
 0x603   :  { %v13555_v10 = vpop.f32.mrb[211].mxu0  ;;  %v7839_v23 = vpop.f32.mrb[44].mxu1 }
 0x604   :  { %v9638_v39 = vadd.f32 %v7839_v23, %v6973_v18  ;;  %v7841_v21 = vpop.f32.mrb[45].mxu1  ;;  %v8307_v23 = vadd.f32 %v8306_v31, %v8305_v57 }
 0x605   :  { %v7842_v50 = vpop.f32.mrb[46].mxu1  ;;  %v6981_v21 = vadd.f32 %v13333_v35, %v13230_v7 }
 0x606   :  { %v13568_v20 = vadd.f32 %v9638_v39, %v13427_v5  ;;  %v9640_v45 = vadd.f32 %v7842_v50, %v6976_v37  ;;  %v7844_v2 = vpop.f32.mrb[47].mxu1  ;;  %v8308_v5 = vsel %vm1929_vm0, %v13483_v27, 0.0  ;;  %v6984_v37 = vadd.f32 %v13333_v35, %v13233_v52 }
 0x607   :  { %v8312_v52 = vsel %vm1929_vm0, %v13505_v46, 0.0 }
 0x608   :  { %v13563_v28 = vpop.f32.mrb[212].mxu0  ;;  %v13575_v0 = vadd.f32 %v9640_v45, %v13435_v15  ;;  %v8309_v15 = vadd.f32 %v8308_v5, %v8307_v23  ;;  %v6989_v5 = vadd.f32 %v13333_v35, %v13238_v63 }
 0x609   :  { %v13570_v49 = vpop.f32.mrb[213].mxu0 }
 0x60a   :  { %v13572_v58 = vpop.f32.mrb[214].mxu0  ;;  %v8311_v27 = vadd.f32 %v8310_v55, %v8309_v15  ;;  %v6992_v55 = vadd.f32 %v13333_v35, %v13241_v41  ;;  %v8318_v41 = vsel %vm1929_vm0, %v13544_v60, 0.0 }
 0x60b   :  { %v13577_v18 = vpop.f32.mrb[215].mxu0  ;;  %v7847_v39 = vpop.f32.mrb[48].mxu1 }
 0x60c   :  { %v9642_v36 = vadd.f32 %v7847_v39, %v6981_v21  ;;  %v7849_v50 = vpop.f32.mrb[49].mxu1  ;;  %v8313_v39 = vadd.f32 %v8312_v52, %v8311_v27 }
 0x60d   :  { %v7850_v45 = vpop.f32.mrb[50].mxu1 }
 0x60e   :  { %v9644_v31 = vadd.f32 %v7850_v45, %v6984_v37  ;;  %v13590_v57 = vadd.f32 %v9642_v36, %v13453_v47  ;;  %v7852_v7 = vpop.f32.mrb[51].mxu1  ;;  %v8314_v47 = vsel %vm1929_vm0, %v13520_v53, 0.0 }
 0x60f   :  { %v8315_v15 = vadd.f32 %v8314_v47, %v8313_v39  ;;  %v6997_v39 = vadd.f32 %v13333_v35, %v13245_v40 }
 0x610   :  { %v13587_v2 = vpop.f32.mrb[216].mxu0  ;;  %v13599_v21 = vadd.f32 %v9644_v31, %v13461_v38  ;;  %v8316_v38 = vsel %vm1929_vm0, %v13529_v59, 0.0 }
 0x611   :  { %v13592_v32 = vpop.f32.mrb[217].mxu0  ;;  %v8317_v47 = vadd.f32 %v8316_v38, %v8315_v15 }
 0x612   :  { %v13594_v24 = vpop.f32.mrb[218].mxu0 }
 0x613   :  { %v13601_v23 = vpop.f32.mrb[219].mxu0  ;;  %v7855_v37 = vpop.f32.mrb[52].mxu1 }
 0x614   :  { %v9646_v36 = vadd.f32 %v7855_v37, %v6989_v5  ;;  %v7857_v50 = vpop.f32.mrb[53].mxu1 }
 0x615   :  { %v7858_v45 = vpop.f32.mrb[54].mxu1 }
 0x616   :  { %v13614_v31 = vadd.f32 %v9646_v36, %v13449_v12  ;;  %v9648_v63 = vadd.f32 %v7858_v45, %v6992_v55  ;;  %v7860_v46 = vpop.f32.mrb[55].mxu1  ;;  %v8319_v12 = vadd.f32 %v8318_v41, %v8317_v47  ;;  %v8320_v55 = vsel %vm1929_vm0, %v13553_v14, 0.0 }
 0x617   :  { %v7000_v46 = vadd.f32 %v13333_v35, %v13249_v8  ;;  %v7005_v8 = vadd.f32 %v13333_v35, %v13253_v22 }
 0x618   :  { %v13609_v7 = vpop.f32.mrb[220].mxu0  ;;  %v13623_v52 = vadd.f32 %v9648_v63, %v13455_v19  ;;  %v8322_v19 = vsel %vm1929_vm0, %v13568_v20, 0.0  ;;  %v8321_v40 = vadd.f32 %v8320_v55, %v8319_v12 }
 0x619   :  { %v13616_v53 = vpop.f32.mrb[221].mxu0 }
 0x61a   :  { %v13618_v27 = vpop.f32.mrb[222].mxu0  ;;  %v8323_v47 = vadd.f32 %v8322_v19, %v8321_v40  ;;  %v8330_v40 = vsel %vm1929_vm0, %v13614_v31, 0.0 }
 0x61b   :  { %v13625_v5 = vpop.f32.mrb[223].mxu0  ;;  %v7863_v37 = vpop.f32.mrb[56].mxu1 }
 0x61c   :  { %v9650_v36 = vadd.f32 %v7863_v37, %v6997_v39  ;;  %v7865_v50 = vpop.f32.mrb[57].mxu1  ;;  %v8324_v39 = vsel %vm1929_vm0, %v13575_v0, 0.0 }
 0x61d   :  { %v7866_v45 = vpop.f32.mrb[58].mxu1  ;;  %v7008_v50 = vadd.f32 %v13333_v35, %v13257_v4  ;;  %v8325_v12 = vadd.f32 %v8324_v39, %v8323_v47  ;;  %v7013_v4 = vadd.f32 %v13333_v35, %v13261_v33 }
 0x61e   :  { %v9652_v63 = vadd.f32 %v7866_v45, %v7000_v46  ;;  %v13636_v15 = vadd.f32 %v9650_v36, %v13476_v3  ;;  %v7868_v38 = vpop.f32.mrb[59].mxu1  ;;  %v8326_v3 = vsel %vm1929_vm0, %v13590_v57, 0.0 }
 0x61f   :  { %v8327_v22 = vadd.f32 %v8326_v3, %v8325_v12 }
 0x620   :  { %v13639_v41 = vadd.f32 %v9652_v63, %v13485_v9  ;;  %v8328_v63 = vsel %vm1929_vm0, %v13599_v21, 0.0  ;;  %v8334_v12 = vsel %vm1929_vm0, %v13636_v15, 0.0 }
 0x621   :  { %v8329_v47 = vadd.f32 %v8328_v63, %v8327_v22  ;;  %v14844_v63 = vld [vmem:[#allocation13_spill] sm:$0xff] }
 0x623   :  { %v7871_v37 = vpop.f32.mrb[60].mxu1 }
 0x624   :  { %v9654_v46 = vadd.f32 %v7871_v37, %v7005_v8  ;;  %v7873_v36 = vpop.f32.mrb[61].mxu1 }
 0x625   :  { %v7874_v55 = vpop.f32.mrb[62].mxu1 }
 0x626   :  { %v13650_v9 = vadd.f32 %v9654_v46, %v13469_v43  ;;  %v9656_v45 = vadd.f32 %v7874_v55, %v7008_v50  ;;  %v7876_v19 = vpop.f32.mrb[63].mxu1  ;;  %v7016_v43 = vadd.f32 %v13333_v35, %v13265_v34  ;;  %v8331_v50 = vadd.f32 %v8330_v40, %v8329_v47 }
 0x627   :  { %v8332_v46 = vsel %vm1929_vm0, %v13623_v52, 0.0  ;;  %v7021_v34 = vadd.f32 %v13333_v35, %v13269_v56 }
 0x628   :  { %v13655_v38 = vadd.f32 %v9656_v45, %v13478_v25  ;;  %v8333_v45 = vadd.f32 %v8332_v46, %v8331_v50  ;;  %v14845_v46 = vld [vmem:[#allocation14_spill] sm:$0xff] }
 0x62a   :  { %v8335_v19 = vadd.f32 %v8334_v12, %v8333_v45  ;;  %v14846_v45 = vld [vmem:[#allocation15_spill] sm:$0xff] }
 0x62b   :  { %v7879_v8 = vpop.f32.mrb[64].mxu1 }
 0x62c   :  { %v9658_v39 = vadd.f32 %v7879_v8, %v7013_v4  ;;  %v7881_v37 = vpop.f32.mrb[65].mxu1  ;;  %v7024_v4 = vadd.f32 %v13333_v35, %v14844_v63 }
 0x62d   :  { %v7882_v3 = vpop.f32.mrb[66].mxu1 }
 0x62e   :  { %v9660_v25 = vadd.f32 %v7882_v3, %v7016_v43  ;;  %v13666_v36 = vadd.f32 %v9658_v39, %v13500_v54  ;;  %v7884_v33 = vpop.f32.mrb[67].mxu1  ;;  %v8336_v54 = vsel %vm1929_vm0, %v13639_v41, 0.0  ;;  %v8338_v43 = vsel %vm1929_vm0, %v13650_v9, 0.0 }
 0x62f   :  { %v8337_v56 = vadd.f32 %v8336_v54, %v8335_v19  ;;  %v8340_v33 = vsel %vm1929_vm0, %v13655_v38, 0.0 }
 0x630   :  { %v13671_v55 = vadd.f32 %v9660_v25, %v13507_v30  ;;  %v7029_v25 = vadd.f32 %v13333_v35, %v14845_v46 }
 0x631   :  { %v8339_v3 = vadd.f32 %v8338_v43, %v8337_v56 }
 0x633   :  { %v7887_v22 = vpop.f32.mrb[68].mxu1  ;;  %v8341_v19 = vadd.f32 %v8340_v33, %v8339_v3 }
 0x634   :  { %v9662_v40 = vadd.f32 %v7887_v22, %v7021_v34  ;;  %v7889_v47 = vpop.f32.mrb[69].mxu1  ;;  %v7032_v34 = vadd.f32 %v13333_v35, %v14846_v45 }
 0x635   :  { %v7890_v8 = vpop.f32.mrb[70].mxu1 }
 0x636   :  { %v13682_v30 = vadd.f32 %v9662_v40, %v13493_v16  ;;  %v9664_v39 = vadd.f32 %v7890_v8, %v7024_v4  ;;  %v7892_v37 = vpop.f32.mrb[71].mxu1  ;;  %v8342_v16 = vsel %vm1929_vm0, %v13666_v36, 0.0  ;;  %v8344_v8 = vsel %vm1929_vm0, %v13671_v55, 0.0 }
 0x637   :  { %v8343_v47 = vadd.f32 %v8342_v16, %v8341_v19 }
 0x638   :  { %v13685_v50 = vadd.f32 %v9664_v39, %v13502_v29  ;;  %v14847_v39 = vld [vmem:[#allocation16_spill] sm:$0xff]  ;;  %v8346_v56 = vsel %vm1929_vm0, %v13682_v30, 0.0 }
 0x639   :  { %v7037_v37 = vadd.f32 %v13333_v35, %v14847_v39  ;;  %v8345_v3 = vadd.f32 %v8344_v8, %v8343_v47 }
 0x63a   :  { %v8348_v16 = vsel %vm1929_vm0, %v13685_v50, 0.0 }
 0x63b   :  { %v7895_v12 = vpop.f32.mrb[72].mxu1  ;;  %v8347_v45 = vadd.f32 %v8346_v56, %v8345_v3 }
 0x63c   :  { %v9666_v22 = vadd.f32 %v7895_v12, %v7029_v25  ;;  %v7897_v63 = vpop.f32.mrb[73].mxu1  ;;  %v14848_v25 = vld [vmem:[#allocation17_spill] sm:$0xff] }
 0x63d   :  { %v7898_v4 = vpop.f32.mrb[74].mxu1 }
 0x63e   :  { %v9668_v29 = vadd.f32 %v7898_v4, %v7032_v34  ;;  %v13696_v54 = vadd.f32 %v9666_v22, %v13522_v48  ;;  %v7900_v40 = vpop.f32.mrb[75].mxu1  ;;  %v7040_v48 = vadd.f32 %v13333_v35, %v14848_v25 }
 0x63f   :  { %v14849_v40 = vld [vmem:[#allocation18_spill] sm:$0xff] }
 0x640   :  { %v13701_v43 = vadd.f32 %v9668_v29, %v13531_v42  ;;  %v8350_v19 = vsel %vm1929_vm0, %v13696_v54, 0.0  ;;  %v8349_v29 = vadd.f32 %v8348_v16, %v8347_v45  ;;  %v7045_v47 = vadd.f32 %v13333_v35, %v14849_v40  ;;  %v14852_v40 = vld [vmem:[#allocation21_spill] sm:$0xff] }
 0x642   :  { %v8351_v8 = vadd.f32 %v8350_v19, %v8349_v29 }
 0x643   :  { %v7903_v46 = vpop.f32.mrb[76].mxu1 }
 0x644   :  { %v9670_v33 = vadd.f32 %v7903_v46, %v7037_v37  ;;  %v7905_v12 = vpop.f32.mrb[77].mxu1  ;;  %v14850_v37 = vld [vmem:[#allocation19_spill] sm:$0xff] }
 0x645   :  { %v7906_v34 = vpop.f32.mrb[78].mxu1  ;;  %v7048_v56 = vadd.f32 %v13333_v35, %v14850_v37 }
 0x646   :  { %v13712_v42 = vadd.f32 %v9670_v33, %v13517_v11  ;;  %v9672_v22 = vadd.f32 %v7906_v34, %v7040_v48  ;;  %v7908_v63 = vpop.f32.mrb[79].mxu1  ;;  %v8352_v11 = vsel %vm1929_vm0, %v13701_v43, 0.0 }
 0x647   :  { %v8353_v45 = vadd.f32 %v8352_v11, %v8351_v8 }
 0x648   :  { %v13717_v4 = vadd.f32 %v9672_v22, %v13524_v26  ;;  %v8354_v48 = vsel %vm1929_vm0, %v13712_v42, 0.0  ;;  %v14851_v22 = vld [vmem:[#allocation20_spill] sm:$0xff] }
 0x649   :  { %v8355_v16 = vadd.f32 %v8354_v48, %v8353_v45  ;;  %v7053_v63 = vadd.f32 %v13333_v35, %v14851_v22 }
 0x64a   :  { %v8356_v19 = vsel %vm1929_vm0, %v13717_v4, 0.0 }
 0x64b   :  { %v7911_v39 = vpop.f32.mrb[80].mxu1  ;;  %v8357_v8 = vadd.f32 %v8356_v19, %v8355_v16 }
 0x64c   :  { %v9674_v3 = vadd.f32 %v7911_v39, %v7045_v47  ;;  %v7913_v46 = vpop.f32.mrb[81].mxu1  ;;  %v7056_v47 = vadd.f32 %v13333_v35, %v14852_v40 }
 0x64d   :  { %v7914_v25 = vpop.f32.mrb[82].mxu1 }
 0x64e   :  { %v9676_v26 = vadd.f32 %v7914_v25, %v7048_v56  ;;  %v13728_v33 = vadd.f32 %v9674_v3, %v13546_v51  ;;  %v7916_v12 = vpop.f32.mrb[83].mxu1 }
 0x650   :  { %v13731_v34 = vadd.f32 %v9676_v26, %v13555_v10  ;;  %v8358_v51 = vsel %vm1929_vm0, %v13728_v33, 0.0  ;;  %v14853_v26 = vld [vmem:[#allocation22_spill] sm:$0xff] }
 0x651   :  { %v8359_v46 = vadd.f32 %v8358_v51, %v8357_v8  ;;  %v7061_v12 = vadd.f32 %v13333_v35, %v14853_v26 }
 0x652   :  { %v8360_v25 = vsel %vm1929_vm0, %v13731_v34, 0.0 }
 0x653   :  { %v7919_v29 = vpop.f32.mrb[84].mxu1  ;;  %v8361_v16 = vadd.f32 %v8360_v25, %v8359_v46 }
 0x654   :  { %v9678_v39 = vadd.f32 %v7919_v29, %v7053_v63  ;;  %v7921_v37 = vpop.f32.mrb[85].mxu1  ;;  %v14854_v63 = vld [vmem:[#allocation23_spill] sm:$0xff] }
 0x655   :  { %v7922_v56 = vpop.f32.mrb[86].mxu1 }
 0x656   :  { %v13742_v10 = vadd.f32 %v9678_v39, %v13539_v1  ;;  %v9680_v11 = vadd.f32 %v7922_v56, %v7056_v47  ;;  %v7924_v3 = vpop.f32.mrb[87].mxu1  ;;  %v7064_v1 = vadd.f32 %v13333_v35, %v14854_v63 }
 0x657   :  { %v14855_v3 = vld [vmem:[#allocation24_spill] sm:$0xff] }
 0x658   :  { %v13747_v48 = vadd.f32 %v9680_v11, %v13548_v6  ;;  %v8362_v45 = vsel %vm1929_vm0, %v13742_v10, 0.0  ;;  %v7069_v46 = vadd.f32 %v13333_v35, %v14855_v3 }
 0x659   :  { %v8363_v40 = vadd.f32 %v8362_v45, %v8361_v16 }
 0x65a   :  { %v8364_v51 = vsel %vm1929_vm0, %v13747_v48, 0.0 }
 0x65b   :  { %v7927_v22 = vpop.f32.mrb[88].mxu1  ;;  %v8365_v11 = vadd.f32 %v8364_v51, %v8363_v40 }
 0x65c   :  { %v9682_v19 = vadd.f32 %v7927_v22, %v7061_v12  ;;  %v7929_v29 = vpop.f32.mrb[89].mxu1  ;;  %v14856_v12 = vld [vmem:[#allocation25_spill] sm:$0xff] }
 0x65d   :  { %v7930_v47 = vpop.f32.mrb[90].mxu1  ;;  %v7072_v45 = vadd.f32 %v13333_v35, %v14856_v12 }
 0x65e   :  { %v9684_v6 = vadd.f32 %v7930_v47, %v7064_v1  ;;  %v13758_v39 = vadd.f32 %v9682_v19, %v13570_v49  ;;  %v7932_v37 = vpop.f32.mrb[91].mxu1 }
 0x660   :  { %v8366_v8 = vsel %vm1929_vm0, %v13758_v39, 0.0  ;;  %v13763_v56 = vadd.f32 %v9684_v6, %v13577_v18  ;;  %v14857_v6 = vld [vmem:[#allocation26_spill] sm:$0xff] }
 0x661   :  { %v8367_v25 = vadd.f32 %v8366_v8, %v8365_v11  ;;  %v7077_v37 = vadd.f32 %v13333_v35, %v14857_v6  ;;  %v14860_v6 = vld [vmem:[#allocation29_spill] sm:$0xff] }
 0x662   :  { %v8368_v49 = vsel %vm1929_vm0, %v13763_v56, 0.0 }
 0x663   :  { %v7935_v26 = vpop.f32.mrb[92].mxu1  ;;  %v8369_v29 = vadd.f32 %v8368_v49, %v8367_v25 }
 0x664   :  { %v9686_v16 = vadd.f32 %v7935_v26, %v7069_v46  ;;  %v7937_v22 = vpop.f32.mrb[93].mxu1 }
 0x665   :  { %v7938_v63 = vpop.f32.mrb[94].mxu1 }
 0x666   :  { %v13772_v1 = vadd.f32 %v9686_v16, %v13563_v28  ;;  %v9688_v18 = vadd.f32 %v7938_v63, %v7072_v45  ;;  %v7940_v19 = vpop.f32.mrb[95].mxu1  ;;  %v14858_v28 = vld [vmem:[#allocation27_spill] sm:$0xff] }
 0x667   :  { %v7080_v46 = vadd.f32 %v13333_v35, %v14858_v28 }
 0x668   :  { %v8370_v40 = vsel %vm1929_vm0, %v13772_v1, 0.0  ;;  %v13777_v47 = vadd.f32 %v9688_v18, %v13572_v58  ;;  %v14859_v18 = vld [vmem:[#allocation28_spill] sm:$0xff] }
 0x669   :  { %v8371_v51 = vadd.f32 %v8370_v40, %v8369_v29  ;;  %v7085_v19 = vadd.f32 %v13333_v35, %v14859_v18  ;;  %v10411_v18 = vld [vmem:[%s14756_s5] ss:$0 sm:$0xff] }
 0x66a   :  { %v8372_v8 = vsel %vm1929_vm0, %v13777_v47, 0.0 }
 0x66b   :  { %v7943_v11 = vpop.f32.mrb[96].mxu1  ;;  %v8373_v3 = vadd.f32 %v8372_v8, %v8371_v51 }
 0x66c   :  { %v9690_v26 = vadd.f32 %v7943_v11, %v7077_v37  ;;  %v7945_v25 = vpop.f32.mrb[97].mxu1  ;;  %v7088_v37 = vadd.f32 %v13333_v35, %v14860_v6 }
 0x66d   :  { %v7946_v12 = vpop.f32.mrb[98].mxu1 }
 0x66e   :  { %v9692_v45 = vadd.f32 %v7946_v12, %v7080_v46  ;;  %v8233_v49 = vadd.f32 %v9690_v26, %v13592_v32  ;;  %v7948_v58 = vpop.f32.mrb[99].mxu1  ;;  %v14861_v12 = vld [vmem:[#allocation30_spill] sm:$0xff] }
 0x670   :  { %v8374_v16 = vsel %vm1929_vm0, %v8233_v49, 0.0  ;;  %v8236_v22 = vadd.f32 %v9692_v45, %v13601_v23  ;;  %v7093_v45 = vadd.f32 %v13333_v35, %v14861_v12  ;;  %v14864_v12 = vld [vmem:[#allocation33_spill] sm:$0xff] }
 0x671   :  { %v8375_v63 = vadd.f32 %v8374_v16, %v8373_v3 }
 0x672   :  { %v8376_v29 = vsel %vm1929_vm0, %v8236_v22, 0.0 }
 0x673   :  { %v8377_v40 = vadd.f32 %v8376_v29, %v8375_v63  ;;  %v7951_v51 = vpop.f32.mrb[100].mxu1 }
 0x674   :  { %v9694_v8 = vadd.f32 %v7951_v51, %v7085_v19  ;;  %v7953_v11 = vpop.f32.mrb[101].mxu1  ;;  %v14862_v19 = vld [vmem:[#allocation31_spill] sm:$0xff] }
 0x675   :  { %v7954_v28 = vpop.f32.mrb[102].mxu1 }
 0x676   :  { %v8241_v32 = vadd.f32 %v9694_v8, %v13587_v2  ;;  %v9696_v46 = vadd.f32 %v7954_v28, %v7088_v37  ;;  %v7956_v26 = vpop.f32.mrb[103].mxu1  ;;  %v7096_v2 = vadd.f32 %v10411_v18, %v14862_v19  ;;  %v14863_v28 = vld [vmem:[#allocation32_spill] sm:$0xff] }
 0x678   :  { %v8378_v23 = vsel %vm1929_vm0, %v8241_v32, 0.0  ;;  %v8244_v3 = vadd.f32 %v9696_v46, %v13594_v24  ;;  %v7101_v46 = vadd.f32 %v10411_v18, %v14863_v28 }
 0x679   :  { %v8379_v25 = vadd.f32 %v8378_v23, %v8377_v40 }
 0x67a   :  { %v8380_v58 = vsel %vm1929_vm0, %v8244_v3, 0.0 }
 0x67b   :  { %v7959_v16 = vpop.f32.mrb[104].mxu1  ;;  %v8381_v63 = vadd.f32 %v8380_v58, %v8379_v25  ;;  %v7104_v58 = vadd.f32 %v10411_v18, %v14864_v12 }
 0x67c   :  { %v9698_v29 = vadd.f32 %v7959_v16, %v7093_v45  ;;  %v7961_v51 = vpop.f32.mrb[105].mxu1 }
 0x67d   :  { %v7962_v6 = vpop.f32.mrb[106].mxu1 }
 0x67e   :  { %v9700_v37 = vadd.f32 %v7962_v6, %v7096_v2  ;;  %v8249_v24 = vadd.f32 %v9698_v29, %v13616_v53  ;;  %v7964_v40 = vpop.f32.mrb[107].mxu1 }
 0x680   :  { %v8382_v8 = vsel %vm1929_vm0, %v8249_v24, 0.0  ;;  %v8252_v35 = vadd.f32 %v9700_v37, %v13625_v5 }
 0x681   :  { %v8383_v11 = vadd.f32 %v8382_v8, %v8381_v63 }
 0x682   :  { %v8384_v26 = vsel %vm1929_vm0, %v8252_v35, 0.0 }
 0x683   :  { %v8385_v23 = vadd.f32 %v8384_v26, %v8383_v11  ;;  %v7967_v25 = vpop.f32.mrb[108].mxu1 }
 0x684   :  { %v9702_v45 = vadd.f32 %v7967_v25, %v7101_v46  ;;  %v7969_v16 = vpop.f32.mrb[109].mxu1 }
 0x685   :  { %v7970_v19 = vpop.f32.mrb[110].mxu1 }
 0x686   :  { %v8257_v2 = vadd.f32 %v9702_v45, %v13609_v7  ;;  %v9704_v53 = vadd.f32 %v7970_v19, %v7104_v58  ;;  %v7972_v29 = vpop.f32.mrb[111].mxu1 }
 0x687   :  { %v14872_v29 = vld [vmem:[#allocation38_spill] sm:$0xff] }
 0x688   :  { %v8386_v51 = vsel %vm1929_vm0, %v8257_v2, 0.0  ;;  %v8260_v5 = vadd.f32 %v9704_v53, %v13618_v27 }
 0x689   :  { %v8387_v63 = vadd.f32 %v8386_v51, %v8385_v23 }
 0x68a   :  { %v8388_v6 = vsel %vm1929_vm0, %v8260_v5, 0.0 }
 0x68b   :  { %v8389_v37 = vadd.f32 %v8388_v6, %v8387_v63 }
 0x68d   :  { %v8390_v40 = vrot.slane %v8389_v37, 4 }
 0x68f   :  { %v8391_v8 = vadd.f32 %v8390_v40, %v8389_v37 }
 0x691   :  { %v8392_v11 = vrot.slane %v8391_v8, 2 }
 0x693   :  { %v8393_v28 = vadd.f32 %v8392_v11, %v8391_v8  ;;  %v14874_v11 = vld [vmem:[#allocation37_spill] sm:$0xff] }
 0x695   :  { %v8394_v18 = vrot.slane %v8393_v28, 1 }
 0x697   :  { %v8395_v46 = vadd.f32 %v8394_v18, %v8393_v28 }
 0x699   :  { %v13813_v26 = vmul.f32 0.001953125, %v8395_v46 }
 0x69b   :  { %v13817_v7 = vsub.f32 %v13772_v1, %v13813_v26  ;;  %v13821_v25 = vsub.f32 %v13777_v47, %v13813_v26  ;;  %v13824_v27 = vsub.f32 %v8233_v49, %v13813_v26  ;;  %v13827_v23 = vsub.f32 %v8236_v22, %v13813_v26  ;;  %v14869_v22 = vld [vmem:[#allocation34_spill] sm:$0xff] }
 0x69c   :  { %v13830_v12 = vsub.f32 %v8241_v32, %v13813_v26  ;;  %v13833_v58 = vsub.f32 %v8244_v3, %v13813_v26  ;;  %v13836_v45 = vsub.f32 %v8249_v24, %v13813_v26  ;;  %v13839_v1 = vsub.f32 %v8252_v35, %v13813_v26  ;;  %v14870_v32 = vld [vmem:[#allocation36_spill] sm:$0xff]  ;;  %v14871_v35 = vld [vmem:[#allocation35_spill] sm:$0xff] }
 0x69d   :  { %v13842_v47 = vsub.f32 %v8257_v2, %v13813_v26  ;;  %v13845_v49 = vsub.f32 %v8260_v5, %v13813_v26  ;;  %v13849_v16 = vsub.f32 %v14869_v22, %v13813_v26  ;;  %v13853_v3 = vsub.f32 %v14870_v32, %v13813_v26  ;;  %v14876_v32 = vld [vmem:[#allocation39_spill] sm:$0xff] }
 0x69e   :  { %14865 = vst [vmem:[#allocation13_spill] sm:$0xff] %v13833_v58  ;;  %14866 = vst [vmem:[#allocation14_spill] sm:$0xff] %v13836_v45  ;;  %v13857_v24 = vsub.f32 %v13341_v61, %v13813_v26  ;;  %v13861_v19 = vsub.f32 %v14871_v35, %v13813_v26  ;;  %v13869_v51 = vsub.f32 %v14872_v29, %v13813_v26  ;;  %v14873_v61 = vld [vmem:[#allocation40_spill] sm:$0xff] }
 0x69f   :  { %14867 = vst [vmem:[#allocation15_spill] sm:$0xff] %v13839_v1  ;;  %14868 = vst [vmem:[#allocation16_spill] sm:$0xff] %v13842_v47  ;;  %v8462_v2 = vmul.f32 %v13849_v16, %v13849_v16  ;;  %v8463_v53 = vmul.f32 %v13853_v3, %v13853_v3  ;;  %v13875_v63 = vsub.f32 %v14873_v61, %v13813_v26  ;;  %v14877_v61 = vld [vmem:[#allocation41_spill] sm:$0xff] }
 0x6a0   :  { %v8464_v5 = vmul.f32 %v13857_v24, %v13857_v24  ;;  %v8465_v6 = vmul.f32 %v13861_v19, %v13861_v19  ;;  %v13883_v28 = vsub.f32 %v14874_v11, %v13813_v26  ;;  %v8466_v18 = vmul.f32 %v13869_v51, %v13869_v51  ;;  %v14879_v11 = vld [vmem:[#allocation42_spill] sm:$0xff] }
 0x6a1   :  { %v8526_v37 = vsel %vm1929_vm0, %v8462_v2, 0.0  ;;  %v8527_v40 = vsel %vm1929_vm0, %v8463_v53, 0.0  ;;  %v13890_v35 = vsub.f32 %v14876_v32, %v13813_v26  ;;  %v8467_v2 = vmul.f32 %v13875_v63, %v13875_v63 }
 0x6a2   :  { %v8528_v8 = vadd.f32 %v8527_v40, %v8526_v37  ;;  %14875 = vst [vmem:[#allocation17_spill] sm:$0xff] %v13883_v28  ;;  %v8529_v46 = vsel %vm1929_vm0, %v8464_v5, 0.0  ;;  %v8531_v53 = vsel %vm1929_vm0, %v8465_v6, 0.0  ;;  %v13897_v37 = vsub.f32 %v14877_v61, %v13813_v26 }
 0x6a3   :  { %v8468_v40 = vmul.f32 %v13883_v28, %v13883_v28  ;;  %v8533_v5 = vsel %vm1929_vm0, %v8466_v18, 0.0  ;;  %v8469_v32 = vmul.f32 %v13890_v35, %v13890_v35  ;;  %v8535_v6 = vsel %vm1929_vm0, %v8467_v2, 0.0 }
 0x6a4   :  { %v8530_v22 = vadd.f32 %v8529_v46, %v8528_v8  ;;  %14878 = vst [vmem:[#allocation18_spill] sm:$0xff] %v13897_v37  ;;  %v13904_v46 = vsub.f32 %v14879_v11, %v13813_v26  ;;  %v8470_v28 = vmul.f32 %v13897_v37, %v13897_v37 }
 0x6a5   :  { %v8537_v18 = vsel %vm1929_vm0, %v8468_v40, 0.0  ;;  %v8539_v2 = vsel %vm1929_vm0, %v8469_v32, 0.0 }
 0x6a6   :  { %v8532_v29 = vadd.f32 %v8531_v53, %v8530_v22  ;;  %14880 = vst [vmem:[#allocation19_spill] sm:$0xff] %v13904_v46  ;;  %v14881_v53 = vld [vmem:[#allocation43_spill] sm:$0xff]  ;;  %v8471_v11 = vmul.f32 %v13904_v46, %v13904_v46  ;;  %v8541_v40 = vsel %vm1929_vm0, %v8470_v28, 0.0 }
 0x6a7   :  { %v13911_v61 = vsub.f32 %v14881_v53, %v13813_v26 }
 0x6a8   :  { %v8534_v8 = vadd.f32 %v8533_v5, %v8532_v29  ;;  %v13918_v5 = vsub.f32 %v13373_v17, %v13813_v26  ;;  %v8543_v32 = vsel %vm1929_vm0, %v8471_v11, 0.0 }
 0x6a9   :  { %14882 = vst [vmem:[#allocation20_spill] sm:$0xff] %v13911_v61  ;;  %v8472_v37 = vmul.f32 %v13911_v61, %v13911_v61 }
 0x6aa   :  { %v8536_v22 = vadd.f32 %v8535_v6, %v8534_v8  ;;  %14883 = vst [vmem:[#allocation21_spill] sm:$0xff] %v13918_v5  ;;  %v14884_v6 = vld [vmem:[#allocation44_spill] sm:$0xff]  ;;  %v8473_v46 = vmul.f32 %v13918_v5, %v13918_v5 }
 0x6ab   :  { %v13925_v53 = vsub.f32 %v14884_v6, %v13813_v26  ;;  %v8545_v28 = vsel %vm1929_vm0, %v8472_v37, 0.0 }
 0x6ac   :  { %v8538_v29 = vadd.f32 %v8537_v18, %v8536_v22  ;;  %v14886_v18 = vld [vmem:[#allocation45_spill] sm:$0xff]  ;;  %v8547_v11 = vsel %vm1929_vm0, %v8473_v46, 0.0 }
 0x6ad   :  { %14885 = vst [vmem:[#allocation22_spill] sm:$0xff] %v13925_v53  ;;  %v13932_v17 = vsub.f32 %v14886_v18, %v13813_v26  ;;  %v8474_v61 = vmul.f32 %v13925_v53, %v13925_v53 }
 0x6ae   :  { %v8540_v8 = vadd.f32 %v8539_v2, %v8538_v29  ;;  %v14888_v2 = vld [vmem:[#allocation46_spill] sm:$0xff] }
 0x6af   :  { %14887 = vst [vmem:[#allocation23_spill] sm:$0xff] %v13932_v17  ;;  %v13939_v6 = vsub.f32 %v14888_v2, %v13813_v26  ;;  %v8475_v5 = vmul.f32 %v13932_v17, %v13932_v17  ;;  %v8549_v37 = vsel %vm1929_vm0, %v8474_v61, 0.0 }
 0x6b0   :  { %v8542_v22 = vadd.f32 %v8541_v40, %v8540_v8  ;;  %v14890_v40 = vld [vmem:[#allocation47_spill] sm:$0xff] }
 0x6b1   :  { %14889 = vst [vmem:[#allocation24_spill] sm:$0xff] %v13939_v6  ;;  %v13946_v18 = vsub.f32 %v14890_v40, %v13813_v26  ;;  %v8476_v2 = vmul.f32 %v13939_v6, %v13939_v6  ;;  %v8551_v46 = vsel %vm1929_vm0, %v8475_v5, 0.0 }
 0x6b2   :  { %v8544_v29 = vadd.f32 %v8543_v32, %v8542_v22  ;;  %v13953_v32 = vsub.f32 %v13411_v13, %v13813_v26 }
 0x6b3   :  { %14891 = vst [vmem:[#allocation25_spill] sm:$0xff] %v13946_v18  ;;  %v8477_v17 = vmul.f32 %v13946_v18, %v13946_v18  ;;  %v8553_v61 = vsel %vm1929_vm0, %v8476_v2, 0.0 }
 0x6b4   :  { %v8546_v8 = vadd.f32 %v8545_v28, %v8544_v29  ;;  %v14892_v28 = vld [vmem:[#allocation48_spill] sm:$0xff]  ;;  %v8478_v6 = vmul.f32 %v13953_v32, %v13953_v32 }
 0x6b5   :  { %v13960_v40 = vsub.f32 %v14892_v28, %v13813_v26  ;;  %v8555_v5 = vsel %vm1929_vm0, %v8477_v17, 0.0 }
 0x6b6   :  { %v8548_v22 = vadd.f32 %v8547_v11, %v8546_v8  ;;  %v14893_v11 = vld [vmem:[#allocation49_spill] sm:$0xff]  ;;  %v8557_v2 = vsel %vm1929_vm0, %v8478_v6, 0.0 }
 0x6b7   :  { %v13967_v13 = vsub.f32 %v14893_v11, %v13813_v26  ;;  %v8479_v28 = vmul.f32 %v13960_v40, %v13960_v40 }
 0x6b8   :  { %v8550_v29 = vadd.f32 %v8549_v37, %v8548_v22  ;;  %v13974_v37 = vsub.f32 %v13437_v44, %v13813_v26 }
 0x6b9   :  { %14894 = vst [vmem:[#allocation26_spill] sm:$0xff] %v13967_v13  ;;  %v8480_v18 = vmul.f32 %v13967_v13, %v13967_v13  ;;  %v8559_v17 = vsel %vm1929_vm0, %v8479_v28, 0.0 }
 0x6ba   :  { %v8552_v8 = vadd.f32 %v8551_v46, %v8550_v29  ;;  %14895 = vst [vmem:[#allocation27_spill] sm:$0xff] %v13974_v37  ;;  %v14896_v46 = vld [vmem:[#allocation50_spill] sm:$0xff]  ;;  %v8481_v53 = vmul.f32 %v13974_v37, %v13974_v37 }
 0x6bb   :  { %v13981_v11 = vsub.f32 %v14896_v46, %v13813_v26  ;;  %v8561_v6 = vsel %vm1929_vm0, %v8480_v18, 0.0 }
 0x6bc   :  { %v8554_v22 = vadd.f32 %v8553_v61, %v8552_v8  ;;  %v14897_v61 = vld [vmem:[#allocation51_spill] sm:$0xff]  ;;  %v8563_v28 = vsel %vm1929_vm0, %v8481_v53, 0.0 }
 0x6bd   :  { %v13988_v44 = vsub.f32 %v14897_v61, %v13813_v26  ;;  %v8482_v13 = vmul.f32 %v13981_v11, %v13981_v11 }
 0x6be   :  { %v8556_v29 = vadd.f32 %v8555_v5, %v8554_v22  ;;  %v14899_v5 = vld [vmem:[#allocation52_spill] sm:$0xff] }
 0x6bf   :  { %14898 = vst [vmem:[#allocation28_spill] sm:$0xff] %v13988_v44  ;;  %v13995_v46 = vsub.f32 %v14899_v5, %v13813_v26  ;;  %v8483_v37 = vmul.f32 %v13988_v44, %v13988_v44  ;;  %v8565_v18 = vsel %vm1929_vm0, %v8482_v13, 0.0 }
 0x6c0   :  { %v8558_v8 = vadd.f32 %v8557_v2, %v8556_v29  ;;  %v14901_v2 = vld [vmem:[#allocation53_spill] sm:$0xff] }
 0x6c1   :  { %14900 = vst [vmem:[#allocation29_spill] sm:$0xff] %v13995_v46  ;;  %v14002_v61 = vsub.f32 %v14901_v2, %v13813_v26  ;;  %v8484_v5 = vmul.f32 %v13995_v46, %v13995_v46  ;;  %v8567_v53 = vsel %vm1929_vm0, %v8483_v37, 0.0 }
 0x6c2   :  { %v8560_v22 = vadd.f32 %v8559_v17, %v8558_v8  ;;  %v14009_v17 = vsub.f32 %v13498_v62, %v13813_v26 }
 0x6c3   :  { %v8485_v44 = vmul.f32 %v14002_v61, %v14002_v61  ;;  %v8569_v13 = vsel %vm1929_vm0, %v8484_v5, 0.0 }
 0x6c4   :  { %v8562_v29 = vadd.f32 %v8561_v6, %v8560_v22  ;;  %v14902_v6 = vld [vmem:[#allocation54_spill] sm:$0xff]  ;;  %v8486_v46 = vmul.f32 %v14009_v17, %v14009_v17 }
 0x6c5   :  { %v14016_v2 = vsub.f32 %v14902_v6, %v13813_v26  ;;  %v8571_v37 = vsel %vm1929_vm0, %v8485_v44, 0.0 }
 0x6c6   :  { %v8564_v8 = vadd.f32 %v8563_v28, %v8562_v29  ;;  %v14903_v28 = vld [vmem:[#allocation55_spill] sm:$0xff]  ;;  %v8573_v5 = vsel %vm1929_vm0, %v8486_v46, 0.0 }
 0x6c7   :  { %v14023_v62 = vsub.f32 %v14903_v28, %v13813_v26  ;;  %v8487_v6 = vmul.f32 %v14016_v2, %v14016_v2 }
 0x6c8   :  { %v8566_v22 = vadd.f32 %v8565_v18, %v8564_v8  ;;  %v14030_v18 = vsub.f32 %v13529_v59, %v13813_v26  ;;  %v14044_v59 = vsub.f32 %v13553_v14, %v13813_v26  ;;  %v14058_v14 = vsub.f32 %v13575_v0, %v13813_v26 }
 0x6c9   :  { %v8488_v28 = vmul.f32 %v14023_v62, %v14023_v62  ;;  %v8575_v44 = vsel %vm1929_vm0, %v8487_v6, 0.0  ;;  %v14072_v0 = vsub.f32 %v13599_v21, %v13813_v26  ;;  %v14086_v21 = vsub.f32 %v13623_v52, %v13813_v26 }
 0x6ca   :  { %v8568_v29 = vadd.f32 %v8567_v53, %v8566_v22  ;;  %v14037_v53 = vsub.f32 %v13544_v60, %v13813_v26  ;;  %v14051_v60 = vsub.f32 %v13568_v20, %v13813_v26  ;;  %14905 = vst [vmem:[#allocation31_spill] sm:$0xff] %v14058_v14  ;;  %v14065_v20 = vsub.f32 %v13590_v57, %v13813_v26 }
 0x6cb   :  { %v8577_v46 = vsel %vm1929_vm0, %v8488_v28, 0.0  ;;  %v14079_v57 = vsub.f32 %v13614_v31, %v13813_v26  ;;  %v14093_v31 = vsub.f32 %v13636_v15, %v13813_v26  ;;  %v14100_v52 = vsub.f32 %v13639_v41, %v13813_v26 }
 0x6cc   :  { %v8570_v8 = vadd.f32 %v8569_v13, %v8568_v29  ;;  %v8489_v13 = vmul.f32 %v14030_v18, %v14030_v18  ;;  %14904 = vst [vmem:[#allocation30_spill] sm:$0xff] %v14051_v60  ;;  %v14107_v15 = vsub.f32 %v13650_v9, %v13813_v26  ;;  %v14114_v41 = vsub.f32 %v13655_v38, %v13813_v26 }
 0x6cd   :  { %v14121_v9 = vsub.f32 %v13666_v36, %v13813_v26  ;;  %v14128_v38 = vsub.f32 %v13671_v55, %v13813_v26  ;;  %v14135_v36 = vsub.f32 %v13682_v30, %v13813_v26  ;;  %v14142_v55 = vsub.f32 %v13685_v50, %v13813_v26 }
 0x6ce   :  { %v8572_v22 = vadd.f32 %v8571_v37, %v8570_v8  ;;  %v8490_v37 = vmul.f32 %v14037_v53, %v14037_v53  ;;  %v8579_v6 = vsel %vm1929_vm0, %v8489_v13, 0.0  ;;  %v14149_v30 = vsub.f32 %v13696_v54, %v13813_v26 }
 0x6cf   :  { %v14156_v50 = vsub.f32 %v13701_v43, %v13813_v26  ;;  %v14163_v54 = vsub.f32 %v13712_v42, %v13813_v26  ;;  %v14170_v43 = vsub.f32 %v13717_v4, %v13813_v26  ;;  %v14177_v42 = vsub.f32 %v13728_v33, %v13813_v26 }
 0x6d0   :  { %v8574_v29 = vadd.f32 %v8573_v5, %v8572_v22  ;;  %v8491_v5 = vmul.f32 %v14044_v59, %v14044_v59  ;;  %v8581_v28 = vsel %vm1929_vm0, %v8490_v37, 0.0  ;;  %v14184_v4 = vsub.f32 %v13731_v34, %v13813_v26 }
 0x6d1   :  { %v14191_v33 = vsub.f32 %v13742_v10, %v13813_v26  ;;  %v14198_v34 = vsub.f32 %v13747_v48, %v13813_v26  ;;  %v14205_v10 = vsub.f32 %v13758_v39, %v13813_v26  ;;  %v14212_v48 = vsub.f32 %v13763_v56, %v13813_v26 }
 0x6d2   :  { %v8576_v8 = vadd.f32 %v8575_v44, %v8574_v29  ;;  %v8492_v44 = vmul.f32 %v14051_v60, %v14051_v60  ;;  %v8583_v13 = vsel %vm1929_vm0, %v8491_v5, 0.0  ;;  %v8516_v56 = vmul.f32 %v13817_v7, %v13817_v7 }
 0x6d3   :  { %v8514_v39 = vmul.f32 %v14205_v10, %v14205_v10 }
 0x6d4   :  { %v8578_v22 = vadd.f32 %v8577_v46, %v8576_v8  ;;  %v8493_v46 = vmul.f32 %v14058_v14, %v14058_v14  ;;  %v8585_v37 = vsel %vm1929_vm0, %v8492_v44, 0.0 }
 0x6d5   :  { %v8629_v26 = vsel %vm1929_vm0, %v8514_v39, 0.0  ;;  %v8520_v39 = vmul.f32 %v13830_v12, %v13830_v12 }
 0x6d6   :  { %v8580_v29 = vadd.f32 %v8579_v6, %v8578_v22  ;;  %v8494_v6 = vmul.f32 %v14065_v20, %v14065_v20  ;;  %v8587_v5 = vsel %vm1929_vm0, %v8493_v46, 0.0 }
 0x6d8   :  { %v8582_v8 = vadd.f32 %v8581_v28, %v8580_v29  ;;  %v8495_v28 = vmul.f32 %v14072_v0, %v14072_v0  ;;  %v8589_v44 = vsel %vm1929_vm0, %v8494_v6, 0.0 }
 0x6da   :  { %v8584_v22 = vadd.f32 %v8583_v13, %v8582_v8  ;;  %v8496_v13 = vmul.f32 %v14079_v57, %v14079_v57  ;;  %v8591_v46 = vsel %vm1929_vm0, %v8495_v28, 0.0 }
 0x6dc   :  { %v8586_v29 = vadd.f32 %v8585_v37, %v8584_v22  ;;  %v8497_v37 = vmul.f32 %v14086_v21, %v14086_v21  ;;  %v8593_v6 = vsel %vm1929_vm0, %v8496_v13, 0.0 }
 0x6de   :  { %v8588_v8 = vadd.f32 %v8587_v5, %v8586_v29  ;;  %v8498_v5 = vmul.f32 %v14093_v31, %v14093_v31  ;;  %v8595_v28 = vsel %vm1929_vm0, %v8497_v37, 0.0 }
 0x6e0   :  { %v8590_v22 = vadd.f32 %v8589_v44, %v8588_v8  ;;  %v8499_v44 = vmul.f32 %v14100_v52, %v14100_v52  ;;  %v8597_v13 = vsel %vm1929_vm0, %v8498_v5, 0.0 }
 0x6e2   :  { %v8592_v29 = vadd.f32 %v8591_v46, %v8590_v22  ;;  %v8500_v46 = vmul.f32 %v14107_v15, %v14107_v15  ;;  %v8599_v37 = vsel %vm1929_vm0, %v8499_v44, 0.0 }
 0x6e4   :  { %v8594_v8 = vadd.f32 %v8593_v6, %v8592_v29  ;;  %v8501_v6 = vmul.f32 %v14114_v41, %v14114_v41  ;;  %v8601_v5 = vsel %vm1929_vm0, %v8500_v46, 0.0 }
 0x6e6   :  { %v8596_v22 = vadd.f32 %v8595_v28, %v8594_v8  ;;  %v8502_v28 = vmul.f32 %v14121_v9, %v14121_v9  ;;  %v8603_v44 = vsel %vm1929_vm0, %v8501_v6, 0.0 }
 0x6e8   :  { %v8598_v29 = vadd.f32 %v8597_v13, %v8596_v22  ;;  %v8503_v13 = vmul.f32 %v14128_v38, %v14128_v38  ;;  %v8605_v46 = vsel %vm1929_vm0, %v8502_v28, 0.0 }
 0x6ea   :  { %v8600_v8 = vadd.f32 %v8599_v37, %v8598_v29  ;;  %v8504_v37 = vmul.f32 %v14135_v36, %v14135_v36  ;;  %v8607_v6 = vsel %vm1929_vm0, %v8503_v13, 0.0 }
 0x6ec   :  { %v8602_v22 = vadd.f32 %v8601_v5, %v8600_v8  ;;  %v8505_v5 = vmul.f32 %v14142_v55, %v14142_v55  ;;  %v8609_v28 = vsel %vm1929_vm0, %v8504_v37, 0.0 }
 0x6ee   :  { %v8604_v29 = vadd.f32 %v8603_v44, %v8602_v22  ;;  %v8506_v44 = vmul.f32 %v14149_v30, %v14149_v30  ;;  %v8611_v13 = vsel %vm1929_vm0, %v8505_v5, 0.0 }
 0x6f0   :  { %v8606_v8 = vadd.f32 %v8605_v46, %v8604_v29  ;;  %v8507_v46 = vmul.f32 %v14156_v50, %v14156_v50  ;;  %v8613_v37 = vsel %vm1929_vm0, %v8506_v44, 0.0 }
 0x6f2   :  { %v8608_v22 = vadd.f32 %v8607_v6, %v8606_v8  ;;  %v8508_v6 = vmul.f32 %v14163_v54, %v14163_v54  ;;  %v8615_v5 = vsel %vm1929_vm0, %v8507_v46, 0.0 }
 0x6f4   :  { %v8610_v29 = vadd.f32 %v8609_v28, %v8608_v22  ;;  %v8509_v28 = vmul.f32 %v14170_v43, %v14170_v43  ;;  %v8617_v44 = vsel %vm1929_vm0, %v8508_v6, 0.0 }
 0x6f6   :  { %v8612_v8 = vadd.f32 %v8611_v13, %v8610_v29  ;;  %v8510_v13 = vmul.f32 %v14177_v42, %v14177_v42  ;;  %v8619_v46 = vsel %vm1929_vm0, %v8509_v28, 0.0 }
 0x6f8   :  { %v8614_v22 = vadd.f32 %v8613_v37, %v8612_v8  ;;  %v8511_v37 = vmul.f32 %v14184_v4, %v14184_v4  ;;  %v8621_v6 = vsel %vm1929_vm0, %v8510_v13, 0.0  ;;  %v8515_v13 = vmul.f32 %v14212_v48, %v14212_v48 }
 0x6fa   :  { %v8616_v29 = vadd.f32 %v8615_v5, %v8614_v22  ;;  %v8512_v5 = vmul.f32 %v14191_v33, %v14191_v33  ;;  %v8623_v28 = vsel %vm1929_vm0, %v8511_v37, 0.0  ;;  %v8517_v37 = vmul.f32 %v13821_v25, %v13821_v25 }
 0x6fc   :  { %v8618_v8 = vadd.f32 %v8617_v44, %v8616_v29  ;;  %v8513_v44 = vmul.f32 %v14198_v34, %v14198_v34 }
 0x6fe   :  { %v8620_v22 = vadd.f32 %v8619_v46, %v8618_v8  ;;  %v8625_v46 = vsel %vm1929_vm0, %v8512_v5, 0.0  ;;  %v8518_v5 = vmul.f32 %v13824_v27, %v13824_v27 }
 0x700   :  { %v8622_v29 = vadd.f32 %v8621_v6, %v8620_v22  ;;  %v8627_v22 = vsel %vm1929_vm0, %v8513_v44, 0.0  ;;  %v8635_v44 = vsel %vm1929_vm0, %v8517_v37, 0.0  ;;  %v8523_v37 = vmul.f32 %v13839_v1, %v13839_v1 }
 0x702   :  { %v8624_v8 = vadd.f32 %v8623_v28, %v8622_v29  ;;  %v8631_v29 = vsel %vm1929_vm0, %v8515_v13, 0.0 }
 0x704   :  { %v8626_v14 = vadd.f32 %v8625_v46, %v8624_v8  ;;  %v8633_v8 = vsel %vm1929_vm0, %v8516_v56, 0.0  ;;  %v8522_v56 = vmul.f32 %v13836_v45, %v13836_v45 }
 0x706   :  { %v8628_v6 = vadd.f32 %v8627_v22, %v8626_v14  ;;  %v8519_v14 = vmul.f32 %v13827_v23, %v13827_v23 }
 0x708   :  { %v8630_v60 = vadd.f32 %v8629_v26, %v8628_v6  ;;  %v8637_v6 = vsel %vm1929_vm0, %v8518_v5, 0.0  ;;  %v8639_v13 = vsel %vm1929_vm0, %v8519_v14, 0.0  ;;  %v8524_v5 = vmul.f32 %v13842_v47, %v13842_v47 }
 0x709   :  { %v8525_v14 = vmul.f32 %v13845_v49, %v13845_v49 }
 0x70a   :  { %v8632_v28 = vadd.f32 %v8631_v29, %v8630_v60  ;;  %v8521_v60 = vmul.f32 %v13833_v58, %v13833_v58 }
 0x70c   :  { %v8634_v46 = vadd.f32 %v8633_v8, %v8632_v28  ;;  %v8641_v28 = vsel %vm1929_vm0, %v8520_v39, 0.0  ;;  %v8649_v39 = vsel %vm1929_vm0, %v8524_v5, 0.0 }
 0x70e   :  { %v8636_v22 = vadd.f32 %v8635_v44, %v8634_v46  ;;  %v8643_v46 = vsel %vm1929_vm0, %v8521_v60, 0.0 }
 0x710   :  { %v8638_v26 = vadd.f32 %v8637_v6, %v8636_v22  ;;  %v8645_v22 = vsel %vm1929_vm0, %v8522_v56, 0.0 }
 0x712   :  { %v8640_v29 = vadd.f32 %v8639_v13, %v8638_v26  ;;  %v8647_v26 = vsel %vm1929_vm0, %v8523_v37, 0.0 }
 0x714   :  { %v8642_v8 = vadd.f32 %v8641_v28, %v8640_v29  ;;  %v8651_v28 = vsel %vm1929_vm0, %v8525_v14, 0.0 }
 0x716   :  { %v8644_v44 = vadd.f32 %v8643_v46, %v8642_v8 }
 0x718   :  { %v8646_v6 = vadd.f32 %v8645_v22, %v8644_v44 }
 0x71a   :  { %v8648_v13 = vadd.f32 %v8647_v26, %v8646_v6  ;;  %v14909_v26 = vld [vmem:[#allocation19_spill] sm:$0xff] }
 0x71c   :  { %v8650_v29 = vadd.f32 %v8649_v39, %v8648_v13  ;;  %v14912_v39 = vld [vmem:[#allocation26_spill] sm:$0xff] }
 0x71e   :  { %v8652_v1 = vadd.f32 %v8651_v28, %v8650_v29 }
 0x720   :  { %v8653_v60 = vrot.slane %v8652_v1, 4 }
 0x722   :  { %v8654_v8 = vadd.f32 %v8653_v60, %v8652_v1 }
 0x724   :  { %v8655_v46 = vrot.slane %v8654_v8, 2 }
 0x726   :  { %v8656_v45 = vadd.f32 %v8655_v46, %v8654_v8 }
 0x728   :  { %v8657_v47 = vrot.slane %v8656_v45, 1 }
 0x72a   :  { %v8658_v58 = vadd.f32 %v8657_v47, %v8656_v45 }
 0x72c   :  { %v8659_v56 = vmul.f32 0.001953125, %v8658_v58 }
 0x72e   :  { %v8660_v44 = vadd.f32 1e-05, %v8659_v56  ;;  %v14913_v56 = vld [vmem:[#allocation21_spill] sm:$0xff] }
 0x730   :  { %10386 = vrsqrt.f32 %v8660_v44 }
 0x73a   :  { %v14255_v22 = vpop.eup %10386 }
 0x73b   :  { %v8662_v37 = vmul.f32 %v14255_v22, %v13849_v16  ;;  %v8663_v5 = vmul.f32 %v14255_v22, %v13853_v3  ;;  %v8678_v6 = vmul.f32 %v14255_v22, %v13953_v32  ;;  %v8679_v1 = vmul.f32 %v14255_v22, %v13960_v40  ;;  %v14276_v16 = vld [vmem:[%s14757_s6] ss:$0 sm:$0xff] }
 0x73c   :  { %v14267_v45 = vmul.f32 %v14255_v22, %v13845_v49  ;;  %v8664_v58 = vmul.f32 %v14255_v22, %v13857_v24  ;;  %v8665_v47 = vmul.f32 %v14255_v22, %v13861_v19  ;;  %v8666_v3 = vmul.f32 %v14255_v22, %v13869_v51  ;;  %v14907_v49 = vld [vmem:[#allocation17_spill] sm:$0xff]  ;;  %v14908_v19 = vld [vmem:[#allocation18_spill] sm:$0xff]  ;;  %v14910_v51 = vld [vmem:[#allocation20_spill] sm:$0xff] }
 0x73d   :  { %v14282_v32 = vmul.f32 %v14255_v22, %v13875_v63  ;;  %v14286_v40 = vmul.f32 %v14255_v22, %v14907_v49  ;;  %v14290_v24 = vmul.f32 %v14255_v22, %v13890_v35  ;;  %v14294_v14 = vmul.f32 %v14255_v22, %v14908_v19  ;;  %v14309_v35 = vld [vmem:[%s14758_s7] ss:$0 sm:$0xff]  ;;  %v14915_v49 = vld [vmem:[#allocation22_spill] sm:$0xff]  ;;  %s10466_s7 = smov [#allocation10]  }
 0x73e   :  { %14906 = vst [vmem:[#allocation32_spill] sm:$0xff] %v14267_v45  ;;  %v14298_v13 = vmul.f32 %v14255_v22, %v14909_v26  ;;  %v14302_v63 = vmul.f32 %v14255_v22, %v14910_v51  ;;  %v8680_v29 = vmul.f32 %v14255_v22, %v14912_v39  ;;  %v8749_v28 = vmul.f32 %v14276_v16, %v8678_v6  ;;  %v14917_v26 = vld [vmem:[#allocation23_spill] sm:$0xff]  ;;  %s9098_s1 = sshll.u32 %s10466_s7, 4  ;;  %s9099_s1 = int_to_ptr.vmem [resolvable:$true] %s9098_s1 }
 0x73f   :  { %v8733_v60 = vmul.f32 %v14276_v16, %v8662_v37  ;;  %v8750_v8 = vmul.f32 %v14276_v16, %v8679_v1  ;;  %v8734_v46 = vmul.f32 %v14276_v16, %v8663_v5  ;;  %v14317_v44 = vmul.f32 %v14255_v22, %v14913_v56  ;;  %v14919_v39 = vld [vmem:[#allocation27_spill] sm:$0xff]  ;;  %v14920_v1 = vld [vmem:[#allocation28_spill] sm:$0xff]  ;;  %s10434_s20 = scalar_lea.vmem %s9099_s1, 4096  ;;  %p10439_p9 = scmp.lt.s32.totalorder %s9099_s1, %s9099_s1 }
 0x740   :  { %14911 = vst [vmem:[#allocation33_spill] sm:$0xff] %v14302_v63  ;;  %v14321_v19 = vmul.f32 %v14255_v22, %v14915_v49  ;;  %v14325_v51 = vmul.f32 %v14255_v22, %v14917_v26  ;;  %v8681_v6 = vmul.f32 %v14255_v22, %v14919_v39  ;;  %v8682_v37 = vmul.f32 %v14255_v22, %v13981_v11  ;;  %p10435_p8 = scmp.ne.s32.totalorder %s9099_s1, %s10434_s20  ;;  %p10440_p10 = scmp.lt.s32.totalorder %s10434_s20, %s10434_s20 }
 0x741   :  { %14914 = vst [vmem:[#allocation34_spill] sm:$0xff] %v14317_v44  ;;  %v8683_v5 = vmul.f32 %v14255_v22, %v14920_v1  ;;  %v8820_v56 = vadd.f32 %v14309_v35, %v8749_v28  ;;  %v8804_v45 = vadd.f32 %v14309_v35, %v8733_v60  ;;  %v14921_v44 = vld [vmem:[#allocation29_spill] sm:$0xff]  ;;  %v14339_v26 = vmul.f32 %v14255_v22, %v14002_v61 }
 0x742   :  { %14916 = vst [vmem:[#allocation36_spill] sm:$0xff] %v14321_v19  ;;  %14918 = vst [vmem:[#allocation35_spill] sm:$0xff] %v14325_v51  ;;  %v8684_v49 = vmul.f32 %v14255_v22, %v14921_v44  ;;  %v8751_v51 = vmul.f32 %v14276_v16, %v8680_v29  ;;  %v8735_v39 = vmul.f32 %v14276_v16, %v8664_v58  ;;  %p10441_p11 = por %p10440_p10, %p10439_p9 }
 0x743   :  { %v8884_v19 = vmax.f32 %v8820_v56, 0.0  ;;  %v8868_v11 = vmax.f32 %v8804_v45, 0.0  ;;  %v8821_v63 = vadd.f32 %v14309_v35, %v8750_v8  ;;  %v8805_v1 = vadd.f32 %v14309_v35, %v8734_v46 }
 0x744   :  { %v14347_v28 = vmul.f32 %v14255_v22, %v14009_v17  ;;  %v14351_v60 = vmul.f32 %v14255_v22, %v14016_v2  ;;  %v14355_v61 = vmul.f32 %v14255_v22, %v14023_v62  ;;  %v14359_v58 = vmul.f32 %v14255_v22, %v14030_v18  ;;  %p10442_p12 = pnand %p10441_p11, %p10435_p8 }
 0x745   :  { %v14363_v45 = vmul.f32 %v14255_v22, %v14037_v53  ;;  %v14367_v17 = vmul.f32 %v14255_v22, %v14044_v59  ;;  %v14371_v2 = vmul.f32 %v14255_v22, %v14065_v20  ;;  %8964 = vxpose.xlu1.b32.start [1/16] (narrow) %v8884_v19, 64  ;;  %8932 = vxpose.xlu0.b32.start [1/16] (narrow) %v8868_v11, 64  ;;  %v8885_v59 = vmax.f32 %v8821_v63, 0.0 }
 0x746   :  { %v14375_v62 = vmul.f32 %v14255_v22, %v14072_v0  ;;  %v14379_v18 = vmul.f32 %v14255_v22, %v14079_v57  ;;  %v8752_v53 = vmul.f32 %v14276_v16, %v8681_v6  ;;  %v8736_v29 = vmul.f32 %v14276_v16, %v8665_v47 }
 0x747   :  { %v8869_v8 = vmax.f32 %v8805_v1, 0.0  ;;  %v8822_v46 = vadd.f32 %v14309_v35, %v8751_v51  ;;  %v8806_v20 = vadd.f32 %v14309_v35, %v8735_v39  ;;  %v14387_v44 = vmul.f32 %v14255_v22, %v14086_v21 }
 0x748   :  { %v14391_v0 = vmul.f32 %v14255_v22, %v14093_v31  ;;  %v14395_v57 = vmul.f32 %v14255_v22, %v14100_v52  ;;  %v14399_v47 = vmul.f32 %v14255_v22, %v14107_v15  ;;  %v14403_v63 = vmul.f32 %v14255_v22, %v14114_v41 }
 0x749   :  { %v14407_v21 = vmul.f32 %v14255_v22, %v14121_v9  ;;  %v14411_v31 = vmul.f32 %v14255_v22, %v14128_v38  ;;  %8965 = vxpose.xlu1.b32.cont [2/16] (narrow) %v8885_v59, 64  ;;  %8933 = vxpose.xlu0.b32.cont [2/16] (narrow) %v8869_v8, 64  ;;  %v14415_v52 = vmul.f32 %v14255_v22, %v14135_v36  ;;  %v8886_v9 = vmax.f32 %v8822_v46, 0.0 }
 0x74a   :  { %v14419_v15 = vmul.f32 %v14255_v22, %v14142_v55  ;;  %v8823_v41 = vadd.f32 %v14309_v35, %v8752_v53  ;;  %v8807_v19 = vadd.f32 %v14309_v35, %v8736_v29  ;;  %v8870_v51 = vmax.f32 %v8806_v20, 0.0 }
 0x74b   :  { %v8753_v6 = vmul.f32 %v14276_v16, %v8682_v37  ;;  %v8737_v38 = vmul.f32 %v14276_v16, %v8666_v3  ;;  %v14427_v56 = vmul.f32 %v14255_v22, %v14149_v30  ;;  %v14431_v36 = vmul.f32 %v14255_v22, %v14156_v50 }
 0x74c   :  { %v14435_v55 = vmul.f32 %v14255_v22, %v14163_v54  ;;  %v14439_v39 = vmul.f32 %v14255_v22, %v14170_v43  ;;  %v8710_v37 = vmul.f32 %v14255_v22, %v14177_v42  ;;  %v8711_v3 = vmul.f32 %v14255_v22, %v14184_v4 }
 0x74d   :  { %8966 = vxpose.xlu1.b32.cont [3/16] (narrow) %v8886_v9, 64  ;;  %8934 = vxpose.xlu0.b32.cont [3/16] (narrow) %v8870_v51, 64  ;;  %v8754_v30 = vmul.f32 %v14276_v16, %v8683_v5  ;;  %v8712_v50 = vmul.f32 %v14255_v22, %v14191_v33  ;;  %v8738_v54 = vmul.f32 %v14276_v16, %v14282_v32  ;;  %v8887_v1 = vmax.f32 %v8823_v41, 0.0 }
 0x74e   :  { %v8755_v11 = vmul.f32 %v14276_v16, %v8684_v49  ;;  %v8739_v43 = vmul.f32 %v14276_v16, %v14286_v40  ;;  %v8871_v42 = vmax.f32 %v8807_v19, 0.0  ;;  %v8824_v53 = vadd.f32 %v14309_v35, %v8753_v6  ;;  %v14923_v19 = vld [vmem:[#allocation14_spill] sm:$0xff] }
 0x74f   :  { %v8808_v4 = vadd.f32 %v14309_v35, %v8737_v38  ;;  %v8713_v5 = vmul.f32 %v14255_v22, %v14198_v34  ;;  %v8714_v33 = vmul.f32 %v14255_v22, %v14205_v10  ;;  %v8715_v32 = vmul.f32 %v14255_v22, %v14212_v48 }
 0x750   :  { %v8716_v49 = vmul.f32 %v14255_v22, %v13817_v7  ;;  %v8825_v40 = vadd.f32 %v14309_v35, %v8754_v30  ;;  %v8756_v29 = vmul.f32 %v14276_v16, %v14339_v26  ;;  %v8740_v59 = vmul.f32 %v14276_v16, %v14290_v24 }
 0x751   :  { %8967 = vxpose.xlu1.b32.cont [4/16] (narrow) %v8887_v1, 64  ;;  %8935 = vxpose.xlu0.b32.cont [4/16] (narrow) %v8871_v42, 64  ;;  %v8717_v34 = vmul.f32 %v14255_v22, %v13821_v25  ;;  %v8809_v10 = vadd.f32 %v14309_v35, %v8738_v54  ;;  %v8826_v48 = vadd.f32 %v14309_v35, %v8755_v11  ;;  %v8888_v26 = vmax.f32 %v8824_v53, 0.0  ;;  %v14922_v25 = vld [vmem:[#allocation13_spill] sm:$0xff] }
 0x752   :  { %v8810_v8 = vadd.f32 %v14309_v35, %v8739_v43  ;;  %v14475_v7 = vmul.f32 %v14255_v22, %v13824_v27  ;;  %v14479_v46 = vmul.f32 %v14255_v22, %v13827_v23  ;;  %v8872_v20 = vmax.f32 %v8808_v4, 0.0  ;;  %v14924_v27 = vld [vmem:[#allocation15_spill] sm:$0xff]  ;;  %v14925_v23 = vld [vmem:[#allocation16_spill] sm:$0xff] }
 0x753   :  { %v14483_v24 = vmul.f32 %v14255_v22, %v13830_v12  ;;  %v14487_v41 = vmul.f32 %v14255_v22, %v14922_v25  ;;  %v14491_v9 = vmul.f32 %v14255_v22, %v14923_v19  ;;  %v14495_v51 = vmul.f32 %v14255_v22, %v14924_v27  ;;  %v14926_v19 = vld [vmem:[#allocation33_spill] sm:$0xff] }
 0x754   :  { %v14499_v6 = vmul.f32 %v14255_v22, %v14925_v23  ;;  %v8889_v12 = vmax.f32 %v8825_v40, 0.0  ;;  %v8827_v38 = vadd.f32 %v14309_v35, %v8756_v29  ;;  %v8811_v30 = vadd.f32 %v14309_v35, %v8740_v59 }
 0x755   :  { %8968 = vxpose.xlu1.b32.cont [5/16] (narrow) %v8888_v26, 64  ;;  %8936 = vxpose.xlu0.b32.cont [5/16] (narrow) %v8872_v20, 64  ;;  %v8873_v54 = vmax.f32 %v8809_v10, 0.0  ;;  %v8890_v11 = vmax.f32 %v8826_v48, 0.0  ;;  %v8874_v43 = vmax.f32 %v8810_v8, 0.0  ;;  %v8757_v1 = vmul.f32 %v14276_v16, %v14347_v28 }
 0x756   :  { %v8741_v42 = vmul.f32 %v14276_v16, %v14294_v14  ;;  %v8758_v53 = vmul.f32 %v14276_v16, %v14351_v60  ;;  %v8781_v4 = vmul.f32 %v14276_v16, %v8710_v37  ;;  %v8765_v40 = vmul.f32 %v14276_v16, %v14371_v2 }
 0x757   :  { %v8782_v29 = vmul.f32 %v14276_v16, %v8711_v3  ;;  %v8766_v59 = vmul.f32 %v14276_v16, %v14375_v62  ;;  %v8783_v10 = vmul.f32 %v14276_v16, %v8712_v50  ;;  %v8767_v28 = vmul.f32 %v14276_v16, %v14379_v18 }
 0x758   :  { %v8891_v14 = vmax.f32 %v8827_v38, 0.0  ;;  %v14519_v60 = vadd.f32 %v14309_v35, %v8781_v4  ;;  %v14522_v37 = vadd.f32 %v14309_v35, %v8765_v40  ;;  %v8784_v2 = vmul.f32 %v14276_v16, %v8713_v5 }
 0x759   :  { %8969 = vxpose.xlu1.b32.cont [6/16] (narrow) %v8889_v12, 64  ;;  %8937 = vxpose.xlu0.b32.cont [6/16] (narrow) %v8873_v54, 64  ;;  %v14526_v3 = vadd.f32 %v14309_v35, %v8782_v29  ;;  %v14529_v62 = vadd.f32 %v14309_v35, %v8766_v59  ;;  %v14532_v50 = vadd.f32 %v14309_v35, %v8783_v10  ;;  %v14927_v59 = vld [vmem:[#allocation34_spill] sm:$0xff] }
 0x75a   :  { %v14535_v18 = vadd.f32 %v14309_v35, %v8767_v28  ;;  %v8742_v48 = vmul.f32 %v14276_v16, %v14298_v13  ;;  %v8759_v8 = vmul.f32 %v14276_v16, %v14355_v61  ;;  %v14542_v5 = vadd.f32 %v14309_v35, %v8784_v2 }
 0x75b   :  { %v8768_v26 = vmul.f32 %v14276_v16, %v14387_v44  ;;  %v8828_v20 = vadd.f32 %v14309_v35, %v8757_v1  ;;  %v8812_v25 = vadd.f32 %v14309_v35, %v8741_v42  ;;  %v8743_v27 = vmul.f32 %v14276_v16, %v14926_v19 }
 0x75c   :  { %v8760_v23 = vmul.f32 %v14276_v16, %v14359_v58  ;;  %v8875_v13 = vmax.f32 %v8811_v30, 0.0  ;;  %v8785_v12 = vmul.f32 %v14276_v16, %v8714_v33  ;;  %v8769_v44 = vmul.f32 %v14276_v16, %v14391_v0 }
 0x75d   :  { %8970 = vxpose.xlu1.b32.cont [7/16] (narrow) %v8890_v11, 64  ;;  %8938 = vxpose.xlu0.b32.cont [7/16] (narrow) %v8874_v43, 64  ;;  %v14553_v61 = vadd.f32 %v14309_v35, %v8768_v26  ;;  %v8786_v38 = vmul.f32 %v14276_v16, %v8715_v32  ;;  %v8770_v54 = vmul.f32 %v14276_v16, %v14395_v57  ;;  %v8876_v4 = vmax.f32 %v8812_v25, 0.0 }
 0x75e   :  { %v8787_v1 = vmul.f32 %v14276_v16, %v8716_v49  ;;  %v8771_v58 = vmul.f32 %v14276_v16, %v14399_v47  ;;  %v8829_v30 = vadd.f32 %v14309_v35, %v8758_v53  ;;  %v14566_v11 = vadd.f32 %v14309_v35, %v8785_v12 }
 0x75f   :  { %v14569_v33 = vadd.f32 %v14309_v35, %v8769_v44  ;;  %v8788_v0 = vmul.f32 %v14276_v16, %v8717_v34  ;;  %v14573_v32 = vadd.f32 %v14309_v35, %v8786_v38  ;;  %v14576_v57 = vadd.f32 %v14309_v35, %v8770_v54 }
 0x760   :  { %v14579_v49 = vadd.f32 %v14309_v35, %v8787_v1  ;;  %v14582_v47 = vadd.f32 %v14309_v35, %v8771_v58  ;;  %v8813_v43 = vadd.f32 %v14309_v35, %v8742_v48  ;;  %v8772_v34 = vmul.f32 %v14276_v16, %v14403_v63 }
 0x761   :  { %8971 = vxpose.xlu1.b32.cont [8/16] (narrow) %v8891_v14, 64  ;;  %8939 = vxpose.xlu0.b32.cont [8/16] (narrow) %v8875_v13, 64  ;;  %v14586_v42 = vadd.f32 %v14309_v35, %v8788_v0  ;;  %v8892_v53 = vmax.f32 %v8828_v20, 0.0  ;;  %v8830_v40 = vadd.f32 %v14309_v35, %v8759_v8  ;;  %v8814_v29 = vadd.f32 %v14309_v35, %v8743_v27 }
 0x762   :  { %v8744_v10 = vmul.f32 %v14276_v16, %v14927_v59  ;;  %v14595_v28 = vadd.f32 %v14309_v35, %v8772_v34  ;;  %v8789_v14 = vmul.f32 %v14276_v16, %v14475_v7  ;;  %v8773_v2 = vmul.f32 %v14276_v16, %v14407_v21 }
 0x763   :  { %v8790_v63 = vmul.f32 %v14276_v16, %v14479_v46  ;;  %v8774_v48 = vmul.f32 %v14276_v16, %v14411_v31  ;;  %v8791_v8 = vmul.f32 %v14276_v16, %v14483_v24  ;;  %v8775_v26 = vmul.f32 %v14276_v16, %v14415_v52 }
 0x764   :  { %v14610_v20 = vadd.f32 %v14309_v35, %v8789_v14  ;;  %v14613_v7 = vadd.f32 %v14309_v35, %v8773_v2  ;;  %v8792_v21 = vmul.f32 %v14276_v16, %v14487_v41  ;;  %v8893_v25 = vmax.f32 %v8829_v30, 0.0  ;;  %v14931_v14 = vld [vmem:[#allocation30_spill] sm:$0xff] }
 0x765   :  { %8972 = vxpose.xlu1.b32.cont [9/16] (narrow) %v8892_v53, 64  ;;  %8940 = vxpose.xlu0.b32.cont [9/16] (narrow) %v8876_v4, 64  ;;  %v14618_v46 = vadd.f32 %v14309_v35, %v8790_v63  ;;  %v14621_v31 = vadd.f32 %v14309_v35, %v8774_v48  ;;  %v14624_v24 = vadd.f32 %v14309_v35, %v8791_v8  ;;  %v8877_v19 = vmax.f32 %v8813_v43, 0.0  ;;  %v14928_v43 = vld [vmem:[#allocation36_spill] sm:$0xff]  ;;  %v14932_v8 = vld [vmem:[#allocation35_spill] sm:$0xff] }
 0x766   :  { %v14627_v52 = vadd.f32 %v14309_v35, %v8775_v26  ;;  %v14630_v27 = vadd.f32 %v14309_v35, %v8792_v21  ;;  %v8776_v41 = vmul.f32 %v14276_v16, %v14419_v15  ;;  %v8894_v13 = vmax.f32 %v8830_v40, 0.0  ;;  %v14929_v53 = vld [vmem:[#allocation32_spill] sm:$0xff] }
 0x767   :  { %v8831_v12 = vadd.f32 %v14309_v35, %v8760_v23  ;;  %v8815_v44 = vadd.f32 %v14309_v35, %v8744_v10  ;;  %v8761_v38 = vmul.f32 %v14276_v16, %v14363_v45  ;;  %v8878_v54 = vmax.f32 %v8814_v29, 0.0  ;;  %v14930_v40 = vld [vmem:[#allocation24_spill] sm:$0xff] }
 0x768   :  { %v14639_v1 = vadd.f32 %v14309_v35, %v8776_v41  ;;  %v8793_v58 = vmul.f32 %v14276_v16, %v14491_v9  ;;  %v8777_v15 = vmul.f32 %v14276_v16, %v14427_v56  ;;  %v8794_v23 = vmul.f32 %v14276_v16, %v14495_v51 }
 0x769   :  { %8973 = vxpose.xlu1.b32.cont [10/16] (narrow) %v8893_v25, 64  ;;  %8941 = vxpose.xlu0.b32.cont [10/16] (narrow) %v8877_v19, 64  ;;  %v8778_v30 = vmul.f32 %v14276_v16, %v14431_v36  ;;  %v8795_v45 = vmul.f32 %v14276_v16, %v14499_v6  ;;  %v8779_v0 = vmul.f32 %v14276_v16, %v14435_v55  ;;  %v8895_v63 = vmax.f32 %v8831_v12, 0.0  ;;  %v14934_v12 = vld [vmem:[#allocation31_spill] sm:$0xff] }
 0x76a   :  { %v8745_v34 = vmul.f32 %v14276_v16, %v14928_v43  ;;  %v14656_v9 = vadd.f32 %v14309_v35, %v8793_v58  ;;  %v14659_v56 = vadd.f32 %v14309_v35, %v8777_v15  ;;  %v8796_v51 = vmul.f32 %v14276_v16, %v14929_v53 }
 0x76b   :  { %v14664_v36 = vadd.f32 %v14309_v35, %v8794_v23  ;;  %v14667_v6 = vadd.f32 %v14309_v35, %v8778_v30  ;;  %v14670_v55 = vadd.f32 %v14309_v35, %v8795_v45  ;;  %v14673_v4 = vadd.f32 %v14309_v35, %v8779_v0 }
 0x76c   :  { %v8676_v29 = vmul.f32 %v14255_v22, %v14930_v40  ;;  %v14678_v59 = vadd.f32 %v14309_v35, %v8796_v51  ;;  %v8780_v10 = vmul.f32 %v14276_v16, %v14439_v39  ;;  %v8692_v2 = vmul.f32 %v14255_v22, %v14931_v14  ;;  %v14933_v39 = vld [vmem:[#allocation25_spill] sm:$0xff] }
 0x76d   :  { %8974 = vxpose.xlu1.b32.cont [11/16] (narrow) %v8894_v13, 64  ;;  %8942 = vxpose.xlu0.b32.cont [11/16] (narrow) %v8878_v54, 64  ;;  %v8762_v48 = vmul.f32 %v14276_v16, %v14367_v17  ;;  %v8746_v26 = vmul.f32 %v14276_v16, %v14932_v8  ;;  %v8879_v21 = vmax.f32 %v8815_v44, 0.0  ;;  %v8832_v25 = vadd.f32 %v14309_v35, %v8761_v38 }
 0x76e   :  { %v8816_v19 = vadd.f32 %v14309_v35, %v8745_v34  ;;  %v14691_v41 = vadd.f32 %v14309_v35, %v8780_v10  ;;  %v8677_v13 = vmul.f32 %v14255_v22, %v14933_v39  ;;  %v8693_v54 = vmul.f32 %v14255_v22, %v14934_v12 }
 0x76f   :  { %v8763_v17 = vmul.f32 %v14276_v16, %v8692_v2  ;;  %v8747_v58 = vmul.f32 %v14276_v16, %v8676_v29  ;;  %v8896_v44 = vmax.f32 %v8832_v25, 0.0  ;;  %v8833_v38 = vadd.f32 %v14309_v35, %v8762_v48 }
 0x770   :  { %v8880_v15 = vmax.f32 %v8816_v19, 0.0  ;;  %v8817_v23 = vadd.f32 %v14309_v35, %v8746_v26  ;;  %v8764_v45 = vmul.f32 %v14276_v16, %v8693_v54  ;;  %v8748_v34 = vmul.f32 %v14276_v16, %v8677_v13 }
 0x771   :  { %8975 = vxpose.xlu1.b32.cont [12/16] (narrow) %v8895_v63, 64  ;;  %8943 = vxpose.xlu0.b32.cont [12/16] (narrow) %v8879_v21, 64  ;;  %v8834_v30 = vadd.f32 %v14309_v35, %v8763_v17  ;;  %v8897_v0 = vmax.f32 %v8833_v38, 0.0  ;;  %v8818_v22 = vadd.f32 %v14309_v35, %v8747_v58  ;;  %v8916_v2 = vmax.f32 %v14519_v60, 0.0 }
 0x772   :  { %v8881_v43 = vmax.f32 %v8817_v23, 0.0  ;;  %v8835_v40 = vadd.f32 %v14309_v35, %v8764_v45  ;;  %v8819_v29 = vadd.f32 %v14309_v35, %v8748_v34  ;;  %v8900_v63 = vmax.f32 %v14522_v37, 0.0 }
 0x773   :  { %v8898_v53 = vmax.f32 %v8834_v30, 0.0  ;;  %v8882_v51 = vmax.f32 %v8818_v22, 0.0  ;;  %v8917_v16 = vmax.f32 %v14526_v3, 0.0  ;;  %v8901_v48 = vmax.f32 %v14529_v62, 0.0 }
 0x774   :  { %v8899_v10 = vmax.f32 %v8835_v40, 0.0  ;;  %v8883_v14 = vmax.f32 %v8819_v29, 0.0  ;;  %v8918_v35 = vmax.f32 %v14532_v50, 0.0  ;;  %v8902_v8 = vmax.f32 %v14535_v18, 0.0 }
 0x775   :  { %8976 = vxpose.xlu1.b32.cont [13/16] (narrow) %v8896_v44, 64  ;;  %8944 = vxpose.xlu0.b32.cont [13/16] (narrow) %v8880_v15, 64  ;;  %v8919_v26 = vmax.f32 %v14542_v5, 0.0  ;;  %v8903_v60 = vmax.f32 %v14553_v61, 0.0  ;;  %v8920_v37 = vmax.f32 %v14566_v11, 0.0  ;;  %v8904_v3 = vmax.f32 %v14569_v33, 0.0 }
 0x776   :  { %v8921_v62 = vmax.f32 %v14573_v32, 0.0  ;;  %v8905_v50 = vmax.f32 %v14576_v57, 0.0  ;;  %v8922_v18 = vmax.f32 %v14579_v49, 0.0  ;;  %v8906_v5 = vmax.f32 %v14582_v47, 0.0 }
 0x777   :  { %v8923_v61 = vmax.f32 %v14586_v42, 0.0  ;;  %v8907_v11 = vmax.f32 %v14595_v28, 0.0  ;;  %v8924_v33 = vmax.f32 %v14610_v20, 0.0  ;;  %v8908_v32 = vmax.f32 %v14613_v7, 0.0 }
 0x778   :  { %v8925_v57 = vmax.f32 %v14618_v46, 0.0  ;;  %v8909_v49 = vmax.f32 %v14621_v31, 0.0  ;;  %v8926_v47 = vmax.f32 %v14624_v24, 0.0  ;;  %v8910_v42 = vmax.f32 %v14627_v52, 0.0 }
 0x779   :  { %8977 = vxpose.xlu1.b32.cont [14/16] (narrow) %v8897_v0, 64  ;;  %8945 = vxpose.xlu0.b32.cont [14/16] (narrow) %v8881_v43, 64  ;;  %v8927_v28 = vmax.f32 %v14630_v27, 0.0  ;;  %v8911_v20 = vmax.f32 %v14639_v1, 0.0  ;;  %v8928_v7 = vmax.f32 %v14656_v9, 0.0  ;;  %v8912_v46 = vmax.f32 %v14659_v56, 0.0 }
 0x77a   :  { %v8929_v31 = vmax.f32 %v14664_v36, 0.0  ;;  %v8913_v24 = vmax.f32 %v14667_v6, 0.0  ;;  %v8930_v52 = vmax.f32 %v14670_v55, 0.0  ;;  %v8914_v27 = vmax.f32 %v14673_v4, 0.0 }
 0x77b   :  { %v8931_v1 = vmax.f32 %v14678_v59, 0.0  ;;  %v8915_v9 = vmax.f32 %v14691_v41, 0.0 }
 0x77d   :  { %8978 = vxpose.xlu1.b32.cont [15/16] (narrow) %v8898_v53, 64  ;;  %8946 = vxpose.xlu0.b32.cont [15/16] (narrow) %v8882_v51, 64 }
 0x781   :  { %8979 = vxpose.xlu1.b32.end [16/16] (narrow) %v8899_v10, 64  ;;  %8947 = vxpose.xlu0.b32.end [16/16] (narrow) %v8883_v14, 64 }
 0x785   :  { %9028 = vxpose.xlu1.b32.start [1/16] (narrow) %v8916_v2, 64  ;;  %8996 = vxpose.xlu0.b32.start [1/16] (narrow) %v8900_v63, 64 }
 0x789   :  { %9029 = vxpose.xlu1.b32.cont [2/16] (narrow) %v8917_v16, 64  ;;  %8997 = vxpose.xlu0.b32.cont [2/16] (narrow) %v8901_v48, 64 }
 0x78d   :  { %9030 = vxpose.xlu1.b32.cont [3/16] (narrow) %v8918_v35, 64  ;;  %8998 = vxpose.xlu0.b32.cont [3/16] (narrow) %v8902_v8, 64 }
 0x791   :  { %9031 = vxpose.xlu1.b32.cont [4/16] (narrow) %v8919_v26, 64  ;;  %8999 = vxpose.xlu0.b32.cont [4/16] (narrow) %v8903_v60, 64 }
 0x795   :  { %9032 = vxpose.xlu1.b32.cont [5/16] (narrow) %v8920_v37, 64  ;;  %9000 = vxpose.xlu0.b32.cont [5/16] (narrow) %v8904_v3, 64 }
 0x799   :  { %9033 = vxpose.xlu1.b32.cont [6/16] (narrow) %v8921_v62, 64  ;;  %9001 = vxpose.xlu0.b32.cont [6/16] (narrow) %v8905_v50, 64 }
 0x79d   :  { %9034 = vxpose.xlu1.b32.cont [7/16] (narrow) %v8922_v18, 64  ;;  %9002 = vxpose.xlu0.b32.cont [7/16] (narrow) %v8906_v5, 64 }
 0x7a1   :  { %9035 = vxpose.xlu1.b32.cont [8/16] (narrow) %v8923_v61, 64  ;;  %9003 = vxpose.xlu0.b32.cont [8/16] (narrow) %v8907_v11, 64 }
 0x7a5   :  { %9036 = vxpose.xlu1.b32.cont [9/16] (narrow) %v8924_v33, 64  ;;  %9004 = vxpose.xlu0.b32.cont [9/16] (narrow) %v8908_v32, 64 }
 0x7a9   :  { %9037 = vxpose.xlu1.b32.cont [10/16] (narrow) %v8925_v57, 64  ;;  %9005 = vxpose.xlu0.b32.cont [10/16] (narrow) %v8909_v49, 64 }
 0x7ad   :  { %9038 = vxpose.xlu1.b32.cont [11/16] (narrow) %v8926_v47, 64  ;;  %9006 = vxpose.xlu0.b32.cont [11/16] (narrow) %v8910_v42, 64 }
 0x7b1   :  { %9039 = vxpose.xlu1.b32.cont [12/16] (narrow) %v8927_v28, 64  ;;  %9007 = vxpose.xlu0.b32.cont [12/16] (narrow) %v8911_v20, 64 }
 0x7b5   :  { %9040 = vxpose.xlu1.b32.cont [13/16] (narrow) %v8928_v7, 64  ;;  %9008 = vxpose.xlu0.b32.cont [13/16] (narrow) %v8912_v46, 64 }
 0x7b9   :  { %9041 = vxpose.xlu1.b32.cont [14/16] (narrow) %v8929_v31, 64  ;;  %9009 = vxpose.xlu0.b32.cont [14/16] (narrow) %v8913_v24, 64 }
 0x7bd   :  { %9042 = vxpose.xlu1.b32.cont [15/16] (narrow) %v8930_v52, 64  ;;  %9010 = vxpose.xlu0.b32.cont [15/16] (narrow) %v8914_v27, 64 }
 0x7c1   :  { %9043 = vxpose.xlu1.b32.end [16/16] (narrow) %v8931_v1, 64  ;;  %9011 = vxpose.xlu0.b32.end [16/16] (narrow) %v8915_v9, 64 }
 0x7c5   :  { %v8980_v56 = vpop.trf.xlu1  ;;  %v8948_v21 = vpop.trf.xlu0 }
 0x7c6   :  { %9061 = vst [vmem:[#allocation10 + $0x8] sm:$0xff] %v8980_v56  ;;  %9060 = vst [vmem:[#allocation10] sm:$0xff] %v8948_v21 }
 0x7c9   :  { %v8981_v36 = vpop.trf.xlu1  ;;  %v8949_v6 = vpop.trf.xlu0 }
 0x7ca   :  { %9063 = vst [vmem:[#allocation10 + $0x18] sm:$0xff] %v8981_v36  ;;  %9062 = vst [vmem:[#allocation10 + $0x10] sm:$0xff] %v8949_v6 }
 0x7cd   :  { %v8982_v25 = vpop.trf.xlu1  ;;  %v8950_v55 = vpop.trf.xlu0 }
 0x7ce   :  { %9065 = vst [vmem:[#allocation10 + $0x28] sm:$0xff] %v8982_v25  ;;  %9064 = vst [vmem:[#allocation10 + $0x20] sm:$0xff] %v8950_v55 }
 0x7d1   :  { %v8983_v4 = vpop.trf.xlu1  ;;  %v8951_v19 = vpop.trf.xlu0 }
 0x7d2   :  { %9067 = vst [vmem:[#allocation10 + $0x38] sm:$0xff] %v8983_v4  ;;  %9066 = vst [vmem:[#allocation10 + $0x30] sm:$0xff] %v8951_v19 }
 0x7d5   :  { %v8984_v59 = vpop.trf.xlu1  ;;  %v8952_v41 = vpop.trf.xlu0 }
 0x7d6   :  { %9069 = vst [vmem:[#allocation10 + $0x48] sm:$0xff] %v8984_v59  ;;  %9068 = vst [vmem:[#allocation10 + $0x40] sm:$0xff] %v8952_v41 }
 0x7d9   :  { %v8985_v39 = vpop.trf.xlu1  ;;  %v8953_v13 = vpop.trf.xlu0 }
 0x7da   :  { %9071 = vst [vmem:[#allocation10 + $0x58] sm:$0xff] %v8985_v39  ;;  %9070 = vst [vmem:[#allocation10 + $0x50] sm:$0xff] %v8953_v13 }
 0x7dd   :  { %v8986_v12 = vpop.trf.xlu1  ;;  %v8954_v54 = vpop.trf.xlu0 }
 0x7de   :  { %9073 = vst [vmem:[#allocation10 + $0x68] sm:$0xff] %v8986_v12  ;;  %9072 = vst [vmem:[#allocation10 + $0x60] sm:$0xff] %v8954_v54 }
 0x7e1   :  { %v8987_v17 = vpop.trf.xlu1  ;;  %v8955_v58 = vpop.trf.xlu0 }
 0x7e2   :  { %9075 = vst [vmem:[#allocation10 + $0x78] sm:$0xff] %v8987_v17  ;;  %9074 = vst [vmem:[#allocation10 + $0x70] sm:$0xff] %v8955_v58 }
 0x805   :  { %v9044_v44 = vpop.trf.xlu1  ;;  %v9012_v15 = vpop.trf.xlu0 }
 0x806   :  { %9078 = vst [vmem:[#allocation10 + $0x88] sm:$0xff] %v9044_v44  ;;  %9077 = vst [vmem:[#allocation10 + $0x80] sm:$0xff] %v9012_v15 }
 0x809   :  { %v9045_v38 = vpop.trf.xlu1  ;;  %v9013_v23 = vpop.trf.xlu0 }
 0x80a   :  { %9080 = vst [vmem:[#allocation10 + $0x98] sm:$0xff] %v9045_v38  ;;  %9079 = vst [vmem:[#allocation10 + $0x90] sm:$0xff] %v9013_v23 }
 0x80d   :  { %v9046_v30 = vpop.trf.xlu1  ;;  %v9014_v45 = vpop.trf.xlu0 }
 0x80e   :  { %9082 = vst [vmem:[#allocation10 + $0xa8] sm:$0xff] %v9046_v30  ;;  %9081 = vst [vmem:[#allocation10 + $0xa0] sm:$0xff] %v9014_v45 }
 0x811   :  { %v9047_v0 = vpop.trf.xlu1  ;;  %v9015_v43 = vpop.trf.xlu0 }
 0x812   :  { %9084 = vst [vmem:[#allocation10 + $0xb8] sm:$0xff] %v9047_v0  ;;  %9083 = vst [vmem:[#allocation10 + $0xb0] sm:$0xff] %v9015_v43 }
 0x815   :  { %v9048_v22 = vpop.trf.xlu1  ;;  %v9016_v34 = vpop.trf.xlu0 }
 0x816   :  { %9086 = vst [vmem:[#allocation10 + $0xc8] sm:$0xff] %v9048_v22  ;;  %9085 = vst [vmem:[#allocation10 + $0xc0] sm:$0xff] %v9016_v34 }
 0x819   :  { %v9049_v53 = vpop.trf.xlu1  ;;  %v9017_v51 = vpop.trf.xlu0 }
 0x81a   :  { %9088 = vst [vmem:[#allocation10 + $0xd8] sm:$0xff] %v9049_v53  ;;  %9087 = vst [vmem:[#allocation10 + $0xd0] sm:$0xff] %v9017_v51 }
 0x81d   :  { %v9050_v40 = vpop.trf.xlu1  ;;  %v9018_v29 = vpop.trf.xlu0 }
 0x81e   :  { %9090 = vst [vmem:[#allocation10 + $0xe8] sm:$0xff] %v9050_v40  ;;  %9089 = vst [vmem:[#allocation10 + $0xe0] sm:$0xff] %v9018_v29 }
 0x821   :  { %v9051_v10 = vpop.trf.xlu1  ;;  %v9019_v14 = vpop.trf.xlu0 }
 0x822   :  { %9092 = vst [vmem:[#allocation10 + $0xf8] sm:$0xff] %v9051_v10  ;;  %9091 = vst [vmem:[#allocation10 + $0xf0] sm:$0xff] %v9019_v14 }
 0x823   :  { %10445 = shalt.err (!%p10442_p12)
}
 0x824   :  { %s10446_s23 = scalar_lea.hbm %s14759_s8, 4096 }
 0x825   :  { %p10447_p13 = scmp.ne.s32.totalorder %s14759_s8, %s10446_s23  ;;  %p10450_p0 = scmp.lt.u32.totalorder %s10446_s23, %s14759_s8 }
 0x827   :  { %p10452_p1 = pnand %p10450_p0, %p10447_p13 }
 0x829   :  { %10455 = shalt.err (!%p10452_p1)
}
 0x82a   :  { %s10467_s27 = smov 256   ;;  %s10468_s28 = smov 16  }
 0x82b   :  { %9104 = dma.vmem_to_hbm [thread:$0]  %s9099_s1, 4096, %s14759_s8, [#allocation9], %s10467_s27, %s10467_s27, %s10468_s28  }
 0x82c   :  { %10458 = dma.done.wait [#allocation9], 4096  }
 0x82d   :  { %10459 = vsyncadd [#allocation9], 4294963200 }
 0x82e   :  { %9108 = vsyncpa [#allocation8], 1 }
 0x82f   :  { %9109 = vsyncpa [#allocation9], 1 }

</bundles_post_ra>
